<compile_context>
chip_gen: v7x
topology: tpu7x:2x2x1
jax: 0.10.0
libtpu: 0.0.40
codegen_flags: <defaults>
</compile_context>

<pallas_src>
import functools

import jax
import jax.numpy as jnp
from jax.experimental import pallas as pl
from jax.experimental.pallas import tpu as pltpu

INPUT_DIM = 768
LATENT_DIM = 256
# encoder: 768->512->256->256 ; decoder: 256->256->512->768  (ReLU everywhere)
LAYER_DIMS = [
    (INPUT_DIM, 512),
    (512, 256),
    (256, LATENT_DIM),
    (LATENT_DIM, 256),
    (256, 512),
    (512, INPUT_DIM),
]


def _round_up(n, m):
    return ((n + m - 1) // m) * m


def _ae_kernel(x_ref, *refs):
    """Fused forward: 6x (bf16 matmul, f32 acc + bias + ReLU) on one batch tile."""
    # refs = (w1, b1, w2, b2, ..., w6, b6, o_ref)
    o_ref = refs[-1]
    wb_refs = refs[:-1]
    h = x_ref[...]  # bf16 batch tile (tb, 768)
    for li in range(len(LAYER_DIMS)):
        w_ref = wb_refs[2 * li]
        b_ref = wb_refs[2 * li + 1]
        # bf16 x bf16 on the MXU, f32 accumulation.
        h = jnp.dot(h.astype(jnp.bfloat16), w_ref[...],
                    preferred_element_type=jnp.float32)
        h = h + b_ref[...]          # bias (1, dout) broadcasts over rows (f32 VPU)
        h = jnp.maximum(h, 0.0)     # ReLU(inplace=True) in the reference
        # TODO(synk): Dropout(0.2) after layers 1 and 4 is identity in eval mode;
        # training-mode stochastic dropout is not implemented here.
    o_ref[...] = h.astype(o_ref.dtype)


@functools.partial(jax.jit, static_argnames=("tile_b",))
def autoencoder_forward(x, params, tile_b=512):
    """x: (B, 768) float32.  params: flat list [w1(bf16), b1(f32), ..., w6, b6]."""
    B, D = x.shape
    assert D == INPUT_DIM
    assert tile_b % 8 == 0

    # Effective batch tile: cap at the (8-rounded) batch so tiny batches don't
    # force a huge padded tile; then pad the batch up to a tile multiple.
    tb = min(tile_b, _round_up(B, 8))
    Bp = _round_up(B, tb)

    xb = x.astype(jnp.bfloat16)          # halves x HBM traffic; matmul is bf16 anyway
    if Bp != B:
        xb = jnp.pad(xb, ((0, Bp - B), (0, 0)))

    # BlockSpecs: tile the batch dimension; weights/biases are loaded whole and,
    # with a constant index_map, are only DMA'd once and stay VMEM-resident.
    in_specs = [pl.BlockSpec((tb, INPUT_DIM), lambda i: (i, 0))]
    for (din, dout) in LAYER_DIMS:
        in_specs.append(pl.BlockSpec((din, dout), lambda i: (0, 0)))   # weight (bf16)
        in_specs.append(pl.BlockSpec((1, dout), lambda i: (0, 0)))     # bias (f32)
    out_spec = pl.BlockSpec((tb, INPUT_DIM), lambda i: (i, 0))

    flops = 2 * Bp * sum(din * dout for (din, dout) in LAYER_DIMS)
    param_bytes = sum(din * dout * 2 + dout * 4 for (din, dout) in LAYER_DIMS)
    cost = pl.CostEstimate(
        flops=flops,
        transcendentals=0,
        bytes_accessed=Bp * INPUT_DIM * 2 + Bp * INPUT_DIM * 4 + param_bytes,
    )

    out = pl.pallas_call(
        _ae_kernel,
        out_shape=jax.ShapeDtypeStruct((Bp, INPUT_DIM), jnp.float32),
        grid_spec=pltpu.PrefetchScalarGridSpec(
            num_scalar_prefetch=0,
            grid=(Bp // tb,),
            in_specs=in_specs,
            out_specs=out_spec,
        ),
        compiler_params=pltpu.CompilerParams(
            dimension_semantics=("parallel",),     # batch tiles -> both v7x TCs
            vmem_limit_bytes=48 * 1024 * 1024,     # headroom beyond v5e's 16 MiB default
        ),
        cost_estimate=cost,
    )(xb, *params)

    return out[:B] if Bp != B else out


def init_params(key):
    """Deterministic init matching nn.Linear default (uniform +/- 1/sqrt(fan_in)).

    Weights are stored (in_features, out_features), i.e. transposed vs PyTorch's
    (out, in), so the kernel computes x @ W directly.
    """
    params = []
    for (din, dout) in LAYER_DIMS:
        key, kw, kb = jax.random.split(key, 3)
        bound = 1.0 / jnp.sqrt(jnp.float32(din))
        w = jax.random.uniform(kw, (din, dout), jnp.float32, -bound, bound)
        b = jax.random.uniform(kb, (1, dout), jnp.float32, -bound, bound)
        params.extend([w, b])
    return params


def cast_params_for_kernel(params):
    """bf16 weights (MXU rate + half the DMA), biases stay f32."""
    out = []
    for li in range(len(LAYER_DIMS)):
        out.append(params[2 * li].astype(jnp.bfloat16))
        out.append(params[2 * li + 1])
    return out


def reference_forward(x, kernel_params):
    """Plain-JAX reference at the same precision (bf16 matmul, f32 accumulation)."""
    h = x
    for li in range(len(LAYER_DIMS)):
        w, b = kernel_params[2 * li], kernel_params[2 * li + 1]
        h = jnp.dot(h.astype(jnp.bfloat16), w, preferred_element_type=jnp.float32)
        h = jnp.maximum(h + b, 0.0)
    return h


if __name__ == "__main__":
    key = jax.random.PRNGKey(0)
    key, kx = jax.random.split(key)

    # Small demo batch, deliberately NOT a multiple of the tile so the padding
    # path runs, and tile_b=256 so the padded batch (512) spans 2 tiles and the
    # batch-parallel grid (both v7x TensorCores) is exercised.
    B = 300
    x = jax.random.normal(kx, (B, INPUT_DIM), jnp.float32)
    params = cast_params_for_kernel(init_params(key))

    out = autoencoder_forward(x, params, tile_b=256)
    out = jax.block_until_ready(out)

    ref = reference_forward(x, params)
    assert out.shape == (B, INPUT_DIM)
    assert jnp.allclose(out, ref, atol=1e-2, rtol=1e-2), "mismatch vs reference"

    print("KERNEL_OK")
</pallas_src>

<mosaic_0001>
module attributes {stable_mosaic.version = 11 : i64} {
  func.func @_ae_kernel(%arg0: i32, %arg1: memref<256x768xbf16, #tpu.memory_space<vmem>>, %arg2: memref<768x512xbf16, #tpu.memory_space<vmem>>, %arg3: memref<1x512xf32, #tpu.memory_space<vmem>>, %arg4: memref<512x256xbf16, #tpu.memory_space<vmem>>, %arg5: memref<1x256xf32, #tpu.memory_space<vmem>>, %arg6: memref<256x256xbf16, #tpu.memory_space<vmem>>, %arg7: memref<1x256xf32, #tpu.memory_space<vmem>>, %arg8: memref<256x256xbf16, #tpu.memory_space<vmem>>, %arg9: memref<1x256xf32, #tpu.memory_space<vmem>>, %arg10: memref<256x512xbf16, #tpu.memory_space<vmem>>, %arg11: memref<1x512xf32, #tpu.memory_space<vmem>>, %arg12: memref<512x768xbf16, #tpu.memory_space<vmem>>, %arg13: memref<1x768xf32, #tpu.memory_space<vmem>>, %arg14: memref<256x768xf32, #tpu.memory_space<vmem>>) attributes {dimension_semantics = [#tpu.dimension_semantics<parallel>], iteration_bounds = array<i64: 2>, scalar_prefetch = 0 : i64, scratch_operands = 0 : i64, tpu.core_type = #tpu.core_type<tc>, window_params = [{transform_indices = @transform_0, window_bounds = array<i64: 256, 768>}, {pipeline_mode = #tpu.pipeline_mode<synchronous>, transform_indices = @transform_1, window_bounds = array<i64: 768, 512>}, {pipeline_mode = #tpu.pipeline_mode<synchronous>, transform_indices = @transform_2, window_bounds = array<i64: 1, 512>}, {pipeline_mode = #tpu.pipeline_mode<synchronous>, transform_indices = @transform_3, window_bounds = array<i64: 512, 256>}, {pipeline_mode = #tpu.pipeline_mode<synchronous>, transform_indices = @transform_4, window_bounds = array<i64: 1, 256>}, {pipeline_mode = #tpu.pipeline_mode<synchronous>, transform_indices = @transform_5, window_bounds = array<i64: 256, 256>}, {pipeline_mode = #tpu.pipeline_mode<synchronous>, transform_indices = @transform_6, window_bounds = array<i64: 1, 256>}, {pipeline_mode = #tpu.pipeline_mode<synchronous>, transform_indices = @transform_7, window_bounds = array<i64: 256, 256>}, {pipeline_mode = #tpu.pipeline_mode<synchronous>, transform_indices = @transform_8, window_bounds = array<i64: 1, 256>}, {pipeline_mode = #tpu.pipeline_mode<synchronous>, transform_indices = @transform_9, window_bounds = array<i64: 256, 512>}, {pipeline_mode = #tpu.pipeline_mode<synchronous>, transform_indices = @transform_10, window_bounds = array<i64: 1, 512>}, {pipeline_mode = #tpu.pipeline_mode<synchronous>, transform_indices = @transform_11, window_bounds = array<i64: 512, 768>}, {pipeline_mode = #tpu.pipeline_mode<synchronous>, transform_indices = @transform_12, window_bounds = array<i64: 1, 768>}, {transform_indices = @transform_13, window_bounds = array<i64: 256, 768>}]} {
    %c0 = arith.constant 0 : index
    %c0_0 = arith.constant 0 : index
    %0 = vector.load %arg1[%c0, %c0_0] : memref<256x768xbf16, #tpu.memory_space<vmem>>, vector<256x768xbf16>
    %c0_1 = arith.constant 0 : index
    %c0_2 = arith.constant 0 : index
    %1 = vector.load %arg2[%c0_1, %c0_2] : memref<768x512xbf16, #tpu.memory_space<vmem>>, vector<768x512xbf16>
    %cst = arith.constant dense<0.000000e+00> : vector<256x512xf32>
    %2 = tpu.matmul %0, %1, %cst {dimension_numbers = #tpu.dot_dimension_numbers<[1], [0], [0], [1], [0, 0, 1, 1], [], []>} : vector<256x768xbf16>, vector<768x512xbf16>, vector<256x512xf32> -> vector<256x512xf32>
    %c0_3 = arith.constant 0 : index
    %c0_4 = arith.constant 0 : index
    %3 = vector.load %arg3[%c0_3, %c0_4] : memref<1x512xf32, #tpu.memory_space<vmem>>, vector<1x512xf32>
    %4 = vector.broadcast %3 : vector<1x512xf32> to vector<256x512xf32>
    %5 = arith.addf %2, %4 : vector<256x512xf32>
    %cst_5 = arith.constant 0.000000e+00 : f32
    %6 = vector.broadcast %cst_5 : f32 to vector<256x512xf32>
    %7 = arith.maximumf %5, %6 : vector<256x512xf32>
    %8 = arith.truncf %7 : vector<256x512xf32> to vector<256x512xbf16>
    %c0_6 = arith.constant 0 : index
    %c0_7 = arith.constant 0 : index
    %9 = vector.load %arg4[%c0_6, %c0_7] : memref<512x256xbf16, #tpu.memory_space<vmem>>, vector<512x256xbf16>
    %cst_8 = arith.constant dense<0.000000e+00> : vector<256x256xf32>
    %10 = tpu.matmul %8, %9, %cst_8 {dimension_numbers = #tpu.dot_dimension_numbers<[1], [0], [0], [1], [0, 0, 1, 1], [], []>} : vector<256x512xbf16>, vector<512x256xbf16>, vector<256x256xf32> -> vector<256x256xf32>
    %c0_9 = arith.constant 0 : index
    %c0_10 = arith.constant 0 : index
    %11 = vector.load %arg5[%c0_9, %c0_10] : memref<1x256xf32, #tpu.memory_space<vmem>>, vector<1x256xf32>
    %12 = vector.broadcast %11 : vector<1x256xf32> to vector<256x256xf32>
    %13 = arith.addf %10, %12 : vector<256x256xf32>
    %cst_11 = arith.constant 0.000000e+00 : f32
    %14 = vector.broadcast %cst_11 : f32 to vector<256x256xf32>
    %15 = arith.maximumf %13, %14 : vector<256x256xf32>
    %16 = arith.truncf %15 : vector<256x256xf32> to vector<256x256xbf16>
    %c0_12 = arith.constant 0 : index
    %c0_13 = arith.constant 0 : index
    %17 = vector.load %arg6[%c0_12, %c0_13] : memref<256x256xbf16, #tpu.memory_space<vmem>>, vector<256x256xbf16>
    %cst_14 = arith.constant dense<0.000000e+00> : vector<256x256xf32>
    %18 = tpu.matmul %16, %17, %cst_14 {dimension_numbers = #tpu.dot_dimension_numbers<[1], [0], [0], [1], [0, 0, 1, 1], [], []>} : vector<256x256xbf16>, vector<256x256xbf16>, vector<256x256xf32> -> vector<256x256xf32>
    %c0_15 = arith.constant 0 : index
    %c0_16 = arith.constant 0 : index
    %19 = vector.load %arg7[%c0_15, %c0_16] : memref<1x256xf32, #tpu.memory_space<vmem>>, vector<1x256xf32>
    %20 = vector.broadcast %19 : vector<1x256xf32> to vector<256x256xf32>
    %21 = arith.addf %18, %20 : vector<256x256xf32>
    %cst_17 = arith.constant 0.000000e+00 : f32
    %22 = vector.broadcast %cst_17 : f32 to vector<256x256xf32>
    %23 = arith.maximumf %21, %22 : vector<256x256xf32>
    %24 = arith.truncf %23 : vector<256x256xf32> to vector<256x256xbf16>
    %c0_18 = arith.constant 0 : index
    %c0_19 = arith.constant 0 : index
    %25 = vector.load %arg8[%c0_18, %c0_19] : memref<256x256xbf16, #tpu.memory_space<vmem>>, vector<256x256xbf16>
    %cst_20 = arith.constant dense<0.000000e+00> : vector<256x256xf32>
    %26 = tpu.matmul %24, %25, %cst_20 {dimension_numbers = #tpu.dot_dimension_numbers<[1], [0], [0], [1], [0, 0, 1, 1], [], []>} : vector<256x256xbf16>, vector<256x256xbf16>, vector<256x256xf32> -> vector<256x256xf32>
    %c0_21 = arith.constant 0 : index
    %c0_22 = arith.constant 0 : index
    %27 = vector.load %arg9[%c0_21, %c0_22] : memref<1x256xf32, #tpu.memory_space<vmem>>, vector<1x256xf32>
    %28 = vector.broadcast %27 : vector<1x256xf32> to vector<256x256xf32>
    %29 = arith.addf %26, %28 : vector<256x256xf32>
    %cst_23 = arith.constant 0.000000e+00 : f32
    %30 = vector.broadcast %cst_23 : f32 to vector<256x256xf32>
    %31 = arith.maximumf %29, %30 : vector<256x256xf32>
    %32 = arith.truncf %31 : vector<256x256xf32> to vector<256x256xbf16>
    %c0_24 = arith.constant 0 : index
    %c0_25 = arith.constant 0 : index
    %33 = vector.load %arg10[%c0_24, %c0_25] : memref<256x512xbf16, #tpu.memory_space<vmem>>, vector<256x512xbf16>
    %cst_26 = arith.constant dense<0.000000e+00> : vector<256x512xf32>
    %34 = tpu.matmul %32, %33, %cst_26 {dimension_numbers = #tpu.dot_dimension_numbers<[1], [0], [0], [1], [0, 0, 1, 1], [], []>} : vector<256x256xbf16>, vector<256x512xbf16>, vector<256x512xf32> -> vector<256x512xf32>
    %c0_27 = arith.constant 0 : index
    %c0_28 = arith.constant 0 : index
    %35 = vector.load %arg11[%c0_27, %c0_28] : memref<1x512xf32, #tpu.memory_space<vmem>>, vector<1x512xf32>
    %36 = vector.broadcast %35 : vector<1x512xf32> to vector<256x512xf32>
    %37 = arith.addf %34, %36 : vector<256x512xf32>
    %cst_29 = arith.constant 0.000000e+00 : f32
    %38 = vector.broadcast %cst_29 : f32 to vector<256x512xf32>
    %39 = arith.maximumf %37, %38 : vector<256x512xf32>
    %40 = arith.truncf %39 : vector<256x512xf32> to vector<256x512xbf16>
    %c0_30 = arith.constant 0 : index
    %c0_31 = arith.constant 0 : index
    %41 = vector.load %arg12[%c0_30, %c0_31] : memref<512x768xbf16, #tpu.memory_space<vmem>>, vector<512x768xbf16>
    %cst_32 = arith.constant dense<0.000000e+00> : vector<256x768xf32>
    %42 = tpu.matmul %40, %41, %cst_32 {dimension_numbers = #tpu.dot_dimension_numbers<[1], [0], [0], [1], [0, 0, 1, 1], [], []>} : vector<256x512xbf16>, vector<512x768xbf16>, vector<256x768xf32> -> vector<256x768xf32>
    %c0_33 = arith.constant 0 : index
    %c0_34 = arith.constant 0 : index
    %43 = vector.load %arg13[%c0_33, %c0_34] : memref<1x768xf32, #tpu.memory_space<vmem>>, vector<1x768xf32>
    %44 = vector.broadcast %43 : vector<1x768xf32> to vector<256x768xf32>
    %45 = arith.addf %42, %44 : vector<256x768xf32>
    %cst_35 = arith.constant 0.000000e+00 : f32
    %46 = vector.broadcast %cst_35 : f32 to vector<256x768xf32>
    %47 = arith.maximumf %45, %46 : vector<256x768xf32>
    %c0_36 = arith.constant 0 : index
    %c0_37 = arith.constant 0 : index
    %48 = vector.load %arg14[%c0_36, %c0_37] : memref<256x768xf32, #tpu.memory_space<vmem>>, vector<256x768xf32>
    tpu.vector_store %arg14[%c0_36, %c0_37], %47 {strides = array<i32>} : memref<256x768xf32, #tpu.memory_space<vmem>>, vector<256x768xf32>,
    return
  }
  func.func @transform_0(%arg0: i32) -> (i32, i32) {
    %c0_i32 = arith.constant 0 : i32
    %c0_i32_0 = arith.constant 0 : i32
    return %arg0, %c0_i32 : i32, i32
  }
  func.func @transform_1(%arg0: i32) -> (i32, i32) {
    %c0_i32 = arith.constant 0 : i32
    %c0_i32_0 = arith.constant 0 : i32
    %c0_i32_1 = arith.constant 0 : i32
    return %c0_i32, %c0_i32_0 : i32, i32
  }
  func.func @transform_2(%arg0: i32) -> (i32, i32) {
    %c0_i32 = arith.constant 0 : i32
    %c0_i32_0 = arith.constant 0 : i32
    %c0_i32_1 = arith.constant 0 : i32
    return %c0_i32, %c0_i32_0 : i32, i32
  }
  func.func @transform_3(%arg0: i32) -> (i32, i32) {
    %c0_i32 = arith.constant 0 : i32
    %c0_i32_0 = arith.constant 0 : i32
    %c0_i32_1 = arith.constant 0 : i32
    return %c0_i32, %c0_i32_0 : i32, i32
  }
  func.func @transform_4(%arg0: i32) -> (i32, i32) {
    %c0_i32 = arith.constant 0 : i32
    %c0_i32_0 = arith.constant 0 : i32
    %c0_i32_1 = arith.constant 0 : i32
    return %c0_i32, %c0_i32_0 : i32, i32
  }
  func.func @transform_5(%arg0: i32) -> (i32, i32) {
    %c0_i32 = arith.constant 0 : i32
    %c0_i32_0 = arith.constant 0 : i32
    %c0_i32_1 = arith.constant 0 : i32
    return %c0_i32, %c0_i32_0 : i32, i32
  }
  func.func @transform_6(%arg0: i32) -> (i32, i32) {
    %c0_i32 = arith.constant 0 : i32
    %c0_i32_0 = arith.constant 0 : i32
    %c0_i32_1 = arith.constant 0 : i32
    return %c0_i32, %c0_i32_0 : i32, i32
  }
  func.func @transform_7(%arg0: i32) -> (i32, i32) {
    %c0_i32 = arith.constant 0 : i32
    %c0_i32_0 = arith.constant 0 : i32
    %c0_i32_1 = arith.constant 0 : i32
    return %c0_i32, %c0_i32_0 : i32, i32
  }
  func.func @transform_8(%arg0: i32) -> (i32, i32) {
    %c0_i32 = arith.constant 0 : i32
    %c0_i32_0 = arith.constant 0 : i32
    %c0_i32_1 = arith.constant 0 : i32
    return %c0_i32, %c0_i32_0 : i32, i32
  }
  func.func @transform_9(%arg0: i32) -> (i32, i32) {
    %c0_i32 = arith.constant 0 : i32
    %c0_i32_0 = arith.constant 0 : i32
    %c0_i32_1 = arith.constant 0 : i32
    return %c0_i32, %c0_i32_0 : i32, i32
  }
  func.func @transform_10(%arg0: i32) -> (i32, i32) {
    %c0_i32 = arith.constant 0 : i32
    %c0_i32_0 = arith.constant 0 : i32
    %c0_i32_1 = arith.constant 0 : i32
    return %c0_i32, %c0_i32_0 : i32, i32
  }
  func.func @transform_11(%arg0: i32) -> (i32, i32) {
    %c0_i32 = arith.constant 0 : i32
    %c0_i32_0 = arith.constant 0 : i32
    %c0_i32_1 = arith.constant 0 : i32
    return %c0_i32, %c0_i32_0 : i32, i32
  }
  func.func @transform_12(%arg0: i32) -> (i32, i32) {
    %c0_i32 = arith.constant 0 : i32
    %c0_i32_0 = arith.constant 0 : i32
    %c0_i32_1 = arith.constant 0 : i32
    return %c0_i32, %c0_i32_0 : i32, i32
  }
  func.func @transform_13(%arg0: i32) -> (i32, i32) {
    %c0_i32 = arith.constant 0 : i32
    %c0_i32_0 = arith.constant 0 : i32
    return %arg0, %c0_i32 : i32, i32
  }
}

</mosaic_0001>

<bundles_post_ra>
// kernel: autoencoder_forward.1
= control target key start
LH: loop header
LB: loop body
LE: loop exit
PB: predicated region body
PF: predicated region fallthrough
CT: control target
= control target key end

     0   :  { %s11948_s25 = smov 0   ;;  %s15355_s0 = inlined_call_operand.vmem [shape: bf16[512,768], index: 0, kind: input, shape index: {}]   ;;  %s15356_s1 = inlined_call_operand.vmem [shape: bf16[768,512], index: 1, kind: input, shape index: {}]   ;;  %s15357_s2 = inlined_call_operand.vmem [shape: f32[1,512], index: 2, kind: input, shape index: {}]   ;;  %s15358_s3 = inlined_call_operand.vmem [shape: bf16[512,256], index: 3, kind: input, shape index: {}]   ;;  %s15359_s4 = inlined_call_operand.vmem [shape: f32[1,256], index: 4, kind: input, shape index: {}]   ;;  %s15360_s5 = inlined_call_operand.vmem [shape: bf16[256,256], index: 5, kind: input, shape index: {}]   ;;  %s15361_s6 = inlined_call_operand.vmem [shape: f32[1,256], index: 6, kind: input, shape index: {}]   ;;  %s15362_s7 = inlined_call_operand.vmem [shape: bf16[256,256], index: 7, kind: input, shape index: {}]   ;;  %s15363_s8 = inlined_call_operand.vmem [shape: f32[1,256], index: 8, kind: input, shape index: {}]   ;;  %s15364_s9 = inlined_call_operand.vmem [shape: bf16[256,512], index: 9, kind: input, shape index: {}]   ;;  %s15365_s10 = inlined_call_operand.vmem [shape: f32[1,512], index: 10, kind: input, shape index: {}]   ;;  %s15366_s11 = inlined_call_operand.vmem [shape: bf16[512,768], index: 11, kind: input, shape index: {}]   ;;  %s15367_s12 = inlined_call_operand.vmem [shape: f32[1,768], index: 12, kind: input, shape index: {}]   ;;  %s15368_s13 = inlined_call_operand.vmem [shape: f32[512,768], index: 13, kind: output, shape index: {}]  }
   0x1 LB: > { %s9181_s26 = sadd.s32 4294967295, %s11876_s25   ;;  %p9185_p0 = scmp.ge.s32.totalorder %s11876_s25, 1  ;;  %s11876_s25 = sphi %s11948_s25, %s23_s25  }
   0x2   : > { %p389_p1 = scmp.lt.s32.totalorder %s11876_s25, 3 }
   0x4   : > { %p390_p2 = pnand %p9185_p0, %p389_p1 }
   0x6   : > { %393 = sbr.rel (%p390_p2) target bundleno = 2296 (0x8f8), region = 72 }
   0xd   : > { %v10770_v0 = vld [vmem:[%s15356_s1 + $0x4] ss:$16 sps:$4 sm:$0xff]   ;;  %v10774_v2 = vld [vmem:[%s15356_s1] ss:$16 sps:$4 sm:$0xff]   ;;  %s9186_s27 = sshll.u32 %s9181_s26, 5 }
   0xe   : > { %v10772_v1 = vld [vmem:[%s15356_s1 + $0x204] ss:$16 sps:$4 sm:$0xff]   ;;  %2199 = vmatprep.subr.bf16.mxu1 %v10770_v0  ;;  %v10775_v3 = vld [vmem:[%s15356_s1 + $0x200] ss:$16 sps:$4 sm:$0xff]   ;;  %p436_p3 = scmp.lt.s32.totalorder %s9186_s27, 63 }
   0xf   : > { %2392 = vmatprep.subr.bf16.mxu0 %v10772_v1  ;;  %v10776_v4 = vld [vmem:[%s15356_s1 + $0x24] ss:$16 sps:$4 sm:$0xff]   ;;  %2200 = vmatpush1.bf16.msra.mxu1 %v10774_v2  ;;  %v10780_v6 = vld [vmem:[%s15356_s1 + $0x20] ss:$16 sps:$4 sm:$0xff]   ;;  %v10874_v2 = vld [vmem:[%s15356_s1 + $0xc] ss:$16 sps:$4 sm:$0xff]  }
  0x10   : > { %2393 = vmatpush1.bf16.msra.mxu0 %v10775_v3  ;;  %v10778_v5 = vld [vmem:[%s15356_s1 + $0x224] ss:$16 sps:$4 sm:$0xff]   ;;  %2201 = vmatprep.subr.bf16.mxu1 %v10776_v4  ;;  %v10781_v7 = vld [vmem:[%s15356_s1 + $0x220] ss:$16 sps:$4 sm:$0xff]   ;;  %s15492_s27 = smov (!%p436_p3, %s9186_s27), 63 }
  0x11   : > { %2394 = vmatprep.subr.bf16.mxu0 %v10778_v5  ;;  %v10782_v8 = vld [vmem:[%s15356_s1 + $0x44] ss:$16 sps:$4 sm:$0xff]   ;;  %v10786_v10 = vld [vmem:[%s15356_s1 + $0x40] ss:$16 sps:$4 sm:$0xff]   ;;  %s10760_s18 = smul.u32 24, %s15492_s27 }
  0x12   : > { %v10784_v9 = vld [vmem:[%s15356_s1 + $0x244] ss:$16 sps:$4 sm:$0xff]   ;;  %v10787_v11 = vld [vmem:[%s15356_s1 + $0x240] ss:$16 sps:$4 sm:$0xff]   ;;  %v10872_v5 = vld [vmem:[%s15356_s1 + $0x8] ss:$16 sps:$4 sm:$0xff]  }
  0x13   : > { %2202 = vmatpush1.bf16.msra.mxu1 %v10780_v6  ;;  %v10788_v12 = vld [vmem:[%s15356_s1 + $0x64] ss:$16 sps:$4 sm:$0xff]   ;;  %v10792_v14 = vld [vmem:[%s15356_s1 + $0x60] ss:$16 sps:$4 sm:$0xff]   ;;  %s12099_s14 = scalar_lea.vmem %s15355_s0, %s10760_s18  ;;  %s10761_s23 = smul.u32 48, %s15492_s27 }
  0x14   : > { %2395 = vmatpush1.bf16.msra.mxu0 %v10781_v7  ;;  %2203 = vmatprep.subr.bf16.mxu1 %v10782_v8  ;;  %v10790_v13 = vld [vmem:[%s15356_s1 + $0x264] ss:$16 sps:$4 sm:$0xff]   ;;  %v10793_v15 = vld [vmem:[%s15356_s1 + $0x260] ss:$16 sps:$4 sm:$0xff]   ;;  %v10883_v8 = vld [vmem:[%s15356_s1 + $0x2c] ss:$16 sps:$4 sm:$0xff]  }
  0x15   : > { %2396 = vmatprep.subr.bf16.mxu0 %v10784_v9  ;;  %v10794_v16 = vld [vmem:[%s15356_s1 + $0x84] ss:$16 sps:$4 sm:$0xff]   ;;  %v10798_v18 = vld [vmem:[%s15356_s1 + $0x80] ss:$16 sps:$4 sm:$0xff]   ;;  %v10881_v9 = vld [vmem:[%s15356_s1 + $0x28] ss:$16 sps:$4 sm:$0xff]   ;;  %s14918_s27 = scalar_lea.vmem %s15368_s13, %s10761_s23 }
  0x16   : > { %v10796_v17 = vld [vmem:[%s15356_s1 + $0x284] ss:$16 sps:$4 sm:$0xff]   ;;  %v10799_v19 = vld [vmem:[%s15356_s1 + $0x280] ss:$16 sps:$4 sm:$0xff]  }
  0x17   : > { %2204 = vmatpush1.bf16.msra.mxu1 %v10786_v10  ;;  %v10800_v20 = vld [vmem:[%s15356_s1 + $0xa4] ss:$16 sps:$4 sm:$0xff]   ;;  %v10804_v22 = vld [vmem:[%s15356_s1 + $0xa0] ss:$16 sps:$4 sm:$0xff]   ;;  %v10892_v10 = vld [vmem:[%s15356_s1 + $0x4c] ss:$16 sps:$4 sm:$0xff]  }
  0x18   : > { %2397 = vmatpush1.bf16.msra.mxu0 %v10787_v11  ;;  %2205 = vmatprep.subr.bf16.mxu1 %v10788_v12  ;;  %v10802_v21 = vld [vmem:[%s15356_s1 + $0x2a4] ss:$16 sps:$4 sm:$0xff]   ;;  %v10805_v23 = vld [vmem:[%s15356_s1 + $0x2a0] ss:$16 sps:$4 sm:$0xff]  }
  0x19   : > { %2398 = vmatprep.subr.bf16.mxu0 %v10790_v13  ;;  %v10806_v24 = vld [vmem:[%s15356_s1 + $0xc4] ss:$16 sps:$4 sm:$0xff]   ;;  %v10810_v26 = vld [vmem:[%s15356_s1 + $0xc0] ss:$16 sps:$4 sm:$0xff]  }
  0x1a   : > { %v10808_v25 = vld [vmem:[%s15356_s1 + $0x2c4] ss:$16 sps:$4 sm:$0xff]   ;;  %v10811_v27 = vld [vmem:[%s15356_s1 + $0x2c0] ss:$16 sps:$4 sm:$0xff]  }
  0x1b   : > { %2206 = vmatpush1.bf16.msra.mxu1 %v10792_v14  ;;  %v10812_v28 = vld [vmem:[%s15356_s1 + $0xe4] ss:$16 sps:$4 sm:$0xff]   ;;  %v10816_v30 = vld [vmem:[%s15356_s1 + $0xe0] ss:$16 sps:$4 sm:$0xff]  }
  0x1c   : > { %2399 = vmatpush1.bf16.msra.mxu0 %v10793_v15  ;;  %2207 = vmatprep.subr.bf16.mxu1 %v10794_v16  ;;  %v10814_v29 = vld [vmem:[%s15356_s1 + $0x2e4] ss:$16 sps:$4 sm:$0xff]   ;;  %v10817_v31 = vld [vmem:[%s15356_s1 + $0x2e0] ss:$16 sps:$4 sm:$0xff]   ;;  %v10890_v15 = vld [vmem:[%s15356_s1 + $0x48] ss:$16 sps:$4 sm:$0xff]  }
  0x1d   : > { %2400 = vmatprep.subr.bf16.mxu0 %v10796_v17  ;;  %v10818_v32 = vld [vmem:[%s15356_s1 + $0x104] ss:$16 sps:$4 sm:$0xff]   ;;  %v10822_v34 = vld [vmem:[%s15356_s1 + $0x100] ss:$16 sps:$4 sm:$0xff]   ;;  %v10901_v16 = vld [vmem:[%s15356_s1 + $0x6c] ss:$16 sps:$4 sm:$0xff]  }
  0x1e   : > { %v10820_v33 = vld [vmem:[%s15356_s1 + $0x304] ss:$16 sps:$4 sm:$0xff]   ;;  %v10823_v35 = vld [vmem:[%s15356_s1 + $0x300] ss:$16 sps:$4 sm:$0xff]   ;;  %v10899_v17 = vld [vmem:[%s15356_s1 + $0x68] ss:$16 sps:$4 sm:$0xff]  }
  0x1f   : > { %2208 = vmatpush1.bf16.msra.mxu1 %v10798_v18  ;;  %v10824_v36 = vld [vmem:[%s15356_s1 + $0x124] ss:$16 sps:$4 sm:$0xff]   ;;  %v10828_v38 = vld [vmem:[%s15356_s1 + $0x120] ss:$16 sps:$4 sm:$0xff]  }
  0x20   : > { %2401 = vmatpush1.bf16.msra.mxu0 %v10799_v19  ;;  %2209 = vmatprep.subr.bf16.mxu1 %v10800_v20  ;;  %v10826_v37 = vld [vmem:[%s15356_s1 + $0x324] ss:$16 sps:$4 sm:$0xff]   ;;  %v10829_v39 = vld [vmem:[%s15356_s1 + $0x320] ss:$16 sps:$4 sm:$0xff]   ;;  %v10910_v20 = vld [vmem:[%s15356_s1 + $0x8c] ss:$16 sps:$4 sm:$0xff]  }
  0x21   : > { %2402 = vmatprep.subr.bf16.mxu0 %v10802_v21  ;;  %v10830_v40 = vld [vmem:[%s15356_s1 + $0x144] ss:$16 sps:$4 sm:$0xff]   ;;  %v10834_v42 = vld [vmem:[%s15356_s1 + $0x140] ss:$16 sps:$4 sm:$0xff]  }
  0x22   : > { %v10832_v41 = vld [vmem:[%s15356_s1 + $0x344] ss:$16 sps:$4 sm:$0xff]   ;;  %v10835_v43 = vld [vmem:[%s15356_s1 + $0x340] ss:$16 sps:$4 sm:$0xff]  }
  0x23   : > { %2210 = vmatpush1.bf16.msra.mxu1 %v10804_v22  ;;  %v10836_v44 = vld [vmem:[%s15356_s1 + $0x164] ss:$16 sps:$4 sm:$0xff]   ;;  %v10840_v46 = vld [vmem:[%s15356_s1 + $0x160] ss:$16 sps:$4 sm:$0xff]  }
  0x24   : > { %2403 = vmatpush1.bf16.msra.mxu0 %v10805_v23  ;;  %2211 = vmatprep.subr.bf16.mxu1 %v10806_v24  ;;  %v10838_v45 = vld [vmem:[%s15356_s1 + $0x364] ss:$16 sps:$4 sm:$0xff]   ;;  %v10841_v47 = vld [vmem:[%s15356_s1 + $0x360] ss:$16 sps:$4 sm:$0xff]  }
  0x25   : > { %2404 = vmatprep.subr.bf16.mxu0 %v10808_v25  ;;  %v10842_v48 = vld [vmem:[%s15356_s1 + $0x184] ss:$16 sps:$4 sm:$0xff]   ;;  %v10846_v52 = vld [vmem:[%s15356_s1 + $0x180] ss:$16 sps:$4 sm:$0xff]   ;;  %v10908_v25 = vld [vmem:[%s15356_s1 + $0x88] ss:$16 sps:$4 sm:$0xff]  }
  0x26   : > { %v10868_v49 = vld [vmem:[%s12099_s14 + $0x4] ss:$24 sps:$4 sm:$0xff]   ;;  %v10847_v53 = vld [vmem:[%s15356_s1 + $0x380] ss:$16 sps:$4 sm:$0xff]   ;;  %v12171_v6 = vld [vmem:[%s12099_s14 + $0x34] ss:$24 sps:$4 sm:$0xff]  }
  0x27   : > { %2212 = vmatpush1.bf16.msra.mxu1 %v10810_v26  ;;  %v10844_v50 = vld [vmem:[%s15356_s1 + $0x384] ss:$16 sps:$4 sm:$0xff]   ;;  %2231 = vmatprep.mubr.bf16.mxu1 %v10868_v49  ;;  %v10852_v56 = vld [vmem:[%s15356_s1 + $0x1a0] ss:$16 sps:$4 sm:$0xff]   ;;  %v10919_v26 = vld [vmem:[%s15356_s1 + $0xac] ss:$16 sps:$4 sm:$0xff]  }
  0x28   : > { %2405 = vmatpush1.bf16.msra.mxu0 %v10811_v27  ;;  %2213 = vmatprep.subr.bf16.mxu1 %v10812_v28  ;;  %v10871_v51 = vld [vmem:[%s12099_s14 + $0xc] ss:$24 sps:$4 sm:$0xff]   ;;  %v10853_v57 = vld [vmem:[%s15356_s1 + $0x3a0] ss:$16 sps:$4 sm:$0xff]   ;;  %v10877_v7 = vld [vmem:[%s12099_s14 + $0x3c] ss:$24 sps:$4 sm:$0xff]  }
  0x29   : > { %2406 = vmatprep.subr.bf16.mxu0 %v10814_v29  ;;  %2424 = vmatprep.mubr.bf16.mxu0 %v10871_v51  ;;  %v10848_v54 = vld [vmem:[%s15356_s1 + $0x1a4] ss:$16 sps:$4 sm:$0xff]   ;;  %v10858_v60 = vld [vmem:[%s15356_s1 + $0x1c0] ss:$16 sps:$4 sm:$0xff]   ;;  %v10917_v29 = vld [vmem:[%s15356_s1 + $0xa8] ss:$16 sps:$4 sm:$0xff]  }
  0x2a   : > { %v10850_v55 = vld [vmem:[%s15356_s1 + $0x3a4] ss:$16 sps:$4 sm:$0xff]   ;;  %v10859_v61 = vld [vmem:[%s15356_s1 + $0x3c0] ss:$16 sps:$4 sm:$0xff]   ;;  %v10947_v49 = vld [vmem:[%s15356_s1 + $0x108] ss:$16 sps:$4 sm:$0xff]  }
  0x2b   : > { %2214 = vmatpush1.bf16.msra.mxu1 %v10816_v30  ;;  %v10854_v58 = vld [vmem:[%s15356_s1 + $0x1c4] ss:$16 sps:$4 sm:$0xff]   ;;  %v10864_v0 = vld [vmem:[%s15356_s1 + $0x1e0] ss:$16 sps:$4 sm:$0xff]   ;;  %v10964_v51 = vld [vmem:[%s15356_s1 + $0x12c] ss:$16 sps:$4 sm:$0xff]  }
  0x2c   : > { %2407 = vmatpush1.bf16.msra.mxu0 %v10817_v31  ;;  %2215 = vmatprep.subr.bf16.mxu1 %v10818_v32  ;;  %v10856_v59 = vld [vmem:[%s15356_s1 + $0x3c4] ss:$16 sps:$4 sm:$0xff]   ;;  %v10865_v1 = vld [vmem:[%s15356_s1 + $0x3e0] ss:$16 sps:$4 sm:$0xff]  }
  0x2d   : > { %2408 = vmatprep.subr.bf16.mxu0 %v10820_v33  ;;  %v10860_v62 = vld [vmem:[%s15356_s1 + $0x1e4] ss:$16 sps:$4 sm:$0xff]   ;;  %v12164_v3 = vld [vmem:[%s12099_s14] ss:$24 sps:$4 sm:$0xff]   ;;  %v12186_v11 = vld [vmem:[%s12099_s14 + $0x30] ss:$24 sps:$4 sm:$0xff]  }
  0x2e   : > { %v10862_v63 = vld [vmem:[%s15356_s1 + $0x3e4] ss:$16 sps:$4 sm:$0xff]   ;;  %v10869_v4 = vld [vmem:[%s12099_s14 + $0x8] ss:$24 sps:$4 sm:$0xff]   ;;  %v10880_v12 = vld [vmem:[%s12099_s14 + $0x38] ss:$24 sps:$4 sm:$0xff]  }
  0x2f   : > { %2216 = vmatpush1.bf16.msra.mxu1 %v10822_v34  ;;  %v12190_v13 = vld [vmem:[%s12099_s14 + $0x64] ss:$24 sps:$4 sm:$0xff]   ;;  %v10888_v18 = vld [vmem:[%s12099_s14 + $0x60] ss:$24 sps:$4 sm:$0xff]   ;;  %v10893_v21 = vld [vmem:[%s12099_s14 + $0x94] ss:$24 sps:$4 sm:$0xff]  }
  0x30   : > { %2409 = vmatpush1.bf16.msra.mxu0 %v10823_v35  ;;  %2217 = vmatprep.subr.bf16.mxu1 %v10824_v36  ;;  %v10886_v14 = vld [vmem:[%s12099_s14 + $0x6c] ss:$24 sps:$4 sm:$0xff]   ;;  %v10889_v19 = vld [vmem:[%s12099_s14 + $0x68] ss:$24 sps:$4 sm:$0xff]   ;;  %v10895_v24 = vld [vmem:[%s12099_s14 + $0x9c] ss:$24 sps:$4 sm:$0xff]  }
  0x31   : > { %2410 = vmatprep.subr.bf16.mxu0 %v10826_v37  ;;  %v10944_v22 = vld [vmem:[%s15356_s1 + $0x400] ss:$16 sps:$4 sm:$0xff]   ;;  %v10946_v23 = vld [vmem:[%s15356_s1 + $0x404] ss:$16 sps:$4 sm:$0xff]   ;;  %v10928_v33 = vld [vmem:[%s15356_s1 + $0xcc] ss:$16 sps:$4 sm:$0xff]  }
  0x32   : > { %v10952_v27 = vld [vmem:[%s15356_s1 + $0x424] ss:$16 sps:$4 sm:$0xff]   ;;  %v10950_v28 = vld [vmem:[%s15356_s1 + $0x420] ss:$16 sps:$4 sm:$0xff]   ;;  %v10926_v37 = vld [vmem:[%s15356_s1 + $0xc8] ss:$16 sps:$4 sm:$0xff]  }
  0x33   : > { %2218 = vmatpush1.bf16.msra.mxu1 %v10828_v38  ;;  %v10897_v30 = vld [vmem:[%s12099_s14 + $0x90] ss:$24 sps:$4 sm:$0xff]   ;;  %v10961_v32 = vld [vmem:[%s15356_s1 + $0x444] ss:$16 sps:$4 sm:$0xff]  }
  0x34   : > { %2411 = vmatpush1.bf16.msra.mxu0 %v10829_v39  ;;  %2219 = vmatprep.subr.bf16.mxu1 %v10830_v40  ;;  %v10898_v31 = vld [vmem:[%s12099_s14 + $0x98] ss:$24 sps:$4 sm:$0xff]   ;;  %v12244_v35 = vld [vmem:[%s12099_s14 + $0xc4] ss:$24 sps:$4 sm:$0xff]  }
  0x35   : > { %2412 = vmatprep.subr.bf16.mxu0 %v10832_v41  ;;  %v10959_v34 = vld [vmem:[%s15356_s1 + $0x440] ss:$16 sps:$4 sm:$0xff]   ;;  %v10904_v36 = vld [vmem:[%s12099_s14 + $0xcc] ss:$24 sps:$4 sm:$0xff]  }
  0x36   : > { %v10967_v38 = vld [vmem:[%s15356_s1 + $0x464] ss:$16 sps:$4 sm:$0xff]   ;;  %v10937_v39 = vld [vmem:[%s15356_s1 + $0xec] ss:$16 sps:$4 sm:$0xff]   ;;  %v10965_v40 = vld [vmem:[%s15356_s1 + $0x460] ss:$16 sps:$4 sm:$0xff]  }
  0x37   : > { %2220 = vmatpush1.bf16.msra.mxu1 %v10834_v42  ;;  %v10976_v41 = vld [vmem:[%s15356_s1 + $0x484] ss:$16 sps:$4 sm:$0xff]   ;;  %v10906_v42 = vld [vmem:[%s12099_s14 + $0xc0] ss:$24 sps:$4 sm:$0xff]  }
  0x38   : > { %2413 = vmatpush1.bf16.msra.mxu0 %v10835_v43  ;;  %2221 = vmatprep.subr.bf16.mxu1 %v10836_v44  ;;  %v10907_v43 = vld [vmem:[%s12099_s14 + $0xc8] ss:$24 sps:$4 sm:$0xff]  }
  0x39   : > { %2414 = vmatprep.subr.bf16.mxu0 %v10838_v45  ;;  %v10935_v44 = vld [vmem:[%s15356_s1 + $0xe8] ss:$16 sps:$4 sm:$0xff]   ;;  %v10949_v45 = vld [vmem:[%s15356_s1 + $0x10c] ss:$16 sps:$4 sm:$0xff]  }
  0x3b   : > { %2222 = vmatpush1.bf16.msra.mxu1 %v10840_v46  ;;  %v10974_v46 = vld [vmem:[%s15356_s1 + $0x480] ss:$16 sps:$4 sm:$0xff]  }
  0x3c   : > { %2415 = vmatpush1.bf16.msra.mxu0 %v10841_v47  ;;  %2223 = vmatprep.subr.bf16.mxu1 %v10842_v48  ;;  %v10911_v47 = vld [vmem:[%s12099_s14 + $0xf4] ss:$24 sps:$4 sm:$0xff]  }
  0x3d   : > { %2416 = vmatprep.subr.bf16.mxu0 %v10844_v50  ;;  %v10913_v48 = vld [vmem:[%s12099_s14 + $0xfc] ss:$24 sps:$4 sm:$0xff]  }
  0x3e   : > { %v10982_v50 = vld [vmem:[%s15356_s1 + $0x4a4] ss:$16 sps:$4 sm:$0xff]  }
  0x3f   : > { %2224 = vmatpush1.bf16.msra.mxu1 %v10846_v52  ;;  %v10980_v52 = vld [vmem:[%s15356_s1 + $0x4a0] ss:$16 sps:$4 sm:$0xff]  }
  0x40   : > { %2417 = vmatpush1.bf16.msra.mxu0 %v10847_v53  ;;  %2225 = vmatprep.subr.bf16.mxu1 %v10848_v54  ;;  %v10991_v53 = vld [vmem:[%s15356_s1 + $0x4c4] ss:$16 sps:$4 sm:$0xff]   ;;  %v10962_v54 = vld [vmem:[%s15356_s1 + $0x128] ss:$16 sps:$4 sm:$0xff]  }
  0x41   : > { %2418 = vmatprep.subr.bf16.mxu0 %v10850_v55  ;;  %v10915_v55 = vld [vmem:[%s12099_s14 + $0xf0] ss:$24 sps:$4 sm:$0xff]  }
  0x43   : > { %2226 = vmatpush1.bf16.msra.mxu1 %v10852_v56  ;;  %v10979_v56 = vld [vmem:[%s15356_s1 + $0x14c] ss:$16 sps:$4 sm:$0xff]  }
  0x44   : > { %2419 = vmatpush1.bf16.msra.mxu0 %v10853_v57  ;;  %2227 = vmatprep.subr.bf16.mxu1 %v10854_v58  ;;  %v10989_v57 = vld [vmem:[%s15356_s1 + $0x4c0] ss:$16 sps:$4 sm:$0xff]  }
  0x45   : > { %2420 = vmatprep.subr.bf16.mxu0 %v10856_v59  ;;  %v10916_v58 = vld [vmem:[%s12099_s14 + $0xf8] ss:$24 sps:$4 sm:$0xff]   ;;  %v10920_v59 = vld [vmem:[%s12099_s14 + $0x124] ss:$24 sps:$4 sm:$0xff]  }
  0x47   : > { %2228 = vmatpush1.bf16.msra.mxu1 %v10858_v60  ;;  %v10922_v60 = vld [vmem:[%s12099_s14 + $0x12c] ss:$24 sps:$4 sm:$0xff]  }
  0x48   : > { %2421 = vmatpush1.bf16.msra.mxu0 %v10859_v61  ;;  %2229 = vmatprep.subr.bf16.mxu1 %v10860_v62  ;;  %v10977_v61 = vld [vmem:[%s15356_s1 + $0x148] ss:$16 sps:$4 sm:$0xff]   ;;  %v10997_v62 = vld [vmem:[%s15356_s1 + $0x4e4] ss:$16 sps:$4 sm:$0xff]  }
  0x49   : > { %2422 = vmatprep.subr.bf16.mxu0 %v10862_v63  ;;  %v10994_v63 = vld [vmem:[%s15356_s1 + $0x16c] ss:$16 sps:$4 sm:$0xff]  }
  0x4b   : > { %2230 = vmatpush1.bf16.msra.mxu1 %v10864_v0  ;;  %v10995_v0 = vld [vmem:[%s15356_s1 + $0x4e0] ss:$16 sps:$4 sm:$0xff]  }
  0x4c   : > { %2423 = vmatpush1.bf16.msra.mxu0 %v10865_v1  ;;  %2778 = vmatprep.subr.bf16.mxu1 %v10874_v2  ;;  %v11006_v1 = vld [vmem:[%s15356_s1 + $0x504] ss:$16 sps:$4 sm:$0xff]   ;;  %v10924_v2 = vld [vmem:[%s12099_s14 + $0x120] ss:$24 sps:$4 sm:$0xff]  }
  0x4d   : > { %2585 = vmatprep.subr.bf16.mxu0 %v10946_v23  ;;  %v10940_v23 = vld [vmem:[%s12099_s14 + $0x18c] ss:$24 sps:$4 sm:$0xff]  }
  0x4e   : > { %2232 = vmatmul.mubr.bf16.vlgmr.msra.gmra.mrb[0].mxu1 %v12164_v3 }
  0x4f   : > { %2425 = vmatmul.mubr.bf16.vlgmr.msra.gmra.mrb[0].mxu0 %v10869_v4  ;;  %2779 = vmatpush1.bf16.msra.mxu1 %v10872_v5  ;;  %v10925_v4 = vld [vmem:[%s12099_s14 + $0x128] ss:$24 sps:$4 sm:$0xff]  }
  0x50   : > { %2241 = vmatprep.mubr.bf16.mxu1 %v12171_v6  ;;  %2434 = vmatprep.mubr.bf16.mxu0 %v10877_v7  ;;  %v10992_v5 = vld [vmem:[%s15356_s1 + $0x168] ss:$16 sps:$4 sm:$0xff]   ;;  %v11004_v7 = vld [vmem:[%s15356_s1 + $0x500] ss:$16 sps:$4 sm:$0xff]  }
  0x51   : > { %2780 = vmatprep.subr.bf16.mxu1 %v10883_v8  ;;  %2586 = vmatpush1.bf16.msra.mxu0 %v10944_v22  ;;  %v11009_v8 = vld [vmem:[%s15356_s1 + $0x18c] ss:$16 sps:$4 sm:$0xff]   ;;  %v11019_v22 = vld [vmem:[%s15356_s1 + $0x540] ss:$16 sps:$4 sm:$0xff]  }
  0x52   : > { %2587 = vmatprep.subr.bf16.mxu0 %v10952_v27  ;;  %v11025_v27 = vld [vmem:[%s15356_s1 + $0x560] ss:$16 sps:$4 sm:$0xff]  }
  0x53   : > { %2781 = vmatpush1.bf16.msra.mxu1 %v10881_v9  ;;  %v10929_v9 = vld [vmem:[%s12099_s14 + $0x154] ss:$24 sps:$4 sm:$0xff]  }
  0x54   : > { %2782 = vmatprep.subr.bf16.mxu1 %v10892_v10  ;;  %v10931_v10 = vld [vmem:[%s12099_s14 + $0x15c] ss:$24 sps:$4 sm:$0xff]  }
  0x55   : > { %2588 = vmatpush1.bf16.msra.mxu0 %v10950_v28  ;;  %v11036_v28 = vld [vmem:[%s15356_s1 + $0x584] ss:$16 sps:$4 sm:$0xff]  }
  0x56   : > { %2242 = vmatmul.mubr.bf16.gmra.mrb[4].mxu1 %v12186_v11  ;;  %2589 = vmatprep.subr.bf16.mxu0 %v10961_v32  ;;  %v11054_v32 = vld [vmem:[%s15356_s1 + $0x1ec] ss:$16 sps:$4 sm:$0xff]  }
  0x57   : > { %2435 = vmatmul.mubr.bf16.gmra.mrb[4].mxu0 %v10880_v12  ;;  %2251 = vmatprep.mubr.bf16.mxu1 %v12190_v13  ;;  %v11007_v12 = vld [vmem:[%s15356_s1 + $0x188] ss:$16 sps:$4 sm:$0xff]  }
  0x58   : > { %2444 = vmatprep.mubr.bf16.mxu0 %v10886_v14  ;;  %2783 = vmatpush1.bf16.msra.mxu1 %v10890_v15  ;;  %v11012_v14 = vld [vmem:[%s15356_s1 + $0x524] ss:$16 sps:$4 sm:$0xff]   ;;  %v11010_v15 = vld [vmem:[%s15356_s1 + $0x520] ss:$16 sps:$4 sm:$0xff]  }
  0x59   : > { %2784 = vmatprep.subr.bf16.mxu1 %v10901_v16  ;;  %2590 = vmatpush1.bf16.msra.mxu0 %v10959_v34  ;;  %v11024_v16 = vld [vmem:[%s15356_s1 + $0x1ac] ss:$16 sps:$4 sm:$0xff]  }
  0x5a   : > { %2591 = vmatprep.subr.bf16.mxu0 %v10967_v38  ;;  %v10953_v34 = vld [vmem:[%s12099_s14 + $0x1b4] ss:$24 sps:$4 sm:$0xff]   ;;  %v11040_v38 = vld [vmem:[%s15356_s1 + $0x5a0] ss:$16 sps:$4 sm:$0xff]  }
  0x5c   : > { %2785 = vmatpush1.bf16.msra.mxu1 %v10899_v17  ;;  %v11021_v17 = vld [vmem:[%s15356_s1 + $0x544] ss:$16 sps:$4 sm:$0xff]  }
  0x5d   : > { %2786 = vmatprep.subr.bf16.mxu1 %v10910_v20  ;;  %2592 = vmatpush1.bf16.msra.mxu0 %v10965_v40  ;;  %v11022_v20 = vld [vmem:[%s15356_s1 + $0x1a8] ss:$16 sps:$4 sm:$0xff]   ;;  %v11051_v40 = vld [vmem:[%s15356_s1 + $0x5c4] ss:$16 sps:$4 sm:$0xff]  }
  0x5e   : > { %2252 = vmatmul.mubr.bf16.gmra.mrb[8].mxu1 %v10888_v18  ;;  %2593 = vmatprep.subr.bf16.mxu0 %v10976_v41  ;;  %v10933_v18 = vld [vmem:[%s12099_s14 + $0x150] ss:$24 sps:$4 sm:$0xff]  }
  0x5f   : > { %2445 = vmatmul.mubr.bf16.gmra.mrb[8].mxu0 %v10889_v19  ;;  %2261 = vmatprep.mubr.bf16.mxu1 %v10893_v21  ;;  %v10934_v19 = vld [vmem:[%s12099_s14 + $0x158] ss:$24 sps:$4 sm:$0xff]   ;;  %v10938_v21 = vld [vmem:[%s12099_s14 + $0x184] ss:$24 sps:$4 sm:$0xff]  }
  0x60   : > { %2454 = vmatprep.mubr.bf16.mxu0 %v10895_v24  ;;  %2787 = vmatpush1.bf16.msra.mxu1 %v10908_v25  ;;  %v11039_v24 = vld [vmem:[%s15356_s1 + $0x1cc] ss:$16 sps:$4 sm:$0xff]   ;;  %v11027_v25 = vld [vmem:[%s15356_s1 + $0x564] ss:$16 sps:$4 sm:$0xff]   ;;  %v10957_v41 = vld [vmem:[%s12099_s14 + $0x1b0] ss:$24 sps:$4 sm:$0xff]  }
  0x61   : > { %2788 = vmatprep.subr.bf16.mxu1 %v10919_v26  ;;  %2594 = vmatpush1.bf16.msra.mxu0 %v10974_v46  ;;  %v11037_v26 = vld [vmem:[%s15356_s1 + $0x1c8] ss:$16 sps:$4 sm:$0xff]   ;;  %v11057_v46 = vld [vmem:[%s15356_s1 + $0x5e4] ss:$16 sps:$4 sm:$0xff]  }
  0x62   : > { %2595 = vmatprep.subr.bf16.mxu0 %v10982_v50  ;;  %v10983_v50 = vld [vmem:[%s12099_s14 + $0x214] ss:$24 sps:$4 sm:$0xff]  }
  0x64   : > { %2789 = vmatpush1.bf16.msra.mxu1 %v10917_v29  ;;  %v10942_v29 = vld [vmem:[%s12099_s14 + $0x180] ss:$24 sps:$4 sm:$0xff]  }
  0x65   : > { %2790 = vmatprep.subr.bf16.mxu1 %v10928_v33  ;;  %2596 = vmatpush1.bf16.msra.mxu0 %v10980_v52  ;;  %v10943_v33 = vld [vmem:[%s12099_s14 + $0x188] ss:$24 sps:$4 sm:$0xff]  }
  0x66   : > { %2262 = vmatmul.mubr.bf16.gmra.mrb[12].mxu1 %v10897_v30  ;;  %2597 = vmatprep.subr.bf16.mxu0 %v10991_v53  ;;  %v11034_v30 = vld [vmem:[%s15356_s1 + $0x580] ss:$16 sps:$4 sm:$0xff]  }
  0x67   : > { %2455 = vmatmul.mubr.bf16.gmra.mrb[12].mxu0 %v10898_v31  ;;  %2271 = vmatprep.mubr.bf16.mxu1 %v12244_v35  ;;  %v11052_v31 = vld [vmem:[%s15356_s1 + $0x1e8] ss:$16 sps:$4 sm:$0xff]  }
  0x68   : > { %2464 = vmatprep.mubr.bf16.mxu0 %v10904_v36  ;;  %2791 = vmatpush1.bf16.msra.mxu1 %v10926_v37  ;;  %v10955_v36 = vld [vmem:[%s12099_s14 + $0x1bc] ss:$24 sps:$4 sm:$0xff]   ;;  %v10987_v52 = vld [vmem:[%s12099_s14 + $0x210] ss:$24 sps:$4 sm:$0xff]  }
  0x69   : > { %2792 = vmatprep.subr.bf16.mxu1 %v10937_v39  ;;  %2598 = vmatpush1.bf16.msra.mxu0 %v10989_v57  ;;  %v11042_v37 = vld [vmem:[%s15356_s1 + $0x5a4] ss:$16 sps:$4 sm:$0xff]   ;;  %v11063_v39 = vld [vmem:[%s15356_s1 + $0x20c] ss:$16 sps:$4 sm:$0xff]   ;;  %v10988_v53 = vld [vmem:[%s12099_s14 + $0x218] ss:$24 sps:$4 sm:$0xff]  }
  0x6a   : > { %2599 = vmatprep.subr.bf16.mxu0 %v10997_v62  ;;  %v11003_v57 = vld [vmem:[%s12099_s14 + $0x248] ss:$24 sps:$4 sm:$0xff]   ;;  %v11028_v62 = vld [vmem:[%s12099_s14 + $0x2a4] ss:$24 sps:$4 sm:$0xff]  }
  0x6c   : > { %2793 = vmatpush1.bf16.msra.mxu1 %v10935_v44  ;;  %v10968_v44 = vld [vmem:[%s12099_s14 + $0x1e4] ss:$24 sps:$4 sm:$0xff]  }
  0x6d   : > { %2794 = vmatprep.subr.bf16.mxu1 %v10949_v45  ;;  %2600 = vmatpush1.bf16.msra.mxu0 %v10995_v0  ;;  %v10970_v45 = vld [vmem:[%s12099_s14 + $0x1ec] ss:$24 sps:$4 sm:$0xff]   ;;  %v11032_v0 = vld [vmem:[%s12099_s14 + $0x2a0] ss:$24 sps:$4 sm:$0xff]  }
  0x6e   : > { %2272 = vmatmul.mubr.bf16.gmra.mrb[16].mxu1 %v10906_v42  ;;  %2601 = vmatprep.subr.bf16.mxu0 %v11006_v1  ;;  %v11049_v42 = vld [vmem:[%s15356_s1 + $0x5c0] ss:$16 sps:$4 sm:$0xff]  }
  0x6f   : > { %2465 = vmatmul.mubr.bf16.gmra.mrb[16].mxu0 %v10907_v43  ;;  %2281 = vmatprep.mubr.bf16.mxu1 %v10911_v47  ;;  %v10958_v43 = vld [vmem:[%s12099_s14 + $0x1b8] ss:$24 sps:$4 sm:$0xff]   ;;  %v11033_v1 = vld [vmem:[%s12099_s14 + $0x2a8] ss:$24 sps:$4 sm:$0xff]  }
  0x70   : > { %2474 = vmatprep.mubr.bf16.mxu0 %v10913_v48  ;;  %2795 = vmatpush1.bf16.msra.mxu1 %v10947_v49  ;;  %v11055_v47 = vld [vmem:[%s15356_s1 + $0x5e0] ss:$16 sps:$4 sm:$0xff]  }
  0x71   : > { %2796 = vmatprep.subr.bf16.mxu1 %v10964_v51  ;;  %2602 = vmatpush1.bf16.msra.mxu0 %v11004_v7  ;;  %v10972_v48 = vld [vmem:[%s12099_s14 + $0x1e0] ss:$24 sps:$4 sm:$0xff]   ;;  %v10985_v51 = vld [vmem:[%s12099_s14 + $0x21c] ss:$24 sps:$4 sm:$0xff]  }
  0x72   : > { %2603 = vmatprep.subr.bf16.mxu0 %v11012_v14  ;;  %v10973_v49 = vld [vmem:[%s12099_s14 + $0x1e8] ss:$24 sps:$4 sm:$0xff]   ;;  %v11048_v7 = vld [vmem:[%s12099_s14 + $0x2d8] ss:$24 sps:$4 sm:$0xff]   ;;  %v11064_v14 = vld [vmem:[%s12099_s14 + $0x44] ss:$24 sps:$4 sm:$0xff]  }
  0x74   : > { %2797 = vmatpush1.bf16.msra.mxu1 %v10962_v54  ;;  %v10998_v54 = vld [vmem:[%s12099_s14 + $0x244] ss:$24 sps:$4 sm:$0xff]  }
  0x75   : > { %2798 = vmatprep.subr.bf16.mxu1 %v10979_v56  ;;  %2604 = vmatpush1.bf16.msra.mxu0 %v11010_v15  ;;  %v11002_v56 = vld [vmem:[%s12099_s14 + $0x240] ss:$24 sps:$4 sm:$0xff]   ;;  %v11069_v15 = vld [vmem:[%s15356_s1 + $0x22c] ss:$16 sps:$4 sm:$0xff]  }
  0x76   : > { %2282 = vmatmul.mubr.bf16.gmra.mrb[20].mxu1 %v10915_v55  ;;  %2605 = vmatprep.subr.bf16.mxu0 %v11021_v17  ;;  %v11000_v55 = vld [vmem:[%s12099_s14 + $0x24c] ss:$24 sps:$4 sm:$0xff]  }
  0x77   : > { %2475 = vmatmul.mubr.bf16.gmra.mrb[20].mxu0 %v10916_v58  ;;  %2291 = vmatprep.mubr.bf16.mxu1 %v10920_v59  ;;  %v11013_v58 = vld [vmem:[%s12099_s14 + $0x274] ss:$24 sps:$4 sm:$0xff]  }
  0x78   : > { %2484 = vmatprep.mubr.bf16.mxu0 %v10922_v60  ;;  %2799 = vmatpush1.bf16.msra.mxu1 %v10977_v61  ;;  %v11015_v59 = vld [vmem:[%s12099_s14 + $0x27c] ss:$24 sps:$4 sm:$0xff]   ;;  %v11017_v60 = vld [vmem:[%s12099_s14 + $0x270] ss:$24 sps:$4 sm:$0xff]  }
  0x79   : > { %2800 = vmatprep.subr.bf16.mxu1 %v10994_v63  ;;  %2606 = vmatpush1.bf16.msra.mxu0 %v11019_v22  ;;  %v11018_v61 = vld [vmem:[%s12099_s14 + $0x278] ss:$24 sps:$4 sm:$0xff]   ;;  %v11030_v63 = vld [vmem:[%s12099_s14 + $0x2ac] ss:$24 sps:$4 sm:$0xff]  }
  0x7a   : > { %2607 = vmatprep.subr.bf16.mxu0 %v11027_v25  ;;  %v11075_v17 = vld [vmem:[%s15356_s1 + $0x24c] ss:$16 sps:$4 sm:$0xff]   ;;  %v11072_v22 = vld [vmem:[%s12099_s14 + $0x70] ss:$24 sps:$4 sm:$0xff]  }
  0x7b   : > { %v11091_v25 = vld [vmem:[%s15356_s1 + $0x2a8] ss:$16 sps:$4 sm:$0xff]  }
  0x7c   : > { %2801 = vmatpush1.bf16.msra.mxu1 %v10992_v5  ;;  %v11047_v5 = vld [vmem:[%s12099_s14 + $0x2d0] ss:$24 sps:$4 sm:$0xff]  }
  0x7d   : > { %2802 = vmatprep.subr.bf16.mxu1 %v11009_v8  ;;  %2608 = vmatpush1.bf16.msra.mxu0 %v11025_v27  ;;  %v11060_v8 = vld [vmem:[%s12099_s14 + $0x14] ss:$24 sps:$4 sm:$0xff]  }
  0x7e   : > { %2292 = vmatmul.mubr.bf16.gmra.mrb[24].mxu1 %v10924_v2  ;;  %2609 = vmatprep.subr.bf16.mxu0 %v11036_v28  ;;  %v11043_v2 = vld [vmem:[%s12099_s14 + $0x2d4] ss:$24 sps:$4 sm:$0xff]   ;;  %v11078_v28 = vld [vmem:[%s12099_s14 + $0xa0] ss:$24 sps:$4 sm:$0xff]  }
  0x7f   : > { %2485 = vmatmul.mubr.bf16.gmra.mrb[24].mxu0 %v10925_v4  ;;  %2301 = vmatprep.mubr.bf16.mxu1 %v10929_v9  ;;  %v11045_v4 = vld [vmem:[%s12099_s14 + $0x2dc] ss:$24 sps:$4 sm:$0xff]  }
  0x80   : > { %2494 = vmatprep.mubr.bf16.mxu0 %v10931_v10  ;;  %2803 = vmatpush1.bf16.msra.mxu1 %v11007_v12  ;;  %v11778_v9 = vld [vmem:[%s12099_s14 + $0x4] ss:$24 sps:$4 sm:$0xff]   ;;  %v11058_v10 = vld [vmem:[%s12099_s14 + $0x10] ss:$24 sps:$4 sm:$0xff]  }
  0x81   : > { %2804 = vmatprep.subr.bf16.mxu1 %v11024_v16  ;;  %2610 = vmatpush1.bf16.msra.mxu0 %v11034_v30  ;;  %v11061_v12 = vld [vmem:[%s15356_s1 + $0x208] ss:$16 sps:$4 sm:$0xff]   ;;  %v11099_v27 = vld [vmem:[%s15356_s1 + $0x2cc] ss:$16 sps:$4 sm:$0xff]  }
  0x82   : > { %2611 = vmatprep.subr.bf16.mxu0 %v11042_v37  ;;  %v11067_v16 = vld [vmem:[%s15356_s1 + $0x228] ss:$16 sps:$4 sm:$0xff]   ;;  %v11088_v37 = vld [vmem:[%s12099_s14 + $0x104] ss:$24 sps:$4 sm:$0xff]  }
  0x83   : > { %v11097_v30 = vld [vmem:[%s15356_s1 + $0x2c8] ss:$16 sps:$4 sm:$0xff]  }
  0x84   : > { %2805 = vmatpush1.bf16.msra.mxu1 %v11022_v20  ;;  %v11081_v20 = vld [vmem:[%s15356_s1 + $0x26c] ss:$16 sps:$4 sm:$0xff]  }
  0x85   : > { %2806 = vmatprep.subr.bf16.mxu1 %v11039_v24  ;;  %2612 = vmatpush1.bf16.msra.mxu0 %v11040_v38  ;;  %v11093_v24 = vld [vmem:[%s15356_s1 + $0x2ac] ss:$16 sps:$4 sm:$0xff]   ;;  %v11109_v38 = vld [vmem:[%s15356_s1 + $0x308] ss:$16 sps:$4 sm:$0xff]  }
  0x86   : > { %2302 = vmatmul.mubr.bf16.gmra.mrb[28].mxu1 %v10933_v18  ;;  %2613 = vmatprep.subr.bf16.mxu0 %v11051_v40  ;;  %v11066_v18 = vld [vmem:[%s12099_s14 + $0x40] ss:$24 sps:$4 sm:$0xff]  }
  0x87   : > { %2495 = vmatmul.mubr.bf16.gmra.mrb[28].mxu0 %v10934_v19  ;;  %2311 = vmatprep.mubr.bf16.mxu1 %v10938_v21  ;;  %v11070_v19 = vld [vmem:[%s12099_s14 + $0x74] ss:$24 sps:$4 sm:$0xff]   ;;  %v11166_v40 = vld [vmem:[%s15358_s3] ss:$8 sps:$4 sm:$0xff]  }
  0x88   : > { %2504 = vmatprep.mubr.bf16.mxu0 %v10940_v23  ;;  %2807 = vmatpush1.bf16.msra.mxu1 %v11037_v26  ;;  %v11087_v21 = vld [vmem:[%s15356_s1 + $0x28c] ss:$16 sps:$4 sm:$0xff]  }
  0x89   : > { %2808 = vmatprep.subr.bf16.mxu1 %v11054_v32  ;;  %2614 = vmatpush1.bf16.msra.mxu0 %v11049_v42  ;;  %v11076_v23 = vld [vmem:[%s12099_s14 + $0xa4] ss:$24 sps:$4 sm:$0xff]   ;;  %v11780_v26 = vld [vmem:[%s12099_s14 + $0x94] ss:$24 sps:$4 sm:$0xff]   ;;  %v11781_v32 = vld [vmem:[%s12099_s14 + $0x90] ss:$24 sps:$4 sm:$0xff]  }
  0x8a   : > { %2615 = vmatprep.subr.bf16.mxu0 %v11057_v46  ;;  %v11115_v42 = vld [vmem:[%s15356_s1 + $0x328] ss:$16 sps:$4 sm:$0xff]   ;;  %v11174_v46 = vld [vmem:[%s15358_s3 + $0x14] ss:$8 sps:$4 sm:$0xff]  }
  0x8c   : > { %2809 = vmatpush1.bf16.msra.mxu1 %v11052_v31  ;;  %v11105_v31 = vld [vmem:[%s15356_s1 + $0x2ec] ss:$16 sps:$4 sm:$0xff]  }
  0x8d   : > { %2971 = vmatprep.subr.bf16.mxu1 %v11063_v39  ;;  %2616 = vmatpush1.bf16.msra.mxu0 %v11055_v47  ;;  %v11168_v39 = vld [vmem:[%s15358_s3 + $0x4] ss:$8 sps:$4 sm:$0xff]   ;;  %v11090_v47 = vld [vmem:[%s12099_s14 + $0x100] ss:$24 sps:$4 sm:$0xff]  }
  0x8e   : > { %2312 = vmatmul.mubr.bf16.gmra.mrb[32].mxu1 %v10942_v29  ;;  %v11082_v29 = vld [vmem:[%s12099_s14 + $0xd4] ss:$24 sps:$4 sm:$0xff]   ;;  %3945 = vmatprep.subr.bf16.mxu0 %v11168_v39  ;;  %v11220_v39 = vld [vmem:[%s15358_s3 + $0xc0] ss:$8 sps:$4 sm:$0xff]  }
  0x8f   : > { %2505 = vmatmul.mubr.bf16.gmra.mrb[32].mxu0 %v10943_v33  ;;  %2321 = vmatprep.mubr.bf16.mxu1 %v10953_v34  ;;  %v11103_v33 = vld [vmem:[%s15356_s1 + $0x2e8] ss:$16 sps:$4 sm:$0xff]   ;;  %v11111_v34 = vld [vmem:[%s15356_s1 + $0x30c] ss:$16 sps:$4 sm:$0xff]  }
  0x90   : > { %2514 = vmatprep.mubr.bf16.mxu0 %v10955_v36  ;;  %v11084_v36 = vld [vmem:[%s12099_s14 + $0xd0] ss:$24 sps:$4 sm:$0xff]  }
  0x96   : > { %2322 = vmatmul.mubr.bf16.gmra.mrb[36].mxu1 %v10957_v41  ;;  %v11782_v41 = vld [vmem:[%s12099_s14 + $0xc0] ss:$24 sps:$4 sm:$0xff]  }
  0x97   : > { %2515 = vmatmul.mubr.bf16.gmra.mrb[36].mxu0 %v10958_v43  ;;  %2331 = vmatprep.mubr.bf16.mxu1 %v10968_v44  ;;  %v11172_v43 = vld [vmem:[%s15358_s3 + $0x10] ss:$8 sps:$4 sm:$0xff]   ;;  %v11783_v44 = vld [vmem:[%s12099_s14 + $0xf4] ss:$24 sps:$4 sm:$0xff]  }
  0x98   : > { %2524 = vmatprep.mubr.bf16.mxu0 %v10970_v45  ;;  %v11123_v45 = vld [vmem:[%s15356_s1 + $0x34c] ss:$16 sps:$4 sm:$0xff]  }
  0x9e   : > { %2332 = vmatmul.mubr.bf16.gmra.mrb[40].mxu1 %v10972_v48  ;;  %v11094_v48 = vld [vmem:[%s12099_s14 + $0x134] ss:$24 sps:$4 sm:$0xff]  }
  0x9f   : > { %2525 = vmatmul.mubr.bf16.gmra.mrb[40].mxu0 %v10973_v49  ;;  %2341 = vmatprep.mubr.bf16.mxu1 %v10983_v50  ;;  %v11121_v49 = vld [vmem:[%s15356_s1 + $0x348] ss:$16 sps:$4 sm:$0xff]   ;;  %v11177_v50 = vld [vmem:[%s15358_s3 + $0x24] ss:$8 sps:$4 sm:$0xff]  }
  0xa0   : > { %2534 = vmatprep.mubr.bf16.mxu0 %v10985_v51  ;;  %v11129_v51 = vld [vmem:[%s15356_s1 + $0x36c] ss:$16 sps:$4 sm:$0xff]  }
  0xa6   : > { %2342 = vmatmul.mubr.bf16.gmra.mrb[44].mxu1 %v10987_v52  ;;  %v11175_v52 = vld [vmem:[%s15358_s3 + $0x20] ss:$8 sps:$4 sm:$0xff]  }
  0xa7   : > { %2535 = vmatmul.mubr.bf16.gmra.mrb[44].mxu0 %v10988_v53  ;;  %2351 = vmatprep.mubr.bf16.mxu1 %v10998_v54  ;;  %v11784_v53 = vld [vmem:[%s12099_s14 + $0xf0] ss:$24 sps:$4 sm:$0xff]  }
  0xa8   : > { %2544 = vmatprep.mubr.bf16.mxu0 %v11000_v55  ;;  %v11127_v54 = vld [vmem:[%s15356_s1 + $0x368] ss:$16 sps:$4 sm:$0xff]  }
  0xa9   : > { %v11181_v55 = vld [vmem:[%s15358_s3 + $0x30] ss:$8 sps:$4 sm:$0xff]  }
  0xae   : > { %2352 = vmatmul.mubr.bf16.gmra.mrb[48].mxu1 %v11002_v56  ;;  %v11785_v56 = vld [vmem:[%s12099_s14 + $0x124] ss:$24 sps:$4 sm:$0xff]  }
  0xaf   : > { %2545 = vmatmul.mubr.bf16.gmra.mrb[48].mxu0 %v11003_v57  ;;  %2361 = vmatprep.mubr.bf16.mxu1 %v11013_v58  ;;  %v11135_v57 = vld [vmem:[%s15356_s1 + $0x38c] ss:$16 sps:$4 sm:$0xff]  }
  0xb0   : > { %2554 = vmatprep.mubr.bf16.mxu0 %v11015_v59  ;;  %v11183_v58 = vld [vmem:[%s15358_s3 + $0x34] ss:$8 sps:$4 sm:$0xff]   ;;  %v11096_v59 = vld [vmem:[%s12099_s14 + $0x130] ss:$24 sps:$4 sm:$0xff]  }
  0xb6   : > { %2362 = vmatmul.mubr.bf16.gmra.mrb[52].mxu1 %v11017_v60  ;;  %v11100_v60 = vld [vmem:[%s12099_s14 + $0x164] ss:$24 sps:$4 sm:$0xff]  }
  0xb7   : > { %2555 = vmatmul.mubr.bf16.gmra.mrb[52].mxu0 %v11018_v61  ;;  %2371 = vmatprep.mubr.bf16.mxu1 %v11028_v62  ;;  %v11133_v61 = vld [vmem:[%s15356_s1 + $0x388] ss:$16 sps:$4 sm:$0xff]   ;;  %v11186_v62 = vld [vmem:[%s15358_s3 + $0x44] ss:$8 sps:$4 sm:$0xff]  }
  0xb8   : > { %2564 = vmatprep.mubr.bf16.mxu0 %v11030_v63  ;;  %v11141_v63 = vld [vmem:[%s15356_s1 + $0x3ac] ss:$16 sps:$4 sm:$0xff]  }
  0xbe   : > { %2372 = vmatmul.mubr.bf16.gmra.mrb[56].mxu1 %v11032_v0  ;;  %v11184_v0 = vld [vmem:[%s15358_s3 + $0x40] ss:$8 sps:$4 sm:$0xff]  }
  0xbf   : > { %2565 = vmatmul.mubr.bf16.gmra.mrb[56].mxu0 %v11033_v1  ;;  %2381 = vmatprep.mubr.bf16.mxu1 %v11043_v2  ;;  %v11786_v1 = vld [vmem:[%s12099_s14 + $0x120] ss:$24 sps:$4 sm:$0xff]  }
  0xc0   : > { %2574 = vmatprep.mubr.bf16.mxu0 %v11045_v4  ;;  %v11139_v2 = vld [vmem:[%s15356_s1 + $0x3a8] ss:$16 sps:$4 sm:$0xff]  }
  0xc1   : > { %v11190_v4 = vld [vmem:[%s15358_s3 + $0x50] ss:$8 sps:$4 sm:$0xff]  }
  0xc6   : > { %2382 = vmatmul.mubr.bf16.gmra.mrb[60].mxu1 %v11047_v5  ;;  %v11787_v5 = vld [vmem:[%s12099_s14 + $0x154] ss:$24 sps:$4 sm:$0xff]  }
  0xc7   : > { %2575 = vmatmul.mubr.bf16.gmra.mrb[60].mxu0 %v11048_v7  ;;  %2810 = vmatprep.mubr.bf16.mxu1 %v11778_v9  ;;  %v11147_v7 = vld [vmem:[%s15356_s1 + $0x3cc] ss:$16 sps:$4 sm:$0xff]   ;;  %v11102_v9 = vld [vmem:[%s12099_s14 + $0x160] ss:$24 sps:$4 sm:$0xff]  }
  0xc8   : > { %2617 = vmatprep.mubr.bf16.mxu0 %v11060_v8  ;;  %v11192_v8 = vld [vmem:[%s15358_s3 + $0x54] ss:$8 sps:$4 sm:$0xff]  }
  0xce   : > { %2811 = vmatmul.mubr.bf16.vlgmr.msra.gmra.mrb[64].mxu1 %v12164_v3  ;;  %v11073_v3 = vld [vmem:[%s15356_s1 + $0x248] ss:$16 sps:$4 sm:$0xff]  }
  0xcf   : > { %2618 = vmatmul.mubr.bf16.vlgmr.msra.gmra.mrb[0].mxu0 %v11058_v10  ;;  %2972 = vmatpush1.bf16.msra.mxu1 %v11061_v12  ;;  %v11106_v10 = vld [vmem:[%s12099_s14 + $0x194] ss:$24 sps:$4 sm:$0xff]   ;;  %v11145_v12 = vld [vmem:[%s15356_s1 + $0x3c8] ss:$16 sps:$4 sm:$0xff]  }
  0xd0   : > { %2627 = vmatprep.mubr.bf16.mxu0 %v11064_v14  ;;  %2820 = vmatprep.mubr.bf16.mxu1 %v12171_v6  ;;  %v11079_v6 = vld [vmem:[%s15356_s1 + $0x268] ss:$16 sps:$4 sm:$0xff]   ;;  %v11195_v14 = vld [vmem:[%s15358_s3 + $0x64] ss:$8 sps:$4 sm:$0xff]  }
  0xd1   : > { %2973 = vmatprep.subr.bf16.mxu1 %v11069_v15  ;;  %3946 = vmatpush1.bf16.msra.mxu0 %v11166_v40  ;;  %v11153_v15 = vld [vmem:[%s15356_s1 + $0x3ec] ss:$16 sps:$4 sm:$0xff]   ;;  %v11226_v40 = vld [vmem:[%s15358_s3 + $0xd0] ss:$8 sps:$4 sm:$0xff]  }
  0xd2   : > { %3947 = vmatprep.subr.bf16.mxu0 %v11174_v46 }
  0xd3   : > { %2974 = vmatpush1.bf16.msra.mxu1 %v11067_v16  ;;  %v11193_v16 = vld [vmem:[%s15358_s3 + $0x60] ss:$8 sps:$4 sm:$0xff]  }
  0xd4   : > { %2975 = vmatprep.subr.bf16.mxu1 %v11075_v17  ;;  %v11788_v17 = vld [vmem:[%s12099_s14 + $0x150] ss:$24 sps:$4 sm:$0xff]  }
  0xd5   : > { %3948 = vmatpush1.bf16.msra.mxu0 %v11172_v43  ;;  %v11126_v43 = vld [vmem:[%s12099_s14 + $0x220] ss:$24 sps:$4 sm:$0xff]  }
  0xd6   : > { %2821 = vmatmul.mubr.bf16.gmra.mrb[68].mxu1 %v12186_v11  ;;  %v11085_v11 = vld [vmem:[%s15356_s1 + $0x288] ss:$16 sps:$4 sm:$0xff]   ;;  %3949 = vmatprep.subr.bf16.mxu0 %v11177_v50 }
  0xd7   : > { %2628 = vmatmul.mubr.bf16.gmra.mrb[4].mxu0 %v11066_v18  ;;  %2830 = vmatprep.mubr.bf16.mxu1 %v12190_v13  ;;  %v11779_v13 = vld [vmem:[%s12099_s14 + $0x60] ss:$24 sps:$4 sm:$0xff]  }
  0xd8   : > { %2637 = vmatprep.mubr.bf16.mxu0 %v11070_v19  ;;  %2976 = vmatpush1.bf16.msra.mxu1 %v11073_v3  ;;  %v11151_v18 = vld [vmem:[%s15356_s1 + $0x3e8] ss:$16 sps:$4 sm:$0xff]   ;;  %v11789_v3 = vld [vmem:[%s12099_s14 + $0x184] ss:$24 sps:$4 sm:$0xff]  }
  0xd9   : > { %2977 = vmatprep.subr.bf16.mxu1 %v11081_v20  ;;  %3950 = vmatpush1.bf16.msra.mxu0 %v11175_v52  ;;  %v11199_v19 = vld [vmem:[%s15358_s3 + $0x70] ss:$8 sps:$4 sm:$0xff]   ;;  %v11156_v20 = vld [vmem:[%s15356_s1 + $0x40c] ss:$16 sps:$4 sm:$0xff]  }
  0xda   : > { %3951 = vmatprep.subr.bf16.mxu0 %v11183_v58  ;;  %v11237_v52 = vld [vmem:[%s15358_s3 + $0xf4] ss:$8 sps:$4 sm:$0xff]  }
  0xdc   : > { %2978 = vmatpush1.bf16.msra.mxu1 %v11079_v6  ;;  %v11201_v6 = vld [vmem:[%s15358_s3 + $0x74] ss:$8 sps:$4 sm:$0xff]  }
  0xdd   : > { %2979 = vmatprep.subr.bf16.mxu1 %v11087_v21  ;;  %3952 = vmatpush1.bf16.msra.mxu0 %v11181_v55  ;;  %v11108_v21 = vld [vmem:[%s12099_s14 + $0x190] ss:$24 sps:$4 sm:$0xff]  }
  0xde   : > { %2831 = vmatmul.mubr.bf16.gmra.mrb[72].mxu1 %v11779_v13  ;;  %3953 = vmatprep.subr.bf16.mxu0 %v11186_v62  ;;  %v11208_v13 = vld [vmem:[%s15358_s3 + $0x90] ss:$8 sps:$4 sm:$0xff]   ;;  %v11799_v62 = vld [vmem:[%s12099_s14 + $0x274] ss:$24 sps:$4 sm:$0xff]  }
  0xdf   : > { %2638 = vmatmul.mubr.bf16.gmra.mrb[8].mxu0 %v11072_v22  ;;  %2840 = vmatprep.mubr.bf16.mxu1 %v11780_v26  ;;  %v11112_v22 = vld [vmem:[%s12099_s14 + $0x1c4] ss:$24 sps:$4 sm:$0xff]   ;;  %v11235_v55 = vld [vmem:[%s15358_s3 + $0xf0] ss:$8 sps:$4 sm:$0xff]  }
  0xe0   : > { %2647 = vmatprep.mubr.bf16.mxu0 %v11076_v23  ;;  %2980 = vmatpush1.bf16.msra.mxu1 %v11085_v11  ;;  %v11204_v23 = vld [vmem:[%s15358_s3 + $0x84] ss:$8 sps:$4 sm:$0xff]   ;;  %v11202_v11 = vld [vmem:[%s15358_s3 + $0x80] ss:$8 sps:$4 sm:$0xff]   ;;  %v11210_v26 = vld [vmem:[%s15358_s3 + $0x94] ss:$8 sps:$4 sm:$0xff]  }
  0xe1   : > { %2981 = vmatprep.subr.bf16.mxu1 %v11093_v24  ;;  %3954 = vmatpush1.bf16.msra.mxu0 %v11184_v0  ;;  %v11790_v24 = vld [vmem:[%s12099_s14 + $0x180] ss:$24 sps:$4 sm:$0xff]  }
  0xe2   : > { %3955 = vmatprep.subr.bf16.mxu0 %v11192_v8  ;;  %v11801_v8 = vld [vmem:[%s12099_s14 + $0x2a4] ss:$24 sps:$4 sm:$0xff]  }
  0xe4   : > { %2982 = vmatpush1.bf16.msra.mxu1 %v11091_v25  ;;  %v11791_v25 = vld [vmem:[%s12099_s14 + $0x1b4] ss:$24 sps:$4 sm:$0xff]  }
  0xe5   : > { %2983 = vmatprep.subr.bf16.mxu1 %v11099_v27  ;;  %3956 = vmatpush1.bf16.msra.mxu0 %v11190_v4  ;;  %v11114_v27 = vld [vmem:[%s12099_s14 + $0x1c0] ss:$24 sps:$4 sm:$0xff]  }
  0xe6   : > { %2841 = vmatmul.mubr.bf16.gmra.mrb[76].mxu1 %v11781_v32  ;;  %3957 = vmatprep.subr.bf16.mxu0 %v11195_v14  ;;  %v11217_v32 = vld [vmem:[%s15358_s3 + $0xb0] ss:$8 sps:$4 sm:$0xff]  }
  0xe7   : > { %2648 = vmatmul.mubr.bf16.gmra.mrb[12].mxu0 %v11078_v28  ;;  %2850 = vmatprep.mubr.bf16.mxu1 %v12244_v35  ;;  %v11117_v35 = vld [vmem:[%s15356_s1 + $0x32c] ss:$16 sps:$4 sm:$0xff]  }
  0xe8   : > { %2657 = vmatprep.mubr.bf16.mxu0 %v11082_v29  ;;  %2984 = vmatpush1.bf16.msra.mxu1 %v11097_v30  ;;  %v11118_v28 = vld [vmem:[%s12099_s14 + $0x1f4] ss:$24 sps:$4 sm:$0xff]   ;;  %v11211_v30 = vld [vmem:[%s15358_s3 + $0xa0] ss:$8 sps:$4 sm:$0xff]  }
  0xe9   : > { %2985 = vmatprep.subr.bf16.mxu1 %v11105_v31  ;;  %3958 = vmatpush1.bf16.msra.mxu0 %v11193_v16  ;;  %v11213_v29 = vld [vmem:[%s15358_s3 + $0xa4] ss:$8 sps:$4 sm:$0xff]   ;;  %v11792_v31 = vld [vmem:[%s12099_s14 + $0x1b0] ss:$24 sps:$4 sm:$0xff]  }
  0xea   : > { %3959 = vmatprep.subr.bf16.mxu0 %v11201_v6 }
  0xec   : > { %2986 = vmatpush1.bf16.msra.mxu1 %v11103_v33  ;;  %v11793_v33 = vld [vmem:[%s12099_s14 + $0x1e4] ss:$24 sps:$4 sm:$0xff]  }
  0xed   : > { %2987 = vmatprep.subr.bf16.mxu1 %v11111_v34  ;;  %3960 = vmatpush1.bf16.msra.mxu0 %v11199_v19  ;;  %v11219_v34 = vld [vmem:[%s15358_s3 + $0xb4] ss:$8 sps:$4 sm:$0xff]   ;;  %v11150_v19 = vld [vmem:[%s12099_s14 + $0x2e0] ss:$24 sps:$4 sm:$0xff]  }
  0xee   : > { %2851 = vmatmul.mubr.bf16.gmra.mrb[80].mxu1 %v11782_v41  ;;  %3961 = vmatprep.subr.bf16.mxu0 %v11204_v23  ;;  %v11795_v41 = vld [vmem:[%s12099_s14 + $0x214] ss:$24 sps:$4 sm:$0xff]  }
  0xef   : > { %2658 = vmatmul.mubr.bf16.gmra.mrb[16].mxu0 %v11084_v36  ;;  %2860 = vmatprep.mubr.bf16.mxu1 %v11783_v44  ;;  %v11120_v36 = vld [vmem:[%s12099_s14 + $0x1f0] ss:$24 sps:$4 sm:$0xff]   ;;  %v11805_v23 = vld [vmem:[%s12099_s14 + $0xc] ss:$24 sps:$4 sm:$0xff]  }
  0xf0   : > { %2667 = vmatprep.mubr.bf16.mxu0 %v11088_v37  ;;  %2988 = vmatpush1.bf16.msra.mxu1 %v11109_v38  ;;  %v11124_v37 = vld [vmem:[%s12099_s14 + $0x224] ss:$24 sps:$4 sm:$0xff]  }
  0xf1   : > { %2989 = vmatprep.subr.bf16.mxu1 %v11117_v35  ;;  %3962 = vmatpush1.bf16.msra.mxu0 %v11202_v11  ;;  %v11222_v38 = vld [vmem:[%s15358_s3 + $0xc4] ss:$8 sps:$4 sm:$0xff]   ;;  %v11794_v35 = vld [vmem:[%s12099_s14 + $0x1e0] ss:$24 sps:$4 sm:$0xff]  }
  0xf2   : > { %3963 = vmatprep.subr.bf16.mxu0 %v11210_v26 }
  0xf4   : > { %2990 = vmatpush1.bf16.msra.mxu1 %v11115_v42  ;;  %v11228_v42 = vld [vmem:[%s15358_s3 + $0xd4] ss:$8 sps:$4 sm:$0xff]  }
  0xf5   : > { %2991 = vmatprep.subr.bf16.mxu1 %v11123_v45  ;;  %3964 = vmatpush1.bf16.msra.mxu0 %v11208_v13  ;;  %v11130_v45 = vld [vmem:[%s12099_s14 + $0x254] ss:$24 sps:$4 sm:$0xff]  }
  0xf6   : > { %2861 = vmatmul.mubr.bf16.gmra.mrb[84].mxu1 %v11784_v53  ;;  %3965 = vmatprep.subr.bf16.mxu0 %v11213_v29  ;;  %v11797_v53 = vld [vmem:[%s12099_s14 + $0x244] ss:$24 sps:$4 sm:$0xff]   ;;  %v11806_v29 = vld [vmem:[%s12099_s14 + $0x8] ss:$24 sps:$4 sm:$0xff]  }
  0xf7   : > { %2668 = vmatmul.mubr.bf16.gmra.mrb[20].mxu0 %v11090_v47  ;;  %2870 = vmatprep.mubr.bf16.mxu1 %v11785_v56  ;;  %v11231_v47 = vld [vmem:[%s15358_s3 + $0xe4] ss:$8 sps:$4 sm:$0xff]  }
  0xf8   : > { %2677 = vmatprep.mubr.bf16.mxu0 %v11094_v48  ;;  %2992 = vmatpush1.bf16.msra.mxu1 %v11121_v49  ;;  %v11229_v49 = vld [vmem:[%s15358_s3 + $0xe0] ss:$8 sps:$4 sm:$0xff]  }
  0xf9   : > { %2993 = vmatprep.subr.bf16.mxu1 %v11129_v51  ;;  %3966 = vmatpush1.bf16.msra.mxu0 %v11211_v30  ;;  %v11796_v51 = vld [vmem:[%s12099_s14 + $0x210] ss:$24 sps:$4 sm:$0xff]   ;;  %v11162_v30 = vld [vmem:[%s15356_s1 + $0x44c] ss:$16 sps:$4 sm:$0xff]  }
  0xfa   : > { %3967 = vmatprep.subr.bf16.mxu0 %v11219_v34 }
  0xfc   : > { %2994 = vmatpush1.bf16.msra.mxu1 %v11127_v54  ;;  %v11132_v54 = vld [vmem:[%s12099_s14 + $0x250] ss:$24 sps:$4 sm:$0xff]  }
  0xfd   : > { %2995 = vmatprep.subr.bf16.mxu1 %v11135_v57  ;;  %3968 = vmatpush1.bf16.msra.mxu0 %v11217_v32  ;;  %v11136_v57 = vld [vmem:[%s12099_s14 + $0x284] ss:$24 sps:$4 sm:$0xff]  }
  0xfe   : > { %2871 = vmatmul.mubr.bf16.gmra.mrb[88].mxu1 %v11786_v1  ;;  %3969 = vmatprep.subr.bf16.mxu0 %v11222_v38  ;;  %v11142_v1 = vld [vmem:[%s12099_s14 + $0x2b4] ss:$24 sps:$4 sm:$0xff]  }
  0xff   : > { %2678 = vmatmul.mubr.bf16.gmra.mrb[24].mxu0 %v11096_v59  ;;  %2880 = vmatprep.mubr.bf16.mxu1 %v11787_v5 }
 0x100   : > { %2687 = vmatprep.mubr.bf16.mxu0 %v11100_v60  ;;  %2996 = vmatpush1.bf16.msra.mxu1 %v11133_v61  ;;  %v11798_v61 = vld [vmem:[%s12099_s14 + $0x240] ss:$24 sps:$4 sm:$0xff]  }
 0x101   : > { %2997 = vmatprep.subr.bf16.mxu1 %v11141_v63  ;;  %3970 = vmatpush1.bf16.msra.mxu0 %v11220_v39  ;;  %v11138_v63 = vld [vmem:[%s12099_s14 + $0x280] ss:$24 sps:$4 sm:$0xff]  }
 0x102   : > { %3971 = vmatprep.subr.bf16.mxu0 %v11228_v42  ;;  %v11808_v39 = vld [vmem:[%s12099_s14 + $0x38] ss:$24 sps:$4 sm:$0xff]  }
 0x104   : > { %2998 = vmatpush1.bf16.msra.mxu1 %v11139_v2 }
 0x105   : > { %2999 = vmatprep.subr.bf16.mxu1 %v11147_v7  ;;  %3972 = vmatpush1.bf16.msra.mxu0 %v11226_v40  ;;  %v11800_v7 = vld [vmem:[%s12099_s14 + $0x270] ss:$24 sps:$4 sm:$0xff]  }
 0x106   : > { %2881 = vmatmul.mubr.bf16.gmra.mrb[92].mxu1 %v11788_v17  ;;  %3973 = vmatprep.subr.bf16.mxu0 %v11231_v47  ;;  %v11802_v17 = vld [vmem:[%s12099_s14 + $0x2a0] ss:$24 sps:$4 sm:$0xff]  }
 0x107   : > { %2688 = vmatmul.mubr.bf16.gmra.mrb[28].mxu0 %v11102_v9  ;;  %2890 = vmatprep.mubr.bf16.mxu1 %v11789_v3  ;;  %v11144_v9 = vld [vmem:[%s12099_s14 + $0x2b0] ss:$24 sps:$4 sm:$0xff]  }
 0x108   : > { %2697 = vmatprep.mubr.bf16.mxu0 %v11106_v10  ;;  %3000 = vmatpush1.bf16.msra.mxu1 %v11145_v12  ;;  %v11148_v12 = vld [vmem:[%s12099_s14 + $0x2e4] ss:$24 sps:$4 sm:$0xff]   ;;  %v11163_v40 = vld [vmem:[%s15356_s1 + $0x468] ss:$16 sps:$4 sm:$0xff]  }
 0x109   : > { %3001 = vmatprep.subr.bf16.mxu1 %v11153_v15  ;;  %3974 = vmatpush1.bf16.msra.mxu0 %v11229_v49  ;;  %v11169_v47 = vld [vmem:[%s15356_s1 + $0x488] ss:$16 sps:$4 sm:$0xff]  }
 0x10a   : > { %3975 = vmatprep.subr.bf16.mxu0 %v11237_v52  ;;  %v11810_v52 = vld [vmem:[%s12099_s14 + $0x68] ss:$24 sps:$4 sm:$0xff]  }
 0x10c   : > { %3002 = vmatpush1.bf16.msra.mxu1 %v11151_v18  ;;  %v11803_v18 = vld [vmem:[%s12099_s14 + $0x2d4] ss:$24 sps:$4 sm:$0xff]  }
 0x10d   : > { %3164 = vmatprep.subr.bf16.mxu1 %v11156_v20  ;;  %3976 = vmatpush1.bf16.msra.mxu0 %v11235_v55  ;;  %v11189_v55 = vld [vmem:[%s15356_s1 + $0x4cc] ss:$16 sps:$4 sm:$0xff]  }
 0x10e   : > { %2891 = vmatmul.mubr.bf16.gmra.mrb[96].mxu1 %v11790_v24  ;;  %v11154_v24 = vld [vmem:[%s15356_s1 + $0x408] ss:$16 sps:$4 sm:$0xff]  }
 0x10f   : > { %2698 = vmatmul.mubr.bf16.gmra.mrb[32].mxu0 %v11108_v21  ;;  %2900 = vmatprep.mubr.bf16.mxu1 %v11791_v25  ;;  %v11159_v25 = vld [vmem:[%s15356_s1 + $0x42c] ss:$16 sps:$4 sm:$0xff]  }
 0x110   : > { %2707 = vmatprep.mubr.bf16.mxu0 %v11112_v22  ;;  %v11804_v22 = vld [vmem:[%s12099_s14 + $0x2d0] ss:$24 sps:$4 sm:$0xff]  }
 0x116   : > { %2901 = vmatmul.mubr.bf16.gmra.mrb[100].mxu1 %v11792_v31  ;;  %v11807_v31 = vld [vmem:[%s12099_s14 + $0x3c] ss:$24 sps:$4 sm:$0xff]  }
 0x117   : > { %2708 = vmatmul.mubr.bf16.gmra.mrb[36].mxu0 %v11114_v27  ;;  %2910 = vmatprep.mubr.bf16.mxu1 %v11793_v33  ;;  %v11160_v33 = vld [vmem:[%s15356_s1 + $0x448] ss:$16 sps:$4 sm:$0xff]  }
 0x118   : > { %2717 = vmatprep.mubr.bf16.mxu0 %v11118_v28  ;;  %v11157_v28 = vld [vmem:[%s15356_s1 + $0x428] ss:$16 sps:$4 sm:$0xff]  }
 0x11e   : > { %2911 = vmatmul.mubr.bf16.gmra.mrb[104].mxu1 %v11794_v35  ;;  %v11809_v35 = vld [vmem:[%s12099_s14 + $0x6c] ss:$24 sps:$4 sm:$0xff]  }
 0x11f   : > { %2718 = vmatmul.mubr.bf16.gmra.mrb[40].mxu0 %v11120_v36  ;;  %2920 = vmatprep.mubr.bf16.mxu1 %v11795_v41  ;;  %v11165_v36 = vld [vmem:[%s15356_s1 + $0x46c] ss:$16 sps:$4 sm:$0xff]  }
 0x120   : > { %2727 = vmatprep.mubr.bf16.mxu0 %v11124_v37  ;;  %v11171_v41 = vld [vmem:[%s15356_s1 + $0x48c] ss:$16 sps:$4 sm:$0xff]  }
 0x121   : > { %v12659_v44 = vpop.f32.mrb[0].mxu1 }
 0x122   : > { %v12662_v46 = vpop.f32.mrb[1].mxu1 }
 0x123   : > { %v12667_v48 = vpop.f32.mrb[2].mxu1 }
 0x124   : > { %v12672_v50 = vpop.f32.mrb[3].mxu1 }
 0x126   : > { %2921 = vmatmul.mubr.bf16.gmra.mrb[108].mxu1 %v11796_v51  ;;  %v11180_v51 = vld [vmem:[%s15356_s1 + $0x4ac] ss:$16 sps:$4 sm:$0xff]  }
 0x127   : > { %2728 = vmatmul.mubr.bf16.gmra.mrb[44].mxu0 %v11126_v43  ;;  %2930 = vmatprep.mubr.bf16.mxu1 %v11797_v53  ;;  %v11811_v53 = vld [vmem:[%s12099_s14 + $0x9c] ss:$24 sps:$4 sm:$0xff]  }
 0x128   : > { %2737 = vmatprep.mubr.bf16.mxu0 %v11130_v45 }
 0x129   : > { %v12683_v56 = vpop.f32.mrb[4].mxu1 }
 0x12a   : > { %v12686_v58 = vpop.f32.mrb[5].mxu1 }
 0x12b   : > { %v12688_v59 = vpop.f32.mrb[6].mxu1 }
 0x12c   : > { %v12690_v60 = vpop.f32.mrb[7].mxu1 }
 0x12e   : > { %2931 = vmatmul.mubr.bf16.gmra.mrb[112].mxu1 %v11798_v61 }
 0x12f   : > { %2738 = vmatmul.mubr.bf16.gmra.mrb[48].mxu0 %v11132_v54  ;;  %2940 = vmatprep.mubr.bf16.mxu1 %v11799_v62  ;;  %v11178_v54 = vld [vmem:[%s15356_s1 + $0x4a8] ss:$16 sps:$4 sm:$0xff]  }
 0x130   : > { %2747 = vmatprep.mubr.bf16.mxu0 %v11136_v57 }
 0x131   : > { %v12695_v0 = vpop.f32.mrb[8].mxu1 }
 0x132   : > { %v12698_v2 = vpop.f32.mrb[9].mxu1 }
 0x133   : > { %v12700_v4 = vpop.f32.mrb[10].mxu1 }
 0x134   : > { %v12702_v5 = vpop.f32.mrb[11].mxu1 }
 0x136   : > { %2941 = vmatmul.mubr.bf16.gmra.mrb[116].mxu1 %v11800_v7  ;;  %v11198_v7 = vld [vmem:[%s15356_s1 + $0x4ec] ss:$16 sps:$4 sm:$0xff]  }
 0x137   : > { %2748 = vmatmul.mubr.bf16.gmra.mrb[52].mxu0 %v11138_v63  ;;  %2950 = vmatprep.mubr.bf16.mxu1 %v11801_v8  ;;  %v11187_v63 = vld [vmem:[%s15356_s1 + $0x4c8] ss:$16 sps:$4 sm:$0xff]  }
 0x138   : > { %2757 = vmatprep.mubr.bf16.mxu0 %v11142_v1  ;;  %v11812_v8 = vld [vmem:[%s12099_s14 + $0x98] ss:$24 sps:$4 sm:$0xff]  }
 0x139   : > { %v12707_v10 = vpop.f32.mrb[12].mxu1 }
 0x13a   : > { %v12710_v14 = vpop.f32.mrb[13].mxu1 }
 0x13b   : > { %v12712_v15 = vpop.f32.mrb[14].mxu1 }
 0x13c   : > { %v12714_v16 = vpop.f32.mrb[15].mxu1 }
 0x13e   : > { %2951 = vmatmul.mubr.bf16.gmra.mrb[120].mxu1 %v11802_v17  ;;  %v11207_v17 = vld [vmem:[%s15356_s1 + $0x50c] ss:$16 sps:$4 sm:$0xff]  }
 0x13f   : > { %2758 = vmatmul.mubr.bf16.gmra.mrb[56].mxu0 %v11144_v9  ;;  %2960 = vmatprep.mubr.bf16.mxu1 %v11803_v18  ;;  %v11813_v9 = vld [vmem:[%s12099_s14 + $0xcc] ss:$24 sps:$4 sm:$0xff]  }
 0x140   : > { %2767 = vmatprep.mubr.bf16.mxu0 %v11148_v12  ;;  %v11196_v12 = vld [vmem:[%s15356_s1 + $0x4e8] ss:$16 sps:$4 sm:$0xff]  }
 0x141   : > { %v12719_v3 = vpop.f32.mrb[16].mxu1 }
 0x142   : > { %v12721_v20 = vpop.f32.mrb[17].mxu1 }
 0x143   : > { %v12723_v6 = vpop.f32.mrb[18].mxu1 }
 0x144   : > { %v12725_v21 = vpop.f32.mrb[19].mxu1 }
 0x146   : > { %2961 = vmatmul.mubr.bf16.gmra.mrb[124].mxu1 %v11804_v22 }
 0x147   : > { %2768 = vmatmul.mubr.bf16.gmra.mrb[60].mxu0 %v11150_v19  ;;  %3003 = vmatprep.mubr.bf16.mxu1 %v11805_v23  ;;  %v11205_v23 = vld [vmem:[%s15356_s1 + $0x508] ss:$16 sps:$4 sm:$0xff]  }
 0x149   : > { %v12729_v11 = vpop.f32.mrb[20].mxu1 }
 0x14a   : > { %v12734_v13 = vpop.f32.mrb[21].mxu1 }
 0x14b   : > { %v12739_v26 = vpop.f32.mrb[22].mxu1 }
 0x14c   : > { %v12741_v27 = vpop.f32.mrb[23].mxu1 }
 0x14e   : > { %3004 = vmatmul.mubr.bf16.vlgmr.msra.gmra.mrb[64].mxu1 %v11806_v29  ;;  %v11815_v29 = vld [vmem:[%s12099_s14 + $0xfc] ss:$24 sps:$4 sm:$0xff]  }
 0x14f   : > { %3165 = vmatpush1.bf16.msra.mxu1 %v11154_v24  ;;  %3013 = vmatprep.mubr.bf16.mxu1 %v11807_v31  ;;  %v11225_v31 = vld [vmem:[%s15356_s1 + $0x54c] ss:$16 sps:$4 sm:$0xff]  }
 0x150   : > { %3166 = vmatprep.subr.bf16.mxu1 %v11159_v25  ;;  %v11216_v25 = vld [vmem:[%s15356_s1 + $0x52c] ss:$16 sps:$4 sm:$0xff]  }
 0x151   : > { %v12751_v32 = vpop.f32.mrb[24].mxu1 }
 0x152   : > { %v12756_v34 = vpop.f32.mrb[25].mxu1 }
 0x153   : > { %v12761_v37 = vpop.f32.mrb[26].mxu1  ;;  %3167 = vmatpush1.bf16.msra.mxu1 %v11157_v28  ;;  %v11814_v28 = vld [vmem:[%s12099_s14 + $0xc8] ss:$24 sps:$4 sm:$0xff]  }
 0x154   : > { %v12763_v38 = vpop.f32.mrb[27].mxu1  ;;  %3168 = vmatprep.subr.bf16.mxu1 %v11162_v30  ;;  %v11214_v30 = vld [vmem:[%s15356_s1 + $0x528] ss:$16 sps:$4 sm:$0xff]  }
 0x156   : > { %3014 = vmatmul.mubr.bf16.gmra.mrb[68].mxu1 %v11808_v39 }
 0x157   : > { %3023 = vmatprep.mubr.bf16.mxu1 %v11809_v35  ;;  %3169 = vmatpush1.bf16.msra.mxu1 %v11160_v33  ;;  %v11223_v35 = vld [vmem:[%s15356_s1 + $0x548] ss:$16 sps:$4 sm:$0xff]  }
 0x158   : > { %3170 = vmatprep.subr.bf16.mxu1 %v11165_v36 }
 0x159   : > { %v12773_v42 = vpop.f32.mrb[28].mxu1 }
 0x15a   : > { %v12775_v43 = vpop.f32.mrb[29].mxu1 }
 0x15b   : > { %v12777_v45 = vpop.f32.mrb[30].mxu1  ;;  %3171 = vmatpush1.bf16.msra.mxu1 %v11163_v40 }
 0x15c   : > { %v12782_v49 = vpop.f32.mrb[31].mxu1  ;;  %3172 = vmatprep.subr.bf16.mxu1 %v11171_v41  ;;  %v11234_v41 = vld [vmem:[%s15356_s1 + $0x56c] ss:$16 sps:$4 sm:$0xff]  }
 0x15e   : > { %3024 = vmatmul.mubr.bf16.gmra.mrb[72].mxu1 %v11810_v52  ;;  %v11232_v52 = vld [vmem:[%s15356_s1 + $0x568] ss:$16 sps:$4 sm:$0xff]  }
 0x15f   : > { %3033 = vmatprep.mubr.bf16.mxu1 %v11811_v53  ;;  %3173 = vmatpush1.bf16.msra.mxu1 %v11169_v47  ;;  %v11816_v47 = vld [vmem:[%s12099_s14 + $0xf8] ss:$24 sps:$4 sm:$0xff]   ;;  %v11240_v53 = vld [vmem:[%s15356_s1 + $0x58c] ss:$16 sps:$4 sm:$0xff]  }
 0x160   : > { %3174 = vmatprep.subr.bf16.mxu1 %v11180_v51  ;;  %v11817_v51 = vld [vmem:[%s12099_s14 + $0x12c] ss:$24 sps:$4 sm:$0xff]  }
 0x161   : > { %v12795_v57 = vpop.f32.mrb[32].mxu1 }
 0x162   : > { %v12797_v61 = vpop.f32.mrb[33].mxu1 }
 0x163   : > { %v12799_v62 = vpop.f32.mrb[34].mxu1  ;;  %3175 = vmatpush1.bf16.msra.mxu1 %v11178_v54 }
 0x164   : > { %v12804_v1 = vpop.f32.mrb[35].mxu1  ;;  %3176 = vmatprep.subr.bf16.mxu1 %v11189_v55 }
 0x166   : > { %3034 = vmatmul.mubr.bf16.gmra.mrb[76].mxu1 %v11812_v8 }
 0x167   : > { %3043 = vmatprep.mubr.bf16.mxu1 %v11813_v9  ;;  %3177 = vmatpush1.bf16.msra.mxu1 %v11187_v63  ;;  %v11243_v9 = vld [vmem:[%s15356_s1 + $0x5ac] ss:$16 sps:$4 sm:$0xff]  }
 0x168   : > { %3178 = vmatprep.subr.bf16.mxu1 %v11198_v7  ;;  %v11238_v7 = vld [vmem:[%s15356_s1 + $0x588] ss:$16 sps:$4 sm:$0xff]  }
 0x169   : > { %v12817_v18 = vpop.f32.mrb[36].mxu1 }
 0x16a   : > { %v12819_v19 = vpop.f32.mrb[37].mxu1 }
 0x16b   : > { %v12821_v22 = vpop.f32.mrb[38].mxu1  ;;  %3179 = vmatpush1.bf16.msra.mxu1 %v11196_v12  ;;  %v11818_v12 = vld [vmem:[%s12099_s14 + $0x128] ss:$24 sps:$4 sm:$0xff]  }
 0x16c   : > { %v12826_v24 = vpop.f32.mrb[39].mxu1  ;;  %3180 = vmatprep.subr.bf16.mxu1 %v11207_v17  ;;  %v11819_v17 = vld [vmem:[%s12099_s14 + $0x15c] ss:$24 sps:$4 sm:$0xff]  }
 0x16e   : > { %3044 = vmatmul.mubr.bf16.gmra.mrb[80].mxu1 %v11814_v28 }
 0x16f   : > { %3053 = vmatprep.mubr.bf16.mxu1 %v11815_v29  ;;  %3181 = vmatpush1.bf16.msra.mxu1 %v11205_v23  ;;  %v11241_v23 = vld [vmem:[%s15356_s1 + $0x5a8] ss:$16 sps:$4 sm:$0xff]  }
 0x170   : > { %3182 = vmatprep.subr.bf16.mxu1 %v11216_v25  ;;  %v11246_v25 = vld [vmem:[%s15356_s1 + $0x5cc] ss:$16 sps:$4 sm:$0xff]  }
 0x171   : > { %v12839_v33 = vpop.f32.mrb[40].mxu1 }
 0x172   : > { %v12841_v36 = vpop.f32.mrb[41].mxu1 }
 0x173   : > { %v12843_v39 = vpop.f32.mrb[42].mxu1  ;;  %3183 = vmatpush1.bf16.msra.mxu1 %v11214_v30 }
 0x174   : > { %v12848_v40 = vpop.f32.mrb[43].mxu1  ;;  %3184 = vmatprep.subr.bf16.mxu1 %v11225_v31  ;;  %v11244_v31 = vld [vmem:[%s15356_s1 + $0x5c8] ss:$16 sps:$4 sm:$0xff]  }
 0x176   : > { %3054 = vmatmul.mubr.bf16.gmra.mrb[84].mxu1 %v11816_v47  ;;  %v11820_v47 = vld [vmem:[%s12099_s14 + $0x158] ss:$24 sps:$4 sm:$0xff]  }
 0x177   : > { %3063 = vmatprep.mubr.bf16.mxu1 %v11817_v51  ;;  %3185 = vmatpush1.bf16.msra.mxu1 %v11223_v35  ;;  %v11821_v51 = vld [vmem:[%s12099_s14 + $0x18c] ss:$24 sps:$4 sm:$0xff]  }
 0x178   : > { %3186 = vmatprep.subr.bf16.mxu1 %v11234_v41  ;;  %v11249_v41 = vld [vmem:[%s15356_s1 + $0x5ec] ss:$16 sps:$4 sm:$0xff]  }
 0x179   : > { %v12861_v54 = vpop.f32.mrb[44].mxu1 }
 0x17a   : > { %v12863_v55 = vpop.f32.mrb[45].mxu1 }
 0x17b   : > { %v12865_v63 = vpop.f32.mrb[46].mxu1  ;;  %3187 = vmatpush1.bf16.msra.mxu1 %v11232_v52  ;;  %v11247_v52 = vld [vmem:[%s15356_s1 + $0x5e8] ss:$16 sps:$4 sm:$0xff]  }
 0x17c   : > { %v12870_v8 = vpop.f32.mrb[47].mxu1  ;;  %3188 = vmatprep.subr.bf16.mxu1 %v11240_v53 }
 0x17d   : > { %15402 = vst [vmem:[#allocation2_spill] sm:$0xff] %v12870_v8 }
 0x17e   : > { %3064 = vmatmul.mubr.bf16.gmra.mrb[88].mxu1 %v11818_v12 }
 0x17f   : > { %3073 = vmatprep.mubr.bf16.mxu1 %v11819_v17  ;;  %3189 = vmatpush1.bf16.msra.mxu1 %v11238_v7  ;;  %v11822_v17 = vld [vmem:[%s12099_s14 + $0x188] ss:$24 sps:$4 sm:$0xff]  }
 0x180   : > { %3190 = vmatprep.subr.bf16.mxu1 %v11243_v9 }
 0x181   : > { %v12883_v28 = vpop.f32.mrb[48].mxu1 }
 0x182   : > { %15403 = vst [vmem:[#allocation3_spill] sm:$0xff] %v12883_v28  ;;  %v12885_v29 = vpop.f32.mrb[49].mxu1  ;;  %v11828_v28 = vld [vmem:[%s12099_s14 + $0x218] ss:$24 sps:$4 sm:$0xff]  }
 0x183   : > { %15404 = vst [vmem:[#allocation4_spill] sm:$0xff] %v12885_v29  ;;  %v12887_v30 = vpop.f32.mrb[50].mxu1  ;;  %3191 = vmatpush1.bf16.msra.mxu1 %v11241_v23  ;;  %v11823_v23 = vld [vmem:[%s12099_s14 + $0x1bc] ss:$24 sps:$4 sm:$0xff]  }
 0x184   : > { %15405 = vst [vmem:[#allocation5_spill] sm:$0xff] %v12887_v30  ;;  %v12892_v35 = vpop.f32.mrb[51].mxu1  ;;  %3192 = vmatprep.subr.bf16.mxu1 %v11246_v25  ;;  %v739_v25 = vlaneseq }
 0x185   : > { %15406 = vst [vmem:[#allocation6_spill] sm:$0xff] %v12892_v35 }
 0x186   : > { %3074 = vmatmul.mubr.bf16.gmra.mrb[92].mxu1 %v11820_v47 }
 0x187   : > { %3083 = vmatprep.mubr.bf16.mxu1 %v11821_v51  ;;  %3193 = vmatpush1.bf16.msra.mxu1 %v11244_v31  ;;  %v12918_v51 = vshrl.u32 %v739_v25, 7 }
 0x188   : > { %3194 = vmatprep.subr.bf16.mxu1 %v11249_v41 }
 0x189   : > { %v12902_v53 = vpop.f32.mrb[52].mxu1  ;;  %15414 = vst [vmem:[#allocation14_spill] sm:$0xff] %v12918_v51 }
 0x18a   : > { %15407 = vst [vmem:[#allocation7_spill] sm:$0xff] %v12902_v53  ;;  %v12904_v7 = vpop.f32.mrb[53].mxu1 }
 0x18b   : > { %15408 = vst [vmem:[#allocation8_spill] sm:$0xff] %v12904_v7  ;;  %v12906_v9 = vpop.f32.mrb[54].mxu1  ;;  %3195 = vmatpush1.bf16.msra.mxu1 %v11247_v52  ;;  %v11824_v52 = vld [vmem:[%s12099_s14 + $0x1b8] ss:$24 sps:$4 sm:$0xff]  }
 0x18c   : > { %15409 = vst [vmem:[#allocation9_spill] sm:$0xff] %v12906_v9  ;;  %v12908_v12 = vpop.f32.mrb[55].mxu1  ;;  %v11826_v9 = vld [vmem:[%s12099_s14 + $0x1e8] ss:$24 sps:$4 sm:$0xff]  }
 0x18d   : > { %15410 = vst [vmem:[#allocation10_spill] sm:$0xff] %v12908_v12  ;;  %v11825_v12 = vld [vmem:[%s12099_s14 + $0x1ec] ss:$24 sps:$4 sm:$0xff]  }
 0x18e   : > { %3084 = vmatmul.mubr.bf16.gmra.mrb[96].mxu1 %v11822_v17  ;;  %v12925_v17 = vsub.s32 0, %v12918_v51 }
 0x18f   : > { %3093 = vmatprep.mubr.bf16.mxu1 %v11823_v23  ;;  %v12930_v23 = vld [vmem:[%s15357_s2] sm:$0xf] }
 0x190   : > { %15416 = vst [vmem:[#allocation16_spill] sm:$0xff] %v12925_v17  ;;  %15417 = vst [vmem:[#allocation17_spill] sm:$0xff] %v12930_v23 }
 0x191   : > { %v12912_v31 = vpop.f32.mrb[56].mxu1 }
 0x192   : > { %15411 = vst [vmem:[#allocation11_spill] sm:$0xff] %v12912_v31  ;;  %v12914_v47 = vpop.f32.mrb[57].mxu1 }
 0x193   : > { %15412 = vst [vmem:[#allocation12_spill] sm:$0xff] %v12914_v47  ;;  %v12916_v41 = vpop.f32.mrb[58].mxu1 }
 0x194   : > { %15413 = vst [vmem:[#allocation13_spill] sm:$0xff] %v12916_v41  ;;  %v12920_v7 = vpop.f32.mrb[59].mxu1  ;;  %v12933_v41 = vsub.s32 1, %v12918_v51  ;;  %v11827_v51 = vld [vmem:[%s12099_s14 + $0x21c] ss:$24 sps:$4 sm:$0xff]  }
 0x195   : > { %15415 = vst [vmem:[#allocation15_spill] sm:$0xff] %v12920_v7 }
 0x196   : > { %3094 = vmatmul.mubr.bf16.gmra.mrb[100].mxu1 %v11824_v52  ;;  %15418 = vst [vmem:[#allocation18_spill] sm:$0xff] %v12933_v41  ;;  %v12949_v31 = vrot.slane %v12930_v23, %v12933_v41 }
 0x197   : > { %3103 = vmatprep.mubr.bf16.mxu1 %v11825_v12  ;;  %v12943_v12 = vrot.slane %v12930_v23, %v12925_v17 }
 0x198   : > { %v2240_v41 = vadd.f32 %v12672_v50, %v12949_v31 }
 0x199   : > { %v12935_v25 = vpop.f32.mrb[60].mxu1  ;;  %v2238_v17 = vadd.f32 %v12667_v48, %v12943_v12  ;;  %v2244_v50 = vadd.f32 %v12683_v56, %v12943_v12  ;;  %v2250_v56 = vadd.f32 %v12690_v60, %v12949_v31  ;;  %v11255_v60 = vld [vmem:[%s15358_s3 + $0x114] ss:$8 sps:$4 sm:$0xff]  }
 0x19a   : > { %15419 = vst [vmem:[#allocation19_spill] sm:$0xff] %v12935_v25  ;;  %v12937_v47 = vpop.f32.mrb[61].mxu1 }
 0x19b   : > { %15420 = vst [vmem:[#allocation20_spill] sm:$0xff] %v12937_v47  ;;  %v12939_v7 = vpop.f32.mrb[62].mxu1  ;;  %v2234_v47 = vadd.f32 %v12659_v44, %v12943_v12 }
 0x19c   : > { %15421 = vst [vmem:[#allocation21_spill] sm:$0xff] %v12939_v7  ;;  %v12945_v52 = vpop.f32.mrb[63].mxu1  ;;  %v2236_v7 = vadd.f32 %v12662_v46, %v12949_v31  ;;  %v11252_v46 = vld [vmem:[%s15358_s3 + $0x104] ss:$8 sps:$4 sm:$0xff]  }
 0x19d   : > { %15422 = vst [vmem:[#allocation22_spill] sm:$0xff] %v12945_v52  ;;  %4138 = vmatprep.subr.bf16.mxu0 %v11252_v46 }
 0x19e   : > { %3104 = vmatmul.mubr.bf16.gmra.mrb[104].mxu1 %v11826_v9 }
 0x19f   : > { %3113 = vmatprep.mubr.bf16.mxu1 %v11827_v51 }
 0x1a2   : > { %v2619_v25 = vpop.f32.mrb[0].mxu0 }
 0x1a3   : > { %v9865_v52 = vadd.f32 %v2619_v25, %v2234_v47  ;;  %v2621_v53 = vpop.f32.mrb[1].mxu0  ;;  %v11829_v47 = vld [vmem:[%s12099_s14 + $0x24c] ss:$24 sps:$4 sm:$0xff]  }
 0x1a4   : > { %v9867_v9 = vadd.f32 %v2621_v53, %v2236_v7  ;;  %v2623_v23 = vpop.f32.mrb[2].mxu0  ;;  %v2246_v7 = vadd.f32 %v12686_v58, %v12949_v31 }
 0x1a5   : > { %v9869_v35 = vadd.f32 %v2623_v23, %v2238_v17  ;;  %v2625_v51 = vpop.f32.mrb[3].mxu0  ;;  %v3357_v29 = vmax.f32 %v9865_v52, 0.0 }
 0x1a6   : > { %v9871_v30 = vadd.f32 %v2625_v51, %v2240_v41  ;;  %3114 = vmatmul.mubr.bf16.gmra.mrb[108].mxu1 %v11828_v28  ;;  %v3358_v48 = vmax.f32 %v9867_v9, 0.0  ;;  %v11250_v28 = vld [vmem:[%s15358_s3 + $0x100] ss:$8 sps:$4 sm:$0xff]  }
 0x1a7   : > { %v3361_v44 = vmax.f32 %v9869_v35, 0.0  ;;  %3123 = vmatprep.mubr.bf16.mxu1 %v11829_v47  ;;  %v11830_v9 = vld [vmem:[%s12099_s14 + $0x248] ss:$24 sps:$4 sm:$0xff]   ;;  %v11831_v47 = vld [vmem:[%s12099_s14 + $0x27c] ss:$24 sps:$4 sm:$0xff]  }
 0x1a8   : > { %v3362_v8 = vmax.f32 %v9871_v30, 0.0  ;;  %v2248_v30 = vadd.f32 %v12688_v59, %v12943_v12  ;;  %v11253_v59 = vld [vmem:[%s15358_s3 + $0x110] ss:$8 sps:$4 sm:$0xff]  }
 0x1a9   : > { %v3485_v53 = vpack.c.bf16 %v3361_v44, %v3357_v29 }
 0x1aa   : > { %v2629_v35 = vpop.f32.mrb[4].mxu0  ;;  %v3486_v41 = vpack.c.bf16 %v3362_v8, %v3358_v48 }
 0x1ab   : > { %v9873_v17 = vadd.f32 %v2629_v35, %v2244_v50  ;;  %v2631_v23 = vpop.f32.mrb[5].mxu0  ;;  %v2254_v50 = vadd.f32 %v12695_v0, %v12943_v12 }
 0x1ac   : > { %v9875_v29 = vadd.f32 %v2631_v23, %v2246_v7  ;;  %v2633_v25 = vpop.f32.mrb[6].mxu0  ;;  %3977 = vmatprep.mubr.bf16.mxu0 %v3486_v41  ;;  %v2256_v7 = vadd.f32 %v12698_v2, %v12949_v31  ;;  %v2260_v23 = vadd.f32 %v12702_v5, %v12949_v31  ;;  %v11832_v2 = vld [vmem:[%s12099_s14 + $0x278] ss:$24 sps:$4 sm:$0xff]   ;;  %v11258_v5 = vld [vmem:[%s15358_s3 + $0x124] ss:$8 sps:$4 sm:$0xff]  }
 0x1ad   : > { %v9877_v58 = vadd.f32 %v2633_v25, %v2248_v30  ;;  %v2635_v52 = vpop.f32.mrb[7].mxu0  ;;  %3978 = vmatmul.mubr.bf16.vlgmr.msra.gmra.mrb[64].mxu0 %v3485_v53  ;;  %v3365_v51 = vmax.f32 %v9873_v17, 0.0 }
 0x1ae   : > { %v9879_v8 = vadd.f32 %v2635_v52, %v2250_v56  ;;  %4139 = vmatpush1.bf16.msra.mxu0 %v11250_v28  ;;  %3124 = vmatmul.mubr.bf16.gmra.mrb[112].mxu1 %v11830_v9  ;;  %v3366_v46 = vmax.f32 %v9875_v29, 0.0  ;;  %v2258_v28 = vadd.f32 %v12700_v4, %v12943_v12  ;;  %v11256_v4 = vld [vmem:[%s15358_s3 + $0x120] ss:$8 sps:$4 sm:$0xff]  }
 0x1af   : > { %v3369_v44 = vmax.f32 %v9877_v58, 0.0  ;;  %3133 = vmatprep.mubr.bf16.mxu1 %v11831_v47  ;;  %4140 = vmatprep.subr.bf16.mxu0 %v11255_v60 }
 0x1b0   : > { %v3370_v48 = vmax.f32 %v9879_v8, 0.0 }
 0x1b1   : > { %v3489_v53 = vpack.c.bf16 %v3369_v44, %v3365_v51  ;;  %v11833_v44 = vld [vmem:[%s12099_s14 + $0x2ac] ss:$24 sps:$4 sm:$0xff]  }
 0x1b2   : > { %v2639_v35 = vpop.f32.mrb[8].mxu0  ;;  %v3490_v41 = vpack.c.bf16 %v3370_v48, %v3366_v46  ;;  %4141 = vmatpush1.bf16.msra.mxu0 %v11253_v59  ;;  %v2264_v59 = vadd.f32 %v12707_v10, %v12943_v12  ;;  %v2266_v46 = vadd.f32 %v12710_v14, %v12949_v31  ;;  %v11834_v14 = vld [vmem:[%s12099_s14 + $0x2a8] ss:$24 sps:$4 sm:$0xff]  }
 0x1b3   : > { %v9881_v30 = vadd.f32 %v2639_v35, %v2254_v50  ;;  %v2641_v17 = vpop.f32.mrb[9].mxu0  ;;  %4142 = vmatprep.subr.bf16.mxu0 %v11258_v5  ;;  %v2268_v50 = vadd.f32 %v12712_v15, %v12943_v12  ;;  %v2270_v35 = vadd.f32 %v12714_v16, %v12949_v31  ;;  %v11259_v15 = vld [vmem:[%s15358_s3 + $0x130] ss:$8 sps:$4 sm:$0xff]   ;;  %v11261_v16 = vld [vmem:[%s15358_s3 + $0x134] ss:$8 sps:$4 sm:$0xff]   ;;  %v2278_v5 = vadd.f32 %v12723_v6, %v12943_v12 }
 0x1b4   : > { %v9883_v56 = vadd.f32 %v2641_v17, %v2256_v7  ;;  %v2643_v0 = vpop.f32.mrb[10].mxu0  ;;  %3987 = vmatprep.mubr.bf16.mxu0 %v3490_v41  ;;  %v11262_v6 = vld [vmem:[%s15358_s3 + $0x140] ss:$8 sps:$4 sm:$0xff]  }
 0x1b5   : > { %v9885_v29 = vadd.f32 %v2643_v0, %v2258_v28  ;;  %v2645_v25 = vpop.f32.mrb[11].mxu0  ;;  %3988 = vmatmul.mubr.bf16.gmra.mrb[68].mxu0 %v3489_v53  ;;  %v3373_v52 = vmax.f32 %v9881_v30, 0.0 }
 0x1b6   : > { %v9887_v58 = vadd.f32 %v2645_v25, %v2260_v23  ;;  %3134 = vmatmul.mubr.bf16.gmra.mrb[116].mxu1 %v11832_v2  ;;  %v3374_v9 = vmax.f32 %v9883_v56, 0.0  ;;  %4143 = vmatpush1.bf16.msra.mxu0 %v11256_v4  ;;  %v11835_v25 = vld [vmem:[%s12099_s14 + $0x2dc] ss:$24 sps:$4 sm:$0xff]  }
 0x1b7   : > { %v3377_v8 = vmax.f32 %v9885_v29, 0.0  ;;  %3143 = vmatprep.mubr.bf16.mxu1 %v11833_v44  ;;  %4144 = vmatprep.subr.bf16.mxu0 %v11261_v16  ;;  %v2280_v44 = vadd.f32 %v12725_v21, %v12949_v31  ;;  %v11264_v21 = vld [vmem:[%s15358_s3 + $0x144] ss:$8 sps:$4 sm:$0xff]  }
 0x1b8   : > { %v3378_v51 = vmax.f32 %v9887_v58, 0.0  ;;  %v2274_v58 = vadd.f32 %v12719_v3, %v12943_v12 }
 0x1b9   : > { %v3493_v60 = vpack.c.bf16 %v3377_v8, %v3373_v52  ;;  %v2276_v52 = vadd.f32 %v12721_v20, %v12949_v31  ;;  %v11836_v20 = vld [vmem:[%s12099_s14 + $0x2d8] ss:$24 sps:$4 sm:$0xff]  }
 0x1ba   : > { %v2649_v48 = vpop.f32.mrb[12].mxu0  ;;  %v3494_v47 = vpack.c.bf16 %v3378_v51, %v3374_v9  ;;  %4145 = vmatpush1.bf16.msra.mxu0 %v11259_v15 }
 0x1bb   : > { %v9889_v53 = vadd.f32 %v2649_v48, %v2264_v59  ;;  %v2651_v7 = vpop.f32.mrb[13].mxu0  ;;  %4146 = vmatprep.subr.bf16.mxu0 %v11264_v21 }
 0x1bc   : > { %v9891_v41 = vadd.f32 %v2651_v7, %v2266_v46  ;;  %v2653_v10 = vpop.f32.mrb[14].mxu0  ;;  %3997 = vmatprep.mubr.bf16.mxu0 %v3494_v47 }
 0x1bd   : > { %v9893_v28 = vadd.f32 %v2653_v10, %v2268_v50  ;;  %v2655_v30 = vpop.f32.mrb[15].mxu0  ;;  %3998 = vmatmul.mubr.bf16.gmra.mrb[72].mxu0 %v3493_v60  ;;  %v3381_v23 = vmax.f32 %v9889_v53, 0.0  ;;  %v2284_v10 = vadd.f32 %v12729_v11, %v12943_v12  ;;  %v11270_v11 = vld [vmem:[%s15358_s3 + $0x164] ss:$8 sps:$4 sm:$0xff]  }
 0x1be   : > { %v9895_v17 = vadd.f32 %v2655_v30, %v2270_v35  ;;  %3144 = vmatmul.mubr.bf16.gmra.mrb[120].mxu1 %v11834_v14  ;;  %v3382_v0 = vmax.f32 %v9891_v41, 0.0  ;;  %v11837_v35 = vld [vmem:[%s12099_s14 + $0x14] ss:$24 sps:$4 sm:$0xff]   ;;  %v2286_v30 = vadd.f32 %v12734_v13, %v12949_v31  ;;  %4147 = vmatpush1.bf16.msra.mxu0 %v11262_v6  ;;  %v2290_v13 = vadd.f32 %v12741_v27, %v12949_v31 }
 0x1bf   : > { %v3385_v56 = vmax.f32 %v9893_v28, 0.0  ;;  %3153 = vmatprep.mubr.bf16.mxu1 %v11835_v25  ;;  %v11267_v41 = vld [vmem:[%s15358_s3 + $0x154] ss:$8 sps:$4 sm:$0xff]  }
 0x1c0   : > { %v3386_v29 = vmax.f32 %v9895_v17, 0.0  ;;  %4148 = vmatprep.subr.bf16.mxu0 %v11267_v41  ;;  %v11273_v27 = vld [vmem:[%s15358_s3 + $0x174] ss:$8 sps:$4 sm:$0xff]   ;;  %v11840_v41 = vld [vmem:[%s12099_s14 + $0x40] ss:$24 sps:$4 sm:$0xff]  }
 0x1c1   : > { %v3497_v2 = vpack.c.bf16 %v3385_v56, %v3381_v23  ;;  %v11265_v23 = vld [vmem:[%s15358_s3 + $0x150] ss:$8 sps:$4 sm:$0xff]   ;;  %v2288_v56 = vadd.f32 %v12739_v26, %v12943_v12  ;;  %v11268_v26 = vld [vmem:[%s15358_s3 + $0x160] ss:$8 sps:$4 sm:$0xff]  }
 0x1c2   : > { %v2659_v8 = vpop.f32.mrb[16].mxu0  ;;  %v3498_v4 = vpack.c.bf16 %v3386_v29, %v3382_v0  ;;  %4149 = vmatpush1.bf16.msra.mxu0 %v11265_v23  ;;  %v2304_v23 = vadd.f32 %v12773_v42, %v12943_v12  ;;  %v11282_v42 = vld [vmem:[%s15358_s3 + $0x1a4] ss:$8 sps:$4 sm:$0xff]  }
 0x1c3   : > { %v9897_v9 = vadd.f32 %v2659_v8, %v2274_v58  ;;  %v2661_v51 = vpop.f32.mrb[17].mxu0  ;;  %4150 = vmatprep.subr.bf16.mxu0 %v11270_v11 }
 0x1c4   : > { %v9899_v59 = vadd.f32 %v2661_v51, %v2276_v52  ;;  %v2663_v3 = vpop.f32.mrb[18].mxu0  ;;  %4007 = vmatprep.mubr.bf16.mxu0 %v3498_v4  ;;  %v11838_v52 = vld [vmem:[%s12099_s14 + $0x10] ss:$24 sps:$4 sm:$0xff]   ;;  %v11839_v51 = vld [vmem:[%s12099_s14 + $0x44] ss:$24 sps:$4 sm:$0xff]  }
 0x1c5   : > { %v9901_v60 = vadd.f32 %v2663_v3, %v2278_v5  ;;  %v2665_v46 = vpop.f32.mrb[19].mxu0  ;;  %4008 = vmatmul.mubr.bf16.gmra.mrb[76].mxu0 %v3497_v2  ;;  %v3389_v47 = vmax.f32 %v9897_v9, 0.0  ;;  %v2296_v3 = vadd.f32 %v12756_v34, %v12949_v31  ;;  %v2300_v34 = vadd.f32 %v12763_v38, %v12949_v31  ;;  %v11279_v38 = vld [vmem:[%s15358_s3 + $0x194] ss:$8 sps:$4 sm:$0xff]  }
 0x1c6   : > { %v9903_v48 = vadd.f32 %v2665_v46, %v2280_v44  ;;  %3154 = vmatmul.mubr.bf16.gmra.mrb[124].mxu1 %v11836_v20  ;;  %v3390_v53 = vmax.f32 %v9899_v59, 0.0  ;;  %v2294_v44 = vadd.f32 %v12751_v32, %v12943_v12  ;;  %4151 = vmatpush1.bf16.msra.mxu0 %v11268_v26  ;;  %v2298_v20 = vadd.f32 %v12761_v37, %v12943_v12  ;;  %v11276_v32 = vld [vmem:[%s15358_s3 + $0x184] ss:$8 sps:$4 sm:$0xff]   ;;  %v11274_v37 = vld [vmem:[%s15358_s3 + $0x180] ss:$8 sps:$4 sm:$0xff]  }
 0x1c7   : > { %v3393_v50 = vmax.f32 %v9901_v60, 0.0  ;;  %3196 = vmatprep.mubr.bf16.mxu1 %v11837_v35  ;;  %4152 = vmatprep.subr.bf16.mxu0 %v11273_v27 }
 0x1c8   : > { %v3394_v7 = vmax.f32 %v9903_v48, 0.0  ;;  %v11271_v48 = vld [vmem:[%s15358_s3 + $0x170] ss:$8 sps:$4 sm:$0xff]  }
 0x1c9   : > { %v3501_v28 = vpack.c.bf16 %v3393_v50, %v3389_v47 }
 0x1ca   : > { %v2669_v17 = vpop.f32.mrb[20].mxu0  ;;  %v3502_v14 = vpack.c.bf16 %v3394_v7, %v3390_v53  ;;  %4153 = vmatpush1.bf16.msra.mxu0 %v11271_v48 }
 0x1cb   : > { %v9905_v15 = vadd.f32 %v2669_v17, %v2284_v10  ;;  %v2671_v16 = vpop.f32.mrb[21].mxu0  ;;  %4154 = vmatprep.subr.bf16.mxu0 %v11276_v32 }
 0x1cc   : > { %v9907_v0 = vadd.f32 %v2671_v16, %v2286_v30  ;;  %v2673_v29 = vpop.f32.mrb[22].mxu0  ;;  %4017 = vmatprep.mubr.bf16.mxu0 %v3502_v14  ;;  %v11841_v14 = vld [vmem:[%s12099_s14 + $0x74] ss:$24 sps:$4 sm:$0xff]  }
 0x1cd   : > { %v9909_v25 = vadd.f32 %v2673_v29, %v2288_v56  ;;  %v2675_v58 = vpop.f32.mrb[23].mxu0  ;;  %4018 = vmatmul.mubr.bf16.gmra.mrb[80].mxu0 %v3501_v28  ;;  %v3397_v8 = vmax.f32 %v9905_v15, 0.0  ;;  %v2306_v15 = vadd.f32 %v12775_v43, %v12949_v31  ;;  %v2310_v43 = vadd.f32 %v12782_v49, %v12949_v31  ;;  %v11285_v49 = vld [vmem:[%s15358_s3 + $0x1b4] ss:$8 sps:$4 sm:$0xff]  }
 0x1ce   : > { %v9911_v2 = vadd.f32 %v2675_v58, %v2290_v13  ;;  %3197 = vmatmul.mubr.bf16.vlgmr.msra.gmra.mrb[64].mxu1 %v11838_v52  ;;  %v3398_v5 = vmax.f32 %v9907_v0, 0.0  ;;  %4155 = vmatpush1.bf16.msra.mxu0 %v11274_v37  ;;  %v11277_v13 = vld [vmem:[%s15358_s3 + $0x190] ss:$8 sps:$4 sm:$0xff]   ;;  %v2308_v0 = vadd.f32 %v12777_v45, %v12943_v12  ;;  %v11280_v45 = vld [vmem:[%s15358_s3 + $0x1a0] ss:$8 sps:$4 sm:$0xff]  }
 0x1cf   : > { %v3401_v4 = vmax.f32 %v9909_v25, 0.0  ;;  %3206 = vmatprep.mubr.bf16.mxu1 %v11839_v51  ;;  %4156 = vmatprep.subr.bf16.mxu0 %v11279_v38  ;;  %v11845_v38 = vld [vmem:[%s12099_s14 + $0xd4] ss:$24 sps:$4 sm:$0xff]  }
 0x1d0   : > { %v3402_v9 = vmax.f32 %v9911_v2, 0.0 }
 0x1d1   : > { %v3505_v59 = vpack.c.bf16 %v3401_v4, %v3397_v8  ;;  %v11842_v4 = vld [vmem:[%s12099_s14 + $0x70] ss:$24 sps:$4 sm:$0xff]  }
 0x1d2   : > { %v2679_v60 = vpop.f32.mrb[24].mxu0  ;;  %v3506_v46 = vpack.c.bf16 %v3402_v9, %v3398_v5  ;;  %4157 = vmatpush1.bf16.msra.mxu0 %v11277_v13 }
 0x1d3   : > { %v9913_v47 = vadd.f32 %v2679_v60, %v2294_v44  ;;  %v2681_v50 = vpop.f32.mrb[25].mxu0  ;;  %4158 = vmatprep.subr.bf16.mxu0 %v11282_v42  ;;  %v11843_v44 = vld [vmem:[%s12099_s14 + $0xa4] ss:$24 sps:$4 sm:$0xff]   ;;  %v2316_v60 = vadd.f32 %v12797_v61, %v12949_v31  ;;  %v2320_v61 = vadd.f32 %v12804_v1, %v12949_v31 }
 0x1d4   : > { %v9915_v6 = vadd.f32 %v2681_v50, %v2296_v3  ;;  %v2683_v21 = vpop.f32.mrb[26].mxu0  ;;  %4027 = vmatprep.mubr.bf16.mxu0 %v3506_v46  ;;  %v11291_v1 = vld [vmem:[%s15358_s3 + $0x1d4] ss:$8 sps:$4 sm:$0xff]  }
 0x1d5   : > { %v9917_v53 = vadd.f32 %v2683_v21, %v2298_v20  ;;  %v2685_v7 = vpop.f32.mrb[27].mxu0  ;;  %4028 = vmatmul.mubr.bf16.gmra.mrb[84].mxu0 %v3505_v59  ;;  %v3405_v10 = vmax.f32 %v9913_v47, 0.0  ;;  %v2314_v59 = vadd.f32 %v12795_v57, %v12943_v12  ;;  %v11283_v20 = vld [vmem:[%s15358_s3 + $0x1b0] ss:$8 sps:$4 sm:$0xff]   ;;  %v2318_v47 = vadd.f32 %v12799_v62, %v12943_v12  ;;  %v11288_v57 = vld [vmem:[%s15358_s3 + $0x1c4] ss:$8 sps:$4 sm:$0xff]  }
 0x1d6   : > { %v9919_v35 = vadd.f32 %v2685_v7, %v2300_v34  ;;  %3207 = vmatmul.mubr.bf16.gmra.mrb[68].mxu1 %v11840_v41  ;;  %v3406_v30 = vmax.f32 %v9915_v6, 0.0  ;;  %4159 = vmatpush1.bf16.msra.mxu0 %v11280_v45  ;;  %v11286_v62 = vld [vmem:[%s15358_s3 + $0x1c0] ss:$8 sps:$4 sm:$0xff]   ;;  %v2334_v45 = vadd.f32 %v12839_v33, %v12943_v12 }
 0x1d7   : > { %v3409_v28 = vmax.f32 %v9917_v53, 0.0  ;;  %3216 = vmatprep.mubr.bf16.mxu1 %v11841_v14  ;;  %4160 = vmatprep.subr.bf16.mxu0 %v11285_v49  ;;  %v2326_v14 = vadd.f32 %v12819_v19, %v12949_v31  ;;  %v2330_v19 = vadd.f32 %v12826_v24, %v12949_v31 }
 0x1d8   : > { %v3410_v17 = vmax.f32 %v9919_v35, 0.0  ;;  %v11844_v35 = vld [vmem:[%s12099_s14 + $0xa0] ss:$24 sps:$4 sm:$0xff]  }
 0x1d9   : > { %v3509_v56 = vpack.c.bf16 %v3409_v28, %v3405_v10 }
 0x1da   : > { %v2689_v16 = vpop.f32.mrb[28].mxu0  ;;  %v3510_v11 = vpack.c.bf16 %v3410_v17, %v3406_v30  ;;  %4161 = vmatpush1.bf16.msra.mxu0 %v11283_v20  ;;  %v2324_v30 = vadd.f32 %v12817_v18, %v12943_v12  ;;  %v11294_v18 = vld [vmem:[%s15358_s3 + $0x1e4] ss:$8 sps:$4 sm:$0xff]  }
 0x1db   : > { %v9921_v29 = vadd.f32 %v2689_v16, %v2304_v23  ;;  %v2691_v25 = vpop.f32.mrb[29].mxu0  ;;  %4162 = vmatprep.subr.bf16.mxu0 %v11288_v57  ;;  %v2328_v16 = vadd.f32 %v12821_v22, %v12943_v12  ;;  %v11292_v22 = vld [vmem:[%s15358_s3 + $0x1e0] ss:$8 sps:$4 sm:$0xff]   ;;  %v2344_v57 = vadd.f32 %v12861_v54, %v12943_v12 }
 0x1dc   : > { %v9923_v58 = vadd.f32 %v2691_v25, %v2306_v15  ;;  %v2693_v2 = vpop.f32.mrb[30].mxu0  ;;  %4037 = vmatprep.mubr.bf16.mxu0 %v3510_v11  ;;  %v11289_v15 = vld [vmem:[%s15358_s3 + $0x1d0] ss:$8 sps:$4 sm:$0xff]  }
 0x1dd   : > { %v9925_v26 = vadd.f32 %v2693_v2, %v2308_v0  ;;  %v2695_v52 = vpop.f32.mrb[31].mxu0  ;;  %4038 = vmatmul.mubr.bf16.gmra.mrb[88].mxu0 %v3509_v56  ;;  %v3413_v27 = vmax.f32 %v9921_v29, 0.0 }
 0x1de   : > { %v9927_v8 = vadd.f32 %v2695_v52, %v2310_v43  ;;  %3217 = vmatmul.mubr.bf16.gmra.mrb[72].mxu1 %v11842_v4  ;;  %v3414_v9 = vmax.f32 %v9923_v58, 0.0  ;;  %4163 = vmatpush1.bf16.msra.mxu0 %v11286_v62  ;;  %v11846_v58 = vld [vmem:[%s12099_s14 + $0xd0] ss:$24 sps:$4 sm:$0xff]   ;;  %v15423_v62 = vld [vmem:[#allocation2_spill] sm:$0xff] }
 0x1df   : > { %v3417_v5 = vmax.f32 %v9925_v26, 0.0  ;;  %3226 = vmatprep.mubr.bf16.mxu1 %v11843_v44  ;;  %4164 = vmatprep.subr.bf16.mxu0 %v11291_v1 }
 0x1e0   : > { %v3418_v51 = vmax.f32 %v9927_v8, 0.0  ;;  %v11847_v8 = vld [vmem:[%s12099_s14 + $0x104] ss:$24 sps:$4 sm:$0xff]  }
 0x1e1   : > { %v3513_v3 = vpack.c.bf16 %v3417_v5, %v3413_v27  ;;  %v2336_v27 = vadd.f32 %v12841_v36, %v12949_v31  ;;  %v11848_v36 = vld [vmem:[%s12099_s14 + $0x100] ss:$24 sps:$4 sm:$0xff]  }
 0x1e2   : > { %v2699_v46 = vpop.f32.mrb[32].mxu0  ;;  %v3514_v48 = vpack.c.bf16 %v3418_v51, %v3414_v9  ;;  %4165 = vmatpush1.bf16.msra.mxu0 %v11289_v15  ;;  %v2338_v9 = vadd.f32 %v12843_v39, %v12943_v12  ;;  %v11849_v39 = vld [vmem:[%s12099_s14 + $0x134] ss:$24 sps:$4 sm:$0xff]  }
 0x1e3   : > { %v9929_v50 = vadd.f32 %v2699_v46, %v2314_v59  ;;  %v2701_v32 = vpop.f32.mrb[33].mxu0  ;;  %4166 = vmatprep.subr.bf16.mxu0 %v11294_v18  ;;  %v2340_v59 = vadd.f32 %v12848_v40, %v12949_v31  ;;  %v15425_v15 = vld [vmem:[#allocation4_spill] sm:$0xff]  ;;  %v15426_v18 = vld [vmem:[#allocation5_spill] sm:$0xff] }
 0x1e4   : > { %v9931_v34 = vadd.f32 %v2701_v32, %v2316_v60  ;;  %v2703_v6 = vpop.f32.mrb[34].mxu0  ;;  %4047 = vmatprep.mubr.bf16.mxu0 %v3514_v48 }
 0x1e5   : > { %v9933_v21 = vadd.f32 %v2703_v6, %v2318_v47  ;;  %v2705_v53 = vpop.f32.mrb[35].mxu0  ;;  %4048 = vmatmul.mubr.bf16.gmra.mrb[92].mxu0 %v3513_v3  ;;  %v3421_v37 = vmax.f32 %v9929_v50, 0.0 }
 0x1e6   : > { %v9935_v7 = vadd.f32 %v2705_v53, %v2320_v61  ;;  %3227 = vmatmul.mubr.bf16.gmra.mrb[76].mxu1 %v11844_v35  ;;  %v3422_v10 = vmax.f32 %v9931_v34, 0.0  ;;  %4167 = vmatpush1.bf16.msra.mxu0 %v11292_v22  ;;  %v2346_v61 = vadd.f32 %v12863_v55, %v12949_v31  ;;  %v2350_v35 = vadd.f32 %v15423_v62, %v12949_v31 }
 0x1e7   : > { %v3425_v41 = vmax.f32 %v9933_v21, 0.0  ;;  %3236 = vmatprep.mubr.bf16.mxu1 %v11845_v38  ;;  %v2348_v21 = vadd.f32 %v12865_v63, %v12943_v12  ;;  %v11851_v63 = vld [vmem:[%s12099_s14 + $0x164] ss:$24 sps:$4 sm:$0xff]  }
 0x1e8   : > { %v3426_v28 = vmax.f32 %v9935_v7, 0.0 }
 0x1e9   : > { %v3517_v17 = vpack.c.bf16 %v3425_v41, %v3421_v37 }
 0x1ea   : > { %v2709_v23 = vpop.f32.mrb[36].mxu0  ;;  %v3518_v56 = vpack.c.bf16 %v3426_v28, %v3422_v10  ;;  %v11850_v28 = vld [vmem:[%s12099_s14 + $0x130] ss:$24 sps:$4 sm:$0xff]  }
 0x1eb   : > { %v9937_v11 = vadd.f32 %v2709_v23, %v2324_v30  ;;  %v2711_v13 = vpop.f32.mrb[37].mxu0 }
 0x1ec   : > { %v9939_v0 = vadd.f32 %v2711_v13, %v2326_v14  ;;  %v2713_v29 = vpop.f32.mrb[38].mxu0  ;;  %4057 = vmatprep.mubr.bf16.mxu0 %v3518_v56  ;;  %v15424_v14 = vld [vmem:[#allocation3_spill] sm:$0xff] }
 0x1ed   : > { %v9941_v25 = vadd.f32 %v2713_v29, %v2328_v16  ;;  %v2715_v42 = vpop.f32.mrb[39].mxu0  ;;  %4058 = vmatmul.mubr.bf16.gmra.mrb[96].mxu0 %v3517_v17  ;;  %v3429_v2 = vmax.f32 %v9937_v11, 0.0  ;;  %v2354_v23 = vadd.f32 %v15424_v14, %v12943_v12  ;;  %v2356_v16 = vadd.f32 %v15425_v15, %v12949_v31 }
 0x1ee   : > { %v9943_v43 = vadd.f32 %v2715_v42, %v2330_v19  ;;  %3237 = vmatmul.mubr.bf16.gmra.mrb[80].mxu1 %v11846_v58  ;;  %v3430_v52 = vmax.f32 %v9939_v0, 0.0  ;;  %v2358_v19 = vadd.f32 %v15426_v18, %v12943_v12 }
 0x1ef   : > { %v3433_v26 = vmax.f32 %v9941_v25, 0.0  ;;  %3246 = vmatprep.mubr.bf16.mxu1 %v11847_v8  ;;  %v15427_v25 = vld [vmem:[#allocation6_spill] sm:$0xff] }
 0x1f0   : > { %v3434_v24 = vmax.f32 %v9943_v43, 0.0  ;;  %v2360_v42 = vadd.f32 %v15427_v25, %v12949_v31 }
 0x1f1   : > { %v3521_v4 = vpack.c.bf16 %v3433_v26, %v3429_v2 }
 0x1f2   : > { %v2719_v5 = vpop.f32.mrb[40].mxu0  ;;  %v3522_v49 = vpack.c.bf16 %v3434_v24, %v3430_v52  ;;  %v11852_v52 = vld [vmem:[%s12099_s14 + $0x160] ss:$24 sps:$4 sm:$0xff]  }
 0x1f3   : > { %v9945_v51 = vadd.f32 %v2719_v5, %v2334_v45  ;;  %v2721_v44 = vpop.f32.mrb[41].mxu0  ;;  %v15428_v5 = vld [vmem:[#allocation7_spill] sm:$0xff] }
 0x1f4   : > { %v9947_v3 = vadd.f32 %v2721_v44, %v2336_v27  ;;  %v2723_v60 = vpop.f32.mrb[42].mxu0  ;;  %4067 = vmatprep.mubr.bf16.mxu0 %v3522_v49  ;;  %v11853_v27 = vld [vmem:[%s12099_s14 + $0x194] ss:$24 sps:$4 sm:$0xff]   ;;  %v2364_v49 = vadd.f32 %v15428_v5, %v12943_v12 }
 0x1f5   : > { %v9949_v33 = vadd.f32 %v2723_v60, %v2338_v9  ;;  %v2725_v46 = vpop.f32.mrb[43].mxu0  ;;  %4068 = vmatmul.mubr.bf16.gmra.mrb[100].mxu0 %v3521_v4  ;;  %v3437_v20 = vmax.f32 %v9945_v51, 0.0  ;;  %v15429_v51 = vld [vmem:[#allocation8_spill] sm:$0xff]  ;;  %v15430_v60 = vld [vmem:[#allocation9_spill] sm:$0xff] }
 0x1f6   : > { %v9951_v48 = vadd.f32 %v2725_v46, %v2340_v59  ;;  %3247 = vmatmul.mubr.bf16.gmra.mrb[84].mxu1 %v11848_v36  ;;  %v3438_v50 = vmax.f32 %v9947_v3, 0.0  ;;  %v2366_v44 = vadd.f32 %v15429_v51, %v12949_v31  ;;  %v15431_v36 = vld [vmem:[#allocation10_spill] sm:$0xff] }
 0x1f7   : > { %v3441_v47 = vmax.f32 %v9949_v33, 0.0  ;;  %3256 = vmatprep.mubr.bf16.mxu1 %v11849_v39  ;;  %v2368_v33 = vadd.f32 %v15430_v60, %v12943_v12 }
 0x1f8   : > { %v3442_v32 = vmax.f32 %v9951_v48, 0.0 }
 0x1f9   : > { %v3525_v40 = vpack.c.bf16 %v3441_v47, %v3437_v20  ;;  %v2370_v20 = vadd.f32 %v15431_v36, %v12949_v31  ;;  %v11297_v36 = vld [vmem:[%s15358_s3 + $0x1f4] ss:$8 sps:$4 sm:$0xff]  }
 0x1fa   : > { %v2729_v34 = vpop.f32.mrb[44].mxu0  ;;  %v3526_v6 = vpack.c.bf16 %v3442_v32, %v3438_v50  ;;  %4168 = vmatprep.subr.bf16.mxu0 %v11297_v36 }
 0x1fb   : > { %v9953_v53 = vadd.f32 %v2729_v34, %v2344_v57  ;;  %v2731_v7 = vpop.f32.mrb[45].mxu0 }
 0x1fc   : > { %v9955_v37 = vadd.f32 %v2731_v7, %v2346_v61  ;;  %v2733_v41 = vpop.f32.mrb[46].mxu0  ;;  %4077 = vmatprep.mubr.bf16.mxu0 %v3526_v6  ;;  %v15432_v7 = vld [vmem:[#allocation11_spill] sm:$0xff] }
 0x1fd   : > { %v9957_v54 = vadd.f32 %v2733_v41, %v2348_v21  ;;  %v2735_v1 = vpop.f32.mrb[47].mxu0  ;;  %4078 = vmatmul.mubr.bf16.gmra.mrb[104].mxu0 %v3525_v40  ;;  %v3445_v55 = vmax.f32 %v9953_v53, 0.0  ;;  %v11854_v40 = vld [vmem:[%s12099_s14 + $0x190] ss:$24 sps:$4 sm:$0xff]   ;;  %v11855_v53 = vld [vmem:[%s12099_s14 + $0x1c4] ss:$24 sps:$4 sm:$0xff]   ;;  %v2374_v62 = vadd.f32 %v15432_v7, %v12943_v12 }
 0x1fe   : > { %v9959_v10 = vadd.f32 %v2735_v1, %v2350_v35  ;;  %3257 = vmatmul.mubr.bf16.gmra.mrb[88].mxu1 %v11850_v28  ;;  %v3446_v30 = vmax.f32 %v9955_v37, 0.0  ;;  %v15433_v37 = vld [vmem:[#allocation12_spill] sm:$0xff] }
 0x1ff   : > { %v3449_v38 = vmax.f32 %v9957_v54, 0.0  ;;  %3266 = vmatprep.mubr.bf16.mxu1 %v11851_v63  ;;  %v2376_v41 = vadd.f32 %v15433_v37, %v12949_v31  ;;  %v11303_v7 = vld [vmem:[%s15360_s5 + $0x14] ss:$8 sps:$4 sm:$0xff]  }
 0x200   : > { %v3450_v17 = vmax.f32 %v9959_v10, 0.0  ;;  %v15434_v10 = vld [vmem:[#allocation13_spill] sm:$0xff] }
 0x201   : > { %v3529_v56 = vpack.c.bf16 %v3449_v38, %v3445_v55  ;;  %v2378_v28 = vadd.f32 %v15434_v10, %v12943_v12  ;;  %v15443_v10 = vld [vmem:[#allocation17_spill] sm:$0xff] }
 0x202   : > { %v2739_v11 = vpop.f32.mrb[48].mxu0  ;;  %v3530_v13 = vpack.c.bf16 %v3450_v17, %v3446_v30  ;;  %v15435_v30 = vld [vmem:[#allocation15_spill] sm:$0xff] }
 0x203   : > { %v9961_v0 = vadd.f32 %v2739_v11, %v2354_v23  ;;  %v2741_v29 = vpop.f32.mrb[49].mxu0  ;;  %v2380_v17 = vadd.f32 %v15435_v30, %v12949_v31 }
 0x204   : > { %v9963_v43 = vadd.f32 %v2741_v29, %v2356_v16  ;;  %v2743_v22 = vpop.f32.mrb[50].mxu0  ;;  %4087 = vmatprep.mubr.bf16.mxu0 %v3530_v13  ;;  %v11856_v16 = vld [vmem:[%s12099_s14 + $0x1c0] ss:$24 sps:$4 sm:$0xff]   ;;  %v15436_v29 = vld [vmem:[#allocation19_spill] sm:$0xff] }
 0x205   : > { %v9965_v58 = vadd.f32 %v2743_v22, %v2358_v19  ;;  %v2745_v2 = vpop.f32.mrb[51].mxu0  ;;  %4088 = vmatmul.mubr.bf16.gmra.mrb[108].mxu0 %v3529_v56  ;;  %v3453_v24 = vmax.f32 %v9961_v0, 0.0  ;;  %v11857_v0 = vld [vmem:[%s12099_s14 + $0x1f4] ss:$24 sps:$4 sm:$0xff]   ;;  %v2384_v25 = vadd.f32 %v15436_v29, %v12943_v12 }
 0x206   : > { %v9967_v26 = vadd.f32 %v2745_v2, %v2360_v42  ;;  %3267 = vmatmul.mubr.bf16.gmra.mrb[92].mxu1 %v11852_v52  ;;  %v3454_v45 = vmax.f32 %v9963_v43, 0.0  ;;  %v15437_v43 = vld [vmem:[#allocation20_spill] sm:$0xff] }
 0x207   : > { %v3457_v8 = vmax.f32 %v9965_v58, 0.0  ;;  %3276 = vmatprep.mubr.bf16.mxu1 %v11853_v27  ;;  %v2386_v22 = vadd.f32 %v15437_v43, %v12949_v31 }
 0x208   : > { %v3458_v4 = vmax.f32 %v9967_v26, 0.0  ;;  %v15438_v26 = vld [vmem:[#allocation21_spill] sm:$0xff] }
 0x209   : > { %v3533_v9 = vpack.c.bf16 %v3457_v8, %v3453_v24  ;;  %v2388_v52 = vadd.f32 %v15438_v26, %v12943_v12 }
 0x20a   : > { %v2749_v59 = vpop.f32.mrb[52].mxu0  ;;  %v3534_v3 = vpack.c.bf16 %v3458_v4, %v3454_v45  ;;  %v15439_v45 = vld [vmem:[#allocation22_spill] sm:$0xff] }
 0x20b   : > { %v9969_v46 = vadd.f32 %v2749_v59, %v2364_v49  ;;  %v2751_v48 = vpop.f32.mrb[53].mxu0  ;;  %v2390_v4 = vadd.f32 %v15439_v45, %v12949_v31  ;;  %v11316_v45 = vld [vmem:[%s15360_s5 + $0x60] ss:$8 sps:$4 sm:$0xff]  }
 0x20c   : > { %v9971_v47 = vadd.f32 %v2751_v48, %v2366_v44  ;;  %v2753_v50 = vpop.f32.mrb[54].mxu0  ;;  %4097 = vmatprep.mubr.bf16.mxu0 %v3534_v3  ;;  %v11858_v44 = vld [vmem:[%s12099_s14 + $0x1f0] ss:$24 sps:$4 sm:$0xff]   ;;  %v11860_v48 = vld [vmem:[%s12099_s14 + $0x220] ss:$24 sps:$4 sm:$0xff]  }
 0x20d   : > { %v9973_v32 = vadd.f32 %v2753_v50, %v2368_v33  ;;  %v2755_v39 = vpop.f32.mrb[55].mxu0  ;;  %4098 = vmatmul.mubr.bf16.gmra.mrb[112].mxu0 %v3533_v9  ;;  %v3461_v61 = vmax.f32 %v9969_v46, 0.0  ;;  %v11859_v33 = vld [vmem:[%s12099_s14 + $0x224] ss:$24 sps:$4 sm:$0xff]   ;;  %v11862_v50 = vld [vmem:[%s12099_s14 + $0x250] ss:$24 sps:$4 sm:$0xff]  }
 0x20e   : > { %v9975_v57 = vadd.f32 %v2755_v39, %v2370_v20  ;;  %3277 = vmatmul.mubr.bf16.gmra.mrb[96].mxu1 %v11854_v40  ;;  %v3462_v6 = vmax.f32 %v9971_v47, 0.0  ;;  %v11861_v20 = vld [vmem:[%s12099_s14 + $0x254] ss:$24 sps:$4 sm:$0xff]   ;;  %v11295_v47 = vld [vmem:[%s15358_s3 + $0x1f0] ss:$8 sps:$4 sm:$0xff]  }
 0x20f   : > { %v3465_v34 = vmax.f32 %v9973_v32, 0.0  ;;  %3286 = vmatprep.mubr.bf16.mxu1 %v11855_v53  ;;  %4169 = vmatpush1.bf16.msra.mxu0 %v11295_v47  ;;  %v11863_v32 = vld [vmem:[%s12099_s14 + $0x284] ss:$24 sps:$4 sm:$0xff]   ;;  %v11864_v39 = vld [vmem:[%s12099_s14 + $0x280] ss:$24 sps:$4 sm:$0xff]  }
 0x210   : > { %v3466_v21 = vmax.f32 %v9975_v57, 0.0  ;;  %v11865_v57 = vld [vmem:[%s12099_s14 + $0x2b4] ss:$24 sps:$4 sm:$0xff]   ;;  %v11866_v40 = vld [vmem:[%s12099_s14 + $0x2b0] ss:$24 sps:$4 sm:$0xff]  }
 0x211   : > { %v3537_v35 = vpack.c.bf16 %v3465_v34, %v3461_v61  ;;  %v11867_v61 = vld [vmem:[%s12099_s14 + $0x2e4] ss:$24 sps:$4 sm:$0xff]   ;;  %v11868_v34 = vld [vmem:[%s12099_s14 + $0x2e0] ss:$24 sps:$4 sm:$0xff]  }
 0x212   : > { %v2759_v54 = vpop.f32.mrb[56].mxu0  ;;  %v3538_v1 = vpack.c.bf16 %v3466_v21, %v3462_v6  ;;  %v11298_v6 = vld [vmem:[%s15360_s5] ss:$8 sps:$4 sm:$0xff]   ;;  %v11300_v21 = vld [vmem:[%s15360_s5 + $0x4] ss:$8 sps:$4 sm:$0xff]  }
 0x213   : > { %v9977_v55 = vadd.f32 %v2759_v54, %v2374_v62  ;;  %v2761_v38 = vpop.f32.mrb[57].mxu0  ;;  %4631 = vmatprep.subr.bf16.mxu1 %v11300_v21  ;;  %v11301_v53 = vld [vmem:[%s15360_s5 + $0x10] ss:$8 sps:$4 sm:$0xff]   ;;  %v15440_v62 = vld [vmem:[#allocation14_spill] sm:$0xff] }
 0x214   : > { %v9979_v63 = vadd.f32 %v2761_v38, %v2376_v41  ;;  %v2763_v14 = vpop.f32.mrb[58].mxu0  ;;  %4107 = vmatprep.mubr.bf16.mxu0 %v3538_v1  ;;  %4632 = vmatpush1.bf16.msra.mxu1 %v11298_v6  ;;  %v13234_v37 = vsub.s32 3, %v15440_v62  ;;  %v11304_v41 = vld [vmem:[%s15360_s5 + $0x20] ss:$8 sps:$4 sm:$0xff]   ;;  %v11306_v54 = vld [vmem:[%s15360_s5 + $0x24] ss:$8 sps:$4 sm:$0xff]  }
 0x215   : > { %v9981_v23 = vadd.f32 %v2763_v14, %v2378_v28  ;;  %v2765_v56 = vpop.f32.mrb[59].mxu0  ;;  %4108 = vmatmul.mubr.bf16.gmra.mrb[116].mxu0 %v3537_v35  ;;  %v3469_v11 = vmax.f32 %v9977_v55, 0.0  ;;  %4633 = vmatprep.subr.bf16.mxu1 %v11303_v7  ;;  %v13231_v35 = vsub.s32 2, %v15440_v62  ;;  %v11309_v1 = vld [vmem:[%s15360_s5 + $0x34] ss:$8 sps:$4 sm:$0xff]  }
 0x216   : > { %v9983_v15 = vadd.f32 %v2765_v56, %v2380_v17  ;;  %3287 = vmatmul.mubr.bf16.gmra.mrb[100].mxu1 %v11856_v16  ;;  %v3470_v18 = vmax.f32 %v9979_v63, 0.0  ;;  %15442 = vst [vmem:[#allocation3_spill] sm:$0xff] %v13234_v37  ;;  %v11307_v55 = vld [vmem:[%s15360_s5 + $0x30] ss:$8 sps:$4 sm:$0xff]   ;;  %v13254_v38 = vrot.slane %v15443_v10, %v13234_v37  ;;  %v11310_v16 = vld [vmem:[%s15360_s5 + $0x40] ss:$8 sps:$4 sm:$0xff]  }
 0x217   : > { %v3473_v13 = vmax.f32 %v9981_v23, 0.0  ;;  %3296 = vmatprep.mubr.bf16.mxu1 %v11857_v0  ;;  %15441 = vst [vmem:[#allocation2_spill] sm:$0xff] %v13231_v35  ;;  %v13247_v28 = vrot.slane %v15443_v10, %v13231_v35  ;;  %v11322_v47 = vld [vmem:[%s15360_s5 + $0x80] ss:$8 sps:$4 sm:$0xff]   ;;  %v11325_v21 = vld [vmem:[%s15360_s5 + $0x90] ss:$8 sps:$4 sm:$0xff]  }
 0x218   : > { %v3474_v19 = vmax.f32 %v9983_v15, 0.0  ;;  %4634 = vmatpush1.bf16.msra.mxu1 %v11301_v53  ;;  %v11330_v7 = vld [vmem:[%s15360_s5 + $0xa4] ss:$8 sps:$4 sm:$0xff]  }
 0x219   : > { %v3541_v42 = vpack.c.bf16 %v3473_v13, %v3469_v11  ;;  %4635 = vmatprep.subr.bf16.mxu1 %v11306_v54  ;;  %v11312_v11 = vld [vmem:[%s15360_s5 + $0x44] ss:$8 sps:$4 sm:$0xff]  }
 0x21a   : > { %v2769_v58 = vpop.f32.mrb[60].mxu0  ;;  %v3542_v2 = vpack.c.bf16 %v3474_v19, %v3470_v18  ;;  %v11315_v18 = vld [vmem:[%s15360_s5 + $0x54] ss:$8 sps:$4 sm:$0xff]  }
 0x21b   : > { %v9985_v24 = vadd.f32 %v2769_v58, %v2384_v25  ;;  %v2771_v8 = vpop.f32.mrb[61].mxu0 }
 0x21c   : > { %v9987_v27 = vadd.f32 %v2771_v8, %v2386_v22  ;;  %v2773_v5 = vpop.f32.mrb[62].mxu0  ;;  %4117 = vmatprep.mubr.bf16.mxu0 %v3542_v2  ;;  %4636 = vmatpush1.bf16.msra.mxu1 %v11304_v41  ;;  %v11318_v22 = vld [vmem:[%s15360_s5 + $0x64] ss:$8 sps:$4 sm:$0xff]  }
 0x21d   : > { %v9989_v49 = vadd.f32 %v2773_v5, %v2388_v52  ;;  %v2775_v9 = vpop.f32.mrb[63].mxu0  ;;  %4118 = vmatmul.mubr.bf16.gmra.mrb[120].mxu0 %v3541_v42  ;;  %v3477_v59 = vmax.f32 %v9985_v24, 0.0  ;;  %4637 = vmatprep.subr.bf16.mxu1 %v11309_v1  ;;  %v11313_v42 = vld [vmem:[%s15360_s5 + $0x50] ss:$8 sps:$4 sm:$0xff]   ;;  %v11321_v5 = vld [vmem:[%s15360_s5 + $0x74] ss:$8 sps:$4 sm:$0xff]  }
 0x21e   : > { %v9991_v51 = vadd.f32 %v2775_v9, %v2390_v4  ;;  %3297 = vmatmul.mubr.bf16.gmra.mrb[104].mxu1 %v11858_v44  ;;  %v3478_v12 = vmax.f32 %v9987_v27, 0.0 }
 0x21f   : > { %v3481_v3 = vmax.f32 %v9989_v49, 0.0  ;;  %3306 = vmatprep.mubr.bf16.mxu1 %v11859_v33 }
 0x220   : > { %v3482_v60 = vmax.f32 %v9991_v51, 0.0  ;;  %4638 = vmatpush1.bf16.msra.mxu1 %v11307_v55 }
 0x221   : > { %v3545_v31 = vpack.c.bf16 %v3481_v3, %v3477_v59  ;;  %4639 = vmatprep.subr.bf16.mxu1 %v11312_v11  ;;  %v11319_v3 = vld [vmem:[%s15360_s5 + $0x70] ss:$8 sps:$4 sm:$0xff]  }
 0x222   : > { %v3546_v46 = vpack.c.bf16 %v3482_v60, %v3478_v12  ;;  %v11324_v60 = vld [vmem:[%s15360_s5 + $0x84] ss:$8 sps:$4 sm:$0xff]  }
 0x224   : > { %4127 = vmatprep.mubr.bf16.mxu0 %v3546_v46  ;;  %4640 = vmatpush1.bf16.msra.mxu1 %v11310_v16 }
 0x225   : > { %4128 = vmatmul.mubr.bf16.gmra.mrb[124].mxu0 %v3545_v31  ;;  %4641 = vmatprep.subr.bf16.mxu1 %v11315_v18  ;;  %v11331_v18 = vld [vmem:[%s15360_s5 + $0xb0] ss:$8 sps:$4 sm:$0xff]  }
 0x226   : > { %3307 = vmatmul.mubr.bf16.gmra.mrb[108].mxu1 %v11860_v48 }
 0x227   : > { %3316 = vmatprep.mubr.bf16.mxu1 %v11861_v20 }
 0x228   : > { %4642 = vmatpush1.bf16.msra.mxu1 %v11313_v42 }
 0x229   : > { %4643 = vmatprep.subr.bf16.mxu1 %v11318_v22 }
 0x22c   : > { %4644 = vmatpush1.bf16.msra.mxu1 %v11316_v45 }
 0x22d   : > { %4645 = vmatprep.subr.bf16.mxu1 %v11321_v5 }
 0x22e   : > { %3317 = vmatmul.mubr.bf16.gmra.mrb[112].mxu1 %v11862_v50 }
 0x22f   : > { %3326 = vmatprep.mubr.bf16.mxu1 %v11863_v32 }
 0x230   : > { %4646 = vmatpush1.bf16.msra.mxu1 %v11319_v3 }
 0x231   : > { %4647 = vmatprep.subr.bf16.mxu1 %v11324_v60 }
 0x234   : > { %4648 = vmatpush1.bf16.msra.mxu1 %v11322_v47 }
 0x236   : > { %3327 = vmatmul.mubr.bf16.gmra.mrb[116].mxu1 %v11864_v39  ;;  %v11327_v39 = vld [vmem:[%s15360_s5 + $0x94] ss:$8 sps:$4 sm:$0xff]  }
 0x237   : > { %3336 = vmatprep.mubr.bf16.mxu1 %v11865_v57  ;;  %4649 = vmatprep.subr.bf16.mxu1 %v11327_v39 }
 0x238   : > { %4650 = vmatpush1.bf16.msra.mxu1 %v11325_v21 }
 0x239   : > { %4651 = vmatprep.subr.bf16.mxu1 %v11330_v7 }
 0x23e   : > { %3337 = vmatmul.mubr.bf16.gmra.mrb[120].mxu1 %v11866_v40 }
 0x23f   : > { %3346 = vmatprep.mubr.bf16.mxu1 %v11867_v61 }
 0x246   : > { %3347 = vmatmul.mubr.bf16.gmra.mrb[124].mxu1 %v11868_v34 }
 0x2a1   : > { %v3198_v30 = vpop.f32.mrb[64].mxu1 }
 0x2a2   : > { %v9992_v17 = vadd.f32 %v3198_v30, %v13247_v28  ;;  %v3200_v63 = vpop.f32.mrb[65].mxu1 }
 0x2a3   : > { %v9993_v14 = vadd.f32 %v3200_v63, %v13254_v38  ;;  %v3202_v23 = vpop.f32.mrb[66].mxu1 }
 0x2a4   : > { %v9994_v56 = vadd.f32 %v3202_v23, %v13247_v28  ;;  %v3204_v15 = vpop.f32.mrb[67].mxu1  ;;  %v3359_v19 = vmax.f32 %v9992_v17, 0.0  ;;  %v11328_v17 = vld [vmem:[%s15360_s5 + $0xa0] ss:$8 sps:$4 sm:$0xff]   ;;  %v11333_v23 = vld [vmem:[%s15360_s5 + $0xb4] ss:$8 sps:$4 sm:$0xff]  }
 0x2a5   : > { %v9995_v13 = vadd.f32 %v3204_v15, %v13254_v38  ;;  %v3360_v29 = vmax.f32 %v9993_v14, 0.0  ;;  %4652 = vmatpush1.bf16.msra.mxu1 %v11328_v17 }
 0x2a6   : > { %v3363_v0 = vmax.f32 %v9994_v56, 0.0  ;;  %4653 = vmatprep.subr.bf16.mxu1 %v11333_v23 }
 0x2a7   : > { %v3364_v25 = vmax.f32 %v9995_v13, 0.0 }
 0x2a8   : > { %v3487_v43 = vpack.c.bf16 %v3363_v0, %v3359_v19  ;;  %v11336_v0 = vld [vmem:[%s15360_s5 + $0xc4] ss:$8 sps:$4 sm:$0xff]  }
 0x2a9   : > { %v3208_v58 = vpop.f32.mrb[68].mxu1  ;;  %v3488_v2 = vpack.c.bf16 %v3364_v25, %v3360_v29  ;;  %4654 = vmatpush1.bf16.msra.mxu1 %v11331_v18 }
 0x2aa   : > { %v9996_v26 = vadd.f32 %v3208_v58, %v13247_v28  ;;  %v3210_v52 = vpop.f32.mrb[69].mxu1  ;;  %4655 = vmatprep.subr.bf16.mxu1 %v11336_v0 }
 0x2ab   : > { %v9997_v24 = vadd.f32 %v3210_v52, %v13254_v38  ;;  %v3212_v8 = vpop.f32.mrb[70].mxu1  ;;  %4170 = vmatprep.mubr.bf16.mxu0 %v3488_v2  ;;  %v11334_v2 = vld [vmem:[%s15360_s5 + $0xc0] ss:$8 sps:$4 sm:$0xff]  }
 0x2ac   : > { %v9998_v4 = vadd.f32 %v3212_v8, %v13247_v28  ;;  %v3214_v27 = vpop.f32.mrb[71].mxu1  ;;  %4171 = vmatmul.mubr.bf16.vlgmr.msra.gmra.mrb[64].mxu0 %v3487_v43  ;;  %v3367_v9 = vmax.f32 %v9996_v26, 0.0 }
 0x2ad   : > { %v9999_v49 = vadd.f32 %v3214_v27, %v13254_v38  ;;  %v3368_v44 = vmax.f32 %v9997_v24, 0.0  ;;  %v11339_v24 = vld [vmem:[%s15360_s5 + $0xd4] ss:$8 sps:$4 sm:$0xff]   ;;  %4656 = vmatpush1.bf16.msra.mxu1 %v11334_v2 }
 0x2ae   : > { %v3371_v51 = vmax.f32 %v9998_v4, 0.0  ;;  %4657 = vmatprep.subr.bf16.mxu1 %v11339_v24 }
 0x2af   : > { %v3372_v59 = vmax.f32 %v9999_v49, 0.0  ;;  %v11337_v49 = vld [vmem:[%s15360_s5 + $0xd0] ss:$8 sps:$4 sm:$0xff]  }
 0x2b0   : > { %v3491_v12 = vpack.c.bf16 %v3371_v51, %v3367_v9  ;;  %v11342_v51 = vld [vmem:[%s15360_s5 + $0xe4] ss:$8 sps:$4 sm:$0xff]  }
 0x2b1   : > { %v3218_v33 = vpop.f32.mrb[72].mxu1  ;;  %v3492_v31 = vpack.c.bf16 %v3372_v59, %v3368_v44  ;;  %4658 = vmatpush1.bf16.msra.mxu1 %v11337_v49 }
 0x2b2   : > { %v10000_v46 = vadd.f32 %v3218_v33, %v13247_v28  ;;  %v3220_v48 = vpop.f32.mrb[73].mxu1  ;;  %4659 = vmatprep.subr.bf16.mxu1 %v11342_v51 }
 0x2b3   : > { %v10001_v36 = vadd.f32 %v3220_v48, %v13254_v38  ;;  %v3222_v20 = vpop.f32.mrb[74].mxu1  ;;  %4180 = vmatprep.mubr.bf16.mxu0 %v3492_v31  ;;  %v11340_v31 = vld [vmem:[%s15360_s5 + $0xe0] ss:$8 sps:$4 sm:$0xff]  }
 0x2b4   : > { %v10002_v50 = vadd.f32 %v3222_v20, %v13247_v28  ;;  %v3224_v32 = vpop.f32.mrb[75].mxu1  ;;  %4181 = vmatmul.mubr.bf16.gmra.mrb[68].mxu0 %v3491_v12  ;;  %v3375_v40 = vmax.f32 %v10000_v46, 0.0 }
 0x2b5   : > { %v10003_v57 = vadd.f32 %v3224_v32, %v13254_v38  ;;  %v3376_v34 = vmax.f32 %v10001_v36, 0.0  ;;  %4660 = vmatpush1.bf16.msra.mxu1 %v11340_v31 }
 0x2b6   : > { %v3379_v61 = vmax.f32 %v10002_v50, 0.0 }
 0x2b7   : > { %v3380_v6 = vmax.f32 %v10003_v57, 0.0 }
 0x2b8   : > { %v3495_v53 = vpack.c.bf16 %v3379_v61, %v3375_v40 }
 0x2b9   : > { %v3228_v41 = vpop.f32.mrb[76].mxu1  ;;  %v3496_v54 = vpack.c.bf16 %v3380_v6, %v3376_v34 }
 0x2ba   : > { %v10004_v1 = vadd.f32 %v3228_v41, %v13247_v28  ;;  %v3230_v10 = vpop.f32.mrb[77].mxu1 }
 0x2bb   : > { %v10005_v55 = vadd.f32 %v3230_v10, %v13254_v38  ;;  %v3232_v30 = vpop.f32.mrb[78].mxu1  ;;  %4190 = vmatprep.mubr.bf16.mxu0 %v3496_v54 }
 0x2bc   : > { %v10006_v63 = vadd.f32 %v3232_v30, %v13247_v28  ;;  %v3234_v14 = vpop.f32.mrb[79].mxu1  ;;  %4191 = vmatmul.mubr.bf16.gmra.mrb[72].mxu0 %v3495_v53  ;;  %v3383_v15 = vmax.f32 %v10004_v1, 0.0 }
 0x2bd   : > { %v10007_v56 = vadd.f32 %v3234_v14, %v13254_v38  ;;  %v3384_v11 = vmax.f32 %v10005_v55, 0.0 }
 0x2be   : > { %v3387_v16 = vmax.f32 %v10006_v63, 0.0 }
 0x2bf   : > { %v3388_v13 = vmax.f32 %v10007_v56, 0.0 }
 0x2c0   : > { %v3499_v19 = vpack.c.bf16 %v3387_v16, %v3383_v15 }
 0x2c1   : > { %v3238_v29 = vpop.f32.mrb[80].mxu1  ;;  %v3500_v25 = vpack.c.bf16 %v3388_v13, %v3384_v11 }
 0x2c2   : > { %v10008_v42 = vadd.f32 %v3238_v29, %v13247_v28  ;;  %v3240_v43 = vpop.f32.mrb[81].mxu1 }
 0x2c3   : > { %v10009_v22 = vadd.f32 %v3240_v43, %v13254_v38  ;;  %v3242_v58 = vpop.f32.mrb[82].mxu1  ;;  %4200 = vmatprep.mubr.bf16.mxu0 %v3500_v25 }
 0x2c4   : > { %v10010_v26 = vadd.f32 %v3242_v58, %v13247_v28  ;;  %v3244_v52 = vpop.f32.mrb[83].mxu1  ;;  %4201 = vmatmul.mubr.bf16.gmra.mrb[76].mxu0 %v3499_v19  ;;  %v3391_v45 = vmax.f32 %v10008_v42, 0.0 }
 0x2c5   : > { %v10011_v8 = vadd.f32 %v3244_v52, %v13254_v38  ;;  %v3392_v27 = vmax.f32 %v10009_v22, 0.0 }
 0x2c6   : > { %v3395_v4 = vmax.f32 %v10010_v26, 0.0 }
 0x2c7   : > { %v3396_v5 = vmax.f32 %v10011_v8, 0.0 }
 0x2c8   : > { %v3503_v9 = vpack.c.bf16 %v3395_v4, %v3391_v45 }
 0x2c9   : > { %v3248_v44 = vpop.f32.mrb[84].mxu1  ;;  %v3504_v59 = vpack.c.bf16 %v3396_v5, %v3392_v27 }
 0x2ca   : > { %v10012_v3 = vadd.f32 %v3248_v44, %v13247_v28  ;;  %v3250_v12 = vpop.f32.mrb[85].mxu1 }
 0x2cb   : > { %v10013_v60 = vadd.f32 %v3250_v12, %v13254_v38  ;;  %v3252_v33 = vpop.f32.mrb[86].mxu1  ;;  %4210 = vmatprep.mubr.bf16.mxu0 %v3504_v59 }
 0x2cc   : > { %v10014_v46 = vadd.f32 %v3252_v33, %v13247_v28  ;;  %v3254_v48 = vpop.f32.mrb[87].mxu1  ;;  %4211 = vmatmul.mubr.bf16.gmra.mrb[80].mxu0 %v3503_v9  ;;  %v3399_v20 = vmax.f32 %v10012_v3, 0.0 }
 0x2cd   : > { %v10015_v36 = vadd.f32 %v3254_v48, %v13254_v38  ;;  %v3400_v50 = vmax.f32 %v10013_v60, 0.0 }
 0x2ce   : > { %v3403_v47 = vmax.f32 %v10014_v46, 0.0 }
 0x2cf   : > { %v3404_v32 = vmax.f32 %v10015_v36, 0.0 }
 0x2d0   : > { %v3507_v39 = vpack.c.bf16 %v3403_v47, %v3399_v20 }
 0x2d1   : > { %v3258_v57 = vpop.f32.mrb[88].mxu1  ;;  %v3508_v40 = vpack.c.bf16 %v3404_v32, %v3400_v50 }
 0x2d2   : > { %v10016_v61 = vadd.f32 %v3258_v57, %v13247_v28  ;;  %v3260_v34 = vpop.f32.mrb[89].mxu1 }
 0x2d3   : > { %v10017_v6 = vadd.f32 %v3260_v34, %v13254_v38  ;;  %v3262_v21 = vpop.f32.mrb[90].mxu1  ;;  %4220 = vmatprep.mubr.bf16.mxu0 %v3508_v40 }
 0x2d4   : > { %v10018_v53 = vadd.f32 %v3262_v21, %v13247_v28  ;;  %v3264_v7 = vpop.f32.mrb[91].mxu1  ;;  %4221 = vmatmul.mubr.bf16.gmra.mrb[84].mxu0 %v3507_v39  ;;  %v3407_v54 = vmax.f32 %v10016_v61, 0.0 }
 0x2d5   : > { %v10019_v41 = vadd.f32 %v3264_v7, %v13254_v38  ;;  %v3408_v10 = vmax.f32 %v10017_v6, 0.0 }
 0x2d6   : > { %v3411_v1 = vmax.f32 %v10018_v53, 0.0 }
 0x2d7   : > { %v3412_v55 = vmax.f32 %v10019_v41, 0.0 }
 0x2d8   : > { %v3511_v30 = vpack.c.bf16 %v3411_v1, %v3407_v54 }
 0x2d9   : > { %v3268_v17 = vpop.f32.mrb[92].mxu1  ;;  %v3512_v63 = vpack.c.bf16 %v3412_v55, %v3408_v10 }
 0x2da   : > { %v10020_v14 = vadd.f32 %v3268_v17, %v13247_v28  ;;  %v3270_v23 = vpop.f32.mrb[93].mxu1 }
 0x2db   : > { %v10021_v56 = vadd.f32 %v3270_v23, %v13254_v38  ;;  %v3272_v15 = vpop.f32.mrb[94].mxu1  ;;  %4230 = vmatprep.mubr.bf16.mxu0 %v3512_v63 }
 0x2dc   : > { %v10022_v16 = vadd.f32 %v3272_v15, %v13247_v28  ;;  %v3274_v11 = vpop.f32.mrb[95].mxu1  ;;  %4231 = vmatmul.mubr.bf16.gmra.mrb[88].mxu0 %v3511_v30  ;;  %v3415_v18 = vmax.f32 %v10020_v14, 0.0 }
 0x2dd   : > { %v10023_v13 = vadd.f32 %v3274_v11, %v13254_v38  ;;  %v3416_v0 = vmax.f32 %v10021_v56, 0.0 }
 0x2de   : > { %v3419_v19 = vmax.f32 %v10022_v16, 0.0 }
 0x2df   : > { %v3420_v29 = vmax.f32 %v10023_v13, 0.0 }
 0x2e0   : > { %v3515_v25 = vpack.c.bf16 %v3419_v19, %v3415_v18 }
 0x2e1   : > { %v3278_v42 = vpop.f32.mrb[96].mxu1  ;;  %v3516_v43 = vpack.c.bf16 %v3420_v29, %v3416_v0 }
 0x2e2   : > { %v10024_v22 = vadd.f32 %v3278_v42, %v13247_v28  ;;  %v3280_v58 = vpop.f32.mrb[97].mxu1 }
 0x2e3   : > { %v10025_v2 = vadd.f32 %v3280_v58, %v13254_v38  ;;  %v3282_v26 = vpop.f32.mrb[98].mxu1  ;;  %4240 = vmatprep.mubr.bf16.mxu0 %v3516_v43 }
 0x2e4   : > { %v10026_v52 = vadd.f32 %v3282_v26, %v13247_v28  ;;  %v3284_v24 = vpop.f32.mrb[99].mxu1  ;;  %4241 = vmatmul.mubr.bf16.gmra.mrb[92].mxu0 %v3515_v25  ;;  %v3423_v45 = vmax.f32 %v10024_v22, 0.0  ;;  %v11345_v26 = vld [vmem:[%s15360_s5 + $0xf4] ss:$8 sps:$4 sm:$0xff]  }
 0x2e5   : > { %v10027_v8 = vadd.f32 %v3284_v24, %v13254_v38  ;;  %v3424_v27 = vmax.f32 %v10025_v2, 0.0  ;;  %v11343_v24 = vld [vmem:[%s15360_s5 + $0xf0] ss:$8 sps:$4 sm:$0xff]   ;;  %4661 = vmatprep.subr.bf16.mxu1 %v11345_v26 }
 0x2e6   : > { %v3427_v4 = vmax.f32 %v10026_v52, 0.0  ;;  %4662 = vmatpush1.bf16.msra.mxu1 %v11343_v24 }
 0x2e7   : > { %v3428_v5 = vmax.f32 %v10027_v8, 0.0 }
 0x2e8   : > { %v3519_v49 = vpack.c.bf16 %v3427_v4, %v3423_v45 }
 0x2e9   : > { %v3288_v9 = vpop.f32.mrb[100].mxu1  ;;  %v3520_v51 = vpack.c.bf16 %v3428_v5, %v3424_v27 }
 0x2ea   : > { %v10028_v44 = vadd.f32 %v3288_v9, %v13247_v28  ;;  %v3290_v59 = vpop.f32.mrb[101].mxu1 }
 0x2eb   : > { %v10029_v3 = vadd.f32 %v3290_v59, %v13254_v38  ;;  %v3292_v12 = vpop.f32.mrb[102].mxu1  ;;  %4250 = vmatprep.mubr.bf16.mxu0 %v3520_v51 }
 0x2ec   : > { %v10030_v60 = vadd.f32 %v3292_v12, %v13247_v28  ;;  %v3294_v33 = vpop.f32.mrb[103].mxu1  ;;  %4251 = vmatmul.mubr.bf16.gmra.mrb[96].mxu0 %v3519_v49  ;;  %v3431_v46 = vmax.f32 %v10028_v44, 0.0 }
 0x2ed   : > { %v10031_v31 = vadd.f32 %v3294_v33, %v13254_v38  ;;  %v3432_v36 = vmax.f32 %v10029_v3, 0.0 }
 0x2ee   : > { %v3435_v48 = vmax.f32 %v10030_v60, 0.0 }
 0x2ef   : > { %v3436_v20 = vmax.f32 %v10031_v31, 0.0 }
 0x2f0   : > { %v3523_v47 = vpack.c.bf16 %v3435_v48, %v3431_v46 }
 0x2f1   : > { %v3298_v50 = vpop.f32.mrb[104].mxu1  ;;  %v3524_v32 = vpack.c.bf16 %v3436_v20, %v3432_v36 }
 0x2f2   : > { %v10032_v39 = vadd.f32 %v3298_v50, %v13247_v28  ;;  %v3300_v57 = vpop.f32.mrb[105].mxu1 }
 0x2f3   : > { %v10033_v40 = vadd.f32 %v3300_v57, %v13254_v38  ;;  %v3302_v61 = vpop.f32.mrb[106].mxu1  ;;  %4260 = vmatprep.mubr.bf16.mxu0 %v3524_v32 }
 0x2f4   : > { %v10034_v34 = vadd.f32 %v3302_v61, %v13247_v28  ;;  %v3304_v6 = vpop.f32.mrb[107].mxu1  ;;  %4261 = vmatmul.mubr.bf16.gmra.mrb[100].mxu0 %v3523_v47  ;;  %v3439_v53 = vmax.f32 %v10032_v39, 0.0 }
 0x2f5   : > { %v10035_v21 = vadd.f32 %v3304_v6, %v13254_v38  ;;  %v3440_v41 = vmax.f32 %v10033_v40, 0.0 }
 0x2f6   : > { %v3443_v7 = vmax.f32 %v10034_v34, 0.0 }
 0x2f7   : > { %v3444_v54 = vmax.f32 %v10035_v21, 0.0 }
 0x2f8   : > { %v3527_v1 = vpack.c.bf16 %v3443_v7, %v3439_v53 }
 0x2f9   : > { %v3308_v10 = vpop.f32.mrb[108].mxu1  ;;  %v3528_v55 = vpack.c.bf16 %v3444_v54, %v3440_v41 }
 0x2fa   : > { %v10036_v30 = vadd.f32 %v3308_v10, %v13247_v28  ;;  %v3310_v17 = vpop.f32.mrb[109].mxu1 }
 0x2fb   : > { %v10037_v63 = vadd.f32 %v3310_v17, %v13254_v38  ;;  %v3312_v14 = vpop.f32.mrb[110].mxu1  ;;  %4270 = vmatprep.mubr.bf16.mxu0 %v3528_v55 }
 0x2fc   : > { %v10038_v23 = vadd.f32 %v3312_v14, %v13247_v28  ;;  %v3314_v56 = vpop.f32.mrb[111].mxu1  ;;  %4271 = vmatmul.mubr.bf16.gmra.mrb[104].mxu0 %v3527_v1  ;;  %v3447_v16 = vmax.f32 %v10036_v30, 0.0 }
 0x2fd   : > { %v10039_v15 = vadd.f32 %v3314_v56, %v13254_v38  ;;  %v3448_v13 = vmax.f32 %v10037_v63, 0.0 }
 0x2fe   : > { %v3451_v11 = vmax.f32 %v10038_v23, 0.0 }
 0x2ff   : > { %v3452_v18 = vmax.f32 %v10039_v15, 0.0 }
 0x300   : > { %v3531_v19 = vpack.c.bf16 %v3451_v11, %v3447_v16 }
 0x301   : > { %v3318_v0 = vpop.f32.mrb[112].mxu1  ;;  %v3532_v29 = vpack.c.bf16 %v3452_v18, %v3448_v13 }
 0x302   : > { %v10040_v25 = vadd.f32 %v3318_v0, %v13247_v28  ;;  %v3320_v42 = vpop.f32.mrb[113].mxu1  ;;  %v11348_v0 = vld [vmem:[%s15362_s7 + $0x4] ss:$8 sps:$4 sm:$0xff]  }
 0x303   : > { %v10041_v43 = vadd.f32 %v3320_v42, %v13254_v38  ;;  %v3322_v22 = vpop.f32.mrb[114].mxu1  ;;  %4280 = vmatprep.mubr.bf16.mxu0 %v3532_v29  ;;  %5124 = vmatprep.subr.bf16.mxu1 %v11348_v0  ;;  %v15444_v29 = vld [vmem:[#allocation16_spill] sm:$0xff] }
 0x304   : > { %v10042_v58 = vadd.f32 %v3322_v22, %v13247_v28  ;;  %v3324_v2 = vpop.f32.mrb[115].mxu1  ;;  %4281 = vmatmul.mubr.bf16.gmra.mrb[108].mxu0 %v3531_v19  ;;  %v3455_v8 = vmax.f32 %v10040_v25, 0.0 }
 0x305   : > { %v10043_v52 = vadd.f32 %v3324_v2, %v13254_v38  ;;  %v3456_v4 = vmax.f32 %v10041_v43, 0.0 }
 0x306   : > { %v3459_v45 = vmax.f32 %v10042_v58, 0.0 }
 0x307   : > { %v3460_v27 = vmax.f32 %v10043_v52, 0.0 }
 0x308   : > { %v3535_v5 = vpack.c.bf16 %v3459_v45, %v3455_v8 }
 0x309   : > { %v3328_v49 = vpop.f32.mrb[116].mxu1  ;;  %v3536_v9 = vpack.c.bf16 %v3460_v27, %v3456_v4 }
 0x30a   : > { %v10044_v51 = vadd.f32 %v3328_v49, %v13247_v28  ;;  %v3330_v44 = vpop.f32.mrb[117].mxu1 }
 0x30b   : > { %v10045_v59 = vadd.f32 %v3330_v44, %v13254_v38  ;;  %v3332_v3 = vpop.f32.mrb[118].mxu1  ;;  %4290 = vmatprep.mubr.bf16.mxu0 %v3536_v9  ;;  %v11346_v44 = vld [vmem:[%s15362_s7] ss:$8 sps:$4 sm:$0xff]  }
 0x30c   : > { %v10046_v12 = vadd.f32 %v3332_v3, %v13247_v28  ;;  %v3334_v60 = vpop.f32.mrb[119].mxu1  ;;  %4291 = vmatmul.mubr.bf16.gmra.mrb[112].mxu0 %v3535_v5  ;;  %v3463_v31 = vmax.f32 %v10044_v51, 0.0 }
 0x30d   : > { %v10047_v33 = vadd.f32 %v3334_v60, %v13254_v38  ;;  %v3464_v48 = vmax.f32 %v10045_v59, 0.0 }
 0x30e   : > { %v3467_v46 = vmax.f32 %v10046_v12, 0.0  ;;  %v11351_v12 = vld [vmem:[%s15362_s7 + $0x14] ss:$8 sps:$4 sm:$0xff]  }
 0x30f   : > { %v3468_v36 = vmax.f32 %v10047_v33, 0.0 }
 0x310   : > { %v3539_v20 = vpack.c.bf16 %v3467_v46, %v3463_v31 }
 0x311   : > { %v3338_v47 = vpop.f32.mrb[120].mxu1  ;;  %v3540_v50 = vpack.c.bf16 %v3468_v36, %v3464_v48  ;;  %v11349_v36 = vld [vmem:[%s15362_s7 + $0x10] ss:$8 sps:$4 sm:$0xff]  }
 0x312   : > { %v10048_v32 = vadd.f32 %v3338_v47, %v13247_v28  ;;  %v3340_v39 = vpop.f32.mrb[121].mxu1 }
 0x313   : > { %v10049_v57 = vadd.f32 %v3340_v39, %v13254_v38  ;;  %v3342_v40 = vpop.f32.mrb[122].mxu1  ;;  %4300 = vmatprep.mubr.bf16.mxu0 %v3540_v50  ;;  %v11354_v50 = vld [vmem:[%s15362_s7 + $0x24] ss:$8 sps:$4 sm:$0xff]  }
 0x314   : > { %v10050_v61 = vadd.f32 %v3342_v40, %v13247_v28  ;;  %v3344_v34 = vpop.f32.mrb[123].mxu1  ;;  %4301 = vmatmul.mubr.bf16.gmra.mrb[116].mxu0 %v3539_v20  ;;  %v3471_v21 = vmax.f32 %v10048_v32, 0.0 }
 0x315   : > { %v10051_v6 = vadd.f32 %v3344_v34, %v13254_v38  ;;  %v3472_v7 = vmax.f32 %v10049_v57, 0.0  ;;  %v11352_v34 = vld [vmem:[%s15362_s7 + $0x20] ss:$8 sps:$4 sm:$0xff]  }
 0x316   : > { %v3475_v53 = vmax.f32 %v10050_v61, 0.0 }
 0x317   : > { %v3476_v41 = vmax.f32 %v10051_v6, 0.0 }
 0x318   : > { %v3543_v54 = vpack.c.bf16 %v3475_v53, %v3471_v21  ;;  %v11357_v53 = vld [vmem:[%s15362_s7 + $0x34] ss:$8 sps:$4 sm:$0xff]  }
 0x319   : > { %v3348_v1 = vpop.f32.mrb[124].mxu1  ;;  %v3544_v10 = vpack.c.bf16 %v3476_v41, %v3472_v7 }
 0x31a   : > { %v10052_v55 = vadd.f32 %v3348_v1, %v13247_v28  ;;  %v3350_v30 = vpop.f32.mrb[125].mxu1 }
 0x31b   : > { %v10053_v17 = vadd.f32 %v3350_v30, %v13254_v38  ;;  %v3352_v63 = vpop.f32.mrb[126].mxu1  ;;  %4310 = vmatprep.mubr.bf16.mxu0 %v3544_v10 }
 0x31c   : > { %v10054_v14 = vadd.f32 %v3352_v63, %v13247_v28  ;;  %v3354_v23 = vpop.f32.mrb[127].mxu1  ;;  %4311 = vmatmul.mubr.bf16.gmra.mrb[120].mxu0 %v3543_v54  ;;  %v3479_v15 = vmax.f32 %v10052_v55, 0.0  ;;  %v3613_v28 = vld [vmem:[%s15359_s4] sm:$0x3]  ;;  %v11355_v55 = vld [vmem:[%s15362_s7 + $0x30] ss:$8 sps:$4 sm:$0xff]  }
 0x31d   : > { %v10055_v56 = vadd.f32 %v3354_v23, %v13254_v38  ;;  %v3480_v11 = vmax.f32 %v10053_v17, 0.0  ;;  %v13399_v25 = vrot.slane %v3613_v28, %v15444_v29  ;;  %v15445_v38 = vld [vmem:[#allocation18_spill] sm:$0xff] }
 0x31e   : > { %v3483_v16 = vmax.f32 %v10054_v14, 0.0  ;;  %v13402_v42 = vrot.slane %v3613_v28, %v15445_v38  ;;  %v11360_v63 = vld [vmem:[%s15362_s7 + $0x44] ss:$8 sps:$4 sm:$0xff]  }
 0x31f   : > { %v3484_v13 = vmax.f32 %v10055_v56, 0.0 }
 0x320   : > { %v3547_v18 = vpack.c.bf16 %v3483_v16, %v3479_v15 }
 0x321   : > { %v3548_v19 = vpack.c.bf16 %v3484_v13, %v3480_v11  ;;  %v11358_v11 = vld [vmem:[%s15362_s7 + $0x40] ss:$8 sps:$4 sm:$0xff]  }
 0x323   : > { %4320 = vmatprep.mubr.bf16.mxu0 %v3548_v19  ;;  %v11363_v19 = vld [vmem:[%s15362_s7 + $0x54] ss:$8 sps:$4 sm:$0xff]  }
 0x324   : > { %4321 = vmatmul.mubr.bf16.gmra.mrb[124].mxu0 %v3547_v18 }
 0x37f   : > { %v4172_v43 = vpop.f32.mrb[64].mxu0 }
 0x380   : > { %v10056_v22 = vadd.f32 %v4172_v43, %v13399_v25  ;;  %v4174_v58 = vpop.f32.mrb[65].mxu0 }
 0x381   : > { %v10057_v2 = vadd.f32 %v4174_v58, %v13402_v42  ;;  %v4176_v26 = vpop.f32.mrb[66].mxu0 }
 0x382   : > { %v10058_v52 = vadd.f32 %v4176_v26, %v13399_v25  ;;  %v4178_v24 = vpop.f32.mrb[67].mxu0  ;;  %v4331_v45 = vmax.f32 %v10056_v22, 0.0 }
 0x383   : > { %v10059_v8 = vadd.f32 %v4178_v24, %v13402_v42  ;;  %v4332_v27 = vmax.f32 %v10057_v2, 0.0  ;;  %v11361_v2 = vld [vmem:[%s15362_s7 + $0x50] ss:$8 sps:$4 sm:$0xff]   ;;  %v11366_v24 = vld [vmem:[%s15362_s7 + $0x64] ss:$8 sps:$4 sm:$0xff]  }
 0x384   : > { %v4333_v4 = vmax.f32 %v10058_v52, 0.0 }
 0x385   : > { %v4334_v5 = vmax.f32 %v10059_v8, 0.0 }
 0x386   : > { %v4395_v49 = vpack.c.bf16 %v4333_v4, %v4331_v45 }
 0x387   : > { %v4396_v9 = vpack.c.bf16 %v4334_v5, %v4332_v27  ;;  %v4182_v51 = vpop.f32.mrb[68].mxu0 }
 0x388   : > { %v10060_v59 = vadd.f32 %v4182_v51, %v13399_v25  ;;  %v4184_v3 = vpop.f32.mrb[69].mxu0 }
 0x389   : > { %v10061_v60 = vadd.f32 %v4184_v3, %v13402_v42  ;;  %v4186_v33 = vpop.f32.mrb[70].mxu0  ;;  %4663 = vmatprep.mubr.bf16.mxu1 %v4396_v9 }
 0x38a   : > { %v10062_v31 = vadd.f32 %v4186_v33, %v13399_v25  ;;  %v4188_v46 = vpop.f32.mrb[71].mxu0  ;;  %4664 = vmatmul.mubr.bf16.vlgmr.msra.gmra.mrb[128].mxu1 %v4395_v49  ;;  %v4335_v20 = vmax.f32 %v10060_v59, 0.0  ;;  %v11364_v49 = vld [vmem:[%s15362_s7 + $0x60] ss:$8 sps:$4 sm:$0xff]  }
 0x38b   : > { %v10063_v48 = vadd.f32 %v4188_v46, %v13402_v42  ;;  %5125 = vmatpush1.bf16.msra.mxu1 %v11346_v44  ;;  %v4336_v32 = vmax.f32 %v10061_v60, 0.0  ;;  %v11369_v44 = vld [vmem:[%s15362_s7 + $0x74] ss:$8 sps:$4 sm:$0xff]  }
 0x38c   : > { %v4337_v47 = vmax.f32 %v10062_v31, 0.0  ;;  %5126 = vmatprep.subr.bf16.mxu1 %v11351_v12  ;;  %v11367_v31 = vld [vmem:[%s15362_s7 + $0x70] ss:$8 sps:$4 sm:$0xff]  }
 0x38d   : > { %v4338_v39 = vmax.f32 %v10063_v48, 0.0 }
 0x38e   : > { %v4397_v57 = vpack.c.bf16 %v4337_v47, %v4335_v20 }
 0x38f   : > { %v4398_v40 = vpack.c.bf16 %v4338_v39, %v4336_v32  ;;  %v4192_v61 = vpop.f32.mrb[72].mxu0  ;;  %5127 = vmatpush1.bf16.msra.mxu1 %v11349_v36  ;;  %v11372_v36 = vld [vmem:[%s15362_s7 + $0x84] ss:$8 sps:$4 sm:$0xff]  }
 0x390   : > { %v10064_v6 = vadd.f32 %v4192_v61, %v13399_v25  ;;  %v4194_v21 = vpop.f32.mrb[73].mxu0  ;;  %5128 = vmatprep.subr.bf16.mxu1 %v11354_v50 }
 0x391   : > { %v10065_v7 = vadd.f32 %v4194_v21, %v13402_v42  ;;  %v4196_v41 = vpop.f32.mrb[74].mxu0  ;;  %4673 = vmatprep.mubr.bf16.mxu1 %v4398_v40 }
 0x392   : > { %v10066_v54 = vadd.f32 %v4196_v41, %v13399_v25  ;;  %v4198_v1 = vpop.f32.mrb[75].mxu0  ;;  %4674 = vmatmul.mubr.bf16.gmra.mrb[132].mxu1 %v4397_v57  ;;  %v4339_v30 = vmax.f32 %v10064_v6, 0.0  ;;  %v11370_v57 = vld [vmem:[%s15362_s7 + $0x80] ss:$8 sps:$4 sm:$0xff]  }
 0x393   : > { %v10067_v10 = vadd.f32 %v4198_v1, %v13402_v42  ;;  %5129 = vmatpush1.bf16.msra.mxu1 %v11352_v34  ;;  %v4340_v14 = vmax.f32 %v10065_v7, 0.0  ;;  %v11375_v34 = vld [vmem:[%s15362_s7 + $0x94] ss:$8 sps:$4 sm:$0xff]  }
 0x394   : > { %v4341_v17 = vmax.f32 %v10066_v54, 0.0  ;;  %5130 = vmatprep.subr.bf16.mxu1 %v11357_v53  ;;  %v11373_v54 = vld [vmem:[%s15362_s7 + $0x90] ss:$8 sps:$4 sm:$0xff]  }
 0x395   : > { %v4342_v23 = vmax.f32 %v10067_v10, 0.0 }
 0x396   : > { %v4399_v56 = vpack.c.bf16 %v4341_v17, %v4339_v30 }
 0x397   : > { %v4400_v15 = vpack.c.bf16 %v4342_v23, %v4340_v14  ;;  %v4202_v16 = vpop.f32.mrb[76].mxu0  ;;  %5131 = vmatpush1.bf16.msra.mxu1 %v11355_v55  ;;  %v11378_v55 = vld [vmem:[%s15362_s7 + $0xa4] ss:$8 sps:$4 sm:$0xff]  }
 0x398   : > { %v10068_v13 = vadd.f32 %v4202_v16, %v13399_v25  ;;  %v4204_v18 = vpop.f32.mrb[77].mxu0  ;;  %5132 = vmatprep.subr.bf16.mxu1 %v11360_v63 }
 0x399   : > { %v10069_v0 = vadd.f32 %v4204_v18, %v13402_v42  ;;  %v4206_v28 = vpop.f32.mrb[78].mxu0  ;;  %4683 = vmatprep.mubr.bf16.mxu1 %v4400_v15 }
 0x39a   : > { %v10070_v43 = vadd.f32 %v4206_v28, %v13399_v25  ;;  %v4208_v22 = vpop.f32.mrb[79].mxu0  ;;  %4684 = vmatmul.mubr.bf16.gmra.mrb[136].mxu1 %v4399_v56  ;;  %v4343_v26 = vmax.f32 %v10068_v13, 0.0  ;;  %v11376_v56 = vld [vmem:[%s15362_s7 + $0xa0] ss:$8 sps:$4 sm:$0xff]  }
 0x39b   : > { %v10071_v58 = vadd.f32 %v4208_v22, %v13402_v42  ;;  %5133 = vmatpush1.bf16.msra.mxu1 %v11358_v11  ;;  %v4344_v8 = vmax.f32 %v10069_v0, 0.0  ;;  %v11381_v11 = vld [vmem:[%s15362_s7 + $0xb4] ss:$8 sps:$4 sm:$0xff]  }
 0x39c   : > { %v4345_v52 = vmax.f32 %v10070_v43, 0.0  ;;  %5134 = vmatprep.subr.bf16.mxu1 %v11363_v19  ;;  %v11379_v43 = vld [vmem:[%s15362_s7 + $0xb0] ss:$8 sps:$4 sm:$0xff]  }
 0x39d   : > { %v4346_v45 = vmax.f32 %v10071_v58, 0.0 }
 0x39e   : > { %v4401_v4 = vpack.c.bf16 %v4345_v52, %v4343_v26 }
 0x39f   : > { %v4402_v27 = vpack.c.bf16 %v4346_v45, %v4344_v8  ;;  %v4212_v5 = vpop.f32.mrb[80].mxu0  ;;  %5135 = vmatpush1.bf16.msra.mxu1 %v11361_v2  ;;  %v11384_v2 = vld [vmem:[%s15362_s7 + $0xc4] ss:$8 sps:$4 sm:$0xff]  }
 0x3a0   : > { %v10072_v9 = vadd.f32 %v4212_v5, %v13399_v25  ;;  %v4214_v51 = vpop.f32.mrb[81].mxu0  ;;  %5136 = vmatprep.subr.bf16.mxu1 %v11366_v24 }
 0x3a1   : > { %v10073_v59 = vadd.f32 %v4214_v51, %v13402_v42  ;;  %v4216_v3 = vpop.f32.mrb[82].mxu0  ;;  %4693 = vmatprep.mubr.bf16.mxu1 %v4402_v27 }
 0x3a2   : > { %v10074_v12 = vadd.f32 %v4216_v3, %v13399_v25  ;;  %v4218_v60 = vpop.f32.mrb[83].mxu0  ;;  %4694 = vmatmul.mubr.bf16.gmra.mrb[140].mxu1 %v4401_v4  ;;  %v4347_v46 = vmax.f32 %v10072_v9, 0.0  ;;  %v11382_v4 = vld [vmem:[%s15362_s7 + $0xc0] ss:$8 sps:$4 sm:$0xff]  }
 0x3a3   : > { %v10075_v33 = vadd.f32 %v4218_v60, %v13402_v42  ;;  %5137 = vmatpush1.bf16.msra.mxu1 %v11364_v49  ;;  %v4348_v20 = vmax.f32 %v10073_v59, 0.0  ;;  %v11387_v49 = vld [vmem:[%s15362_s7 + $0xd4] ss:$8 sps:$4 sm:$0xff]  }
 0x3a4   : > { %v4349_v48 = vmax.f32 %v10074_v12, 0.0  ;;  %5138 = vmatprep.subr.bf16.mxu1 %v11369_v44  ;;  %v11385_v12 = vld [vmem:[%s15362_s7 + $0xd0] ss:$8 sps:$4 sm:$0xff]  }
 0x3a5   : > { %v4350_v47 = vmax.f32 %v10075_v33, 0.0 }
 0x3a6   : > { %v4403_v50 = vpack.c.bf16 %v4349_v48, %v4347_v46 }
 0x3a7   : > { %v4404_v32 = vpack.c.bf16 %v4350_v47, %v4348_v20  ;;  %v4222_v39 = vpop.f32.mrb[84].mxu0  ;;  %5139 = vmatpush1.bf16.msra.mxu1 %v11367_v31  ;;  %v11390_v31 = vld [vmem:[%s15362_s7 + $0xe4] ss:$8 sps:$4 sm:$0xff]  }
 0x3a8   : > { %v10076_v40 = vadd.f32 %v4222_v39, %v13399_v25  ;;  %v4224_v61 = vpop.f32.mrb[85].mxu0  ;;  %5140 = vmatprep.subr.bf16.mxu1 %v11372_v36 }
 0x3a9   : > { %v10077_v6 = vadd.f32 %v4224_v61, %v13402_v42  ;;  %v4226_v21 = vpop.f32.mrb[86].mxu0  ;;  %4703 = vmatprep.mubr.bf16.mxu1 %v4404_v32 }
 0x3aa   : > { %v10078_v53 = vadd.f32 %v4226_v21, %v13399_v25  ;;  %v4228_v7 = vpop.f32.mrb[87].mxu0  ;;  %4704 = vmatmul.mubr.bf16.gmra.mrb[144].mxu1 %v4403_v50  ;;  %v4351_v1 = vmax.f32 %v10076_v40, 0.0  ;;  %v11388_v50 = vld [vmem:[%s15362_s7 + $0xe0] ss:$8 sps:$4 sm:$0xff]  }
 0x3ab   : > { %v10079_v41 = vadd.f32 %v4228_v7, %v13402_v42  ;;  %5141 = vmatpush1.bf16.msra.mxu1 %v11370_v57  ;;  %v4352_v30 = vmax.f32 %v10077_v6, 0.0 }
 0x3ac   : > { %v4353_v10 = vmax.f32 %v10078_v53, 0.0  ;;  %5142 = vmatprep.subr.bf16.mxu1 %v11375_v34 }
 0x3ad   : > { %v4354_v17 = vmax.f32 %v10079_v41, 0.0 }
 0x3ae   : > { %v4405_v63 = vpack.c.bf16 %v4353_v10, %v4351_v1 }
 0x3af   : > { %v4406_v14 = vpack.c.bf16 %v4354_v17, %v4352_v30  ;;  %v4232_v23 = vpop.f32.mrb[88].mxu0  ;;  %5143 = vmatpush1.bf16.msra.mxu1 %v11373_v54 }
 0x3b0   : > { %v10080_v15 = vadd.f32 %v4232_v23, %v13399_v25  ;;  %v4234_v16 = vpop.f32.mrb[89].mxu0  ;;  %5144 = vmatprep.subr.bf16.mxu1 %v11378_v55 }
 0x3b1   : > { %v10081_v13 = vadd.f32 %v4234_v16, %v13402_v42  ;;  %v4236_v18 = vpop.f32.mrb[90].mxu0  ;;  %4713 = vmatprep.mubr.bf16.mxu1 %v4406_v14 }
 0x3b2   : > { %v10082_v19 = vadd.f32 %v4236_v18, %v13399_v25  ;;  %v4238_v0 = vpop.f32.mrb[91].mxu0  ;;  %4714 = vmatmul.mubr.bf16.gmra.mrb[148].mxu1 %v4405_v63  ;;  %v4355_v22 = vmax.f32 %v10080_v15, 0.0 }
 0x3b3   : > { %v10083_v28 = vadd.f32 %v4238_v0, %v13402_v42  ;;  %5145 = vmatpush1.bf16.msra.mxu1 %v11376_v56  ;;  %v4356_v26 = vmax.f32 %v10081_v13, 0.0 }
 0x3b4   : > { %v4357_v58 = vmax.f32 %v10082_v19, 0.0  ;;  %5146 = vmatprep.subr.bf16.mxu1 %v11381_v11 }
 0x3b5   : > { %v4358_v52 = vmax.f32 %v10083_v28, 0.0 }
 0x3b6   : > { %v4407_v24 = vpack.c.bf16 %v4357_v58, %v4355_v22 }
 0x3b7   : > { %v4408_v8 = vpack.c.bf16 %v4358_v52, %v4356_v26  ;;  %v4242_v45 = vpop.f32.mrb[92].mxu0  ;;  %5147 = vmatpush1.bf16.msra.mxu1 %v11379_v43 }
 0x3b8   : > { %v10084_v27 = vadd.f32 %v4242_v45, %v13399_v25  ;;  %v4244_v5 = vpop.f32.mrb[93].mxu0  ;;  %5148 = vmatprep.subr.bf16.mxu1 %v11384_v2 }
 0x3b9   : > { %v10085_v9 = vadd.f32 %v4244_v5, %v13402_v42  ;;  %v4246_v51 = vpop.f32.mrb[94].mxu0  ;;  %4723 = vmatprep.mubr.bf16.mxu1 %v4408_v8 }
 0x3ba   : > { %v10086_v44 = vadd.f32 %v4246_v51, %v13399_v25  ;;  %v4248_v59 = vpop.f32.mrb[95].mxu0  ;;  %4724 = vmatmul.mubr.bf16.gmra.mrb[152].mxu1 %v4407_v24  ;;  %v4359_v60 = vmax.f32 %v10084_v27, 0.0 }
 0x3bb   : > { %v10087_v3 = vadd.f32 %v4248_v59, %v13402_v42  ;;  %5149 = vmatpush1.bf16.msra.mxu1 %v11382_v4  ;;  %v4360_v46 = vmax.f32 %v10085_v9, 0.0 }
 0x3bc   : > { %v4361_v33 = vmax.f32 %v10086_v44, 0.0  ;;  %5150 = vmatprep.subr.bf16.mxu1 %v11387_v49 }
 0x3bd   : > { %v4362_v48 = vmax.f32 %v10087_v3, 0.0 }
 0x3be   : > { %v4409_v36 = vpack.c.bf16 %v4361_v33, %v4359_v60 }
 0x3bf   : > { %v4410_v20 = vpack.c.bf16 %v4362_v48, %v4360_v46  ;;  %v4252_v47 = vpop.f32.mrb[96].mxu0  ;;  %5151 = vmatpush1.bf16.msra.mxu1 %v11385_v12 }
 0x3c0   : > { %v10088_v32 = vadd.f32 %v4252_v47, %v13399_v25  ;;  %v4254_v39 = vpop.f32.mrb[97].mxu0  ;;  %5152 = vmatprep.subr.bf16.mxu1 %v11390_v31 }
 0x3c1   : > { %v10089_v57 = vadd.f32 %v4254_v39, %v13402_v42  ;;  %v4256_v40 = vpop.f32.mrb[98].mxu0  ;;  %4733 = vmatprep.mubr.bf16.mxu1 %v4410_v20 }
 0x3c2   : > { %v10090_v61 = vadd.f32 %v4256_v40, %v13399_v25  ;;  %v4258_v34 = vpop.f32.mrb[99].mxu0  ;;  %4734 = vmatmul.mubr.bf16.gmra.mrb[156].mxu1 %v4409_v36  ;;  %v4363_v21 = vmax.f32 %v10088_v32, 0.0 }
 0x3c3   : > { %v10091_v6 = vadd.f32 %v4258_v34, %v13402_v42  ;;  %5153 = vmatpush1.bf16.msra.mxu1 %v11388_v50  ;;  %v4364_v7 = vmax.f32 %v10089_v57, 0.0  ;;  %v11393_v34 = vld [vmem:[%s15362_s7 + $0xf4] ss:$8 sps:$4 sm:$0xff]  }
 0x3c4   : > { %v4365_v53 = vmax.f32 %v10090_v61, 0.0  ;;  %5154 = vmatprep.subr.bf16.mxu1 %v11393_v34 }
 0x3c5   : > { %v4366_v41 = vmax.f32 %v10091_v6, 0.0 }
 0x3c6   : > { %v4411_v54 = vpack.c.bf16 %v4365_v53, %v4363_v21  ;;  %v11391_v21 = vld [vmem:[%s15362_s7 + $0xf0] ss:$8 sps:$4 sm:$0xff]  }
 0x3c7   : > { %v4412_v1 = vpack.c.bf16 %v4366_v41, %v4364_v7  ;;  %v4262_v10 = vpop.f32.mrb[100].mxu0  ;;  %5155 = vmatpush1.bf16.msra.mxu1 %v11391_v21  ;;  %v11403_v21 = vld [vmem:[%s15364_s9 + $0x60] ss:$16 sps:$4 sm:$0xff]  }
 0x3c8   : > { %v10092_v55 = vadd.f32 %v4262_v10, %v13399_v25  ;;  %v4264_v30 = vpop.f32.mrb[101].mxu0 }
 0x3c9   : > { %v10093_v17 = vadd.f32 %v4264_v30, %v13402_v42  ;;  %v4266_v63 = vpop.f32.mrb[102].mxu0  ;;  %4743 = vmatprep.mubr.bf16.mxu1 %v4412_v1 }
 0x3ca   : > { %v10094_v14 = vadd.f32 %v4266_v63, %v13399_v25  ;;  %v4268_v23 = vpop.f32.mrb[103].mxu0  ;;  %4744 = vmatmul.mubr.bf16.gmra.mrb[160].mxu1 %v4411_v54  ;;  %v4367_v15 = vmax.f32 %v10092_v55, 0.0 }
 0x3cb   : > { %v10095_v56 = vadd.f32 %v4268_v23, %v13402_v42  ;;  %v4368_v11 = vmax.f32 %v10093_v17, 0.0 }
 0x3cc   : > { %v4369_v16 = vmax.f32 %v10094_v14, 0.0 }
 0x3cd   : > { %v4370_v13 = vmax.f32 %v10095_v56, 0.0 }
 0x3ce   : > { %v4413_v18 = vpack.c.bf16 %v4369_v16, %v4367_v15 }
 0x3cf   : > { %v4414_v19 = vpack.c.bf16 %v4370_v13, %v4368_v11  ;;  %v4272_v0 = vpop.f32.mrb[104].mxu0 }
 0x3d0   : > { %v10096_v28 = vadd.f32 %v4272_v0, %v13399_v25  ;;  %v4274_v43 = vpop.f32.mrb[105].mxu0 }
 0x3d1   : > { %v10097_v22 = vadd.f32 %v4274_v43, %v13402_v42  ;;  %v4276_v58 = vpop.f32.mrb[106].mxu0  ;;  %4753 = vmatprep.mubr.bf16.mxu1 %v4414_v19 }
 0x3d2   : > { %v10098_v2 = vadd.f32 %v4276_v58, %v13399_v25  ;;  %v4278_v26 = vpop.f32.mrb[107].mxu0  ;;  %4754 = vmatmul.mubr.bf16.gmra.mrb[164].mxu1 %v4413_v18  ;;  %v4371_v24 = vmax.f32 %v10096_v28, 0.0 }
 0x3d3   : > { %v10099_v52 = vadd.f32 %v4278_v26, %v13402_v42  ;;  %v4372_v45 = vmax.f32 %v10097_v22, 0.0 }
 0x3d4   : > { %v4373_v8 = vmax.f32 %v10098_v2, 0.0 }
 0x3d5   : > { %v4374_v4 = vmax.f32 %v10099_v52, 0.0 }
 0x3d6   : > { %v4415_v27 = vpack.c.bf16 %v4373_v8, %v4371_v24 }
 0x3d7   : > { %v4416_v5 = vpack.c.bf16 %v4374_v4, %v4372_v45  ;;  %v4282_v49 = vpop.f32.mrb[108].mxu0 }
 0x3d8   : > { %v10100_v9 = vadd.f32 %v4282_v49, %v13399_v25  ;;  %v4284_v51 = vpop.f32.mrb[109].mxu0 }
 0x3d9   : > { %v10101_v44 = vadd.f32 %v4284_v51, %v13402_v42  ;;  %v4286_v59 = vpop.f32.mrb[110].mxu0  ;;  %4763 = vmatprep.mubr.bf16.mxu1 %v4416_v5 }
 0x3da   : > { %v10102_v3 = vadd.f32 %v4286_v59, %v13399_v25  ;;  %v4288_v12 = vpop.f32.mrb[111].mxu0  ;;  %4764 = vmatmul.mubr.bf16.gmra.mrb[168].mxu1 %v4415_v27  ;;  %v4375_v33 = vmax.f32 %v10100_v9, 0.0 }
 0x3db   : > { %v10103_v60 = vadd.f32 %v4288_v12, %v13402_v42  ;;  %v4376_v46 = vmax.f32 %v10101_v44, 0.0 }
 0x3dc   : > { %v4377_v31 = vmax.f32 %v10102_v3, 0.0 }
 0x3dd   : > { %v4378_v48 = vmax.f32 %v10103_v60, 0.0 }
 0x3de   : > { %v4417_v36 = vpack.c.bf16 %v4377_v31, %v4375_v33 }
 0x3df   : > { %v4418_v20 = vpack.c.bf16 %v4378_v48, %v4376_v46  ;;  %v4292_v47 = vpop.f32.mrb[112].mxu0 }
 0x3e0   : > { %v10104_v50 = vadd.f32 %v4292_v47, %v13399_v25  ;;  %v4294_v32 = vpop.f32.mrb[113].mxu0 }
 0x3e1   : > { %v10105_v39 = vadd.f32 %v4294_v32, %v13402_v42  ;;  %v4296_v57 = vpop.f32.mrb[114].mxu0  ;;  %4773 = vmatprep.mubr.bf16.mxu1 %v4418_v20  ;;  %v11399_v32 = vld [vmem:[%s15364_s9 + $0x24] ss:$16 sps:$4 sm:$0xff]  }
 0x3e2   : > { %v10106_v40 = vadd.f32 %v4296_v57, %v13399_v25  ;;  %v4298_v61 = vpop.f32.mrb[115].mxu0  ;;  %4774 = vmatmul.mubr.bf16.gmra.mrb[172].mxu1 %v4417_v36  ;;  %v4379_v53 = vmax.f32 %v10104_v50, 0.0  ;;  %v11394_v50 = vld [vmem:[%s15364_s9] ss:$16 sps:$4 sm:$0xff]  }
 0x3e3   : > { %v10107_v6 = vadd.f32 %v4298_v61, %v13402_v42  ;;  %v4380_v41 = vmax.f32 %v10105_v39, 0.0  ;;  %v4459_v39 = vld [vmem:[%s15361_s6] sm:$0x3] }
 0x3e4   : > { %v4381_v7 = vmax.f32 %v10106_v40, 0.0  ;;  %v11400_v57 = vld [vmem:[%s15364_s9 + $0x40] ss:$16 sps:$4 sm:$0xff]   ;;  %v11402_v40 = vld [vmem:[%s15364_s9 + $0x44] ss:$16 sps:$4 sm:$0xff]   ;;  %v13583_v61 = vrot.slane %v4459_v39, %v15444_v29  ;;  %v13586_v34 = vrot.slane %v4459_v39, %v15445_v38 }
 0x3e5   : > { %v4382_v54 = vmax.f32 %v10107_v6, 0.0 }
 0x3e6   : > { %v4419_v1 = vpack.c.bf16 %v4381_v7, %v4379_v53  ;;  %v11405_v53 = vld [vmem:[%s15364_s9 + $0x64] ss:$16 sps:$4 sm:$0xff]  }
 0x3e7   : > { %v4420_v10 = vpack.c.bf16 %v4382_v54, %v4380_v41  ;;  %v4302_v55 = vpop.f32.mrb[116].mxu0 }
 0x3e8   : > { %v10108_v30 = vadd.f32 %v4302_v55, %v13399_v25  ;;  %v4304_v17 = vpop.f32.mrb[117].mxu0 }
 0x3e9   : > { %v10109_v63 = vadd.f32 %v4304_v17, %v13402_v42  ;;  %v4306_v14 = vpop.f32.mrb[118].mxu0  ;;  %4783 = vmatprep.mubr.bf16.mxu1 %v4420_v10  ;;  %v11408_v17 = vld [vmem:[%s15364_s9 + $0x84] ss:$16 sps:$4 sm:$0xff]  }
 0x3ea   : > { %v10110_v23 = vadd.f32 %v4306_v14, %v13399_v25  ;;  %v4308_v56 = vpop.f32.mrb[119].mxu0  ;;  %4784 = vmatmul.mubr.bf16.gmra.mrb[176].mxu1 %v4419_v1  ;;  %v4383_v16 = vmax.f32 %v10108_v30, 0.0  ;;  %v11406_v30 = vld [vmem:[%s15364_s9 + $0x80] ss:$16 sps:$4 sm:$0xff]   ;;  %v11411_v14 = vld [vmem:[%s15364_s9 + $0xa4] ss:$16 sps:$4 sm:$0xff]  }
 0x3eb   : > { %v10111_v15 = vadd.f32 %v4308_v56, %v13402_v42  ;;  %v4384_v13 = vmax.f32 %v10109_v63, 0.0 }
 0x3ec   : > { %v4385_v11 = vmax.f32 %v10110_v23, 0.0 }
 0x3ed   : > { %v4386_v18 = vmax.f32 %v10111_v15, 0.0 }
 0x3ee   : > { %v4421_v19 = vpack.c.bf16 %v4385_v11, %v4383_v16 }
 0x3ef   : > { %v4422_v0 = vpack.c.bf16 %v4386_v18, %v4384_v13  ;;  %v4312_v28 = vpop.f32.mrb[120].mxu0  ;;  %v11409_v13 = vld [vmem:[%s15364_s9 + $0xa0] ss:$16 sps:$4 sm:$0xff]   ;;  %v11414_v18 = vld [vmem:[%s15364_s9 + $0xc4] ss:$16 sps:$4 sm:$0xff]  }
 0x3f0   : > { %v10112_v43 = vadd.f32 %v4312_v28, %v13399_v25  ;;  %v4314_v22 = vpop.f32.mrb[121].mxu0  ;;  %v11421_v28 = vld [vmem:[%s15364_s9 + $0x8] ss:$16 sps:$4 sm:$0xff]  }
 0x3f1   : > { %v10113_v58 = vadd.f32 %v4314_v22, %v13402_v42  ;;  %v4316_v2 = vpop.f32.mrb[122].mxu0  ;;  %4793 = vmatprep.mubr.bf16.mxu1 %v4422_v0 }
 0x3f2   : > { %v10114_v26 = vadd.f32 %v4316_v2, %v13399_v25  ;;  %v4318_v52 = vpop.f32.mrb[123].mxu0  ;;  %4794 = vmatmul.mubr.bf16.gmra.mrb[180].mxu1 %v4421_v19  ;;  %v4387_v8 = vmax.f32 %v10112_v43, 0.0  ;;  %v11423_v43 = vld [vmem:[%s15364_s9 + $0xc] ss:$16 sps:$4 sm:$0xff]  }
 0x3f3   : > { %v10115_v24 = vadd.f32 %v4318_v52, %v13402_v42  ;;  %v4388_v4 = vmax.f32 %v10113_v58, 0.0  ;;  %v11426_v2 = vld [vmem:[%s15364_s9 + $0x2c] ss:$16 sps:$4 sm:$0xff]   ;;  %6012 = vmatprep.subr.bf16.mxu1 %v11423_v43 }
 0x3f4   : > { %v4389_v45 = vmax.f32 %v10114_v26, 0.0 }
 0x3f5   : > { %v4390_v27 = vmax.f32 %v10115_v24, 0.0 }
 0x3f6   : > { %v4423_v5 = vpack.c.bf16 %v4389_v45, %v4387_v8  ;;  %v11412_v45 = vld [vmem:[%s15364_s9 + $0xc0] ss:$16 sps:$4 sm:$0xff]  }
 0x3f7   : > { %v4424_v49 = vpack.c.bf16 %v4390_v27, %v4388_v4  ;;  %v4322_v9 = vpop.f32.mrb[124].mxu0  ;;  %v11417_v27 = vld [vmem:[%s15364_s9 + $0xe4] ss:$16 sps:$4 sm:$0xff]  }
 0x3f8   : > { %v10116_v51 = vadd.f32 %v4322_v9, %v13399_v25  ;;  %v4324_v44 = vpop.f32.mrb[125].mxu0 }
 0x3f9   : > { %v10117_v59 = vadd.f32 %v4324_v44, %v13402_v42  ;;  %v4326_v3 = vpop.f32.mrb[126].mxu0  ;;  %4803 = vmatprep.mubr.bf16.mxu1 %v4424_v49 }
 0x3fa   : > { %v10118_v12 = vadd.f32 %v4326_v3, %v13399_v25  ;;  %v4328_v60 = vpop.f32.mrb[127].mxu0  ;;  %4804 = vmatmul.mubr.bf16.gmra.mrb[184].mxu1 %v4423_v5  ;;  %v4391_v31 = vmax.f32 %v10116_v51, 0.0  ;;  %v11396_v25 = vld [vmem:[%s15364_s9 + $0x4] ss:$16 sps:$4 sm:$0xff]   ;;  %v11424_v5 = vld [vmem:[%s15364_s9 + $0x28] ss:$16 sps:$4 sm:$0xff]  }
 0x3fb   : > { %v10119_v33 = vadd.f32 %v4328_v60, %v13402_v42  ;;  %v4392_v48 = vmax.f32 %v10117_v59, 0.0  ;;  %5819 = vmatprep.subr.bf16.mxu0 %v11396_v25  ;;  %v11397_v42 = vld [vmem:[%s15364_s9 + $0x20] ss:$16 sps:$4 sm:$0xff]   ;;  %v11432_v51 = vld [vmem:[%s15364_s9 + $0x4c] ss:$16 sps:$4 sm:$0xff]  }
 0x3fc   : > { %v4393_v46 = vmax.f32 %v10118_v12, 0.0  ;;  %5820 = vmatpush1.bf16.msra.mxu0 %v11394_v50  ;;  %v11415_v12 = vld [vmem:[%s15364_s9 + $0xe0] ss:$16 sps:$4 sm:$0xff]  }
 0x3fd   : > { %v4394_v36 = vmax.f32 %v10119_v33, 0.0  ;;  %5821 = vmatprep.subr.bf16.mxu0 %v11399_v32  ;;  %v11418_v32 = vld [vmem:[%s15364_s9 + $0x100] ss:$16 sps:$4 sm:$0xff]  }
 0x3fe   : > { %v4425_v20 = vpack.c.bf16 %v4393_v46, %v4391_v31  ;;  %v11420_v31 = vld [vmem:[%s15364_s9 + $0x104] ss:$16 sps:$4 sm:$0xff]   ;;  %v11430_v46 = vld [vmem:[%s15364_s9 + $0x48] ss:$16 sps:$4 sm:$0xff]  }
 0x3ff   : > { %v4426_v47 = vpack.c.bf16 %v4394_v36, %v4392_v48 }
 0x400   : > { %5822 = vmatpush1.bf16.msra.mxu0 %v11397_v42 }
 0x401   : > { %4813 = vmatprep.mubr.bf16.mxu1 %v4426_v47  ;;  %5823 = vmatprep.subr.bf16.mxu0 %v11402_v40  ;;  %v11433_v40 = vld [vmem:[%s15364_s9 + $0x68] ss:$16 sps:$4 sm:$0xff]  }
 0x402   : > { %4814 = vmatmul.mubr.bf16.gmra.mrb[188].mxu1 %v4425_v20  ;;  %v11435_v20 = vld [vmem:[%s15364_s9 + $0x6c] ss:$16 sps:$4 sm:$0xff]  }
 0x404   : > { %5824 = vmatpush1.bf16.msra.mxu0 %v11400_v57  ;;  %v11429_v57 = vld [vmem:[%s15364_s9 + $0x124] ss:$16 sps:$4 sm:$0xff]  }
 0x405   : > { %5825 = vmatprep.subr.bf16.mxu0 %v11405_v53  ;;  %v11441_v53 = vld [vmem:[%s15364_s9 + $0x8c] ss:$16 sps:$4 sm:$0xff]  }
 0x408   : > { %5826 = vmatpush1.bf16.msra.mxu0 %v11403_v21 }
 0x409   : > { %5827 = vmatprep.subr.bf16.mxu0 %v11408_v17  ;;  %v11439_v17 = vld [vmem:[%s15364_s9 + $0x88] ss:$16 sps:$4 sm:$0xff]  }
 0x40c   : > { %5828 = vmatpush1.bf16.msra.mxu0 %v11406_v30  ;;  %v11438_v30 = vld [vmem:[%s15364_s9 + $0x144] ss:$16 sps:$4 sm:$0xff]  }
 0x40d   : > { %5829 = vmatprep.subr.bf16.mxu0 %v11411_v14 }
 0x410   : > { %5830 = vmatpush1.bf16.msra.mxu0 %v11409_v13  ;;  %v11436_v13 = vld [vmem:[%s15364_s9 + $0x140] ss:$16 sps:$4 sm:$0xff]  }
 0x411   : > { %5831 = vmatprep.subr.bf16.mxu0 %v11414_v18 }
 0x414   : > { %5832 = vmatpush1.bf16.msra.mxu0 %v11412_v45  ;;  %v11448_v45 = vld [vmem:[%s15364_s9 + $0xc8] ss:$16 sps:$4 sm:$0xff]  }
 0x415   : > { %5833 = vmatprep.subr.bf16.mxu0 %v11417_v27 }
 0x418   : > { %5834 = vmatpush1.bf16.msra.mxu0 %v11415_v12 }
 0x419   : > { %5835 = vmatprep.subr.bf16.mxu0 %v11420_v31 }
 0x41c   : > { %5836 = vmatpush1.bf16.msra.mxu0 %v11418_v32  ;;  %v11457_v32 = vld [vmem:[%s15364_s9 + $0x108] ss:$16 sps:$4 sm:$0xff]  }
 0x41d   : > { %5837 = vmatprep.subr.bf16.mxu0 %v11429_v57 }
 0x45d   : > { %v4665_v6 = vpop.f32.mrb[128].mxu1 }
 0x45e   : > { %v4666_v7 = vadd.f32 %v4665_v6, %v13583_v61  ;;  %v4667_v41 = vpop.f32.mrb[129].mxu1 }
 0x45f   : > { %v4668_v54 = vadd.f32 %v4667_v41, %v13586_v34  ;;  %v4669_v1 = vpop.f32.mrb[130].mxu1 }
 0x460   : > { %v4670_v10 = vadd.f32 %v4669_v1, %v13583_v61  ;;  %v4671_v55 = vpop.f32.mrb[131].mxu1  ;;  %v4824_v23 = vmax.f32 %v4666_v7, 0.0  ;;  %v11427_v1 = vld [vmem:[%s15364_s9 + $0x120] ss:$16 sps:$4 sm:$0xff]  }
 0x461   : > { %v4672_v63 = vadd.f32 %v4671_v55, %v13586_v34  ;;  %v4825_v15 = vmax.f32 %v4668_v54, 0.0  ;;  %5838 = vmatpush1.bf16.msra.mxu0 %v11427_v1 }
 0x462   : > { %v4826_v56 = vmax.f32 %v4670_v10, 0.0  ;;  %5839 = vmatprep.subr.bf16.mxu0 %v11438_v30 }
 0x463   : > { %v4827_v16 = vmax.f32 %v4672_v63, 0.0 }
 0x464   : > { %v4888_v11 = vpack.c.bf16 %v4826_v56, %v4824_v23  ;;  %v11444_v23 = vld [vmem:[%s15364_s9 + $0xac] ss:$16 sps:$4 sm:$0xff]  }
 0x465   : > { %v4889_v19 = vpack.c.bf16 %v4827_v16, %v4825_v15  ;;  %v4675_v0 = vpop.f32.mrb[132].mxu1  ;;  %5840 = vmatpush1.bf16.msra.mxu0 %v11436_v13 }
 0x466   : > { %v4676_v22 = vadd.f32 %v4675_v0, %v13583_v61  ;;  %v4677_v58 = vpop.f32.mrb[133].mxu1  ;;  %v11447_v0 = vld [vmem:[%s15364_s9 + $0x164] ss:$16 sps:$4 sm:$0xff]  }
 0x467   : > { %v4678_v26 = vadd.f32 %v4677_v58, %v13586_v34  ;;  %v4679_v52 = vpop.f32.mrb[134].mxu1  ;;  %5156 = vmatprep.mubr.bf16.mxu1 %v4889_v19  ;;  %v11442_v19 = vld [vmem:[%s15364_s9 + $0xa8] ss:$16 sps:$4 sm:$0xff]   ;;  %5841 = vmatprep.subr.bf16.mxu0 %v11447_v0 }
 0x468   : > { %v4680_v24 = vadd.f32 %v4679_v52, %v13583_v61  ;;  %v4681_v8 = vpop.f32.mrb[135].mxu1  ;;  %5157 = vmatmul.mubr.bf16.vlgmr.msra.gmra.mrb[192].mxu1 %v4888_v11  ;;  %v4828_v49 = vmax.f32 %v4676_v22, 0.0  ;;  %v11450_v22 = vld [vmem:[%s15364_s9 + $0xcc] ss:$16 sps:$4 sm:$0xff]   ;;  %v11445_v52 = vld [vmem:[%s15364_s9 + $0x160] ss:$16 sps:$4 sm:$0xff]  }
 0x469   : > { %v4682_v4 = vadd.f32 %v4681_v8, %v13586_v34  ;;  %6013 = vmatpush1.bf16.msra.mxu1 %v11421_v28  ;;  %v4829_v44 = vmax.f32 %v4678_v26, 0.0  ;;  %5842 = vmatpush1.bf16.msra.mxu0 %v11445_v52  ;;  %v11477_v52 = vld [vmem:[%s15364_s9 + $0x18c] ss:$16 sps:$4 sm:$0xff]  }
 0x46a   : > { %v4830_v9 = vmax.f32 %v4680_v24, 0.0  ;;  %6014 = vmatprep.subr.bf16.mxu1 %v11426_v2 }
 0x46b   : > { %v4831_v59 = vmax.f32 %v4682_v4, 0.0  ;;  %v11456_v4 = vld [vmem:[%s15364_s9 + $0x184] ss:$16 sps:$4 sm:$0xff]  }
 0x46c   : > { %v4890_v3 = vpack.c.bf16 %v4830_v9, %v4828_v49  ;;  %v11453_v49 = vld [vmem:[%s15364_s9 + $0xec] ss:$16 sps:$4 sm:$0xff]   ;;  %5843 = vmatprep.subr.bf16.mxu0 %v11456_v4 }
 0x46d   : > { %v4891_v60 = vpack.c.bf16 %v4831_v59, %v4829_v44  ;;  %v4685_v33 = vpop.f32.mrb[136].mxu1  ;;  %6015 = vmatpush1.bf16.msra.mxu1 %v11424_v5 }
 0x46e   : > { %v4686_v48 = vadd.f32 %v4685_v33, %v13583_v61  ;;  %v4687_v36 = vpop.f32.mrb[137].mxu1  ;;  %6016 = vmatprep.subr.bf16.mxu1 %v11432_v51  ;;  %v11465_v33 = vld [vmem:[%s15364_s9 + $0x1a4] ss:$16 sps:$4 sm:$0xff]  }
 0x46f   : > { %v4688_v47 = vadd.f32 %v4687_v36, %v13586_v34  ;;  %v4689_v50 = vpop.f32.mrb[138].mxu1  ;;  %5166 = vmatprep.mubr.bf16.mxu1 %v4891_v60  ;;  %v11451_v60 = vld [vmem:[%s15364_s9 + $0xe8] ss:$16 sps:$4 sm:$0xff]  }
 0x470   : > { %v4690_v25 = vadd.f32 %v4689_v50, %v13583_v61  ;;  %v4691_v42 = vpop.f32.mrb[139].mxu1  ;;  %5167 = vmatmul.mubr.bf16.gmra.mrb[196].mxu1 %v4890_v3  ;;  %v4832_v6 = vmax.f32 %v4686_v48, 0.0  ;;  %v11454_v3 = vld [vmem:[%s15364_s9 + $0x180] ss:$16 sps:$4 sm:$0xff]   ;;  %v11459_v48 = vld [vmem:[%s15364_s9 + $0x10c] ss:$16 sps:$4 sm:$0xff]  }
 0x471   : > { %v4692_v39 = vadd.f32 %v4691_v42, %v13586_v34  ;;  %6017 = vmatpush1.bf16.msra.mxu1 %v11430_v46  ;;  %v4833_v7 = vmax.f32 %v4688_v47, 0.0  ;;  %5844 = vmatpush1.bf16.msra.mxu0 %v11454_v3  ;;  %v11463_v50 = vld [vmem:[%s15364_s9 + $0x1a0] ss:$16 sps:$4 sm:$0xff]  }
 0x472   : > { %v4834_v21 = vmax.f32 %v4690_v25, 0.0  ;;  %6018 = vmatprep.subr.bf16.mxu1 %v11435_v20  ;;  %5845 = vmatprep.subr.bf16.mxu0 %v11465_v33  ;;  %v11478_v33 = vld [vmem:[%s15364_s9 + $0x1a8] ss:$16 sps:$4 sm:$0xff]  }
 0x473   : > { %v4835_v41 = vmax.f32 %v4692_v39, 0.0  ;;  %v11474_v39 = vld [vmem:[%s15364_s9 + $0x1c4] ss:$16 sps:$4 sm:$0xff]  }
 0x474   : > { %v4892_v54 = vpack.c.bf16 %v4834_v21, %v4832_v6  ;;  %v11462_v6 = vld [vmem:[%s15364_s9 + $0x12c] ss:$16 sps:$4 sm:$0xff]  }
 0x475   : > { %v4893_v10 = vpack.c.bf16 %v4835_v41, %v4833_v7  ;;  %v4695_v55 = vpop.f32.mrb[140].mxu1  ;;  %6019 = vmatpush1.bf16.msra.mxu1 %v11433_v40  ;;  %5846 = vmatpush1.bf16.msra.mxu0 %v11463_v50 }
 0x476   : > { %v4696_v63 = vadd.f32 %v4695_v55, %v13583_v61  ;;  %v4697_v14 = vpop.f32.mrb[141].mxu1  ;;  %6020 = vmatprep.subr.bf16.mxu1 %v11441_v53  ;;  %5847 = vmatprep.subr.bf16.mxu0 %v11474_v39 }
 0x477   : > { %v4698_v56 = vadd.f32 %v4697_v14, %v13586_v34  ;;  %v4699_v15 = vpop.f32.mrb[142].mxu1  ;;  %5176 = vmatprep.mubr.bf16.mxu1 %v4893_v10  ;;  %v11460_v10 = vld [vmem:[%s15364_s9 + $0x128] ss:$16 sps:$4 sm:$0xff]  }
 0x478   : > { %v4700_v16 = vadd.f32 %v4699_v15, %v13583_v61  ;;  %v4701_v11 = vpop.f32.mrb[143].mxu1  ;;  %5177 = vmatmul.mubr.bf16.gmra.mrb[200].mxu1 %v4892_v54  ;;  %v4836_v28 = vmax.f32 %v4696_v63, 0.0  ;;  %v11472_v54 = vld [vmem:[%s15364_s9 + $0x1c0] ss:$16 sps:$4 sm:$0xff]  }
 0x479   : > { %v4702_v18 = vadd.f32 %v4701_v11, %v13586_v34  ;;  %6021 = vmatpush1.bf16.msra.mxu1 %v11439_v17  ;;  %v4837_v58 = vmax.f32 %v4698_v56, 0.0  ;;  %v11468_v17 = vld [vmem:[%s15364_s9 + $0x14c] ss:$16 sps:$4 sm:$0xff]   ;;  %5848 = vmatpush1.bf16.msra.mxu0 %v11472_v54 }
 0x47a   : > { %v4838_v43 = vmax.f32 %v4700_v16, 0.0  ;;  %6022 = vmatprep.subr.bf16.mxu1 %v11444_v23  ;;  %v11466_v16 = vld [vmem:[%s15364_s9 + $0x148] ss:$16 sps:$4 sm:$0xff]  }
 0x47b   : > { %v4839_v2 = vmax.f32 %v4702_v18, 0.0  ;;  %v11471_v18 = vld [vmem:[%s15364_s9 + $0x16c] ss:$16 sps:$4 sm:$0xff]  }
 0x47c   : > { %v4894_v26 = vpack.c.bf16 %v4838_v43, %v4836_v28 }
 0x47d   : > { %v4895_v24 = vpack.c.bf16 %v4839_v2, %v4837_v58  ;;  %v4705_v8 = vpop.f32.mrb[144].mxu1  ;;  %6023 = vmatpush1.bf16.msra.mxu1 %v11442_v19  ;;  %v11469_v58 = vld [vmem:[%s15364_s9 + $0x168] ss:$16 sps:$4 sm:$0xff]  }
 0x47e   : > { %v4706_v27 = vadd.f32 %v4705_v8, %v13583_v61  ;;  %v4707_v5 = vpop.f32.mrb[145].mxu1  ;;  %6024 = vmatprep.subr.bf16.mxu1 %v11450_v22 }
 0x47f   : > { %v4708_v9 = vadd.f32 %v4707_v5, %v13586_v34  ;;  %v4709_v51 = vpop.f32.mrb[146].mxu1  ;;  %5186 = vmatprep.mubr.bf16.mxu1 %v4895_v24  ;;  %v11475_v5 = vld [vmem:[%s15364_s9 + $0x188] ss:$16 sps:$4 sm:$0xff]  }
 0x480   : > { %v4710_v44 = vadd.f32 %v4709_v51, %v13583_v61  ;;  %v4711_v59 = vpop.f32.mrb[147].mxu1  ;;  %5187 = vmatmul.mubr.bf16.gmra.mrb[204].mxu1 %v4894_v26  ;;  %v4840_v31 = vmax.f32 %v4706_v27, 0.0  ;;  %v11480_v51 = vld [vmem:[%s15364_s9 + $0x1ac] ss:$16 sps:$4 sm:$0xff]  }
 0x481   : > { %v4712_v12 = vadd.f32 %v4711_v59, %v13586_v34  ;;  %6025 = vmatpush1.bf16.msra.mxu1 %v11448_v45  ;;  %v4841_v36 = vmax.f32 %v4708_v9, 0.0 }
 0x482   : > { %v4842_v46 = vmax.f32 %v4710_v44, 0.0  ;;  %6026 = vmatprep.subr.bf16.mxu1 %v11453_v49 }
 0x483   : > { %v4843_v20 = vmax.f32 %v4712_v12, 0.0 }
 0x484   : > { %v4896_v47 = vpack.c.bf16 %v4842_v46, %v4840_v31 }
 0x485   : > { %v4897_v25 = vpack.c.bf16 %v4843_v20, %v4841_v36  ;;  %v4715_v42 = vpop.f32.mrb[148].mxu1  ;;  %6027 = vmatpush1.bf16.msra.mxu1 %v11451_v60 }
 0x486   : > { %v4716_v57 = vadd.f32 %v4715_v42, %v13583_v61  ;;  %v4717_v40 = vpop.f32.mrb[149].mxu1  ;;  %6028 = vmatprep.subr.bf16.mxu1 %v11459_v48 }
 0x487   : > { %v4718_v21 = vadd.f32 %v4717_v40, %v13586_v34  ;;  %v4719_v53 = vpop.f32.mrb[150].mxu1  ;;  %5196 = vmatprep.mubr.bf16.mxu1 %v4897_v25 }
 0x488   : > { %v4720_v7 = vadd.f32 %v4719_v53, %v13583_v61  ;;  %v4721_v41 = vpop.f32.mrb[151].mxu1  ;;  %5197 = vmatmul.mubr.bf16.gmra.mrb[208].mxu1 %v4896_v47  ;;  %v4844_v55 = vmax.f32 %v4716_v57, 0.0 }
 0x489   : > { %v4722_v1 = vadd.f32 %v4721_v41, %v13586_v34  ;;  %6029 = vmatpush1.bf16.msra.mxu1 %v11457_v32  ;;  %v4845_v63 = vmax.f32 %v4718_v21, 0.0 }
 0x48a   : > { %v4846_v30 = vmax.f32 %v4720_v7, 0.0  ;;  %6030 = vmatprep.subr.bf16.mxu1 %v11462_v6 }
 0x48b   : > { %v4847_v14 = vmax.f32 %v4722_v1, 0.0 }
 0x48c   : > { %v4898_v23 = vpack.c.bf16 %v4846_v30, %v4844_v55 }
 0x48d   : > { %v4899_v56 = vpack.c.bf16 %v4847_v14, %v4845_v63  ;;  %v4725_v15 = vpop.f32.mrb[152].mxu1  ;;  %6031 = vmatpush1.bf16.msra.mxu1 %v11460_v10 }
 0x48e   : > { %v4726_v11 = vadd.f32 %v4725_v15, %v13583_v61  ;;  %v4727_v13 = vpop.f32.mrb[153].mxu1  ;;  %6032 = vmatprep.subr.bf16.mxu1 %v11468_v17 }
 0x48f   : > { %v4728_v19 = vadd.f32 %v4727_v13, %v13586_v34  ;;  %v4729_v0 = vpop.f32.mrb[154].mxu1  ;;  %5206 = vmatprep.mubr.bf16.mxu1 %v4899_v56 }
 0x490   : > { %v4730_v28 = vadd.f32 %v4729_v0, %v13583_v61  ;;  %v4731_v43 = vpop.f32.mrb[155].mxu1  ;;  %5207 = vmatmul.mubr.bf16.gmra.mrb[212].mxu1 %v4898_v23  ;;  %v4848_v2 = vmax.f32 %v4726_v11, 0.0 }
 0x491   : > { %v4732_v22 = vadd.f32 %v4731_v43, %v13586_v34  ;;  %6033 = vmatpush1.bf16.msra.mxu1 %v11466_v16  ;;  %v4849_v24 = vmax.f32 %v4728_v19, 0.0 }
 0x492   : > { %v4850_v26 = vmax.f32 %v4730_v28, 0.0  ;;  %6034 = vmatprep.subr.bf16.mxu1 %v11471_v18 }
 0x493   : > { %v4851_v8 = vmax.f32 %v4732_v22, 0.0 }
 0x494   : > { %v4900_v45 = vpack.c.bf16 %v4850_v26, %v4848_v2 }
 0x495   : > { %v4901_v4 = vpack.c.bf16 %v4851_v8, %v4849_v24  ;;  %v4735_v27 = vpop.f32.mrb[156].mxu1  ;;  %6035 = vmatpush1.bf16.msra.mxu1 %v11469_v58 }
 0x496   : > { %v4736_v49 = vadd.f32 %v4735_v27, %v13583_v61  ;;  %v4737_v9 = vpop.f32.mrb[157].mxu1  ;;  %6036 = vmatprep.subr.bf16.mxu1 %v11477_v52 }
 0x497   : > { %v4738_v44 = vadd.f32 %v4737_v9, %v13586_v34  ;;  %v4739_v59 = vpop.f32.mrb[158].mxu1  ;;  %5216 = vmatprep.mubr.bf16.mxu1 %v4901_v4 }
 0x498   : > { %v4740_v3 = vadd.f32 %v4739_v59, %v13583_v61  ;;  %v4741_v12 = vpop.f32.mrb[159].mxu1  ;;  %5217 = vmatmul.mubr.bf16.gmra.mrb[216].mxu1 %v4900_v45  ;;  %v4852_v31 = vmax.f32 %v4736_v49, 0.0 }
 0x499   : > { %v4742_v60 = vadd.f32 %v4741_v12, %v13586_v34  ;;  %6037 = vmatpush1.bf16.msra.mxu1 %v11475_v5  ;;  %v4853_v48 = vmax.f32 %v4738_v44, 0.0 }
 0x49a   : > { %v4854_v46 = vmax.f32 %v4740_v3, 0.0  ;;  %6038 = vmatprep.subr.bf16.mxu1 %v11480_v51 }
 0x49b   : > { %v4855_v36 = vmax.f32 %v4742_v60, 0.0 }
 0x49c   : > { %v4902_v20 = vpack.c.bf16 %v4854_v46, %v4852_v31 }
 0x49d   : > { %v4903_v47 = vpack.c.bf16 %v4855_v36, %v4853_v48  ;;  %v4745_v50 = vpop.f32.mrb[160].mxu1  ;;  %6039 = vmatpush1.bf16.msra.mxu1 %v11478_v33 }
 0x49e   : > { %v4746_v25 = vadd.f32 %v4745_v50, %v13583_v61  ;;  %v4747_v42 = vpop.f32.mrb[161].mxu1 }
 0x49f   : > { %v4748_v32 = vadd.f32 %v4747_v42, %v13586_v34  ;;  %v4749_v39 = vpop.f32.mrb[162].mxu1  ;;  %5226 = vmatprep.mubr.bf16.mxu1 %v4903_v47 }
 0x4a0   : > { %v4750_v57 = vadd.f32 %v4749_v39, %v13583_v61  ;;  %v4751_v40 = vpop.f32.mrb[163].mxu1  ;;  %5227 = vmatmul.mubr.bf16.gmra.mrb[220].mxu1 %v4902_v20  ;;  %v4856_v21 = vmax.f32 %v4746_v25, 0.0  ;;  %v11486_v20 = vld [vmem:[%s15364_s9 + $0x1cc] ss:$16 sps:$4 sm:$0xff]   ;;  %v11484_v25 = vld [vmem:[%s15364_s9 + $0x1c8] ss:$16 sps:$4 sm:$0xff]  }
 0x4a1   : > { %v4752_v6 = vadd.f32 %v4751_v40, %v13586_v34  ;;  %v4857_v7 = vmax.f32 %v4748_v32, 0.0  ;;  %6040 = vmatprep.subr.bf16.mxu1 %v11486_v20 }
 0x4a2   : > { %v4858_v53 = vmax.f32 %v4750_v57, 0.0  ;;  %6041 = vmatpush1.bf16.msra.mxu1 %v11484_v25 }
 0x4a3   : > { %v4859_v41 = vmax.f32 %v4752_v6, 0.0 }
 0x4a4   : > { %v4904_v54 = vpack.c.bf16 %v4858_v53, %v4856_v21  ;;  %v11483_v21 = vld [vmem:[%s15364_s9 + $0x1e4] ss:$16 sps:$4 sm:$0xff]   ;;  %v11489_v53 = vld [vmem:[%s15364_s9 + $0x1ec] ss:$16 sps:$4 sm:$0xff]  }
 0x4a5   : > { %v4905_v1 = vpack.c.bf16 %v4859_v41, %v4857_v7  ;;  %v4755_v10 = vpop.f32.mrb[164].mxu1  ;;  %v11481_v41 = vld [vmem:[%s15364_s9 + $0x1e0] ss:$16 sps:$4 sm:$0xff]   ;;  %5849 = vmatprep.subr.bf16.mxu0 %v11483_v21  ;;  %6042 = vmatprep.subr.bf16.mxu1 %v11489_v53 }
 0x4a6   : > { %v4756_v55 = vadd.f32 %v4755_v10, %v13583_v61  ;;  %v4757_v30 = vpop.f32.mrb[165].mxu1  ;;  %5850 = vmatpush1.bf16.msra.mxu0 %v11481_v41 }
 0x4a7   : > { %v4758_v17 = vadd.f32 %v4757_v30, %v13586_v34  ;;  %v4759_v63 = vpop.f32.mrb[166].mxu1  ;;  %5236 = vmatprep.mubr.bf16.mxu1 %v4905_v1 }
 0x4a8   : > { %v4760_v14 = vadd.f32 %v4759_v63, %v13583_v61  ;;  %v4761_v23 = vpop.f32.mrb[167].mxu1  ;;  %5237 = vmatmul.mubr.bf16.gmra.mrb[224].mxu1 %v4904_v54  ;;  %v4860_v15 = vmax.f32 %v4756_v55, 0.0  ;;  %v11487_v54 = vld [vmem:[%s15364_s9 + $0x1e8] ss:$16 sps:$4 sm:$0xff]  }
 0x4a9   : > { %v4762_v56 = vadd.f32 %v4761_v23, %v13586_v34  ;;  %v4861_v11 = vmax.f32 %v4758_v17, 0.0  ;;  %6043 = vmatpush1.bf16.msra.mxu1 %v11487_v54 }
 0x4aa   : > { %v4862_v16 = vmax.f32 %v4760_v14, 0.0 }
 0x4ab   : > { %v4863_v13 = vmax.f32 %v4762_v56, 0.0 }
 0x4ac   : > { %v4906_v18 = vpack.c.bf16 %v4862_v16, %v4860_v15 }
 0x4ad   : > { %v4907_v19 = vpack.c.bf16 %v4863_v13, %v4861_v11  ;;  %v4765_v0 = vpop.f32.mrb[168].mxu1 }
 0x4ae   : > { %v4766_v28 = vadd.f32 %v4765_v0, %v13583_v61  ;;  %v4767_v43 = vpop.f32.mrb[169].mxu1 }
 0x4af   : > { %v4768_v22 = vadd.f32 %v4767_v43, %v13586_v34  ;;  %v4769_v58 = vpop.f32.mrb[170].mxu1  ;;  %5246 = vmatprep.mubr.bf16.mxu1 %v4907_v19 }
 0x4b0   : > { %v4770_v2 = vadd.f32 %v4769_v58, %v13583_v61  ;;  %v4771_v26 = vpop.f32.mrb[171].mxu1  ;;  %5247 = vmatmul.mubr.bf16.gmra.mrb[228].mxu1 %v4906_v18  ;;  %v4864_v24 = vmax.f32 %v4766_v28, 0.0 }
 0x4b1   : > { %v4772_v52 = vadd.f32 %v4771_v26, %v13586_v34  ;;  %v4865_v45 = vmax.f32 %v4768_v22, 0.0 }
 0x4b2   : > { %v4866_v8 = vmax.f32 %v4770_v2, 0.0 }
 0x4b3   : > { %v4867_v4 = vmax.f32 %v4772_v52, 0.0 }
 0x4b4   : > { %v4908_v27 = vpack.c.bf16 %v4866_v8, %v4864_v24 }
 0x4b5   : > { %v4909_v5 = vpack.c.bf16 %v4867_v4, %v4865_v45  ;;  %v4775_v49 = vpop.f32.mrb[172].mxu1 }
 0x4b6   : > { %v4776_v9 = vadd.f32 %v4775_v49, %v13583_v61  ;;  %v4777_v51 = vpop.f32.mrb[173].mxu1 }
 0x4b7   : > { %v4778_v44 = vadd.f32 %v4777_v51, %v13586_v34  ;;  %v4779_v59 = vpop.f32.mrb[174].mxu1  ;;  %5256 = vmatprep.mubr.bf16.mxu1 %v4909_v5 }
 0x4b8   : > { %v4780_v3 = vadd.f32 %v4779_v59, %v13583_v61  ;;  %v4781_v12 = vpop.f32.mrb[175].mxu1  ;;  %5257 = vmatmul.mubr.bf16.gmra.mrb[232].mxu1 %v4908_v27  ;;  %v4868_v33 = vmax.f32 %v4776_v9, 0.0 }
 0x4b9   : > { %v4782_v60 = vadd.f32 %v4781_v12, %v13586_v34  ;;  %v4869_v46 = vmax.f32 %v4778_v44, 0.0 }
 0x4ba   : > { %v4870_v31 = vmax.f32 %v4780_v3, 0.0 }
 0x4bb   : > { %v4871_v48 = vmax.f32 %v4782_v60, 0.0 }
 0x4bc   : > { %v4910_v36 = vpack.c.bf16 %v4870_v31, %v4868_v33 }
 0x4bd   : > { %v4911_v47 = vpack.c.bf16 %v4871_v48, %v4869_v46  ;;  %v4785_v50 = vpop.f32.mrb[176].mxu1 }
 0x4be   : > { %v4786_v42 = vadd.f32 %v4785_v50, %v13583_v61  ;;  %v4787_v32 = vpop.f32.mrb[177].mxu1 }
 0x4bf   : > { %v4788_v39 = vadd.f32 %v4787_v32, %v13586_v34  ;;  %v4789_v57 = vpop.f32.mrb[178].mxu1  ;;  %5266 = vmatprep.mubr.bf16.mxu1 %v4911_v47 }
 0x4c0   : > { %v4790_v40 = vadd.f32 %v4789_v57, %v13583_v61  ;;  %v4791_v6 = vpop.f32.mrb[179].mxu1  ;;  %5267 = vmatmul.mubr.bf16.gmra.mrb[236].mxu1 %v4910_v36  ;;  %v4872_v1 = vmax.f32 %v4786_v42, 0.0 }
 0x4c1   : > { %v4792_v7 = vadd.f32 %v4791_v6, %v13586_v34  ;;  %v4873_v55 = vmax.f32 %v4788_v39, 0.0  ;;  %v11492_v39 = vld [vmem:[%s15366_s11 + $0x4] ss:$24 sps:$4 sm:$0xff]  }
 0x4c2   : > { %v4874_v10 = vmax.f32 %v4790_v40, 0.0  ;;  %7581 = vmatprep.subr.bf16.mxu0 %v11492_v39 }
 0x4c3   : > { %v4875_v30 = vmax.f32 %v4792_v7, 0.0 }
 0x4c4   : > { %v4912_v17 = vpack.c.bf16 %v4874_v10, %v4872_v1 }
 0x4c5   : > { %v4913_v63 = vpack.c.bf16 %v4875_v30, %v4873_v55  ;;  %v4795_v14 = vpop.f32.mrb[180].mxu1 }
 0x4c6   : > { %v4796_v23 = vadd.f32 %v4795_v14, %v13583_v61  ;;  %v4797_v56 = vpop.f32.mrb[181].mxu1 }
 0x4c7   : > { %v4798_v15 = vadd.f32 %v4797_v56, %v13586_v34  ;;  %v4799_v16 = vpop.f32.mrb[182].mxu1  ;;  %5276 = vmatprep.mubr.bf16.mxu1 %v4913_v63  ;;  %v11490_v56 = vld [vmem:[%s15366_s11] ss:$24 sps:$4 sm:$0xff]  }
 0x4c8   : > { %v4800_v11 = vadd.f32 %v4799_v16, %v13583_v61  ;;  %v4801_v13 = vpop.f32.mrb[183].mxu1  ;;  %5277 = vmatmul.mubr.bf16.gmra.mrb[240].mxu1 %v4912_v17  ;;  %v4876_v19 = vmax.f32 %v4796_v23, 0.0 }
 0x4c9   : > { %v4802_v18 = vadd.f32 %v4801_v13, %v13586_v34  ;;  %v4877_v28 = vmax.f32 %v4798_v15, 0.0  ;;  %v11519_v15 = vld [vmem:[%s15366_s11 + $0xc] ss:$24 sps:$4 sm:$0xff]  }
 0x4ca   : > { %v4878_v0 = vmax.f32 %v4800_v11, 0.0  ;;  %v11495_v13 = vld [vmem:[%s15366_s11 + $0x34] ss:$24 sps:$4 sm:$0xff]   ;;  %7967 = vmatprep.subr.bf16.mxu1 %v11519_v15 }
 0x4cb   : > { %v4879_v43 = vmax.f32 %v4802_v18, 0.0  ;;  %v11517_v18 = vld [vmem:[%s15366_s11 + $0x8] ss:$24 sps:$4 sm:$0xff]  }
 0x4cc   : > { %v4914_v22 = vpack.c.bf16 %v4878_v0, %v4876_v19 }
 0x4cd   : > { %v4915_v58 = vpack.c.bf16 %v4879_v43, %v4877_v28  ;;  %v4805_v2 = vpop.f32.mrb[184].mxu1  ;;  %v11522_v28 = vld [vmem:[%s15366_s11 + $0x3c] ss:$24 sps:$4 sm:$0xff]  }
 0x4ce   : > { %v4806_v26 = vadd.f32 %v4805_v2, %v13583_v61  ;;  %v4807_v52 = vpop.f32.mrb[185].mxu1  ;;  %v11493_v2 = vld [vmem:[%s15366_s11 + $0x30] ss:$24 sps:$4 sm:$0xff]  }
 0x4cf   : > { %v4808_v24 = vadd.f32 %v4807_v52, %v13586_v34  ;;  %v4809_v8 = vpop.f32.mrb[186].mxu1  ;;  %5286 = vmatprep.mubr.bf16.mxu1 %v4915_v58 }
 0x4d0   : > { %v4810_v45 = vadd.f32 %v4809_v8, %v13583_v61  ;;  %v4811_v4 = vpop.f32.mrb[187].mxu1  ;;  %5287 = vmatmul.mubr.bf16.gmra.mrb[244].mxu1 %v4914_v22  ;;  %v4880_v5 = vmax.f32 %v4806_v26, 0.0  ;;  %v11520_v8 = vld [vmem:[%s15366_s11 + $0x38] ss:$24 sps:$4 sm:$0xff]  }
 0x4d1   : > { %v4812_v27 = vadd.f32 %v4811_v4, %v13586_v34  ;;  %v4881_v9 = vmax.f32 %v4808_v24, 0.0  ;;  %v11498_v24 = vld [vmem:[%s15366_s11 + $0x64] ss:$24 sps:$4 sm:$0xff]  }
 0x4d2   : > { %v4882_v49 = vmax.f32 %v4810_v45, 0.0 }
 0x4d3   : > { %v4883_v51 = vmax.f32 %v4812_v27, 0.0 }
 0x4d4   : > { %v4916_v44 = vpack.c.bf16 %v4882_v49, %v4880_v5 }
 0x4d5   : > { %v4917_v59 = vpack.c.bf16 %v4883_v51, %v4881_v9  ;;  %v4815_v3 = vpop.f32.mrb[188].mxu1  ;;  %v11496_v9 = vld [vmem:[%s15366_s11 + $0x60] ss:$24 sps:$4 sm:$0xff]   ;;  %v11528_v51 = vld [vmem:[%s15366_s11 + $0x6c] ss:$24 sps:$4 sm:$0xff]  }
 0x4d6   : > { %v4816_v12 = vadd.f32 %v4815_v3, %v13583_v61  ;;  %v4817_v60 = vpop.f32.mrb[189].mxu1  ;;  %v11501_v3 = vld [vmem:[%s15366_s11 + $0x94] ss:$24 sps:$4 sm:$0xff]  }
 0x4d7   : > { %v4818_v33 = vadd.f32 %v4817_v60, %v13586_v34  ;;  %v4819_v31 = vpop.f32.mrb[190].mxu1  ;;  %5296 = vmatprep.mubr.bf16.mxu1 %v4917_v59 }
 0x4d8   : > { %v4820_v46 = vadd.f32 %v4819_v31, %v13583_v61  ;;  %v4821_v48 = vpop.f32.mrb[191].mxu1  ;;  %5297 = vmatmul.mubr.bf16.gmra.mrb[248].mxu1 %v4916_v44  ;;  %v4884_v20 = vmax.f32 %v4816_v12, 0.0  ;;  %v4952_v61 = vld [vmem:[%s15363_s8] sm:$0x3]  ;;  %v11531_v31 = vld [vmem:[%s15366_s11 + $0x9c] ss:$24 sps:$4 sm:$0xff]  }
 0x4d9   : > { %v4822_v36 = vadd.f32 %v4821_v48, %v13586_v34  ;;  %v4885_v50 = vmax.f32 %v4818_v33, 0.0  ;;  %v13833_v57 = vrot.slane %v4952_v61, %v15444_v29  ;;  %v13836_v34 = vrot.slane %v4952_v61, %v15445_v38  ;;  %v11526_v12 = vld [vmem:[%s15366_s11 + $0x68] ss:$24 sps:$4 sm:$0xff]  }
 0x4da   : > { %v4886_v47 = vmax.f32 %v4820_v46, 0.0 }
 0x4db   : > { %v4887_v25 = vmax.f32 %v4822_v36, 0.0 }
 0x4dc   : > { %v4918_v42 = vpack.c.bf16 %v4886_v47, %v4884_v20  ;;  %v11499_v20 = vld [vmem:[%s15366_s11 + $0x90] ss:$24 sps:$4 sm:$0xff]  }
 0x4dd   : > { %v4919_v32 = vpack.c.bf16 %v4887_v25, %v4885_v50  ;;  %v11504_v25 = vld [vmem:[%s15366_s11 + $0xc4] ss:$24 sps:$4 sm:$0xff]  }
 0x4df   : > { %5306 = vmatprep.mubr.bf16.mxu1 %v4919_v32 }
 0x4e0   : > { %5307 = vmatmul.mubr.bf16.gmra.mrb[252].mxu1 %v4918_v42  ;;  %v11529_v42 = vld [vmem:[%s15366_s11 + $0x98] ss:$24 sps:$4 sm:$0xff]  }
 0x53b   : > { %v5158_v40 = vpop.f32.mrb[192].mxu1 }
 0x53c   : > { %v5159_v6 = vadd.f32 %v5158_v40, %v13833_v57  ;;  %v5160_v21 = vpop.f32.mrb[193].mxu1 }
 0x53d   : > { %v5161_v53 = vadd.f32 %v5160_v21, %v13836_v34  ;;  %v5162_v7 = vpop.f32.mrb[194].mxu1  ;;  %v11502_v21 = vld [vmem:[%s15366_s11 + $0xc0] ss:$24 sps:$4 sm:$0xff]  }
 0x53e   : > { %v5163_v41 = vadd.f32 %v5162_v7, %v13833_v57  ;;  %v5164_v54 = vpop.f32.mrb[195].mxu1  ;;  %v5317_v10 = vmax.f32 %v5159_v6, 0.0 }
 0x53f   : > { %v5165_v1 = vadd.f32 %v5164_v54, %v13836_v34  ;;  %v5318_v30 = vmax.f32 %v5161_v53, 0.0  ;;  %v11537_v53 = vld [vmem:[%s15366_s11 + $0xcc] ss:$24 sps:$4 sm:$0xff]  }
 0x540   : > { %v5319_v55 = vmax.f32 %v5163_v41, 0.0  ;;  %v11507_v54 = vld [vmem:[%s15366_s11 + $0xf4] ss:$24 sps:$4 sm:$0xff]  }
 0x541   : > { %v5320_v17 = vmax.f32 %v5165_v1, 0.0  ;;  %v11535_v1 = vld [vmem:[%s15366_s11 + $0xc8] ss:$24 sps:$4 sm:$0xff]  }
 0x542   : > { %v5381_v63 = vpack.c.bf16 %v5319_v55, %v5317_v10 }
 0x543   : > { %v5382_v14 = vpack.c.bf16 %v5320_v17, %v5318_v30  ;;  %v5168_v23 = vpop.f32.mrb[196].mxu1  ;;  %v11540_v30 = vld [vmem:[%s15366_s11 + $0xfc] ss:$24 sps:$4 sm:$0xff]  }
 0x544   : > { %v5169_v16 = vadd.f32 %v5168_v23, %v13833_v57  ;;  %v5170_v11 = vpop.f32.mrb[197].mxu1  ;;  %v11505_v23 = vld [vmem:[%s15366_s11 + $0xf0] ss:$24 sps:$4 sm:$0xff]  }
 0x545   : > { %v5171_v19 = vadd.f32 %v5170_v11, %v13836_v34  ;;  %v5172_v0 = vpop.f32.mrb[198].mxu1  ;;  %5851 = vmatprep.mubr.bf16.mxu0 %v5382_v14  ;;  %6044 = vmatprep.mubr.bf16.mxu1 %v5382_v14  ;;  %v11538_v11 = vld [vmem:[%s15366_s11 + $0xf8] ss:$24 sps:$4 sm:$0xff]  }
 0x546   : > { %v5173_v43 = vadd.f32 %v5172_v0, %v13833_v57  ;;  %v5174_v22 = vpop.f32.mrb[199].mxu1  ;;  %5852 = vmatmul.mubr.bf16.vlgmr.msra.gmra.mrb[128].mxu0 %v5381_v63  ;;  %6045 = vmatmul.mubr.bf16.vlgmr.msra.gmra.mrb[0].mxu1 %v5381_v63  ;;  %v5321_v26 = vmax.f32 %v5169_v16, 0.0  ;;  %v11510_v16 = vld [vmem:[%s15366_s11 + $0x124] ss:$24 sps:$4 sm:$0xff]  }
 0x547   : > { %v5175_v58 = vadd.f32 %v5174_v22, %v13836_v34  ;;  %7582 = vmatpush1.bf16.msra.mxu0 %v11490_v56  ;;  %7968 = vmatpush1.bf16.msra.mxu1 %v11517_v18  ;;  %v5322_v45 = vmax.f32 %v5171_v19, 0.0  ;;  %v11546_v22 = vld [vmem:[%s15366_s11 + $0x12c] ss:$24 sps:$4 sm:$0xff]  }
 0x548   : > { %v5323_v52 = vmax.f32 %v5173_v43, 0.0  ;;  %7583 = vmatprep.subr.bf16.mxu0 %v11495_v13  ;;  %7969 = vmatprep.subr.bf16.mxu1 %v11522_v28  ;;  %v11508_v43 = vld [vmem:[%s15366_s11 + $0x120] ss:$24 sps:$4 sm:$0xff]  }
 0x549   : > { %v5324_v4 = vmax.f32 %v5175_v58, 0.0 }
 0x54a   : > { %v5383_v27 = vpack.c.bf16 %v5323_v52, %v5321_v26  ;;  %v11513_v26 = vld [vmem:[%s15366_s11 + $0x154] ss:$24 sps:$4 sm:$0xff]   ;;  %v11544_v52 = vld [vmem:[%s15366_s11 + $0x128] ss:$24 sps:$4 sm:$0xff]  }
 0x54b   : > { %v5384_v5 = vpack.c.bf16 %v5324_v4, %v5322_v45  ;;  %v5178_v49 = vpop.f32.mrb[200].mxu1  ;;  %7584 = vmatpush1.bf16.msra.mxu0 %v11493_v2  ;;  %7970 = vmatpush1.bf16.msra.mxu1 %v11520_v8  ;;  %v11549_v45 = vld [vmem:[%s15366_s11 + $0x15c] ss:$24 sps:$4 sm:$0xff]  }
 0x54c   : > { %v5179_v44 = vadd.f32 %v5178_v49, %v13833_v57  ;;  %v5180_v59 = vpop.f32.mrb[201].mxu1  ;;  %7585 = vmatprep.subr.bf16.mxu0 %v11498_v24  ;;  %7971 = vmatprep.subr.bf16.mxu1 %v11528_v51  ;;  %v11511_v49 = vld [vmem:[%s15366_s11 + $0x150] ss:$24 sps:$4 sm:$0xff]  }
 0x54d   : > { %v5181_v60 = vadd.f32 %v5180_v59, %v13836_v34  ;;  %v5182_v33 = vpop.f32.mrb[202].mxu1  ;;  %5861 = vmatprep.mubr.bf16.mxu0 %v5384_v5  ;;  %6054 = vmatprep.mubr.bf16.mxu1 %v5384_v5  ;;  %v11547_v59 = vld [vmem:[%s15366_s11 + $0x158] ss:$24 sps:$4 sm:$0xff]  }
 0x54e   : > { %v5183_v46 = vadd.f32 %v5182_v33, %v13833_v57  ;;  %v5184_v48 = vpop.f32.mrb[203].mxu1  ;;  %5862 = vmatmul.mubr.bf16.gmra.mrb[132].mxu0 %v5383_v27  ;;  %6055 = vmatmul.mubr.bf16.gmra.mrb[4].mxu1 %v5383_v27  ;;  %v5325_v47 = vmax.f32 %v5179_v44, 0.0  ;;  %v11516_v44 = vld [vmem:[%s15366_s11 + $0x184] ss:$24 sps:$4 sm:$0xff]  }
 0x54f   : > { %v5185_v36 = vadd.f32 %v5184_v48, %v13836_v34  ;;  %7586 = vmatpush1.bf16.msra.mxu0 %v11496_v9  ;;  %7972 = vmatpush1.bf16.msra.mxu1 %v11526_v12  ;;  %v5326_v32 = vmax.f32 %v5181_v60, 0.0  ;;  %v11555_v48 = vld [vmem:[%s15366_s11 + $0x18c] ss:$24 sps:$4 sm:$0xff]  }
 0x550   : > { %v5327_v50 = vmax.f32 %v5183_v46, 0.0  ;;  %7587 = vmatprep.subr.bf16.mxu0 %v11501_v3  ;;  %7973 = vmatprep.subr.bf16.mxu1 %v11531_v31  ;;  %v11514_v46 = vld [vmem:[%s15366_s11 + $0x180] ss:$24 sps:$4 sm:$0xff]  }
 0x551   : > { %v5328_v39 = vmax.f32 %v5185_v36, 0.0 }
 0x552   : > { %v5385_v61 = vpack.c.bf16 %v5327_v50, %v5325_v47  ;;  %v11525_v47 = vld [vmem:[%s15366_s11 + $0x1b4] ss:$24 sps:$4 sm:$0xff]   ;;  %v11553_v50 = vld [vmem:[%s15366_s11 + $0x188] ss:$24 sps:$4 sm:$0xff]  }
 0x553   : > { %v5386_v40 = vpack.c.bf16 %v5328_v39, %v5326_v32  ;;  %v5188_v6 = vpop.f32.mrb[204].mxu1  ;;  %7588 = vmatpush1.bf16.msra.mxu0 %v11499_v20  ;;  %7974 = vmatpush1.bf16.msra.mxu1 %v11529_v42  ;;  %v11558_v32 = vld [vmem:[%s15366_s11 + $0x1bc] ss:$24 sps:$4 sm:$0xff]  }
 0x554   : > { %v5189_v7 = vadd.f32 %v5188_v6, %v13833_v57  ;;  %v5190_v41 = vpop.f32.mrb[205].mxu1  ;;  %7589 = vmatprep.subr.bf16.mxu0 %v11504_v25  ;;  %7975 = vmatprep.subr.bf16.mxu1 %v11537_v53  ;;  %v11523_v6 = vld [vmem:[%s15366_s11 + $0x1b0] ss:$24 sps:$4 sm:$0xff]  }
 0x555   : > { %v5191_v10 = vadd.f32 %v5190_v41, %v13836_v34  ;;  %v5192_v55 = vpop.f32.mrb[206].mxu1  ;;  %5871 = vmatprep.mubr.bf16.mxu0 %v5386_v40  ;;  %6064 = vmatprep.mubr.bf16.mxu1 %v5386_v40  ;;  %v11556_v41 = vld [vmem:[%s15366_s11 + $0x1b8] ss:$24 sps:$4 sm:$0xff]  }
 0x556   : > { %v5193_v17 = vadd.f32 %v5192_v55, %v13833_v57  ;;  %v5194_v63 = vpop.f32.mrb[207].mxu1  ;;  %5872 = vmatmul.mubr.bf16.gmra.mrb[136].mxu0 %v5385_v61  ;;  %6065 = vmatmul.mubr.bf16.gmra.mrb[8].mxu1 %v5385_v61  ;;  %v5329_v56 = vmax.f32 %v5189_v7, 0.0  ;;  %v11534_v7 = vld [vmem:[%s15366_s11 + $0x1e4] ss:$24 sps:$4 sm:$0xff]  }
 0x557   : > { %v5195_v14 = vadd.f32 %v5194_v63, %v13836_v34  ;;  %7590 = vmatpush1.bf16.msra.mxu0 %v11502_v21  ;;  %7976 = vmatpush1.bf16.msra.mxu1 %v11535_v1  ;;  %v5330_v13 = vmax.f32 %v5191_v10, 0.0  ;;  %v11564_v63 = vld [vmem:[%s15366_s11 + $0x1ec] ss:$24 sps:$4 sm:$0xff]  }
 0x558   : > { %v5331_v15 = vmax.f32 %v5193_v17, 0.0  ;;  %7591 = vmatprep.subr.bf16.mxu0 %v11507_v54  ;;  %7977 = vmatprep.subr.bf16.mxu1 %v11540_v30  ;;  %v11532_v17 = vld [vmem:[%s15366_s11 + $0x1e0] ss:$24 sps:$4 sm:$0xff]  }
 0x559   : > { %v5332_v18 = vmax.f32 %v5195_v14, 0.0 }
 0x55a   : > { %v5387_v19 = vpack.c.bf16 %v5331_v15, %v5329_v56  ;;  %v11543_v56 = vld [vmem:[%s15366_s11 + $0x214] ss:$24 sps:$4 sm:$0xff]   ;;  %v11562_v15 = vld [vmem:[%s15366_s11 + $0x1e8] ss:$24 sps:$4 sm:$0xff]  }
 0x55b   : > { %v5388_v0 = vpack.c.bf16 %v5332_v18, %v5330_v13  ;;  %v5198_v28 = vpop.f32.mrb[208].mxu1  ;;  %7592 = vmatpush1.bf16.msra.mxu0 %v11505_v23  ;;  %7978 = vmatpush1.bf16.msra.mxu1 %v11538_v11  ;;  %v11567_v13 = vld [vmem:[%s15366_s11 + $0x21c] ss:$24 sps:$4 sm:$0xff]  }
 0x55c   : > { %v5199_v58 = vadd.f32 %v5198_v28, %v13833_v57  ;;  %v5200_v2 = vpop.f32.mrb[209].mxu1  ;;  %7593 = vmatprep.subr.bf16.mxu0 %v11510_v16  ;;  %7979 = vmatprep.subr.bf16.mxu1 %v11546_v22  ;;  %v11541_v28 = vld [vmem:[%s15366_s11 + $0x210] ss:$24 sps:$4 sm:$0xff]  }
 0x55d   : > { %v5201_v24 = vadd.f32 %v5200_v2, %v13836_v34  ;;  %v5202_v8 = vpop.f32.mrb[210].mxu1  ;;  %5881 = vmatprep.mubr.bf16.mxu0 %v5388_v0  ;;  %6074 = vmatprep.mubr.bf16.mxu1 %v5388_v0  ;;  %v11565_v2 = vld [vmem:[%s15366_s11 + $0x218] ss:$24 sps:$4 sm:$0xff]  }
 0x55e   : > { %v5203_v4 = vadd.f32 %v5202_v8, %v13833_v57  ;;  %v5204_v27 = vpop.f32.mrb[211].mxu1  ;;  %5882 = vmatmul.mubr.bf16.gmra.mrb[140].mxu0 %v5387_v19  ;;  %6075 = vmatmul.mubr.bf16.gmra.mrb[12].mxu1 %v5387_v19  ;;  %v5333_v9 = vmax.f32 %v5199_v58, 0.0  ;;  %v11552_v58 = vld [vmem:[%s15366_s11 + $0x244] ss:$24 sps:$4 sm:$0xff]  }
 0x55f   : > { %v5205_v5 = vadd.f32 %v5204_v27, %v13836_v34  ;;  %7594 = vmatpush1.bf16.msra.mxu0 %v11508_v43  ;;  %7980 = vmatpush1.bf16.msra.mxu1 %v11544_v52  ;;  %v5334_v3 = vmax.f32 %v5201_v24, 0.0  ;;  %v11573_v27 = vld [vmem:[%s15366_s11 + $0x24c] ss:$24 sps:$4 sm:$0xff]  }
 0x560   : > { %v5335_v51 = vmax.f32 %v5203_v4, 0.0  ;;  %7595 = vmatprep.subr.bf16.mxu0 %v11513_v26  ;;  %7981 = vmatprep.subr.bf16.mxu1 %v11549_v45  ;;  %v11550_v4 = vld [vmem:[%s15366_s11 + $0x240] ss:$24 sps:$4 sm:$0xff]  }
 0x561   : > { %v5336_v12 = vmax.f32 %v5205_v5, 0.0 }
 0x562   : > { %v5389_v60 = vpack.c.bf16 %v5335_v51, %v5333_v9  ;;  %v11561_v9 = vld [vmem:[%s15366_s11 + $0x274] ss:$24 sps:$4 sm:$0xff]   ;;  %v11571_v51 = vld [vmem:[%s15366_s11 + $0x248] ss:$24 sps:$4 sm:$0xff]  }
 0x563   : > { %v5390_v33 = vpack.c.bf16 %v5336_v12, %v5334_v3  ;;  %v5208_v31 = vpop.f32.mrb[212].mxu1  ;;  %7596 = vmatpush1.bf16.msra.mxu0 %v11511_v49  ;;  %7982 = vmatpush1.bf16.msra.mxu1 %v11547_v59  ;;  %v11576_v3 = vld [vmem:[%s15366_s11 + $0x27c] ss:$24 sps:$4 sm:$0xff]  }
 0x564   : > { %v5209_v36 = vadd.f32 %v5208_v31, %v13833_v57  ;;  %v5210_v20 = vpop.f32.mrb[213].mxu1  ;;  %7597 = vmatprep.subr.bf16.mxu0 %v11516_v44  ;;  %7983 = vmatprep.subr.bf16.mxu1 %v11555_v48  ;;  %v11559_v31 = vld [vmem:[%s15366_s11 + $0x270] ss:$24 sps:$4 sm:$0xff]  }
 0x565   : > { %v5211_v25 = vadd.f32 %v5210_v20, %v13836_v34  ;;  %v5212_v42 = vpop.f32.mrb[214].mxu1  ;;  %5891 = vmatprep.mubr.bf16.mxu0 %v5390_v33  ;;  %6084 = vmatprep.mubr.bf16.mxu1 %v5390_v33  ;;  %v11574_v20 = vld [vmem:[%s15366_s11 + $0x278] ss:$24 sps:$4 sm:$0xff]  }
 0x566   : > { %v5213_v39 = vadd.f32 %v5212_v42, %v13833_v57  ;;  %v5214_v61 = vpop.f32.mrb[215].mxu1  ;;  %5892 = vmatmul.mubr.bf16.gmra.mrb[144].mxu0 %v5389_v60  ;;  %6085 = vmatmul.mubr.bf16.gmra.mrb[16].mxu1 %v5389_v60  ;;  %v5337_v21 = vmax.f32 %v5209_v36, 0.0  ;;  %v11570_v36 = vld [vmem:[%s15366_s11 + $0x2a4] ss:$24 sps:$4 sm:$0xff]  }
 0x567   : > { %v5215_v40 = vadd.f32 %v5214_v61, %v13836_v34  ;;  %7598 = vmatpush1.bf16.msra.mxu0 %v11514_v46  ;;  %7984 = vmatpush1.bf16.msra.mxu1 %v11553_v50  ;;  %v5338_v54 = vmax.f32 %v5211_v25, 0.0 }
 0x568   : > { %v5339_v53 = vmax.f32 %v5213_v39, 0.0  ;;  %7599 = vmatprep.subr.bf16.mxu0 %v11525_v47  ;;  %7985 = vmatprep.subr.bf16.mxu1 %v11558_v32  ;;  %v11568_v39 = vld [vmem:[%s15366_s11 + $0x2a0] ss:$24 sps:$4 sm:$0xff]  }
 0x569   : > { %v5340_v1 = vmax.f32 %v5215_v40, 0.0 }
 0x56a   : > { %v5391_v10 = vpack.c.bf16 %v5339_v53, %v5337_v21 }
 0x56b   : > { %v5392_v55 = vpack.c.bf16 %v5340_v1, %v5338_v54  ;;  %v5218_v30 = vpop.f32.mrb[216].mxu1  ;;  %7600 = vmatpush1.bf16.msra.mxu0 %v11523_v6  ;;  %7986 = vmatpush1.bf16.msra.mxu1 %v11556_v41 }
 0x56c   : > { %v5219_v14 = vadd.f32 %v5218_v30, %v13833_v57  ;;  %v5220_v23 = vpop.f32.mrb[217].mxu1  ;;  %7601 = vmatprep.subr.bf16.mxu0 %v11534_v7  ;;  %7987 = vmatprep.subr.bf16.mxu1 %v11564_v63 }
 0x56d   : > { %v5221_v16 = vadd.f32 %v5220_v23, %v13836_v34  ;;  %v5222_v11 = vpop.f32.mrb[218].mxu1  ;;  %5901 = vmatprep.mubr.bf16.mxu0 %v5392_v55  ;;  %6094 = vmatprep.mubr.bf16.mxu1 %v5392_v55 }
 0x56e   : > { %v5223_v18 = vadd.f32 %v5222_v11, %v13833_v57  ;;  %v5224_v19 = vpop.f32.mrb[219].mxu1  ;;  %5902 = vmatmul.mubr.bf16.gmra.mrb[148].mxu0 %v5391_v10  ;;  %6095 = vmatmul.mubr.bf16.gmra.mrb[20].mxu1 %v5391_v10  ;;  %v5341_v43 = vmax.f32 %v5219_v14, 0.0 }
 0x56f   : > { %v5225_v0 = vadd.f32 %v5224_v19, %v13836_v34  ;;  %7602 = vmatpush1.bf16.msra.mxu0 %v11532_v17  ;;  %7988 = vmatpush1.bf16.msra.mxu1 %v11562_v15  ;;  %v5342_v26 = vmax.f32 %v5221_v16, 0.0 }
 0x570   : > { %v5343_v22 = vmax.f32 %v5223_v18, 0.0  ;;  %7603 = vmatprep.subr.bf16.mxu0 %v11543_v56  ;;  %7989 = vmatprep.subr.bf16.mxu1 %v11567_v13 }
 0x571   : > { %v5344_v52 = vmax.f32 %v5225_v0, 0.0 }
 0x572   : > { %v5393_v24 = vpack.c.bf16 %v5343_v22, %v5341_v43 }
 0x573   : > { %v5394_v8 = vpack.c.bf16 %v5344_v52, %v5342_v26  ;;  %v5228_v45 = vpop.f32.mrb[220].mxu1  ;;  %7604 = vmatpush1.bf16.msra.mxu0 %v11541_v28  ;;  %7990 = vmatpush1.bf16.msra.mxu1 %v11565_v2 }
 0x574   : > { %v5229_v5 = vadd.f32 %v5228_v45, %v13833_v57  ;;  %v5230_v49 = vpop.f32.mrb[221].mxu1  ;;  %7605 = vmatprep.subr.bf16.mxu0 %v11552_v58  ;;  %7991 = vmatprep.subr.bf16.mxu1 %v11573_v27 }
 0x575   : > { %v5231_v44 = vadd.f32 %v5230_v49, %v13836_v34  ;;  %v5232_v59 = vpop.f32.mrb[222].mxu1  ;;  %5911 = vmatprep.mubr.bf16.mxu0 %v5394_v8  ;;  %6104 = vmatprep.mubr.bf16.mxu1 %v5394_v8 }
 0x576   : > { %v5233_v12 = vadd.f32 %v5232_v59, %v13833_v57  ;;  %v5234_v60 = vpop.f32.mrb[223].mxu1  ;;  %5912 = vmatmul.mubr.bf16.gmra.mrb[152].mxu0 %v5393_v24  ;;  %6105 = vmatmul.mubr.bf16.gmra.mrb[24].mxu1 %v5393_v24  ;;  %v5345_v46 = vmax.f32 %v5229_v5, 0.0 }
 0x577   : > { %v5235_v33 = vadd.f32 %v5234_v60, %v13836_v34  ;;  %7606 = vmatpush1.bf16.msra.mxu0 %v11550_v4  ;;  %7992 = vmatpush1.bf16.msra.mxu1 %v11571_v51  ;;  %v5346_v47 = vmax.f32 %v5231_v44, 0.0 }
 0x578   : > { %v5347_v48 = vmax.f32 %v5233_v12, 0.0  ;;  %7607 = vmatprep.subr.bf16.mxu0 %v11561_v9  ;;  %7993 = vmatprep.subr.bf16.mxu1 %v11576_v3 }
 0x579   : > { %v5348_v50 = vmax.f32 %v5235_v33, 0.0 }
 0x57a   : > { %v5395_v25 = vpack.c.bf16 %v5347_v48, %v5345_v46 }
 0x57b   : > { %v5396_v42 = vpack.c.bf16 %v5348_v50, %v5346_v47  ;;  %v5238_v32 = vpop.f32.mrb[224].mxu1  ;;  %7608 = vmatpush1.bf16.msra.mxu0 %v11559_v31  ;;  %7994 = vmatpush1.bf16.msra.mxu1 %v11574_v20 }
 0x57c   : > { %v5239_v61 = vadd.f32 %v5238_v32, %v13833_v57  ;;  %v5240_v40 = vpop.f32.mrb[225].mxu1  ;;  %7609 = vmatprep.subr.bf16.mxu0 %v11570_v36 }
 0x57d   : > { %v5241_v6 = vadd.f32 %v5240_v40, %v13836_v34  ;;  %v5242_v21 = vpop.f32.mrb[226].mxu1  ;;  %5921 = vmatprep.mubr.bf16.mxu0 %v5396_v42  ;;  %6114 = vmatprep.mubr.bf16.mxu1 %v5396_v42  ;;  %v11582_v42 = vld [vmem:[%s15366_s11 + $0x2ac] ss:$24 sps:$4 sm:$0xff]  }
 0x57e   : > { %v5243_v53 = vadd.f32 %v5242_v21, %v13833_v57  ;;  %v5244_v7 = vpop.f32.mrb[227].mxu1  ;;  %5922 = vmatmul.mubr.bf16.gmra.mrb[156].mxu0 %v5395_v25  ;;  %6115 = vmatmul.mubr.bf16.gmra.mrb[28].mxu1 %v5395_v25  ;;  %v5349_v54 = vmax.f32 %v5239_v61, 0.0  ;;  %v11580_v61 = vld [vmem:[%s15366_s11 + $0x2a8] ss:$24 sps:$4 sm:$0xff]  }
 0x57f   : > { %v5245_v41 = vadd.f32 %v5244_v7, %v13836_v34  ;;  %7610 = vmatpush1.bf16.msra.mxu0 %v11568_v39  ;;  %v5350_v10 = vmax.f32 %v5241_v6, 0.0  ;;  %7995 = vmatprep.subr.bf16.mxu1 %v11582_v42 }
 0x580   : > { %v5351_v1 = vmax.f32 %v5243_v53, 0.0  ;;  %7996 = vmatpush1.bf16.msra.mxu1 %v11580_v61 }
 0x581   : > { %v5352_v55 = vmax.f32 %v5245_v41, 0.0 }
 0x582   : > { %v5397_v30 = vpack.c.bf16 %v5351_v1, %v5349_v54  ;;  %v11579_v54 = vld [vmem:[%s15366_s11 + $0x2d4] ss:$24 sps:$4 sm:$0xff]  }
 0x583   : > { %v5398_v17 = vpack.c.bf16 %v5352_v55, %v5350_v10  ;;  %v5248_v63 = vpop.f32.mrb[228].mxu1  ;;  %v11585_v1 = vld [vmem:[%s15366_s11 + $0x2dc] ss:$24 sps:$4 sm:$0xff]   ;;  %v11577_v55 = vld [vmem:[%s15366_s11 + $0x2d0] ss:$24 sps:$4 sm:$0xff]   ;;  %7611 = vmatprep.subr.bf16.mxu0 %v11579_v54 }
 0x584   : > { %v5249_v14 = vadd.f32 %v5248_v63, %v13833_v57  ;;  %v5250_v23 = vpop.f32.mrb[229].mxu1  ;;  %7997 = vmatprep.subr.bf16.mxu1 %v11585_v1  ;;  %7612 = vmatpush1.bf16.msra.mxu0 %v11577_v55 }
 0x585   : > { %v5251_v56 = vadd.f32 %v5250_v23, %v13836_v34  ;;  %v5252_v15 = vpop.f32.mrb[230].mxu1  ;;  %5931 = vmatprep.mubr.bf16.mxu0 %v5398_v17  ;;  %6124 = vmatprep.mubr.bf16.mxu1 %v5398_v17 }
 0x586   : > { %v5253_v16 = vadd.f32 %v5252_v15, %v13833_v57  ;;  %v5254_v11 = vpop.f32.mrb[231].mxu1  ;;  %5932 = vmatmul.mubr.bf16.gmra.mrb[160].mxu0 %v5397_v30  ;;  %6125 = vmatmul.mubr.bf16.gmra.mrb[32].mxu1 %v5397_v30  ;;  %v5353_v18 = vmax.f32 %v5249_v14, 0.0  ;;  %v11583_v30 = vld [vmem:[%s15366_s11 + $0x2d8] ss:$24 sps:$4 sm:$0xff]  }
 0x587   : > { %v5255_v13 = vadd.f32 %v5254_v11, %v13836_v34  ;;  %v5354_v0 = vmax.f32 %v5251_v56, 0.0  ;;  %7998 = vmatpush1.bf16.msra.mxu1 %v11583_v30 }
 0x588   : > { %v5355_v19 = vmax.f32 %v5253_v16, 0.0 }
 0x589   : > { %v5356_v28 = vmax.f32 %v5255_v13, 0.0 }
 0x58a   : > { %v5399_v43 = vpack.c.bf16 %v5355_v19, %v5353_v18 }
 0x58b   : > { %v5400_v22 = vpack.c.bf16 %v5356_v28, %v5354_v0  ;;  %v5258_v58 = vpop.f32.mrb[232].mxu1 }
 0x58c   : > { %v5259_v2 = vadd.f32 %v5258_v58, %v13833_v57  ;;  %v5260_v26 = vpop.f32.mrb[233].mxu1 }
 0x58d   : > { %v5261_v52 = vadd.f32 %v5260_v26, %v13836_v34  ;;  %v5262_v24 = vpop.f32.mrb[234].mxu1  ;;  %5941 = vmatprep.mubr.bf16.mxu0 %v5400_v22  ;;  %6134 = vmatprep.mubr.bf16.mxu1 %v5400_v22 }
 0x58e   : > { %v5263_v8 = vadd.f32 %v5262_v24, %v13833_v57  ;;  %v5264_v45 = vpop.f32.mrb[235].mxu1  ;;  %5942 = vmatmul.mubr.bf16.gmra.mrb[164].mxu0 %v5399_v43  ;;  %6135 = vmatmul.mubr.bf16.gmra.mrb[36].mxu1 %v5399_v43  ;;  %v5357_v27 = vmax.f32 %v5259_v2, 0.0 }
 0x58f   : > { %v5265_v4 = vadd.f32 %v5264_v45, %v13836_v34  ;;  %v5358_v49 = vmax.f32 %v5261_v52, 0.0  ;;  %v11588_v52 = vld [vmem:[%s15366_s11 + $0x304] ss:$24 sps:$4 sm:$0xff]  }
 0x590   : > { %v5359_v5 = vmax.f32 %v5263_v8, 0.0  ;;  %7774 = vmatprep.subr.bf16.mxu0 %v11588_v52 }
 0x591   : > { %v5360_v9 = vmax.f32 %v5265_v4, 0.0 }
 0x592   : > { %v5401_v51 = vpack.c.bf16 %v5359_v5, %v5357_v27 }
 0x593   : > { %v5402_v44 = vpack.c.bf16 %v5360_v9, %v5358_v49  ;;  %v5268_v59 = vpop.f32.mrb[236].mxu1 }
 0x594   : > { %v5269_v3 = vadd.f32 %v5268_v59, %v13833_v57  ;;  %v5270_v12 = vpop.f32.mrb[237].mxu1 }
 0x595   : > { %v5271_v60 = vadd.f32 %v5270_v12, %v13836_v34  ;;  %v5272_v33 = vpop.f32.mrb[238].mxu1  ;;  %5951 = vmatprep.mubr.bf16.mxu0 %v5402_v44  ;;  %6144 = vmatprep.mubr.bf16.mxu1 %v5402_v44 }
 0x596   : > { %v5273_v31 = vadd.f32 %v5272_v33, %v13833_v57  ;;  %v5274_v46 = vpop.f32.mrb[239].mxu1  ;;  %5952 = vmatmul.mubr.bf16.gmra.mrb[168].mxu0 %v5401_v51  ;;  %6145 = vmatmul.mubr.bf16.gmra.mrb[40].mxu1 %v5401_v51  ;;  %v5361_v36 = vmax.f32 %v5269_v3, 0.0 }
 0x597   : > { %v5275_v48 = vadd.f32 %v5274_v46, %v13836_v34  ;;  %v5362_v47 = vmax.f32 %v5271_v60, 0.0 }
 0x598   : > { %v5363_v20 = vmax.f32 %v5273_v31, 0.0 }
 0x599   : > { %v5364_v50 = vmax.f32 %v5275_v48, 0.0 }
 0x59a   : > { %v5403_v25 = vpack.c.bf16 %v5363_v20, %v5361_v36 }
 0x59b   : > { %v5404_v32 = vpack.c.bf16 %v5364_v50, %v5362_v47  ;;  %v5278_v39 = vpop.f32.mrb[240].mxu1 }
 0x59c   : > { %v5279_v40 = vadd.f32 %v5278_v39, %v13833_v57  ;;  %v5280_v6 = vpop.f32.mrb[241].mxu1 }
 0x59d   : > { %v5281_v21 = vadd.f32 %v5280_v6, %v13836_v34  ;;  %v5282_v53 = vpop.f32.mrb[242].mxu1  ;;  %5961 = vmatprep.mubr.bf16.mxu0 %v5404_v32  ;;  %6154 = vmatprep.mubr.bf16.mxu1 %v5404_v32 }
 0x59e   : > { %v5283_v7 = vadd.f32 %v5282_v53, %v13833_v57  ;;  %v5284_v41 = vpop.f32.mrb[243].mxu1  ;;  %5962 = vmatmul.mubr.bf16.gmra.mrb[172].mxu0 %v5403_v25  ;;  %6155 = vmatmul.mubr.bf16.gmra.mrb[44].mxu1 %v5403_v25  ;;  %v5365_v17 = vmax.f32 %v5279_v40, 0.0  ;;  %v11615_v53 = vld [vmem:[%s15366_s11 + $0x30c] ss:$24 sps:$4 sm:$0xff]  }
 0x59f   : > { %v5285_v10 = vadd.f32 %v5284_v41, %v13836_v34  ;;  %v5366_v14 = vmax.f32 %v5281_v21, 0.0  ;;  %8160 = vmatprep.subr.bf16.mxu1 %v11615_v53 }
 0x5a0   : > { %v5367_v63 = vmax.f32 %v5283_v7, 0.0 }
 0x5a1   : > { %v5368_v23 = vmax.f32 %v5285_v10, 0.0 }
 0x5a2   : > { %v5405_v56 = vpack.c.bf16 %v5367_v63, %v5365_v17 }
 0x5a3   : > { %v5406_v15 = vpack.c.bf16 %v5368_v23, %v5366_v14  ;;  %v5288_v16 = vpop.f32.mrb[244].mxu1 }
 0x5a4   : > { %v5289_v11 = vadd.f32 %v5288_v16, %v13833_v57  ;;  %v5290_v13 = vpop.f32.mrb[245].mxu1 }
 0x5a5   : > { %v5291_v18 = vadd.f32 %v5290_v13, %v13836_v34  ;;  %v5292_v19 = vpop.f32.mrb[246].mxu1  ;;  %5971 = vmatprep.mubr.bf16.mxu0 %v5406_v15  ;;  %6164 = vmatprep.mubr.bf16.mxu1 %v5406_v15 }
 0x5a6   : > { %v5293_v0 = vadd.f32 %v5292_v19, %v13833_v57  ;;  %v5294_v28 = vpop.f32.mrb[247].mxu1  ;;  %5972 = vmatmul.mubr.bf16.gmra.mrb[176].mxu0 %v5405_v56  ;;  %6165 = vmatmul.mubr.bf16.gmra.mrb[48].mxu1 %v5405_v56  ;;  %v5369_v22 = vmax.f32 %v5289_v11, 0.0 }
 0x5a7   : > { %v5295_v43 = vadd.f32 %v5294_v28, %v13836_v34  ;;  %v5370_v2 = vmax.f32 %v5291_v18, 0.0 }
 0x5a8   : > { %v5371_v58 = vmax.f32 %v5293_v0, 0.0 }
 0x5a9   : > { %v5372_v26 = vmax.f32 %v5295_v43, 0.0 }
 0x5aa   : > { %v5407_v24 = vpack.c.bf16 %v5371_v58, %v5369_v22 }
 0x5ab   : > { %v5408_v8 = vpack.c.bf16 %v5372_v26, %v5370_v2  ;;  %v5298_v45 = vpop.f32.mrb[248].mxu1 }
 0x5ac   : > { %v5299_v4 = vadd.f32 %v5298_v45, %v13833_v57  ;;  %v5300_v27 = vpop.f32.mrb[249].mxu1 }
 0x5ad   : > { %v5301_v5 = vadd.f32 %v5300_v27, %v13836_v34  ;;  %v5302_v49 = vpop.f32.mrb[250].mxu1  ;;  %5981 = vmatprep.mubr.bf16.mxu0 %v5408_v8  ;;  %6174 = vmatprep.mubr.bf16.mxu1 %v5408_v8 }
 0x5ae   : > { %v5303_v9 = vadd.f32 %v5302_v49, %v13833_v57  ;;  %v5304_v51 = vpop.f32.mrb[251].mxu1  ;;  %5982 = vmatmul.mubr.bf16.gmra.mrb[180].mxu0 %v5407_v24  ;;  %6175 = vmatmul.mubr.bf16.gmra.mrb[52].mxu1 %v5407_v24  ;;  %v5373_v59 = vmax.f32 %v5299_v4, 0.0 }
 0x5af   : > { %v5305_v44 = vadd.f32 %v5304_v51, %v13836_v34  ;;  %v5374_v12 = vmax.f32 %v5301_v5, 0.0  ;;  %v11613_v51 = vld [vmem:[%s15366_s11 + $0x308] ss:$24 sps:$4 sm:$0xff]  }
 0x5b0   : > { %v5375_v3 = vmax.f32 %v5303_v9, 0.0  ;;  %v11586_v9 = vld [vmem:[%s15366_s11 + $0x300] ss:$24 sps:$4 sm:$0xff]  }
 0x5b1   : > { %v5376_v60 = vmax.f32 %v5305_v44, 0.0 }
 0x5b2   : > { %v5409_v33 = vpack.c.bf16 %v5375_v3, %v5373_v59 }
 0x5b3   : > { %v5410_v31 = vpack.c.bf16 %v5376_v60, %v5374_v12  ;;  %v5308_v46 = vpop.f32.mrb[252].mxu1  ;;  %v11591_v60 = vld [vmem:[%s15366_s11 + $0x334] ss:$24 sps:$4 sm:$0xff]  }
 0x5b4   : > { %v5309_v48 = vadd.f32 %v5308_v46, %v13833_v57  ;;  %v5310_v36 = vpop.f32.mrb[253].mxu1 }
 0x5b5   : > { %v5311_v20 = vadd.f32 %v5310_v36, %v13836_v34  ;;  %v5312_v47 = vpop.f32.mrb[254].mxu1  ;;  %5991 = vmatprep.mubr.bf16.mxu0 %v5410_v31  ;;  %6184 = vmatprep.mubr.bf16.mxu1 %v5410_v31 }
 0x5b6   : > { %v5313_v50 = vadd.f32 %v5312_v47, %v13833_v57  ;;  %v5314_v25 = vpop.f32.mrb[255].mxu1  ;;  %5992 = vmatmul.mubr.bf16.gmra.mrb[184].mxu0 %v5409_v33  ;;  %6185 = vmatmul.mubr.bf16.gmra.mrb[56].mxu1 %v5409_v33  ;;  %v5377_v32 = vmax.f32 %v5309_v48, 0.0  ;;  %v5477_v57 = vld [vmem:[%s15365_s10] sm:$0xf]  ;;  %v11618_v33 = vld [vmem:[%s15366_s11 + $0x33c] ss:$24 sps:$4 sm:$0xff]  }
 0x5b7   : > { %v5315_v42 = vadd.f32 %v5314_v25, %v13836_v34  ;;  %v5378_v61 = vmax.f32 %v5311_v20, 0.0  ;;  %v14101_v34 = vrot.slane %v5477_v57, %v15444_v29  ;;  %v14104_v7 = vrot.slane %v5477_v57, %v13231_v35 }
 0x5b8   : > { %v5379_v39 = vmax.f32 %v5313_v50, 0.0  ;;  %v14107_v41 = vrot.slane %v5477_v57, %v15445_v38  ;;  %v14110_v54 = vrot.slane %v5477_v57, %v13234_v37 }
 0x5b9   : > { %v5380_v40 = vmax.f32 %v5315_v42, 0.0 }
 0x5ba   : > { %v5411_v6 = vpack.c.bf16 %v5379_v39, %v5377_v32  ;;  %v11589_v39 = vld [vmem:[%s15366_s11 + $0x330] ss:$24 sps:$4 sm:$0xff]  }
 0x5bb   : > { %v5412_v21 = vpack.c.bf16 %v5380_v40, %v5378_v61  ;;  %v11594_v61 = vld [vmem:[%s15366_s11 + $0x364] ss:$24 sps:$4 sm:$0xff]   ;;  %v11616_v40 = vld [vmem:[%s15366_s11 + $0x338] ss:$24 sps:$4 sm:$0xff]  }
 0x5bd   : > { %6001 = vmatprep.mubr.bf16.mxu0 %v5412_v21  ;;  %6194 = vmatprep.mubr.bf16.mxu1 %v5412_v21 }
 0x5be   : > { %6002 = vmatmul.mubr.bf16.gmra.mrb[188].mxu0 %v5411_v6  ;;  %6195 = vmatmul.mubr.bf16.gmra.mrb[60].mxu1 %v5411_v6 }
 0x619   : > { %v5853_v1 = vpop.f32.mrb[128].mxu0  ;;  %v6046_v10 = vpop.f32.mrb[0].mxu1 }
 0x61a   : > { %v5854_v55 = vadd.f32 %v5853_v1, %v14101_v34  ;;  %v6047_v30 = vadd.f32 %v6046_v10, %v14104_v7  ;;  %v5855_v17 = vpop.f32.mrb[129].mxu0  ;;  %v6048_v63 = vpop.f32.mrb[1].mxu1  ;;  %v11624_v1 = vld [vmem:[%s15366_s11 + $0x36c] ss:$24 sps:$4 sm:$0xff]  }
 0x61b   : > { %v5856_v14 = vadd.f32 %v5855_v17, %v14107_v41  ;;  %v6049_v23 = vadd.f32 %v6048_v63, %v14110_v54  ;;  %v5857_v56 = vpop.f32.mrb[130].mxu0  ;;  %v6050_v15 = vpop.f32.mrb[2].mxu1 }
 0x61c   : > { %v5858_v16 = vadd.f32 %v5857_v56, %v14101_v34  ;;  %v6051_v11 = vadd.f32 %v6050_v15, %v14104_v7  ;;  %v5859_v13 = vpop.f32.mrb[131].mxu0  ;;  %v6052_v18 = vpop.f32.mrb[3].mxu1  ;;  %v6205_v28 = vmax.f32 %v5854_v55, 0.0  ;;  %v6207_v43 = vmax.f32 %v6047_v30, 0.0 }
 0x61d   : > { %v5860_v19 = vadd.f32 %v5859_v13, %v14107_v41  ;;  %v6053_v0 = vadd.f32 %v6052_v18, %v14110_v54  ;;  %v6206_v2 = vmax.f32 %v5856_v14, 0.0  ;;  %v6208_v26 = vmax.f32 %v6049_v23, 0.0  ;;  %v11622_v13 = vld [vmem:[%s15366_s11 + $0x368] ss:$24 sps:$4 sm:$0xff]  }
 0x61e   : > { %v6209_v22 = vmax.f32 %v5858_v16, 0.0  ;;  %v6211_v58 = vmax.f32 %v6051_v11, 0.0  ;;  %v11592_v11 = vld [vmem:[%s15366_s11 + $0x360] ss:$24 sps:$4 sm:$0xff]  }
 0x61f   : > { %v6210_v52 = vmax.f32 %v5860_v19, 0.0  ;;  %v6212_v24 = vmax.f32 %v6053_v0, 0.0 }
 0x620   : > { %v14120_v8 = vpack.c.bf16 %v6209_v22, %v6205_v28  ;;  %v14122_v45 = vpack.c.bf16 %v6211_v58, %v6207_v43  ;;  %v11597_v43 = vld [vmem:[%s15366_s11 + $0x394] ss:$24 sps:$4 sm:$0xff]  }
 0x621   : > { %v14124_v4 = vpack.c.bf16 %v6210_v52, %v6206_v2  ;;  %v14126_v27 = vpack.c.bf16 %v6212_v24, %v6208_v26  ;;  %v5863_v5 = vpop.f32.mrb[132].mxu0  ;;  %v6056_v49 = vpop.f32.mrb[4].mxu1  ;;  %v11627_v22 = vld [vmem:[%s15366_s11 + $0x39c] ss:$24 sps:$4 sm:$0xff]  }
 0x622   : > { %v5864_v44 = vadd.f32 %v5863_v5, %v14101_v34  ;;  %v6057_v59 = vadd.f32 %v6056_v49, %v14104_v7  ;;  %v5865_v3 = vpop.f32.mrb[133].mxu0  ;;  %v6058_v12 = vpop.f32.mrb[5].mxu1 }
 0x623   : > { %v5866_v31 = vadd.f32 %v5865_v3, %v14107_v41  ;;  %v6059_v46 = vadd.f32 %v6058_v12, %v14110_v54  ;;  %v5867_v48 = vpop.f32.mrb[134].mxu0  ;;  %v6060_v36 = vpop.f32.mrb[6].mxu1  ;;  %7613 = vmatprep.mubr.bf16.mxu0 %v14124_v4  ;;  %7999 = vmatprep.mubr.bf16.mxu1 %v14124_v4  ;;  %v11600_v3 = vld [vmem:[%s15366_s11 + $0x3c4] ss:$24 sps:$4 sm:$0xff]   ;;  %v11625_v12 = vld [vmem:[%s15366_s11 + $0x398] ss:$24 sps:$4 sm:$0xff]  }
 0x624   : > { %v5868_v20 = vadd.f32 %v5867_v48, %v14101_v34  ;;  %v6061_v47 = vadd.f32 %v6060_v36, %v14104_v7  ;;  %v5869_v50 = vpop.f32.mrb[135].mxu0  ;;  %v6062_v25 = vpop.f32.mrb[7].mxu1  ;;  %7614 = vmatmul.mubr.bf16.vlgmr.msra.gmra.mrb[192].mxu0 %v14120_v8  ;;  %8000 = vmatmul.mubr.bf16.vlgmr.msra.gmra.mrb[64].mxu1 %v14120_v8  ;;  %v6213_v6 = vmax.f32 %v5864_v44, 0.0  ;;  %v6215_v21 = vmax.f32 %v6057_v59, 0.0  ;;  %v11595_v59 = vld [vmem:[%s15366_s11 + $0x390] ss:$24 sps:$4 sm:$0xff]  }
 0x625   : > { %v5870_v42 = vadd.f32 %v5869_v50, %v14107_v41  ;;  %v6063_v32 = vadd.f32 %v6062_v25, %v14110_v54  ;;  %7775 = vmatpush1.bf16.msra.mxu0 %v11586_v9  ;;  %8161 = vmatpush1.bf16.msra.mxu1 %v11613_v51  ;;  %v6214_v10 = vmax.f32 %v5866_v31, 0.0  ;;  %v6216_v55 = vmax.f32 %v6059_v46, 0.0  ;;  %v11633_v48 = vld [vmem:[%s15366_s11 + $0x3cc] ss:$24 sps:$4 sm:$0xff]  }
 0x626   : > { %v6217_v53 = vmax.f32 %v5868_v20, 0.0  ;;  %v6219_v57 = vmax.f32 %v6061_v47, 0.0  ;;  %7776 = vmatprep.subr.bf16.mxu0 %v11591_v60  ;;  %8162 = vmatprep.subr.bf16.mxu1 %v11618_v33 }
 0x627   : > { %v6218_v30 = vmax.f32 %v5870_v42, 0.0  ;;  %v6220_v17 = vmax.f32 %v6063_v32, 0.0 }
 0x628   : > { %v14164_v63 = vpack.c.bf16 %v6217_v53, %v6213_v6  ;;  %v14166_v14 = vpack.c.bf16 %v6219_v57, %v6215_v21  ;;  %v11598_v6 = vld [vmem:[%s15366_s11 + $0x3c0] ss:$24 sps:$4 sm:$0xff]  }
 0x629   : > { %v14168_v23 = vpack.c.bf16 %v6218_v30, %v6214_v10  ;;  %v14170_v56 = vpack.c.bf16 %v6220_v17, %v6216_v55  ;;  %v5873_v15 = vpop.f32.mrb[136].mxu0  ;;  %v6066_v16 = vpop.f32.mrb[8].mxu1  ;;  %7777 = vmatpush1.bf16.msra.mxu0 %v11589_v39  ;;  %8163 = vmatpush1.bf16.msra.mxu1 %v11616_v40  ;;  %v11631_v21 = vld [vmem:[%s15366_s11 + $0x3c8] ss:$24 sps:$4 sm:$0xff]   ;;  %v11603_v55 = vld [vmem:[%s15366_s11 + $0x3f4] ss:$24 sps:$4 sm:$0xff]  }
 0x62a   : > { %v5874_v18 = vadd.f32 %v5873_v15, %v14101_v34  ;;  %v6067_v19 = vadd.f32 %v6066_v16, %v14104_v7  ;;  %v5875_v0 = vpop.f32.mrb[137].mxu0  ;;  %v6068_v28 = vpop.f32.mrb[9].mxu1  ;;  %7778 = vmatprep.subr.bf16.mxu0 %v11594_v61  ;;  %8164 = vmatprep.subr.bf16.mxu1 %v11624_v1  ;;  %v11636_v30 = vld [vmem:[%s15366_s11 + $0x3fc] ss:$24 sps:$4 sm:$0xff]  }
 0x62b   : > { %v5876_v58 = vadd.f32 %v5875_v0, %v14107_v41  ;;  %v6069_v2 = vadd.f32 %v6068_v28, %v14110_v54  ;;  %v5877_v26 = vpop.f32.mrb[138].mxu0  ;;  %v6070_v52 = vpop.f32.mrb[10].mxu1  ;;  %7623 = vmatprep.mubr.bf16.mxu0 %v14168_v23  ;;  %8009 = vmatprep.mubr.bf16.mxu1 %v14168_v23 }
 0x62c   : > { %v5878_v24 = vadd.f32 %v5877_v26, %v14101_v34  ;;  %v6071_v5 = vadd.f32 %v6070_v52, %v14104_v7  ;;  %v5879_v49 = vpop.f32.mrb[139].mxu0  ;;  %v6072_v9 = vpop.f32.mrb[11].mxu1  ;;  %7624 = vmatmul.mubr.bf16.gmra.mrb[196].mxu0 %v14164_v63  ;;  %8010 = vmatmul.mubr.bf16.gmra.mrb[68].mxu1 %v14164_v63  ;;  %v6221_v60 = vmax.f32 %v5874_v18, 0.0  ;;  %v6223_v33 = vmax.f32 %v6067_v19, 0.0 }
 0x62d   : > { %v5880_v51 = vadd.f32 %v5879_v49, %v14107_v41  ;;  %v6073_v44 = vadd.f32 %v6072_v9, %v14110_v54  ;;  %7779 = vmatpush1.bf16.msra.mxu0 %v11592_v11  ;;  %8165 = vmatpush1.bf16.msra.mxu1 %v11622_v13  ;;  %v6222_v36 = vmax.f32 %v5876_v58, 0.0  ;;  %v6224_v20 = vmax.f32 %v6069_v2, 0.0  ;;  %v11606_v58 = vld [vmem:[%s15366_s11 + $0x424] ss:$24 sps:$4 sm:$0xff]   ;;  %v11634_v2 = vld [vmem:[%s15366_s11 + $0x3f8] ss:$24 sps:$4 sm:$0xff]  }
 0x62e   : > { %v6225_v31 = vmax.f32 %v5878_v24, 0.0  ;;  %v6227_v46 = vmax.f32 %v6071_v5, 0.0  ;;  %7780 = vmatprep.subr.bf16.mxu0 %v11597_v43  ;;  %8166 = vmatprep.subr.bf16.mxu1 %v11627_v22  ;;  %v11601_v22 = vld [vmem:[%s15366_s11 + $0x3f0] ss:$24 sps:$4 sm:$0xff]   ;;  %v11642_v49 = vld [vmem:[%s15366_s11 + $0x42c] ss:$24 sps:$4 sm:$0xff]  }
 0x62f   : > { %v6226_v47 = vmax.f32 %v5880_v51, 0.0  ;;  %v6228_v50 = vmax.f32 %v6073_v44, 0.0 }
 0x630   : > { %v14208_v25 = vpack.c.bf16 %v6225_v31, %v6221_v60  ;;  %v14210_v42 = vpack.c.bf16 %v6227_v46, %v6223_v33 }
 0x631   : > { %v14212_v32 = vpack.c.bf16 %v6226_v47, %v6222_v36  ;;  %v14214_v39 = vpack.c.bf16 %v6228_v50, %v6224_v20  ;;  %v5883_v61 = vpop.f32.mrb[140].mxu0  ;;  %v6076_v40 = vpop.f32.mrb[12].mxu1  ;;  %7781 = vmatpush1.bf16.msra.mxu0 %v11595_v59  ;;  %8167 = vmatpush1.bf16.msra.mxu1 %v11625_v12  ;;  %v11640_v36 = vld [vmem:[%s15366_s11 + $0x428] ss:$24 sps:$4 sm:$0xff]  }
 0x632   : > { %v5884_v53 = vadd.f32 %v5883_v61, %v14101_v34  ;;  %v6077_v57 = vadd.f32 %v6076_v40, %v14104_v7  ;;  %v5885_v1 = vpop.f32.mrb[141].mxu0  ;;  %v6078_v10 = vpop.f32.mrb[13].mxu1  ;;  %7782 = vmatprep.subr.bf16.mxu0 %v11600_v3  ;;  %8168 = vmatprep.subr.bf16.mxu1 %v11633_v48  ;;  %v11604_v48 = vld [vmem:[%s15366_s11 + $0x420] ss:$24 sps:$4 sm:$0xff]   ;;  %v11609_v40 = vld [vmem:[%s15366_s11 + $0x454] ss:$24 sps:$4 sm:$0xff]  }
 0x633   : > { %v5886_v17 = vadd.f32 %v5885_v1, %v14107_v41  ;;  %v6079_v15 = vadd.f32 %v6078_v10, %v14110_v54  ;;  %v5887_v16 = vpop.f32.mrb[142].mxu0  ;;  %v6080_v11 = vpop.f32.mrb[14].mxu1  ;;  %7633 = vmatprep.mubr.bf16.mxu0 %v14212_v32  ;;  %8019 = vmatprep.mubr.bf16.mxu1 %v14212_v32 }
 0x634   : > { %v5888_v13 = vadd.f32 %v5887_v16, %v14101_v34  ;;  %v6081_v18 = vadd.f32 %v6080_v11, %v14104_v7  ;;  %v5889_v19 = vpop.f32.mrb[143].mxu0  ;;  %v6082_v0 = vpop.f32.mrb[15].mxu1  ;;  %7634 = vmatmul.mubr.bf16.gmra.mrb[200].mxu0 %v14208_v25  ;;  %8020 = vmatmul.mubr.bf16.gmra.mrb[72].mxu1 %v14208_v25  ;;  %v6229_v26 = vmax.f32 %v5884_v53, 0.0  ;;  %v6231_v52 = vmax.f32 %v6077_v57, 0.0  ;;  %v11607_v11 = vld [vmem:[%s15366_s11 + $0x450] ss:$24 sps:$4 sm:$0xff]  }
 0x635   : > { %v5890_v28 = vadd.f32 %v5889_v19, %v14107_v41  ;;  %v6083_v43 = vadd.f32 %v6082_v0, %v14110_v54  ;;  %7783 = vmatpush1.bf16.msra.mxu0 %v11598_v6  ;;  %8169 = vmatpush1.bf16.msra.mxu1 %v11631_v21  ;;  %v6230_v9 = vmax.f32 %v5886_v17, 0.0  ;;  %v6232_v51 = vmax.f32 %v6079_v15, 0.0  ;;  %v11645_v6 = vld [vmem:[%s15366_s11 + $0x45c] ss:$24 sps:$4 sm:$0xff]  }
 0x636   : > { %v6233_v24 = vmax.f32 %v5888_v13, 0.0  ;;  %v6235_v5 = vmax.f32 %v6081_v18, 0.0  ;;  %7784 = vmatprep.subr.bf16.mxu0 %v11603_v55  ;;  %8170 = vmatprep.subr.bf16.mxu1 %v11636_v30  ;;  %v11612_v13 = vld [vmem:[%s15366_s11 + $0x484] ss:$24 sps:$4 sm:$0xff]   ;;  %v11643_v18 = vld [vmem:[%s15366_s11 + $0x458] ss:$24 sps:$4 sm:$0xff]  }
 0x637   : > { %v6234_v44 = vmax.f32 %v5890_v28, 0.0  ;;  %v6236_v59 = vmax.f32 %v6083_v43, 0.0 }
 0x638   : > { %v14252_v3 = vpack.c.bf16 %v6233_v24, %v6229_v26  ;;  %v14254_v12 = vpack.c.bf16 %v6235_v5, %v6231_v52 }
 0x639   : > { %v14256_v60 = vpack.c.bf16 %v6234_v44, %v6230_v9  ;;  %v14258_v33 = vpack.c.bf16 %v6236_v59, %v6232_v51  ;;  %v5893_v31 = vpop.f32.mrb[144].mxu0  ;;  %v6086_v46 = vpop.f32.mrb[16].mxu1  ;;  %7785 = vmatpush1.bf16.msra.mxu0 %v11601_v22  ;;  %8171 = vmatpush1.bf16.msra.mxu1 %v11634_v2  ;;  %v11651_v22 = vld [vmem:[%s15366_s11 + $0x48c] ss:$24 sps:$4 sm:$0xff]   ;;  %v11610_v59 = vld [vmem:[%s15366_s11 + $0x480] ss:$24 sps:$4 sm:$0xff]  }
 0x63a   : > { %v5894_v20 = vadd.f32 %v5893_v31, %v14101_v34  ;;  %v6087_v47 = vadd.f32 %v6086_v46, %v14104_v7  ;;  %v5895_v50 = vpop.f32.mrb[145].mxu0  ;;  %v6088_v61 = vpop.f32.mrb[17].mxu1  ;;  %7786 = vmatprep.subr.bf16.mxu0 %v11606_v58  ;;  %8172 = vmatprep.subr.bf16.mxu1 %v11642_v49  ;;  %v11649_v31 = vld [vmem:[%s15366_s11 + $0x488] ss:$24 sps:$4 sm:$0xff]  }
 0x63b   : > { %v5896_v21 = vadd.f32 %v5895_v50, %v14107_v41  ;;  %v6089_v53 = vadd.f32 %v6088_v61, %v14110_v54  ;;  %v5897_v57 = vpop.f32.mrb[146].mxu0  ;;  %v6090_v1 = vpop.f32.mrb[18].mxu1  ;;  %7643 = vmatprep.mubr.bf16.mxu0 %v14256_v60  ;;  %8029 = vmatprep.mubr.bf16.mxu1 %v14256_v60  ;;  %v11654_v50 = vld [vmem:[%s15366_s11 + $0x4bc] ss:$24 sps:$4 sm:$0xff]  }
 0x63c   : > { %v5898_v10 = vadd.f32 %v5897_v57, %v14101_v34  ;;  %v6091_v55 = vadd.f32 %v6090_v1, %v14104_v7  ;;  %v5899_v30 = vpop.f32.mrb[147].mxu0  ;;  %v6092_v17 = vpop.f32.mrb[19].mxu1  ;;  %7644 = vmatmul.mubr.bf16.gmra.mrb[204].mxu0 %v14252_v3  ;;  %8030 = vmatmul.mubr.bf16.gmra.mrb[76].mxu1 %v14252_v3  ;;  %v6237_v19 = vmax.f32 %v5894_v20, 0.0  ;;  %v6239_v0 = vmax.f32 %v6087_v47, 0.0  ;;  %v11621_v47 = vld [vmem:[%s15366_s11 + $0x4b4] ss:$24 sps:$4 sm:$0xff]  }
 0x63d   : > { %v5900_v15 = vadd.f32 %v5899_v30, %v14107_v41  ;;  %v6093_v16 = vadd.f32 %v6092_v17, %v14110_v54  ;;  %7787 = vmatpush1.bf16.msra.mxu0 %v11604_v48  ;;  %8173 = vmatpush1.bf16.msra.mxu1 %v11640_v36  ;;  %v6238_v58 = vmax.f32 %v5896_v21, 0.0  ;;  %v6240_v2 = vmax.f32 %v6089_v53, 0.0  ;;  %v11619_v17 = vld [vmem:[%s15366_s11 + $0x4b0] ss:$24 sps:$4 sm:$0xff]  }
 0x63e   : > { %v6241_v28 = vmax.f32 %v5898_v10, 0.0  ;;  %v6243_v43 = vmax.f32 %v6091_v55, 0.0  ;;  %7788 = vmatprep.subr.bf16.mxu0 %v11609_v40  ;;  %8174 = vmatprep.subr.bf16.mxu1 %v11645_v6 }
 0x63f   : > { %v6242_v26 = vmax.f32 %v5900_v15, 0.0  ;;  %v6244_v52 = vmax.f32 %v6093_v16, 0.0  ;;  %v11630_v15 = vld [vmem:[%s15366_s11 + $0x4e4] ss:$24 sps:$4 sm:$0xff]   ;;  %v11652_v16 = vld [vmem:[%s15366_s11 + $0x4b8] ss:$24 sps:$4 sm:$0xff]  }
 0x640   : > { %v14296_v24 = vpack.c.bf16 %v6241_v28, %v6237_v19  ;;  %v14298_v5 = vpack.c.bf16 %v6243_v43, %v6239_v0  ;;  %v11660_v0 = vld [vmem:[%s15366_s11 + $0x4ec] ss:$24 sps:$4 sm:$0xff]  }
 0x641   : > { %v14300_v49 = vpack.c.bf16 %v6242_v26, %v6238_v58  ;;  %v14302_v9 = vpack.c.bf16 %v6244_v52, %v6240_v2  ;;  %v5903_v51 = vpop.f32.mrb[148].mxu0  ;;  %v6096_v44 = vpop.f32.mrb[20].mxu1  ;;  %7789 = vmatpush1.bf16.msra.mxu0 %v11607_v11  ;;  %8175 = vmatpush1.bf16.msra.mxu1 %v11643_v18 }
 0x642   : > { %15446 = vst [vmem:[#allocation4_spill] sm:$0xff] %v14296_v24  ;;  %v5904_v46 = vadd.f32 %v5903_v51, %v14101_v34  ;;  %v6097_v48 = vadd.f32 %v6096_v44, %v14104_v7  ;;  %v5905_v36 = vpop.f32.mrb[149].mxu0  ;;  %v6098_v20 = vpop.f32.mrb[21].mxu1  ;;  %7790 = vmatprep.subr.bf16.mxu0 %v11612_v13  ;;  %8176 = vmatprep.subr.bf16.mxu1 %v11651_v22 }
 0x643   : > { %v5906_v61 = vadd.f32 %v5905_v36, %v14107_v41  ;;  %v6099_v40 = vadd.f32 %v6098_v20, %v14110_v54  ;;  %v5907_v6 = vpop.f32.mrb[150].mxu0  ;;  %v6100_v21 = vpop.f32.mrb[22].mxu1  ;;  %7653 = vmatprep.mubr.bf16.mxu0 %v14300_v49  ;;  %8039 = vmatprep.mubr.bf16.mxu1 %v14300_v49 }
 0x644   : > { %v5908_v53 = vadd.f32 %v5907_v6, %v14101_v34  ;;  %v6101_v57 = vadd.f32 %v6100_v21, %v14104_v7  ;;  %v5909_v1 = vpop.f32.mrb[151].mxu0  ;;  %v6102_v10 = vpop.f32.mrb[23].mxu1  ;;  %7654 = vmatmul.mubr.bf16.gmra.mrb[208].mxu0 %v14296_v24  ;;  %8040 = vmatmul.mubr.bf16.gmra.mrb[80].mxu1 %v14296_v24  ;;  %v6245_v11 = vmax.f32 %v5904_v46, 0.0  ;;  %v6247_v13 = vmax.f32 %v6097_v48, 0.0  ;;  %v11658_v46 = vld [vmem:[%s15366_s11 + $0x4e8] ss:$24 sps:$4 sm:$0xff]  }
 0x645   : > { %v5910_v55 = vadd.f32 %v5909_v1, %v14107_v41  ;;  %v6103_v30 = vadd.f32 %v6102_v10, %v14110_v54  ;;  %7791 = vmatpush1.bf16.msra.mxu0 %v11610_v59  ;;  %8177 = vmatpush1.bf16.msra.mxu1 %v11649_v31  ;;  %v6246_v28 = vmax.f32 %v5906_v61, 0.0  ;;  %v6248_v43 = vmax.f32 %v6099_v40, 0.0  ;;  %v11628_v31 = vld [vmem:[%s15366_s11 + $0x4e0] ss:$24 sps:$4 sm:$0xff]   ;;  %v11663_v61 = vld [vmem:[%s15366_s11 + $0x51c] ss:$24 sps:$4 sm:$0xff]  }
 0x646   : > { %v6249_v18 = vmax.f32 %v5908_v53, 0.0  ;;  %v6251_v19 = vmax.f32 %v6101_v57, 0.0  ;;  %7792 = vmatprep.subr.bf16.mxu0 %v11621_v47  ;;  %8178 = vmatprep.subr.bf16.mxu1 %v11654_v50  ;;  %v11639_v50 = vld [vmem:[%s15366_s11 + $0x514] ss:$24 sps:$4 sm:$0xff]  }
 0x647   : > { %v6250_v22 = vmax.f32 %v5910_v55, 0.0  ;;  %v6252_v58 = vmax.f32 %v6103_v30, 0.0 }
 0x648   : > { %v14340_v2 = vpack.c.bf16 %v6249_v18, %v6245_v11  ;;  %v14342_v26 = vpack.c.bf16 %v6251_v19, %v6247_v13  ;;  %v11661_v11 = vld [vmem:[%s15366_s11 + $0x518] ss:$24 sps:$4 sm:$0xff]  }
 0x649   : > { %v14344_v52 = vpack.c.bf16 %v6250_v22, %v6246_v28  ;;  %v14346_v51 = vpack.c.bf16 %v6252_v58, %v6248_v43  ;;  %v5913_v44 = vpop.f32.mrb[152].mxu0  ;;  %v6106_v59 = vpop.f32.mrb[24].mxu1  ;;  %7793 = vmatpush1.bf16.msra.mxu0 %v11619_v17  ;;  %8179 = vmatpush1.bf16.msra.mxu1 %v11652_v16  ;;  %v11648_v16 = vld [vmem:[%s15366_s11 + $0x544] ss:$24 sps:$4 sm:$0xff]  }
 0x64a   : > { %15447 = vst [vmem:[#allocation5_spill] sm:$0xff] %v14340_v2  ;;  %v5914_v48 = vadd.f32 %v5913_v44, %v14101_v34  ;;  %v6107_v36 = vadd.f32 %v6106_v59, %v14104_v7  ;;  %v5915_v20 = vpop.f32.mrb[153].mxu0  ;;  %v6108_v47 = vpop.f32.mrb[25].mxu1  ;;  %7794 = vmatprep.subr.bf16.mxu0 %v11630_v15  ;;  %8180 = vmatprep.subr.bf16.mxu1 %v11660_v0  ;;  %v11637_v15 = vld [vmem:[%s15366_s11 + $0x510] ss:$24 sps:$4 sm:$0xff]  }
 0x64b   : > { %15448 = vst [vmem:[#allocation6_spill] sm:$0xff] %v14344_v52  ;;  %v5916_v40 = vadd.f32 %v5915_v20, %v14107_v41  ;;  %v6109_v6 = vadd.f32 %v6108_v47, %v14110_v54  ;;  %v5917_v21 = vpop.f32.mrb[154].mxu0  ;;  %v6110_v53 = vpop.f32.mrb[26].mxu1  ;;  %7663 = vmatprep.mubr.bf16.mxu0 %v14344_v52  ;;  %8049 = vmatprep.mubr.bf16.mxu1 %v14344_v52  ;;  %v11669_v28 = vld [vmem:[%s15366_s11 + $0x54c] ss:$24 sps:$4 sm:$0xff]  }
 0x64c   : > { %v5918_v57 = vadd.f32 %v5917_v21, %v14101_v34  ;;  %v6111_v1 = vadd.f32 %v6110_v53, %v14104_v7  ;;  %v5919_v10 = vpop.f32.mrb[155].mxu0  ;;  %v6112_v55 = vpop.f32.mrb[27].mxu1  ;;  %7664 = vmatmul.mubr.bf16.gmra.mrb[212].mxu0 %v14340_v2  ;;  %8050 = vmatmul.mubr.bf16.gmra.mrb[84].mxu1 %v14340_v2  ;;  %v6253_v13 = vmax.f32 %v5914_v48, 0.0  ;;  %v6255_v18 = vmax.f32 %v6107_v36, 0.0  ;;  %v11646_v47 = vld [vmem:[%s15366_s11 + $0x540] ss:$24 sps:$4 sm:$0xff]  }
 0x64d   : > { %v5920_v30 = vadd.f32 %v5919_v10, %v14107_v41  ;;  %v6113_v17 = vadd.f32 %v6112_v55, %v14110_v54  ;;  %7795 = vmatpush1.bf16.msra.mxu0 %v11628_v31  ;;  %8181 = vmatpush1.bf16.msra.mxu1 %v11658_v46  ;;  %v6254_v43 = vmax.f32 %v5916_v40, 0.0  ;;  %v6256_v22 = vmax.f32 %v6109_v6, 0.0  ;;  %v11657_v53 = vld [vmem:[%s15366_s11 + $0x574] ss:$24 sps:$4 sm:$0xff]  }
 0x64e   : > { %v6257_v19 = vmax.f32 %v5918_v57, 0.0  ;;  %v6259_v0 = vmax.f32 %v6111_v1, 0.0  ;;  %7796 = vmatprep.subr.bf16.mxu0 %v11639_v50  ;;  %8182 = vmatprep.subr.bf16.mxu1 %v11663_v61  ;;  %v11667_v50 = vld [vmem:[%s15366_s11 + $0x548] ss:$24 sps:$4 sm:$0xff]   ;;  %v11672_v57 = vld [vmem:[%s15366_s11 + $0x57c] ss:$24 sps:$4 sm:$0xff]  }
 0x64f   : > { %v6258_v58 = vmax.f32 %v5920_v30, 0.0  ;;  %v6260_v44 = vmax.f32 %v6113_v17, 0.0 }
 0x650   : > { %v14384_v59 = vpack.c.bf16 %v6257_v19, %v6253_v13  ;;  %v14386_v31 = vpack.c.bf16 %v6259_v0, %v6255_v18  ;;  %v11655_v19 = vld [vmem:[%s15366_s11 + $0x570] ss:$24 sps:$4 sm:$0xff]   ;;  %v11666_v0 = vld [vmem:[%s15366_s11 + $0x5a4] ss:$24 sps:$4 sm:$0xff]  }
 0x651   : > { %v14388_v46 = vpack.c.bf16 %v6258_v58, %v6254_v43  ;;  %v14390_v48 = vpack.c.bf16 %v6260_v44, %v6256_v22  ;;  %v5923_v36 = vpop.f32.mrb[156].mxu0  ;;  %v6116_v20 = vpop.f32.mrb[28].mxu1  ;;  %7797 = vmatpush1.bf16.msra.mxu0 %v11637_v15  ;;  %8183 = vmatpush1.bf16.msra.mxu1 %v11661_v11 }
 0x652   : > { %15449 = vst [vmem:[#allocation7_spill] sm:$0xff] %v14384_v59  ;;  %v5924_v61 = vadd.f32 %v5923_v36, %v14101_v34  ;;  %v6117_v40 = vadd.f32 %v6116_v20, %v14104_v7  ;;  %v5925_v6 = vpop.f32.mrb[157].mxu0  ;;  %v6118_v21 = vpop.f32.mrb[29].mxu1  ;;  %7798 = vmatprep.subr.bf16.mxu0 %v11648_v16  ;;  %8184 = vmatprep.subr.bf16.mxu1 %v11669_v28  ;;  %v11670_v28 = vld [vmem:[%s15366_s11 + $0x578] ss:$24 sps:$4 sm:$0xff]  }
 0x653   : > { %15450 = vst [vmem:[#allocation8_spill] sm:$0xff] %v14388_v46  ;;  %v5926_v1 = vadd.f32 %v5925_v6, %v14107_v41  ;;  %v6119_v10 = vadd.f32 %v6118_v21, %v14110_v54  ;;  %v5927_v55 = vpop.f32.mrb[158].mxu0  ;;  %v6120_v30 = vpop.f32.mrb[30].mxu1  ;;  %7673 = vmatprep.mubr.bf16.mxu0 %v14388_v46  ;;  %8059 = vmatprep.mubr.bf16.mxu1 %v14388_v46  ;;  %v11678_v36 = vld [vmem:[%s15366_s11 + $0x5ac] ss:$24 sps:$4 sm:$0xff]  }
 0x654   : > { %v5928_v17 = vadd.f32 %v5927_v55, %v14101_v34  ;;  %v6121_v15 = vadd.f32 %v6120_v30, %v14104_v7  ;;  %v5929_v16 = vpop.f32.mrb[159].mxu0  ;;  %v6122_v11 = vpop.f32.mrb[31].mxu1  ;;  %7674 = vmatmul.mubr.bf16.gmra.mrb[216].mxu0 %v14384_v59  ;;  %8060 = vmatmul.mubr.bf16.gmra.mrb[88].mxu1 %v14384_v59  ;;  %v6261_v43 = vmax.f32 %v5924_v61, 0.0  ;;  %v6263_v22 = vmax.f32 %v6117_v40, 0.0 }
 0x655   : > { %v5930_v13 = vadd.f32 %v5929_v16, %v14107_v41  ;;  %v6123_v18 = vadd.f32 %v6122_v11, %v14110_v54  ;;  %7799 = vmatpush1.bf16.msra.mxu0 %v11646_v47  ;;  %8185 = vmatpush1.bf16.msra.mxu1 %v11667_v50  ;;  %v6262_v20 = vmax.f32 %v5926_v1, 0.0  ;;  %v6264_v47 = vmax.f32 %v6119_v10, 0.0  ;;  %v11675_v11 = vld [vmem:[%s15366_s11 + $0x5d4] ss:$24 sps:$4 sm:$0xff]  }
 0x656   : > { %v6265_v58 = vmax.f32 %v5928_v17, 0.0  ;;  %v6267_v44 = vmax.f32 %v6121_v15, 0.0  ;;  %7800 = vmatprep.subr.bf16.mxu0 %v11657_v53  ;;  %8186 = vmatprep.subr.bf16.mxu1 %v11672_v57  ;;  %v11664_v53 = vld [vmem:[%s15366_s11 + $0x5a0] ss:$24 sps:$4 sm:$0xff]  }
 0x657   : > { %v6266_v6 = vmax.f32 %v5930_v13, 0.0  ;;  %v6268_v21 = vmax.f32 %v6123_v18, 0.0  ;;  %v11676_v57 = vld [vmem:[%s15366_s11 + $0x5a8] ss:$24 sps:$4 sm:$0xff]   ;;  %v11681_v13 = vld [vmem:[%s15366_s11 + $0x5dc] ss:$24 sps:$4 sm:$0xff]  }
 0x658   : > { %v14428_v55 = vpack.c.bf16 %v6265_v58, %v6261_v43  ;;  %v14430_v50 = vpack.c.bf16 %v6267_v44, %v6263_v22 }
 0x659   : > { %v14432_v30 = vpack.c.bf16 %v6266_v6, %v6262_v20  ;;  %v14434_v61 = vpack.c.bf16 %v6268_v21, %v6264_v47  ;;  %v5933_v40 = vpop.f32.mrb[160].mxu0  ;;  %v6126_v17 = vpop.f32.mrb[32].mxu1  ;;  %7801 = vmatpush1.bf16.msra.mxu0 %v11655_v19  ;;  %8187 = vmatpush1.bf16.msra.mxu1 %v11670_v28  ;;  %v11673_v47 = vld [vmem:[%s15366_s11 + $0x5d0] ss:$24 sps:$4 sm:$0xff]  }
 0x65a   : > { %15451 = vst [vmem:[#allocation9_spill] sm:$0xff] %v14428_v55  ;;  %v5934_v1 = vadd.f32 %v5933_v40, %v14101_v34  ;;  %v6127_v10 = vadd.f32 %v6126_v17, %v14104_v7  ;;  %v5935_v15 = vpop.f32.mrb[161].mxu0  ;;  %v6128_v16 = vpop.f32.mrb[33].mxu1  ;;  %7802 = vmatprep.subr.bf16.mxu0 %v11666_v0  ;;  %8188 = vmatprep.subr.bf16.mxu1 %v11678_v36  ;;  %v11679_v6 = vld [vmem:[%s15366_s11 + $0x5d8] ss:$24 sps:$4 sm:$0xff]  }
 0x65b   : > { %15452 = vst [vmem:[#allocation10_spill] sm:$0xff] %v14432_v30  ;;  %v5936_v18 = vadd.f32 %v5935_v15, %v14107_v41  ;;  %v6129_v19 = vadd.f32 %v6128_v16, %v14110_v54  ;;  %v5937_v28 = vpop.f32.mrb[162].mxu0  ;;  %v6130_v43 = vpop.f32.mrb[34].mxu1  ;;  %7683 = vmatprep.mubr.bf16.mxu0 %v14432_v30  ;;  %8069 = vmatprep.mubr.bf16.mxu1 %v14432_v30  ;;  %v11684_v16 = vld [vmem:[%s15366_s11 + $0x14] ss:$24 sps:$4 sm:$0xff]  }
 0x65c   : > { %v5938_v0 = vadd.f32 %v5937_v28, %v14101_v34  ;;  %v6131_v22 = vadd.f32 %v6130_v43, %v14104_v7  ;;  %v5939_v58 = vpop.f32.mrb[163].mxu0  ;;  %v6132_v44 = vpop.f32.mrb[35].mxu1  ;;  %7684 = vmatmul.mubr.bf16.gmra.mrb[220].mxu0 %v14428_v55  ;;  %8070 = vmatmul.mubr.bf16.gmra.mrb[92].mxu1 %v14428_v55  ;;  %v6269_v21 = vmax.f32 %v5934_v1, 0.0  ;;  %v6271_v40 = vmax.f32 %v6127_v10, 0.0 }
 0x65d   : > { %v5940_v36 = vadd.f32 %v5939_v58, %v14107_v41  ;;  %v6133_v20 = vadd.f32 %v6132_v44, %v14110_v54  ;;  %7803 = vmatpush1.bf16.msra.mxu0 %v11664_v53  ;;  %8189 = vmatpush1.bf16.msra.mxu1 %v11676_v57  ;;  %v6270_v53 = vmax.f32 %v5936_v18, 0.0  ;;  %v6272_v28 = vmax.f32 %v6129_v19, 0.0 }
 0x65e   : > { %v6273_v17 = vmax.f32 %v5938_v0, 0.0  ;;  %v6275_v15 = vmax.f32 %v6131_v22, 0.0  ;;  %7804 = vmatprep.subr.bf16.mxu0 %v11675_v11  ;;  %8190 = vmatprep.subr.bf16.mxu1 %v11681_v13 }
 0x65f   : > { %v6274_v43 = vmax.f32 %v5940_v36, 0.0  ;;  %v6276_v58 = vmax.f32 %v6133_v20, 0.0 }
 0x660   : > { %v14469_v44 = vpack.c.bf16 %v6273_v17, %v6269_v21  ;;  %v14471_v57 = vpack.c.bf16 %v6275_v15, %v6271_v40 }
 0x661   : > { %v14473_v62 = vpack.c.bf16 %v6274_v43, %v6270_v53  ;;  %v14475_v1 = vpack.c.bf16 %v6276_v58, %v6272_v28  ;;  %v5943_v10 = vpop.f32.mrb[164].mxu0  ;;  %v6136_v0 = vpop.f32.mrb[36].mxu1  ;;  %7805 = vmatpush1.bf16.msra.mxu0 %v11673_v47  ;;  %8191 = vmatpush1.bf16.msra.mxu1 %v11679_v6 }
 0x662   : > { %15453 = vst [vmem:[#allocation11_spill] sm:$0xff] %v14469_v44  ;;  %v5944_v11 = vadd.f32 %v5943_v10, %v14101_v34  ;;  %v6137_v13 = vadd.f32 %v6136_v0, %v14104_v7  ;;  %v5945_v18 = vpop.f32.mrb[165].mxu0  ;;  %v6138_v19 = vpop.f32.mrb[37].mxu1  ;;  %8353 = vmatprep.subr.bf16.mxu0 %v11684_v16 }
 0x663   : > { %15454 = vst [vmem:[#allocation12_spill] sm:$0xff] %v14473_v62  ;;  %v5946_v22 = vadd.f32 %v5945_v18, %v14107_v41  ;;  %v6139_v36 = vadd.f32 %v6138_v19, %v14110_v54  ;;  %v5947_v20 = vpop.f32.mrb[166].mxu0  ;;  %v6140_v21 = vpop.f32.mrb[38].mxu1  ;;  %7693 = vmatprep.mubr.bf16.mxu0 %v14473_v62  ;;  %8079 = vmatprep.mubr.bf16.mxu1 %v14473_v62 }
 0x664   : > { %v5948_v47 = vadd.f32 %v5947_v20, %v14101_v34  ;;  %v6141_v6 = vadd.f32 %v6140_v21, %v14104_v7  ;;  %v5949_v40 = vpop.f32.mrb[167].mxu0  ;;  %v6142_v17 = vpop.f32.mrb[39].mxu1  ;;  %7694 = vmatmul.mubr.bf16.gmra.mrb[224].mxu0 %v14469_v44  ;;  %8080 = vmatmul.mubr.bf16.gmra.mrb[96].mxu1 %v14469_v44  ;;  %v6277_v53 = vmax.f32 %v5944_v11, 0.0  ;;  %v6279_v28 = vmax.f32 %v6137_v13, 0.0 }
 0x665   : > { %v5950_v15 = vadd.f32 %v5949_v40, %v14107_v41  ;;  %v6143_v16 = vadd.f32 %v6142_v17, %v14110_v54  ;;  %v6278_v10 = vmax.f32 %v5946_v22, 0.0  ;;  %v6280_v0 = vmax.f32 %v6139_v36, 0.0 }
 0x666   : > { %v6281_v43 = vmax.f32 %v5948_v47, 0.0  ;;  %v6283_v58 = vmax.f32 %v6141_v6, 0.0 }
 0x667   : > { %v6282_v18 = vmax.f32 %v5950_v15, 0.0  ;;  %v6284_v19 = vmax.f32 %v6143_v16, 0.0 }
 0x668   : > { %v14489_v20 = vpack.c.bf16 %v6281_v43, %v6277_v53  ;;  %v14491_v21 = vpack.c.bf16 %v6283_v58, %v6279_v28 }
 0x669   : > { %v14493_v37 = vpack.c.bf16 %v6282_v18, %v6278_v10  ;;  %v14495_v38 = vpack.c.bf16 %v6284_v19, %v6280_v0  ;;  %v5953_v35 = vpop.f32.mrb[168].mxu0  ;;  %v6146_v40 = vpop.f32.mrb[40].mxu1 }
 0x66a   : > { %15455 = vst [vmem:[#allocation13_spill] sm:$0xff] %v14489_v20  ;;  %v5954_v17 = vadd.f32 %v5953_v35, %v14101_v34  ;;  %v6147_v11 = vadd.f32 %v6146_v40, %v14104_v7  ;;  %v5955_v13 = vpop.f32.mrb[169].mxu0  ;;  %v6148_v47 = vpop.f32.mrb[41].mxu1 }
 0x66b   : > { %15456 = vst [vmem:[#allocation15_spill] sm:$0xff] %v14493_v37  ;;  %v5956_v22 = vadd.f32 %v5955_v13, %v14107_v41  ;;  %v6149_v36 = vadd.f32 %v6148_v47, %v14110_v54  ;;  %v5957_v6 = vpop.f32.mrb[170].mxu0  ;;  %v6150_v15 = vpop.f32.mrb[42].mxu1  ;;  %7703 = vmatprep.mubr.bf16.mxu0 %v14493_v37  ;;  %8089 = vmatprep.mubr.bf16.mxu1 %v14493_v37 }
 0x66c   : > { %v5958_v16 = vadd.f32 %v5957_v6, %v14101_v34  ;;  %v6151_v53 = vadd.f32 %v6150_v15, %v14104_v7  ;;  %v5959_v28 = vpop.f32.mrb[171].mxu0  ;;  %v6152_v35 = vpop.f32.mrb[43].mxu1  ;;  %7704 = vmatmul.mubr.bf16.gmra.mrb[228].mxu0 %v14489_v20  ;;  %8090 = vmatmul.mubr.bf16.gmra.mrb[100].mxu1 %v14489_v20  ;;  %v6285_v10 = vmax.f32 %v5954_v17, 0.0  ;;  %v6287_v0 = vmax.f32 %v6147_v11, 0.0 }
 0x66d   : > { %v5960_v43 = vadd.f32 %v5959_v28, %v14107_v41  ;;  %v6153_v58 = vadd.f32 %v6152_v35, %v14110_v54  ;;  %v6286_v40 = vmax.f32 %v5956_v22, 0.0  ;;  %v6288_v13 = vmax.f32 %v6149_v36, 0.0 }
 0x66e   : > { %v6289_v18 = vmax.f32 %v5958_v16, 0.0  ;;  %v6291_v19 = vmax.f32 %v6151_v53, 0.0 }
 0x66f   : > { %v6290_v47 = vmax.f32 %v5960_v43, 0.0  ;;  %v6292_v6 = vmax.f32 %v6153_v58, 0.0 }
 0x670   : > { %v14509_v29 = vpack.c.bf16 %v6289_v18, %v6285_v10  ;;  %v14511_v15 = vpack.c.bf16 %v6291_v19, %v6287_v0 }
 0x671   : > { %v14513_v37 = vpack.c.bf16 %v6290_v47, %v6286_v40  ;;  %v14515_v44 = vpack.c.bf16 %v6292_v6, %v6288_v13  ;;  %v5963_v20 = vpop.f32.mrb[172].mxu0  ;;  %v6156_v28 = vpop.f32.mrb[44].mxu1 }
 0x672   : > { %15457 = vst [vmem:[#allocation19_spill] sm:$0xff] %v14509_v29  ;;  %v5964_v35 = vadd.f32 %v5963_v20, %v14101_v34  ;;  %v6157_v17 = vadd.f32 %v6156_v28, %v14104_v7  ;;  %v5965_v11 = vpop.f32.mrb[173].mxu0  ;;  %v6158_v16 = vpop.f32.mrb[45].mxu1 }
 0x673   : > { %15458 = vst [vmem:[#allocation20_spill] sm:$0xff] %v14513_v37  ;;  %v5966_v22 = vadd.f32 %v5965_v11, %v14107_v41  ;;  %v6159_v36 = vadd.f32 %v6158_v16, %v14110_v54  ;;  %v5967_v53 = vpop.f32.mrb[174].mxu0  ;;  %v6160_v43 = vpop.f32.mrb[46].mxu1  ;;  %7713 = vmatprep.mubr.bf16.mxu0 %v14513_v37  ;;  %8099 = vmatprep.mubr.bf16.mxu1 %v14513_v37 }
 0x674   : > { %v5968_v58 = vadd.f32 %v5967_v53, %v14101_v34  ;;  %v6161_v10 = vadd.f32 %v6160_v43, %v14104_v7  ;;  %v5969_v0 = vpop.f32.mrb[175].mxu0  ;;  %v6162_v20 = vpop.f32.mrb[47].mxu1  ;;  %7714 = vmatmul.mubr.bf16.gmra.mrb[232].mxu0 %v14509_v29  ;;  %8100 = vmatmul.mubr.bf16.gmra.mrb[104].mxu1 %v14509_v29  ;;  %v6293_v40 = vmax.f32 %v5964_v35, 0.0  ;;  %v6295_v13 = vmax.f32 %v6157_v17, 0.0 }
 0x675   : > { %v5970_v18 = vadd.f32 %v5969_v0, %v14107_v41  ;;  %v6163_v19 = vadd.f32 %v6162_v20, %v14110_v54  ;;  %v6294_v28 = vmax.f32 %v5966_v22, 0.0  ;;  %v6296_v11 = vmax.f32 %v6159_v36, 0.0 }
 0x676   : > { %v6297_v47 = vmax.f32 %v5968_v58, 0.0  ;;  %v6299_v6 = vmax.f32 %v6161_v10, 0.0 }
 0x677   : > { %v6298_v16 = vmax.f32 %v5970_v18, 0.0  ;;  %v6300_v53 = vmax.f32 %v6163_v19, 0.0 }
 0x678   : > { %v14529_v37 = vpack.c.bf16 %v6297_v47, %v6293_v40  ;;  %v14531_v43 = vpack.c.bf16 %v6299_v6, %v6295_v13 }
 0x679   : > { %v14533_v62 = vpack.c.bf16 %v6298_v16, %v6294_v28  ;;  %v14535_v55 = vpack.c.bf16 %v6300_v53, %v6296_v11  ;;  %v5973_v29 = vpop.f32.mrb[176].mxu0  ;;  %v6166_v0 = vpop.f32.mrb[48].mxu1 }
 0x67a   : > { %15459 = vst [vmem:[#allocation21_spill] sm:$0xff] %v14529_v37  ;;  %v5974_v20 = vadd.f32 %v5973_v29, %v14101_v34  ;;  %v6167_v35 = vadd.f32 %v6166_v0, %v14104_v7  ;;  %v5975_v17 = vpop.f32.mrb[177].mxu0  ;;  %v6168_v58 = vpop.f32.mrb[49].mxu1 }
 0x67b   : > { %15460 = vst [vmem:[#allocation22_spill] sm:$0xff] %v14533_v62  ;;  %v5976_v22 = vadd.f32 %v5975_v17, %v14107_v41  ;;  %v6169_v36 = vadd.f32 %v6168_v58, %v14110_v54  ;;  %v5977_v10 = vpop.f32.mrb[178].mxu0  ;;  %v6170_v18 = vpop.f32.mrb[50].mxu1  ;;  %7723 = vmatprep.mubr.bf16.mxu0 %v14533_v62  ;;  %8109 = vmatprep.mubr.bf16.mxu1 %v14533_v62 }
 0x67c   : > { %v5978_v19 = vadd.f32 %v5977_v10, %v14101_v34  ;;  %v6171_v40 = vadd.f32 %v6170_v18, %v14104_v7  ;;  %v5979_v13 = vpop.f32.mrb[179].mxu0  ;;  %v6172_v29 = vpop.f32.mrb[51].mxu1  ;;  %7724 = vmatmul.mubr.bf16.gmra.mrb[236].mxu0 %v14529_v37  ;;  %8110 = vmatmul.mubr.bf16.gmra.mrb[108].mxu1 %v14529_v37  ;;  %v6301_v28 = vmax.f32 %v5974_v20, 0.0  ;;  %v6303_v11 = vmax.f32 %v6167_v35, 0.0 }
 0x67d   : > { %v5980_v47 = vadd.f32 %v5979_v13, %v14107_v41  ;;  %v6173_v6 = vadd.f32 %v6172_v29, %v14110_v54  ;;  %v6302_v0 = vmax.f32 %v5976_v22, 0.0  ;;  %v6304_v17 = vmax.f32 %v6169_v36, 0.0 }
 0x67e   : > { %v6305_v16 = vmax.f32 %v5978_v19, 0.0  ;;  %v6307_v53 = vmax.f32 %v6171_v40, 0.0 }
 0x67f   : > { %v6306_v58 = vmax.f32 %v5980_v47, 0.0  ;;  %v6308_v10 = vmax.f32 %v6173_v6, 0.0 }
 0x680   : > { %v14549_v62 = vpack.c.bf16 %v6305_v16, %v6301_v28  ;;  %v14551_v18 = vpack.c.bf16 %v6307_v53, %v6303_v11 }
 0x681   : > { %v14553_v30 = vpack.c.bf16 %v6306_v58, %v6302_v0  ;;  %v14555_v59 = vpack.c.bf16 %v6308_v10, %v6304_v17  ;;  %v5983_v37 = vpop.f32.mrb[180].mxu0  ;;  %v6176_v13 = vpop.f32.mrb[52].mxu1 }
 0x682   : > { %15461 = vst [vmem:[#allocation17_spill] sm:$0xff] %v14549_v62  ;;  %v5984_v29 = vadd.f32 %v5983_v37, %v14101_v34  ;;  %v6177_v20 = vadd.f32 %v6176_v13, %v14104_v7  ;;  %v5985_v35 = vpop.f32.mrb[181].mxu0  ;;  %v6178_v19 = vpop.f32.mrb[53].mxu1 }
 0x683   : > { %15462 = vst [vmem:[#allocation23_spill] sm:$0xff] %v14553_v30  ;;  %v5986_v22 = vadd.f32 %v5985_v35, %v14107_v41  ;;  %v6179_v36 = vadd.f32 %v6178_v19, %v14110_v54  ;;  %v5987_v40 = vpop.f32.mrb[182].mxu0  ;;  %v6180_v47 = vpop.f32.mrb[54].mxu1  ;;  %7733 = vmatprep.mubr.bf16.mxu0 %v14553_v30  ;;  %8119 = vmatprep.mubr.bf16.mxu1 %v14553_v30 }
 0x684   : > { %v5988_v6 = vadd.f32 %v5987_v40, %v14101_v34  ;;  %v6181_v28 = vadd.f32 %v6180_v47, %v14104_v7  ;;  %v5989_v11 = vpop.f32.mrb[183].mxu0  ;;  %v6182_v37 = vpop.f32.mrb[55].mxu1  ;;  %7734 = vmatmul.mubr.bf16.gmra.mrb[240].mxu0 %v14549_v62  ;;  %8120 = vmatmul.mubr.bf16.gmra.mrb[112].mxu1 %v14549_v62  ;;  %v6309_v0 = vmax.f32 %v5984_v29, 0.0  ;;  %v6311_v17 = vmax.f32 %v6177_v20, 0.0 }
 0x685   : > { %v5990_v16 = vadd.f32 %v5989_v11, %v14107_v41  ;;  %v6183_v53 = vadd.f32 %v6182_v37, %v14110_v54  ;;  %v6310_v13 = vmax.f32 %v5986_v22, 0.0  ;;  %v6312_v35 = vmax.f32 %v6179_v36, 0.0 }
 0x686   : > { %v6313_v58 = vmax.f32 %v5988_v6, 0.0  ;;  %v6315_v10 = vmax.f32 %v6181_v28, 0.0 }
 0x687   : > { %v6314_v19 = vmax.f32 %v5990_v16, 0.0  ;;  %v6316_v40 = vmax.f32 %v6183_v53, 0.0 }
 0x688   : > { %v14569_v30 = vpack.c.bf16 %v6313_v58, %v6309_v0  ;;  %v14571_v47 = vpack.c.bf16 %v6315_v10, %v6311_v17 }
 0x689   : > { %v14573_v46 = vpack.c.bf16 %v6314_v19, %v6310_v13  ;;  %v14575_v2 = vpack.c.bf16 %v6316_v40, %v6312_v35  ;;  %v5993_v62 = vpop.f32.mrb[184].mxu0  ;;  %v6186_v11 = vpop.f32.mrb[56].mxu1 }
 0x68a   : > { %15463 = vst [vmem:[#allocation24_spill] sm:$0xff] %v14569_v30  ;;  %v5994_v37 = vadd.f32 %v5993_v62, %v14101_v34  ;;  %v6187_v29 = vadd.f32 %v6186_v11, %v14104_v7  ;;  %v5995_v20 = vpop.f32.mrb[185].mxu0  ;;  %v6188_v6 = vpop.f32.mrb[57].mxu1 }
 0x68b   : > { %15464 = vst [vmem:[#allocation25_spill] sm:$0xff] %v14573_v46  ;;  %v5996_v22 = vadd.f32 %v5995_v20, %v14107_v41  ;;  %v6189_v36 = vadd.f32 %v6188_v6, %v14110_v54  ;;  %v5997_v28 = vpop.f32.mrb[186].mxu0  ;;  %v6190_v16 = vpop.f32.mrb[58].mxu1  ;;  %7743 = vmatprep.mubr.bf16.mxu0 %v14573_v46  ;;  %8129 = vmatprep.mubr.bf16.mxu1 %v14573_v46 }
 0x68c   : > { %v5998_v53 = vadd.f32 %v5997_v28, %v14101_v34  ;;  %v6191_v0 = vadd.f32 %v6190_v16, %v14104_v7  ;;  %v5999_v17 = vpop.f32.mrb[187].mxu0  ;;  %v6192_v62 = vpop.f32.mrb[59].mxu1  ;;  %7744 = vmatmul.mubr.bf16.gmra.mrb[244].mxu0 %v14569_v30  ;;  %8130 = vmatmul.mubr.bf16.gmra.mrb[116].mxu1 %v14569_v30  ;;  %v6317_v13 = vmax.f32 %v5994_v37, 0.0  ;;  %v6319_v35 = vmax.f32 %v6187_v29, 0.0 }
 0x68d   : > { %v6000_v58 = vadd.f32 %v5999_v17, %v14107_v41  ;;  %v6193_v10 = vadd.f32 %v6192_v62, %v14110_v54  ;;  %v6318_v11 = vmax.f32 %v5996_v22, 0.0  ;;  %v6320_v20 = vmax.f32 %v6189_v36, 0.0 }
 0x68e   : > { %v6321_v19 = vmax.f32 %v5998_v53, 0.0  ;;  %v6323_v40 = vmax.f32 %v6191_v0, 0.0 }
 0x68f   : > { %v6322_v6 = vmax.f32 %v6000_v58, 0.0  ;;  %v6324_v28 = vmax.f32 %v6193_v10, 0.0 }
 0x690   : > { %v14589_v46 = vpack.c.bf16 %v6321_v19, %v6317_v13  ;;  %v14591_v16 = vpack.c.bf16 %v6323_v40, %v6319_v35 }
 0x691   : > { %v14593_v52 = vpack.c.bf16 %v6322_v6, %v6318_v11  ;;  %v14595_v24 = vpack.c.bf16 %v6324_v28, %v6320_v20  ;;  %v6003_v30 = vpop.f32.mrb[188].mxu0  ;;  %v6196_v17 = vpop.f32.mrb[60].mxu1 }
 0x692   : > { %v6004_v62 = vadd.f32 %v6003_v30, %v14101_v34  ;;  %v6197_v37 = vadd.f32 %v6196_v17, %v14104_v7  ;;  %v6005_v29 = vpop.f32.mrb[189].mxu0  ;;  %v6198_v53 = vpop.f32.mrb[61].mxu1 }
 0x693   : > { %15465 = vst [vmem:[#allocation26_spill] sm:$0xff] %v14593_v52  ;;  %v6006_v22 = vadd.f32 %v6005_v29, %v14107_v41  ;;  %v6199_v36 = vadd.f32 %v6198_v53, %v14110_v54  ;;  %v6007_v0 = vpop.f32.mrb[190].mxu0  ;;  %v6200_v58 = vpop.f32.mrb[62].mxu1  ;;  %7753 = vmatprep.mubr.bf16.mxu0 %v14593_v52  ;;  %8139 = vmatprep.mubr.bf16.mxu1 %v14593_v52 }
 0x694   : > { %v6008_v10 = vadd.f32 %v6007_v0, %v14101_v34  ;;  %v6201_v13 = vadd.f32 %v6200_v58, %v14104_v7  ;;  %v6009_v35 = vpop.f32.mrb[191].mxu0  ;;  %v6202_v30 = vpop.f32.mrb[63].mxu1  ;;  %7754 = vmatmul.mubr.bf16.gmra.mrb[248].mxu0 %v14589_v46  ;;  %8140 = vmatmul.mubr.bf16.gmra.mrb[120].mxu1 %v14589_v46  ;;  %v6325_v11 = vmax.f32 %v6004_v62, 0.0  ;;  %v6327_v20 = vmax.f32 %v6197_v37, 0.0  ;;  %v11685_v62 = vld [vmem:[%s15366_s11 + $0x40] ss:$24 sps:$4 sm:$0xff]  }
 0x695   : > { %v6010_v19 = vadd.f32 %v6009_v35, %v14107_v41  ;;  %v6203_v40 = vadd.f32 %v6202_v30, %v14110_v54  ;;  %v6326_v17 = vmax.f32 %v6006_v22, 0.0  ;;  %v6328_v29 = vmax.f32 %v6199_v36, 0.0  ;;  %v11682_v41 = vld [vmem:[%s15366_s11 + $0x10] ss:$24 sps:$4 sm:$0xff]   ;;  %v11687_v54 = vld [vmem:[%s15366_s11 + $0x44] ss:$24 sps:$4 sm:$0xff]  }
 0x696   : > { %v6329_v6 = vmax.f32 %v6008_v10, 0.0  ;;  %v6331_v28 = vmax.f32 %v6201_v13, 0.0  ;;  %v11690_v37 = vld [vmem:[%s15366_s11 + $0x74] ss:$24 sps:$4 sm:$0xff]   ;;  %v11688_v22 = vld [vmem:[%s15366_s11 + $0x70] ss:$24 sps:$4 sm:$0xff]  }
 0x697   : > { %v6330_v53 = vmax.f32 %v6010_v19, 0.0  ;;  %v6332_v34 = vmax.f32 %v6203_v40, 0.0  ;;  %v11693_v36 = vld [vmem:[%s15366_s11 + $0xa4] ss:$24 sps:$4 sm:$0xff]   ;;  %v11691_v10 = vld [vmem:[%s15366_s11 + $0xa0] ss:$24 sps:$4 sm:$0xff]  }
 0x698   : > { %v14609_v0 = vpack.c.bf16 %v6329_v6, %v6325_v11  ;;  %v14611_v7 = vpack.c.bf16 %v6331_v28, %v6327_v20  ;;  %v11696_v13 = vld [vmem:[%s15366_s11 + $0xd4] ss:$24 sps:$4 sm:$0xff]   ;;  %v11694_v35 = vld [vmem:[%s15366_s11 + $0xd0] ss:$24 sps:$4 sm:$0xff]   ;;  %v11699_v30 = vld [vmem:[%s15366_s11 + $0x104] ss:$24 sps:$4 sm:$0xff]  }
 0x699   : > { %v14613_v58 = vpack.c.bf16 %v6330_v53, %v6326_v17  ;;  %v14615_v52 = vpack.c.bf16 %v6332_v34, %v6328_v29  ;;  %v11697_v19 = vld [vmem:[%s15366_s11 + $0x100] ss:$24 sps:$4 sm:$0xff]   ;;  %v11702_v40 = vld [vmem:[%s15366_s11 + $0x134] ss:$24 sps:$4 sm:$0xff]   ;;  %v11700_v11 = vld [vmem:[%s15366_s11 + $0x130] ss:$24 sps:$4 sm:$0xff]  }
 0x69a   : > { %v11705_v20 = vld [vmem:[%s15366_s11 + $0x164] ss:$24 sps:$4 sm:$0xff]   ;;  %v11703_v6 = vld [vmem:[%s15366_s11 + $0x160] ss:$24 sps:$4 sm:$0xff]   ;;  %v11708_v28 = vld [vmem:[%s15366_s11 + $0x194] ss:$24 sps:$4 sm:$0xff]  }
 0x69b   : > { %7763 = vmatprep.mubr.bf16.mxu0 %v14613_v58  ;;  %8149 = vmatprep.mubr.bf16.mxu1 %v14613_v58  ;;  %v11706_v17 = vld [vmem:[%s15366_s11 + $0x190] ss:$24 sps:$4 sm:$0xff]   ;;  %v11711_v29 = vld [vmem:[%s15366_s11 + $0x1c4] ss:$24 sps:$4 sm:$0xff]   ;;  %v11709_v53 = vld [vmem:[%s15366_s11 + $0x1c0] ss:$24 sps:$4 sm:$0xff]  }
 0x69c   : > { %7764 = vmatmul.mubr.bf16.gmra.mrb[252].mxu0 %v14609_v0  ;;  %8150 = vmatmul.mubr.bf16.gmra.mrb[124].mxu1 %v14609_v0  ;;  %v11714_v34 = vld [vmem:[%s15366_s11 + $0x1f4] ss:$24 sps:$4 sm:$0xff]  }
 0x69d   : > { %7806 = vmatprep.mubr.bf16.mxu0 %v14126_v27  ;;  %8192 = vmatprep.mubr.bf16.mxu1 %v14126_v27 }
 0x6a4   : > { %7807 = vmatmul.mubr.bf16.vlgmr.msra.gmra.mrb[192].mxu0 %v14122_v45  ;;  %8193 = vmatmul.mubr.bf16.vlgmr.msra.gmra.mrb[64].mxu1 %v14122_v45 }
 0x6a5   : > { %7816 = vmatprep.mubr.bf16.mxu0 %v14170_v56  ;;  %8202 = vmatprep.mubr.bf16.mxu1 %v14170_v56 }
 0x6a6   : > { %8354 = vmatpush1.bf16.msra.mxu0 %v11682_v41  ;;  %v11712_v41 = vld [vmem:[%s15366_s11 + $0x1f0] ss:$24 sps:$4 sm:$0xff]  }
 0x6a7   : > { %8355 = vmatprep.subr.bf16.mxu0 %v11687_v54  ;;  %v11717_v54 = vld [vmem:[%s15366_s11 + $0x224] ss:$24 sps:$4 sm:$0xff]  }
 0x6aa   : > { %8356 = vmatpush1.bf16.msra.mxu0 %v11685_v62  ;;  %v11715_v62 = vld [vmem:[%s15366_s11 + $0x220] ss:$24 sps:$4 sm:$0xff]  }
 0x6ab   : > { %8357 = vmatprep.subr.bf16.mxu0 %v11690_v37  ;;  %v11720_v37 = vld [vmem:[%s15366_s11 + $0x254] ss:$24 sps:$4 sm:$0xff]  }
 0x6ac   : > { %7817 = vmatmul.mubr.bf16.gmra.mrb[196].mxu0 %v14166_v14  ;;  %8203 = vmatmul.mubr.bf16.gmra.mrb[68].mxu1 %v14166_v14 }
 0x6ad   : > { %7826 = vmatprep.mubr.bf16.mxu0 %v14214_v39  ;;  %8212 = vmatprep.mubr.bf16.mxu1 %v14214_v39 }
 0x6ae   : > { %8358 = vmatpush1.bf16.msra.mxu0 %v11688_v22  ;;  %v11718_v22 = vld [vmem:[%s15366_s11 + $0x250] ss:$24 sps:$4 sm:$0xff]  }
 0x6af   : > { %8359 = vmatprep.subr.bf16.mxu0 %v11693_v36  ;;  %v11723_v36 = vld [vmem:[%s15366_s11 + $0x284] ss:$24 sps:$4 sm:$0xff]  }
 0x6b2   : > { %8360 = vmatpush1.bf16.msra.mxu0 %v11691_v10  ;;  %v11721_v10 = vld [vmem:[%s15366_s11 + $0x280] ss:$24 sps:$4 sm:$0xff]  }
 0x6b3   : > { %8361 = vmatprep.subr.bf16.mxu0 %v11696_v13  ;;  %v11726_v13 = vld [vmem:[%s15366_s11 + $0x2b4] ss:$24 sps:$4 sm:$0xff]  }
 0x6b4   : > { %7827 = vmatmul.mubr.bf16.gmra.mrb[200].mxu0 %v14210_v42  ;;  %8213 = vmatmul.mubr.bf16.gmra.mrb[72].mxu1 %v14210_v42 }
 0x6b5   : > { %7836 = vmatprep.mubr.bf16.mxu0 %v14258_v33  ;;  %8222 = vmatprep.mubr.bf16.mxu1 %v14258_v33 }
 0x6b6   : > { %8362 = vmatpush1.bf16.msra.mxu0 %v11694_v35  ;;  %v11724_v35 = vld [vmem:[%s15366_s11 + $0x2b0] ss:$24 sps:$4 sm:$0xff]  }
 0x6b7   : > { %8363 = vmatprep.subr.bf16.mxu0 %v11699_v30  ;;  %v11729_v30 = vld [vmem:[%s15366_s11 + $0x2e4] ss:$24 sps:$4 sm:$0xff]  }
 0x6ba   : > { %8364 = vmatpush1.bf16.msra.mxu0 %v11697_v19  ;;  %v11727_v19 = vld [vmem:[%s15366_s11 + $0x2e0] ss:$24 sps:$4 sm:$0xff]  }
 0x6bb   : > { %8365 = vmatprep.subr.bf16.mxu0 %v11702_v40  ;;  %v11732_v40 = vld [vmem:[%s15366_s11 + $0x314] ss:$24 sps:$4 sm:$0xff]  }
 0x6bc   : > { %7837 = vmatmul.mubr.bf16.gmra.mrb[204].mxu0 %v14254_v12  ;;  %8223 = vmatmul.mubr.bf16.gmra.mrb[76].mxu1 %v14254_v12 }
 0x6bd   : > { %7846 = vmatprep.mubr.bf16.mxu0 %v14302_v9  ;;  %8232 = vmatprep.mubr.bf16.mxu1 %v14302_v9 }
 0x6be   : > { %8366 = vmatpush1.bf16.msra.mxu0 %v11700_v11  ;;  %v11730_v11 = vld [vmem:[%s15366_s11 + $0x310] ss:$24 sps:$4 sm:$0xff]  }
 0x6bf   : > { %8367 = vmatprep.subr.bf16.mxu0 %v11705_v20  ;;  %v11735_v20 = vld [vmem:[%s15366_s11 + $0x344] ss:$24 sps:$4 sm:$0xff]  }
 0x6c2   : > { %8368 = vmatpush1.bf16.msra.mxu0 %v11703_v6  ;;  %v11733_v6 = vld [vmem:[%s15366_s11 + $0x340] ss:$24 sps:$4 sm:$0xff]  }
 0x6c3   : > { %8369 = vmatprep.subr.bf16.mxu0 %v11708_v28  ;;  %v11736_v28 = vld [vmem:[%s15366_s11 + $0x370] ss:$24 sps:$4 sm:$0xff]  }
 0x6c4   : > { %7847 = vmatmul.mubr.bf16.gmra.mrb[208].mxu0 %v14298_v5  ;;  %8233 = vmatmul.mubr.bf16.gmra.mrb[80].mxu1 %v14298_v5 }
 0x6c5   : > { %7856 = vmatprep.mubr.bf16.mxu0 %v14346_v51  ;;  %8242 = vmatprep.mubr.bf16.mxu1 %v14346_v51 }
 0x6c6   : > { %8370 = vmatpush1.bf16.msra.mxu0 %v11706_v17  ;;  %v11744_v17 = vld [vmem:[%s15366_s11 + $0x3d4] ss:$24 sps:$4 sm:$0xff]  }
 0x6c7   : > { %8371 = vmatprep.subr.bf16.mxu0 %v11711_v29  ;;  %v11742_v29 = vld [vmem:[%s15366_s11 + $0x3d0] ss:$24 sps:$4 sm:$0xff]  }
 0x6ca   : > { %8372 = vmatpush1.bf16.msra.mxu0 %v11709_v53  ;;  %v11750_v53 = vld [vmem:[%s15366_s11 + $0x434] ss:$24 sps:$4 sm:$0xff]  }
 0x6cb   : > { %8373 = vmatprep.subr.bf16.mxu0 %v11714_v34  ;;  %v11748_v34 = vld [vmem:[%s15366_s11 + $0x430] ss:$24 sps:$4 sm:$0xff]  }
 0x6cc   : > { %7857 = vmatmul.mubr.bf16.gmra.mrb[212].mxu0 %v14342_v26  ;;  %8243 = vmatmul.mubr.bf16.gmra.mrb[84].mxu1 %v14342_v26 }
 0x6cd   : > { %7866 = vmatprep.mubr.bf16.mxu0 %v14390_v48  ;;  %8252 = vmatprep.mubr.bf16.mxu1 %v14390_v48 }
 0x6ce   : > { %8374 = vmatpush1.bf16.msra.mxu0 %v11712_v41  ;;  %v11756_v41 = vld [vmem:[%s15366_s11 + $0x494] ss:$24 sps:$4 sm:$0xff]  }
 0x6cf   : > { %8375 = vmatprep.subr.bf16.mxu0 %v11717_v54  ;;  %v11754_v54 = vld [vmem:[%s15366_s11 + $0x490] ss:$24 sps:$4 sm:$0xff]  }
 0x6d2   : > { %8376 = vmatpush1.bf16.msra.mxu0 %v11715_v62  ;;  %v15467_v62 = vld [vmem:[#allocation6_spill] sm:$0xff] }
 0x6d3   : > { %8377 = vmatprep.subr.bf16.mxu0 %v11720_v37  ;;  %v11757_v37 = vld [vmem:[%s15366_s11 + $0x4c0] ss:$24 sps:$4 sm:$0xff]  }
 0x6d4   : > { %7867 = vmatmul.mubr.bf16.gmra.mrb[216].mxu0 %v14386_v31  ;;  %8253 = vmatmul.mubr.bf16.gmra.mrb[88].mxu1 %v14386_v31 }
 0x6d5   : > { %7876 = vmatprep.mubr.bf16.mxu0 %v14434_v61  ;;  %8262 = vmatprep.mubr.bf16.mxu1 %v14434_v61 }
 0x6d6   : > { %8378 = vmatpush1.bf16.msra.mxu0 %v11718_v22  ;;  %v11762_v22 = vld [vmem:[%s15366_s11 + $0x4f4] ss:$24 sps:$4 sm:$0xff]  }
 0x6d7   : > { %8379 = vmatprep.subr.bf16.mxu0 %v11723_v36  ;;  %v11760_v36 = vld [vmem:[%s15366_s11 + $0x4f0] ss:$24 sps:$4 sm:$0xff]  }
 0x6da   : > { %8380 = vmatpush1.bf16.msra.mxu0 %v11721_v10  ;;  %v11765_v10 = vld [vmem:[%s15366_s11 + $0x524] ss:$24 sps:$4 sm:$0xff]  }
 0x6db   : > { %8381 = vmatprep.subr.bf16.mxu0 %v11726_v13  ;;  %v15468_v13 = vld [vmem:[#allocation5_spill] sm:$0xff] }
 0x6dc   : > { %7877 = vmatmul.mubr.bf16.gmra.mrb[220].mxu0 %v14430_v50  ;;  %8263 = vmatmul.mubr.bf16.gmra.mrb[92].mxu1 %v14430_v50 }
 0x6dd   : > { %7886 = vmatprep.mubr.bf16.mxu0 %v14475_v1  ;;  %8272 = vmatprep.mubr.bf16.mxu1 %v14475_v1 }
 0x6de   : > { %8382 = vmatpush1.bf16.msra.mxu0 %v11724_v35  ;;  %v15469_v35 = vld [vmem:[#allocation8_spill] sm:$0xff] }
 0x6df   : > { %8383 = vmatprep.subr.bf16.mxu0 %v11729_v30  ;;  %v11763_v30 = vld [vmem:[%s15366_s11 + $0x520] ss:$24 sps:$4 sm:$0xff]  }
 0x6e2   : > { %8384 = vmatpush1.bf16.msra.mxu0 %v11727_v19  ;;  %v11768_v19 = vld [vmem:[%s15366_s11 + $0x554] ss:$24 sps:$4 sm:$0xff]  }
 0x6e3   : > { %8546 = vmatprep.subr.bf16.mxu0 %v11732_v40  ;;  %v11766_v40 = vld [vmem:[%s15366_s11 + $0x550] ss:$24 sps:$4 sm:$0xff]  }
 0x6e4   : > { %7887 = vmatmul.mubr.bf16.gmra.mrb[224].mxu0 %v14471_v57  ;;  %8273 = vmatmul.mubr.bf16.gmra.mrb[96].mxu1 %v14471_v57 }
 0x6e5   : > { %7896 = vmatprep.mubr.bf16.mxu0 %v14495_v38  ;;  %8282 = vmatprep.mubr.bf16.mxu1 %v14495_v38 }
 0x6ec   : > { %7897 = vmatmul.mubr.bf16.gmra.mrb[228].mxu0 %v14491_v21  ;;  %8283 = vmatmul.mubr.bf16.gmra.mrb[100].mxu1 %v14491_v21 }
 0x6ed   : > { %7906 = vmatprep.mubr.bf16.mxu0 %v14515_v44  ;;  %8292 = vmatprep.mubr.bf16.mxu1 %v14515_v44 }
 0x6f4   : > { %7907 = vmatmul.mubr.bf16.gmra.mrb[232].mxu0 %v14511_v15  ;;  %8293 = vmatmul.mubr.bf16.gmra.mrb[104].mxu1 %v14511_v15 }
 0x6f5   : > { %7916 = vmatprep.mubr.bf16.mxu0 %v14535_v55  ;;  %8302 = vmatprep.mubr.bf16.mxu1 %v14535_v55 }
 0x6fc   : > { %7917 = vmatmul.mubr.bf16.gmra.mrb[236].mxu0 %v14531_v43  ;;  %8303 = vmatmul.mubr.bf16.gmra.mrb[108].mxu1 %v14531_v43 }
 0x6fd   : > { %7926 = vmatprep.mubr.bf16.mxu0 %v14555_v59  ;;  %8312 = vmatprep.mubr.bf16.mxu1 %v14555_v59 }
 0x704   : > { %7927 = vmatmul.mubr.bf16.gmra.mrb[240].mxu0 %v14551_v18  ;;  %8313 = vmatmul.mubr.bf16.gmra.mrb[112].mxu1 %v14551_v18 }
 0x705   : > { %7936 = vmatprep.mubr.bf16.mxu0 %v14575_v2  ;;  %8322 = vmatprep.mubr.bf16.mxu1 %v14575_v2 }
 0x70c   : > { %7937 = vmatmul.mubr.bf16.gmra.mrb[244].mxu0 %v14571_v47  ;;  %8323 = vmatmul.mubr.bf16.gmra.mrb[116].mxu1 %v14571_v47 }
 0x70d   : > { %7946 = vmatprep.mubr.bf16.mxu0 %v14595_v24  ;;  %8332 = vmatprep.mubr.bf16.mxu1 %v14595_v24 }
 0x714   : > { %7947 = vmatmul.mubr.bf16.gmra.mrb[248].mxu0 %v14591_v16  ;;  %8333 = vmatmul.mubr.bf16.gmra.mrb[120].mxu1 %v14591_v16 }
 0x715   : > { %7956 = vmatprep.mubr.bf16.mxu0 %v14615_v52  ;;  %8342 = vmatprep.mubr.bf16.mxu1 %v14615_v52 }
 0x71c   : > { %7957 = vmatmul.mubr.bf16.gmra.mrb[252].mxu0 %v14611_v7  ;;  %8343 = vmatmul.mubr.bf16.gmra.mrb[124].mxu1 %v14611_v7 }
 0x71d   : > { %8385 = vmatprep.mubr.bf16.mxu0 %v14124_v4  ;;  %v11738_v4 = vld [vmem:[%s15366_s11 + $0x374] ss:$24 sps:$4 sm:$0xff]  }
 0x724   : > { %8386 = vmatmul.mubr.bf16.vlgmr.msra.gmra.mrb[0].mxu0 %v14120_v8  ;;  %v11741_v8 = vld [vmem:[%s15366_s11 + $0x3a4] ss:$24 sps:$4 sm:$0xff]  }
 0x725   : > { %8395 = vmatprep.mubr.bf16.mxu0 %v14168_v23  ;;  %8547 = vmatpush1.bf16.msra.mxu0 %v11730_v11  ;;  %v11739_v23 = vld [vmem:[%s15366_s11 + $0x3a0] ss:$24 sps:$4 sm:$0xff]   ;;  %v11771_v11 = vld [vmem:[%s15366_s11 + $0x584] ss:$24 sps:$4 sm:$0xff]  }
 0x726   : > { %8548 = vmatprep.subr.bf16.mxu0 %v11735_v20  ;;  %v15470_v20 = vld [vmem:[#allocation7_spill] sm:$0xff] }
 0x729   : > { %8549 = vmatpush1.bf16.msra.mxu0 %v11733_v6  ;;  %v15471_v6 = vld [vmem:[#allocation10_spill] sm:$0xff] }
 0x72a   : > { %8550 = vmatprep.subr.bf16.mxu0 %v11738_v4  ;;  %v11769_v4 = vld [vmem:[%s15366_s11 + $0x580] ss:$24 sps:$4 sm:$0xff]  }
 0x72c   : > { %8396 = vmatmul.mubr.bf16.gmra.mrb[4].mxu0 %v14164_v63  ;;  %v11747_v63 = vld [vmem:[%s15366_s11 + $0x404] ss:$24 sps:$4 sm:$0xff]  }
 0x72d   : > { %8405 = vmatprep.mubr.bf16.mxu0 %v14212_v32  ;;  %8551 = vmatpush1.bf16.msra.mxu0 %v11736_v28  ;;  %v11745_v32 = vld [vmem:[%s15366_s11 + $0x400] ss:$24 sps:$4 sm:$0xff]   ;;  %v11774_v28 = vld [vmem:[%s15366_s11 + $0x5b4] ss:$24 sps:$4 sm:$0xff]  }
 0x72e   : > { %8552 = vmatprep.subr.bf16.mxu0 %v11741_v8  ;;  %v11772_v8 = vld [vmem:[%s15366_s11 + $0x5b0] ss:$24 sps:$4 sm:$0xff]  }
 0x731   : > { %8553 = vmatpush1.bf16.msra.mxu0 %v11739_v23  ;;  %v11777_v23 = vld [vmem:[%s15366_s11 + $0x5e4] ss:$24 sps:$4 sm:$0xff]  }
 0x732   : > { %8554 = vmatprep.subr.bf16.mxu0 %v11744_v17  ;;  %v15472_v17 = vld [vmem:[#allocation9_spill] sm:$0xff] }
 0x734   : > { %8406 = vmatmul.mubr.bf16.gmra.mrb[8].mxu0 %v14208_v25  ;;  %v11753_v25 = vld [vmem:[%s15366_s11 + $0x464] ss:$24 sps:$4 sm:$0xff]  }
 0x735   : > { %8415 = vmatprep.mubr.bf16.mxu0 %v14256_v60  ;;  %8555 = vmatpush1.bf16.msra.mxu0 %v11742_v29  ;;  %v11751_v60 = vld [vmem:[%s15366_s11 + $0x460] ss:$24 sps:$4 sm:$0xff]   ;;  %v15473_v29 = vld [vmem:[#allocation12_spill] sm:$0xff] }
 0x736   : > { %8556 = vmatprep.subr.bf16.mxu0 %v11747_v63  ;;  %v11775_v63 = vld [vmem:[%s15366_s11 + $0x5e0] ss:$24 sps:$4 sm:$0xff]  }
 0x739   : > { %8557 = vmatpush1.bf16.msra.mxu0 %v11745_v32  ;;  %v15474_v32 = vld [vmem:[#allocation11_spill] sm:$0xff] }
 0x73a   : > { %8558 = vmatprep.subr.bf16.mxu0 %v11750_v53  ;;  %v15475_v53 = vld [vmem:[#allocation15_spill] sm:$0xff] }
 0x73c   : > { %8416 = vmatmul.mubr.bf16.gmra.mrb[12].mxu0 %v14252_v3  ;;  %v11759_v3 = vld [vmem:[%s15366_s11 + $0x4c4] ss:$24 sps:$4 sm:$0xff]  }
 0x73d   : > { %8425 = vmatprep.mubr.bf16.mxu0 %v14300_v49  ;;  %8559 = vmatpush1.bf16.msra.mxu0 %v11748_v34  ;;  %v15466_v49 = vld [vmem:[#allocation4_spill] sm:$0xff]  ;;  %v15476_v34 = vld [vmem:[#allocation13_spill] sm:$0xff] }
 0x73e   : > { %8560 = vmatprep.subr.bf16.mxu0 %v11753_v25  ;;  %v15477_v25 = vld [vmem:[#allocation20_spill] sm:$0xff] }
 0x741   : > { %8561 = vmatpush1.bf16.msra.mxu0 %v11751_v60  ;;  %v6589_v60 = vld [vmem:[%s15367_s12] sm:$0x3f] }
 0x742   : > { %8562 = vmatprep.subr.bf16.mxu0 %v11756_v41  ;;  %v15478_v41 = vld [vmem:[#allocation19_spill] sm:$0xff] }
 0x744   : > { %8426 = vmatmul.mubr.bf16.gmra.mrb[16].mxu0 %v15466_v49  ;;  %v15480_v49 = vld [vmem:[#allocation2_spill] sm:$0xff] }
 0x745   : > { %8435 = vmatprep.mubr.bf16.mxu0 %v15467_v62  ;;  %8563 = vmatpush1.bf16.msra.mxu0 %v11754_v54  ;;  %v15479_v54 = vld [vmem:[#allocation16_spill] sm:$0xff]  ;;  %v14903_v62 = vrot.slane %v6589_v60, %v15480_v49 }
 0x746   : > { %8564 = vmatprep.subr.bf16.mxu0 %v11759_v3  ;;  %v14900_v3 = vrot.slane %v6589_v60, %v15479_v54 }
 0x749   : > { %8565 = vmatpush1.bf16.msra.mxu0 %v11757_v37  ;;  %v15481_v37 = vld [vmem:[#allocation22_spill] sm:$0xff] }
 0x74a   : > { %8566 = vmatprep.subr.bf16.mxu0 %v11762_v22  ;;  %v15482_v22 = vld [vmem:[#allocation18_spill] sm:$0xff] }
 0x74c   : > { %8436 = vmatmul.mubr.bf16.gmra.mrb[20].mxu0 %v15468_v13 }
 0x74d   : > { %8445 = vmatprep.mubr.bf16.mxu0 %v15469_v35  ;;  %8567 = vmatpush1.bf16.msra.mxu0 %v11760_v36  ;;  %v14908_v36 = vrot.slane %v6589_v60, %v15482_v22 }
 0x74e   : > { %8568 = vmatprep.subr.bf16.mxu0 %v11765_v10  ;;  %v15483_v10 = vld [vmem:[#allocation3_spill] sm:$0xff] }
 0x74f   : > { %v14911_v13 = vrot.slane %v6589_v60, %v15483_v10 }
 0x751   : > { %8569 = vmatpush1.bf16.msra.mxu0 %v11763_v30 }
 0x752   : > { %8570 = vmatprep.subr.bf16.mxu0 %v11768_v19 }
 0x754   : > { %8446 = vmatmul.mubr.bf16.gmra.mrb[24].mxu0 %v15470_v20 }
 0x755   : > { %8455 = vmatprep.mubr.bf16.mxu0 %v15471_v6  ;;  %8571 = vmatpush1.bf16.msra.mxu0 %v11766_v40 }
 0x756   : > { %8572 = vmatprep.subr.bf16.mxu0 %v11771_v11 }
 0x759   : > { %8573 = vmatpush1.bf16.msra.mxu0 %v11769_v4 }
 0x75a   : > { %8574 = vmatprep.subr.bf16.mxu0 %v11774_v28 }
 0x75c   : > { %8456 = vmatmul.mubr.bf16.gmra.mrb[28].mxu0 %v15472_v17 }
 0x75d   : > { %8465 = vmatprep.mubr.bf16.mxu0 %v15473_v29  ;;  %8575 = vmatpush1.bf16.msra.mxu0 %v11772_v8 }
 0x75e   : > { %8576 = vmatprep.subr.bf16.mxu0 %v11777_v23 }
 0x761   : > { %8577 = vmatpush1.bf16.msra.mxu0 %v11775_v63 }
 0x764   : > { %8466 = vmatmul.mubr.bf16.gmra.mrb[32].mxu0 %v15474_v32 }
 0x765   : > { %8475 = vmatprep.mubr.bf16.mxu0 %v15475_v53 }
 0x76c   : > { %8476 = vmatmul.mubr.bf16.gmra.mrb[36].mxu0 %v15476_v34 }
 0x76d   : > { %8485 = vmatprep.mubr.bf16.mxu0 %v15477_v25 }
 0x774   : > { %8486 = vmatmul.mubr.bf16.gmra.mrb[40].mxu0 %v15478_v41 }
 0x775   : > { %8495 = vmatprep.mubr.bf16.mxu0 %v15481_v37  ;;  %v15484_v37 = vld [vmem:[#allocation21_spill] sm:$0xff] }
 0x777   : > { %v7808_v35 = vpop.f32.mrb[192].mxu0  ;;  %v8194_v30 = vpop.f32.mrb[64].mxu1 }
 0x778   : > { %v10120_v19 = vadd.f32 %v7808_v35, %v14900_v3  ;;  %v10184_v40 = vadd.f32 %v8194_v30, %v14903_v62  ;;  %v7810_v11 = vpop.f32.mrb[193].mxu0  ;;  %v8196_v20 = vpop.f32.mrb[65].mxu1  ;;  %v15485_v35 = vld [vmem:[#allocation23_spill] sm:$0xff] }
 0x779   : > { %v10121_v6 = vadd.f32 %v7810_v11, %v14908_v36  ;;  %v10185_v4 = vadd.f32 %v8196_v20, %v14911_v13  ;;  %v7812_v28 = vpop.f32.mrb[194].mxu0  ;;  %v8198_v8 = vpop.f32.mrb[66].mxu1 }
 0x77a   : > { %v8739_v23 = vmax.f32 %v10120_v19, 0.0  ;;  %v8741_v17 = vmax.f32 %v10184_v40, 0.0  ;;  %v10122_v29 = vadd.f32 %v7812_v28, %v14900_v3  ;;  %v10186_v63 = vadd.f32 %v8198_v8, %v14903_v62  ;;  %v7814_v32 = vpop.f32.mrb[195].mxu0  ;;  %v8200_v53 = vpop.f32.mrb[67].mxu1 }
 0x77b   : > { %v8740_v34 = vmax.f32 %v10121_v6, 0.0  ;;  %v8742_v25 = vmax.f32 %v10185_v4, 0.0  ;;  %v10123_v60 = vadd.f32 %v7814_v32, %v14908_v36  ;;  %v10187_v41 = vadd.f32 %v8200_v53, %v14911_v13 }
 0x77c   : > { %8931 = vst [vmem:[%s14918_s27] sm:$0xff] %v8739_v23  ;;  %8933 = vst [vmem:[%s14918_s27 + $0x10] sm:$0xff] %v8741_v17  ;;  %v8745_v54 = vmax.f32 %v10122_v29, 0.0  ;;  %v8747_v49 = vmax.f32 %v10186_v63, 0.0  ;;  %8496 = vmatmul.mubr.bf16.gmra.mrb[44].mxu0 %v15484_v37 }
 0x77d   : > { %8932 = vst [vmem:[%s14918_s27 + $0x8] sm:$0xff] %v8740_v34  ;;  %8934 = vst [vmem:[%s14918_s27 + $0x18] sm:$0xff] %v8742_v25  ;;  %v8746_v22 = vmax.f32 %v10123_v60, 0.0  ;;  %v8748_v10 = vmax.f32 %v10187_v41, 0.0  ;;  %8505 = vmatprep.mubr.bf16.mxu0 %v15485_v35 }
 0x77e   : > { %8937 = vst [vmem:[%s14918_s27 + $0x30] sm:$0xff] %v8745_v54  ;;  %8939 = vst [vmem:[%s14918_s27 + $0x40] sm:$0xff] %v8747_v49 }
 0x77f   : > { %8938 = vst [vmem:[%s14918_s27 + $0x38] sm:$0xff] %v8746_v22  ;;  %8940 = vst [vmem:[%s14918_s27 + $0x48] sm:$0xff] %v8748_v10  ;;  %v7818_v30 = vpop.f32.mrb[196].mxu0  ;;  %v8204_v19 = vpop.f32.mrb[68].mxu1  ;;  %v15486_v22 = vld [vmem:[#allocation17_spill] sm:$0xff] }
 0x780   : > { %v10124_v40 = vadd.f32 %v7818_v30, %v14900_v3  ;;  %v10188_v11 = vadd.f32 %v8204_v19, %v14903_v62  ;;  %v7820_v20 = vpop.f32.mrb[197].mxu0  ;;  %v8206_v6 = vpop.f32.mrb[69].mxu1  ;;  %v15487_v30 = vld [vmem:[#allocation25_spill] sm:$0xff] }
 0x781   : > { %v10125_v4 = vadd.f32 %v7820_v20, %v14908_v36  ;;  %v10189_v28 = vadd.f32 %v8206_v6, %v14911_v13  ;;  %v7822_v8 = vpop.f32.mrb[198].mxu0  ;;  %v8208_v23 = vpop.f32.mrb[70].mxu1 }
 0x782   : > { %v8751_v17 = vmax.f32 %v10124_v40, 0.0  ;;  %v8753_v29 = vmax.f32 %v10188_v11, 0.0  ;;  %v10126_v63 = vadd.f32 %v7822_v8, %v14900_v3  ;;  %v10190_v32 = vadd.f32 %v8208_v23, %v14903_v62  ;;  %v7824_v53 = vpop.f32.mrb[199].mxu0  ;;  %v8210_v34 = vpop.f32.mrb[71].mxu1 }
 0x783   : > { %v8752_v25 = vmax.f32 %v10125_v4, 0.0  ;;  %v8754_v60 = vmax.f32 %v10189_v28, 0.0  ;;  %v10127_v41 = vadd.f32 %v7824_v53, %v14908_v36  ;;  %v10191_v54 = vadd.f32 %v8210_v34, %v14911_v13 }
 0x784   : > { %8943 = vst [vmem:[%s14918_s27 + $0x60] sm:$0xff] %v8751_v17  ;;  %8945 = vst [vmem:[%s14918_s27 + $0x70] sm:$0xff] %v8753_v29  ;;  %v8757_v49 = vmax.f32 %v10126_v63, 0.0  ;;  %v8759_v37 = vmax.f32 %v10190_v32, 0.0  ;;  %8506 = vmatmul.mubr.bf16.gmra.mrb[48].mxu0 %v15486_v22 }
 0x785   : > { %8944 = vst [vmem:[%s14918_s27 + $0x68] sm:$0xff] %v8752_v25  ;;  %8946 = vst [vmem:[%s14918_s27 + $0x78] sm:$0xff] %v8754_v60  ;;  %v8758_v10 = vmax.f32 %v10127_v41, 0.0  ;;  %v8760_v35 = vmax.f32 %v10191_v54, 0.0  ;;  %8515 = vmatprep.mubr.bf16.mxu0 %v15487_v30 }
 0x786   : > { %8949 = vst [vmem:[%s14918_s27 + $0x90] sm:$0xff] %v8757_v49  ;;  %8951 = vst [vmem:[%s14918_s27 + $0xa0] sm:$0xff] %v8759_v37 }
 0x787   : > { %8950 = vst [vmem:[%s14918_s27 + $0x98] sm:$0xff] %v8758_v10  ;;  %8952 = vst [vmem:[%s14918_s27 + $0xa8] sm:$0xff] %v8760_v35  ;;  %v7828_v19 = vpop.f32.mrb[200].mxu0  ;;  %v8214_v40 = vpop.f32.mrb[72].mxu1  ;;  %v15488_v10 = vld [vmem:[#allocation24_spill] sm:$0xff] }
 0x788   : > { %v10128_v11 = vadd.f32 %v7828_v19, %v14900_v3  ;;  %v10192_v20 = vadd.f32 %v8214_v40, %v14903_v62  ;;  %v7830_v6 = vpop.f32.mrb[201].mxu0  ;;  %v8216_v4 = vpop.f32.mrb[73].mxu1  ;;  %v15489_v19 = vld [vmem:[#allocation26_spill] sm:$0xff] }
 0x789   : > { %v10129_v28 = vadd.f32 %v7830_v6, %v14908_v36  ;;  %v10193_v8 = vadd.f32 %v8216_v4, %v14911_v13  ;;  %v7832_v23 = vpop.f32.mrb[202].mxu0  ;;  %v8218_v17 = vpop.f32.mrb[74].mxu1 }
 0x78a   : > { %v8763_v29 = vmax.f32 %v10128_v11, 0.0  ;;  %v8765_v63 = vmax.f32 %v10192_v20, 0.0  ;;  %v10130_v32 = vadd.f32 %v7832_v23, %v14900_v3  ;;  %v10194_v53 = vadd.f32 %v8218_v17, %v14903_v62  ;;  %v7834_v34 = vpop.f32.mrb[203].mxu0  ;;  %v8220_v25 = vpop.f32.mrb[75].mxu1 }
 0x78b   : > { %v8764_v60 = vmax.f32 %v10129_v28, 0.0  ;;  %v8766_v41 = vmax.f32 %v10193_v8, 0.0  ;;  %v10131_v54 = vadd.f32 %v7834_v34, %v14908_v36  ;;  %v10195_v49 = vadd.f32 %v8220_v25, %v14911_v13 }
 0x78c   : > { %8955 = vst [vmem:[%s14918_s27 + $0xc0] sm:$0xff] %v8763_v29  ;;  %8957 = vst [vmem:[%s14918_s27 + $0xd0] sm:$0xff] %v8765_v63  ;;  %v8769_v37 = vmax.f32 %v10130_v32, 0.0  ;;  %v8771_v22 = vmax.f32 %v10194_v53, 0.0  ;;  %8516 = vmatmul.mubr.bf16.gmra.mrb[52].mxu0 %v15488_v10 }
 0x78d   : > { %8956 = vst [vmem:[%s14918_s27 + $0xc8] sm:$0xff] %v8764_v60  ;;  %8958 = vst [vmem:[%s14918_s27 + $0xd8] sm:$0xff] %v8766_v41  ;;  %v8770_v35 = vmax.f32 %v10131_v54, 0.0  ;;  %v8772_v30 = vmax.f32 %v10195_v49, 0.0  ;;  %8525 = vmatprep.mubr.bf16.mxu0 %v15489_v19 }
 0x78e   : > { %8961 = vst [vmem:[%s14918_s27 + $0xf0] sm:$0xff] %v8769_v37  ;;  %8963 = vst [vmem:[%s14918_s27 + $0x100] sm:$0xff] %v8771_v22 }
 0x78f   : > { %8962 = vst [vmem:[%s14918_s27 + $0xf8] sm:$0xff] %v8770_v35  ;;  %8964 = vst [vmem:[%s14918_s27 + $0x108] sm:$0xff] %v8772_v30  ;;  %v7838_v40 = vpop.f32.mrb[204].mxu0  ;;  %v8224_v11 = vpop.f32.mrb[76].mxu1 }
 0x790   : > { %v10132_v20 = vadd.f32 %v7838_v40, %v14900_v3  ;;  %v10196_v6 = vadd.f32 %v8224_v11, %v14903_v62  ;;  %v7840_v4 = vpop.f32.mrb[205].mxu0  ;;  %v8226_v28 = vpop.f32.mrb[77].mxu1 }
 0x791   : > { %v10133_v8 = vadd.f32 %v7840_v4, %v14908_v36  ;;  %v10197_v23 = vadd.f32 %v8226_v28, %v14911_v13  ;;  %v7842_v17 = vpop.f32.mrb[206].mxu0  ;;  %v8228_v29 = vpop.f32.mrb[78].mxu1 }
 0x792   : > { %v8775_v63 = vmax.f32 %v10132_v20, 0.0  ;;  %v8777_v32 = vmax.f32 %v10196_v6, 0.0  ;;  %v10134_v53 = vadd.f32 %v7842_v17, %v14900_v3  ;;  %v10198_v34 = vadd.f32 %v8228_v29, %v14903_v62  ;;  %v7844_v25 = vpop.f32.mrb[207].mxu0  ;;  %v8230_v60 = vpop.f32.mrb[79].mxu1 }
 0x793   : > { %v8776_v41 = vmax.f32 %v10133_v8, 0.0  ;;  %v8778_v54 = vmax.f32 %v10197_v23, 0.0  ;;  %v10135_v49 = vadd.f32 %v7844_v25, %v14908_v36  ;;  %v10199_v37 = vadd.f32 %v8230_v60, %v14911_v13 }
 0x794   : > { %8967 = vst [vmem:[%s14918_s27 + $0x120] sm:$0xff] %v8775_v63  ;;  %8969 = vst [vmem:[%s14918_s27 + $0x130] sm:$0xff] %v8777_v32  ;;  %v8781_v22 = vmax.f32 %v10134_v53, 0.0  ;;  %v8783_v10 = vmax.f32 %v10198_v34, 0.0  ;;  %8526 = vmatmul.mubr.bf16.gmra.mrb[56].mxu0 %v14589_v46 }
 0x795   : > { %8968 = vst [vmem:[%s14918_s27 + $0x128] sm:$0xff] %v8776_v41  ;;  %8970 = vst [vmem:[%s14918_s27 + $0x138] sm:$0xff] %v8778_v54  ;;  %v8782_v35 = vmax.f32 %v10135_v49, 0.0  ;;  %v8784_v30 = vmax.f32 %v10199_v37, 0.0  ;;  %8535 = vmatprep.mubr.bf16.mxu0 %v14613_v58 }
 0x796   : > { %8973 = vst [vmem:[%s14918_s27 + $0x150] sm:$0xff] %v8781_v22  ;;  %8975 = vst [vmem:[%s14918_s27 + $0x160] sm:$0xff] %v8783_v10 }
 0x797   : > { %8974 = vst [vmem:[%s14918_s27 + $0x158] sm:$0xff] %v8782_v35  ;;  %8976 = vst [vmem:[%s14918_s27 + $0x168] sm:$0xff] %v8784_v30  ;;  %v7848_v19 = vpop.f32.mrb[208].mxu0  ;;  %v8234_v40 = vpop.f32.mrb[80].mxu1 }
 0x798   : > { %v10136_v11 = vadd.f32 %v7848_v19, %v14900_v3  ;;  %v10200_v20 = vadd.f32 %v8234_v40, %v14903_v62  ;;  %v7850_v6 = vpop.f32.mrb[209].mxu0  ;;  %v8236_v4 = vpop.f32.mrb[81].mxu1 }
 0x799   : > { %v10137_v46 = vadd.f32 %v7850_v6, %v14908_v36  ;;  %v10201_v28 = vadd.f32 %v8236_v4, %v14911_v13  ;;  %v7852_v8 = vpop.f32.mrb[210].mxu0  ;;  %v8238_v58 = vpop.f32.mrb[82].mxu1 }
 0x79a   : > { %v8787_v23 = vmax.f32 %v10136_v11, 0.0  ;;  %v8789_v17 = vmax.f32 %v10200_v20, 0.0  ;;  %v10138_v29 = vadd.f32 %v7852_v8, %v14900_v3  ;;  %v10202_v63 = vadd.f32 %v8238_v58, %v14903_v62  ;;  %v7854_v32 = vpop.f32.mrb[211].mxu0  ;;  %v8240_v53 = vpop.f32.mrb[83].mxu1 }
 0x79b   : > { %v8788_v34 = vmax.f32 %v10137_v46, 0.0  ;;  %v8790_v25 = vmax.f32 %v10201_v28, 0.0  ;;  %v10139_v60 = vadd.f32 %v7854_v32, %v14908_v36  ;;  %v10203_v41 = vadd.f32 %v8240_v53, %v14911_v13 }
 0x79c   : > { %8979 = vst [vmem:[%s14918_s27 + $0x180] sm:$0xff] %v8787_v23  ;;  %8981 = vst [vmem:[%s14918_s27 + $0x190] sm:$0xff] %v8789_v17  ;;  %v8793_v54 = vmax.f32 %v10138_v29, 0.0  ;;  %v8795_v49 = vmax.f32 %v10202_v63, 0.0  ;;  %8536 = vmatmul.mubr.bf16.gmra.mrb[60].mxu0 %v14609_v0 }
 0x79d   : > { %8980 = vst [vmem:[%s14918_s27 + $0x188] sm:$0xff] %v8788_v34  ;;  %8982 = vst [vmem:[%s14918_s27 + $0x198] sm:$0xff] %v8790_v25  ;;  %v8794_v37 = vmax.f32 %v10139_v60, 0.0  ;;  %v8796_v22 = vmax.f32 %v10203_v41, 0.0  ;;  %8578 = vmatprep.mubr.bf16.mxu0 %v14126_v27 }
 0x79e   : > { %8985 = vst [vmem:[%s14918_s27 + $0x1b0] sm:$0xff] %v8793_v54  ;;  %8987 = vst [vmem:[%s14918_s27 + $0x1c0] sm:$0xff] %v8795_v49 }
 0x79f   : > { %8986 = vst [vmem:[%s14918_s27 + $0x1b8] sm:$0xff] %v8794_v37  ;;  %8988 = vst [vmem:[%s14918_s27 + $0x1c8] sm:$0xff] %v8796_v22  ;;  %v7858_v10 = vpop.f32.mrb[212].mxu0  ;;  %v8244_v35 = vpop.f32.mrb[84].mxu1 }
 0x7a0   : > { %v10140_v30 = vadd.f32 %v7858_v10, %v14900_v3  ;;  %v10204_v19 = vadd.f32 %v8244_v35, %v14903_v62  ;;  %v7860_v40 = vpop.f32.mrb[213].mxu0  ;;  %v8246_v11 = vpop.f32.mrb[85].mxu1 }
 0x7a1   : > { %v10141_v0 = vadd.f32 %v7860_v40, %v14908_v36  ;;  %v10205_v20 = vadd.f32 %v8246_v11, %v14911_v13  ;;  %v7862_v6 = vpop.f32.mrb[214].mxu0  ;;  %v8248_v27 = vpop.f32.mrb[86].mxu1 }
 0x7a2   : > { %v8799_v4 = vmax.f32 %v10140_v30, 0.0  ;;  %v8801_v46 = vmax.f32 %v10204_v19, 0.0  ;;  %v10142_v28 = vadd.f32 %v7862_v6, %v14900_v3  ;;  %v10206_v8 = vadd.f32 %v8248_v27, %v14903_v62  ;;  %v7864_v58 = vpop.f32.mrb[215].mxu0  ;;  %v8250_v23 = vpop.f32.mrb[87].mxu1 }
 0x7a3   : > { %v8800_v17 = vmax.f32 %v10141_v0, 0.0  ;;  %v8802_v29 = vmax.f32 %v10205_v20, 0.0  ;;  %v10143_v63 = vadd.f32 %v7864_v58, %v14908_v36  ;;  %v10207_v32 = vadd.f32 %v8250_v23, %v14911_v13 }
 0x7a4   : > { %8991 = vst [vmem:[%s14918_s27 + $0x1e0] sm:$0xff] %v8799_v4  ;;  %8993 = vst [vmem:[%s14918_s27 + $0x1f0] sm:$0xff] %v8801_v46  ;;  %v8805_v53 = vmax.f32 %v10142_v28, 0.0  ;;  %v8807_v34 = vmax.f32 %v10206_v8, 0.0  ;;  %8579 = vmatmul.mubr.bf16.vlgmr.msra.gmra.mrb[0].mxu0 %v14122_v45 }
 0x7a5   : > { %8992 = vst [vmem:[%s14918_s27 + $0x1e8] sm:$0xff] %v8800_v17  ;;  %8994 = vst [vmem:[%s14918_s27 + $0x1f8] sm:$0xff] %v8802_v29  ;;  %v8806_v25 = vmax.f32 %v10143_v63, 0.0  ;;  %v8808_v60 = vmax.f32 %v10207_v32, 0.0  ;;  %8588 = vmatprep.mubr.bf16.mxu0 %v14170_v56 }
 0x7a6   : > { %8997 = vst [vmem:[%s14918_s27 + $0x210] sm:$0xff] %v8805_v53  ;;  %8999 = vst [vmem:[%s14918_s27 + $0x220] sm:$0xff] %v8807_v34 }
 0x7a7   : > { %8998 = vst [vmem:[%s14918_s27 + $0x218] sm:$0xff] %v8806_v25  ;;  %9000 = vst [vmem:[%s14918_s27 + $0x228] sm:$0xff] %v8808_v60  ;;  %v7868_v41 = vpop.f32.mrb[216].mxu0  ;;  %v8254_v54 = vpop.f32.mrb[88].mxu1 }
 0x7a8   : > { %v10144_v49 = vadd.f32 %v7868_v41, %v14900_v3  ;;  %v10208_v37 = vadd.f32 %v8254_v54, %v14903_v62  ;;  %v7870_v22 = vpop.f32.mrb[217].mxu0  ;;  %v8256_v10 = vpop.f32.mrb[89].mxu1 }
 0x7a9   : > { %v10145_v45 = vadd.f32 %v7870_v22, %v14908_v36  ;;  %v10209_v35 = vadd.f32 %v8256_v10, %v14911_v13  ;;  %v7872_v30 = vpop.f32.mrb[218].mxu0  ;;  %v8258_v56 = vpop.f32.mrb[90].mxu1 }
 0x7aa   : > { %v8811_v19 = vmax.f32 %v10144_v49, 0.0  ;;  %v8813_v40 = vmax.f32 %v10208_v37, 0.0  ;;  %v10146_v11 = vadd.f32 %v7872_v30, %v14900_v3  ;;  %v10210_v0 = vadd.f32 %v8258_v56, %v14903_v62  ;;  %v7874_v20 = vpop.f32.mrb[219].mxu0  ;;  %v8260_v6 = vpop.f32.mrb[91].mxu1 }
 0x7ab   : > { %v8812_v27 = vmax.f32 %v10145_v45, 0.0  ;;  %v8814_v4 = vmax.f32 %v10209_v35, 0.0  ;;  %v10147_v46 = vadd.f32 %v7874_v20, %v14908_v36  ;;  %v10211_v28 = vadd.f32 %v8260_v6, %v14911_v13 }
 0x7ac   : > { %9003 = vst [vmem:[%s14918_s27 + $0x240] sm:$0xff] %v8811_v19  ;;  %9005 = vst [vmem:[%s14918_s27 + $0x250] sm:$0xff] %v8813_v40  ;;  %v8817_v8 = vmax.f32 %v10146_v11, 0.0  ;;  %v8819_v58 = vmax.f32 %v10210_v0, 0.0  ;;  %8589 = vmatmul.mubr.bf16.gmra.mrb[4].mxu0 %v14166_v14 }
 0x7ad   : > { %9004 = vst [vmem:[%s14918_s27 + $0x248] sm:$0xff] %v8812_v27  ;;  %9006 = vst [vmem:[%s14918_s27 + $0x258] sm:$0xff] %v8814_v4  ;;  %v8818_v23 = vmax.f32 %v10147_v46, 0.0  ;;  %v8820_v17 = vmax.f32 %v10211_v28, 0.0  ;;  %8598 = vmatprep.mubr.bf16.mxu0 %v14214_v39 }
 0x7ae   : > { %9009 = vst [vmem:[%s14918_s27 + $0x270] sm:$0xff] %v8817_v8  ;;  %9011 = vst [vmem:[%s14918_s27 + $0x280] sm:$0xff] %v8819_v58 }
 0x7af   : > { %9010 = vst [vmem:[%s14918_s27 + $0x278] sm:$0xff] %v8818_v23  ;;  %9012 = vst [vmem:[%s14918_s27 + $0x288] sm:$0xff] %v8820_v17  ;;  %v7878_v29 = vpop.f32.mrb[220].mxu0  ;;  %v8264_v63 = vpop.f32.mrb[92].mxu1 }
 0x7b0   : > { %v10148_v32 = vadd.f32 %v7878_v29, %v14900_v3  ;;  %v10212_v53 = vadd.f32 %v8264_v63, %v14903_v62  ;;  %v7880_v34 = vpop.f32.mrb[221].mxu0  ;;  %v8266_v25 = vpop.f32.mrb[93].mxu1 }
 0x7b1   : > { %v10149_v14 = vadd.f32 %v7880_v34, %v14908_v36  ;;  %v10213_v60 = vadd.f32 %v8266_v25, %v14911_v13  ;;  %v7882_v41 = vpop.f32.mrb[222].mxu0  ;;  %v8268_v39 = vpop.f32.mrb[94].mxu1 }
 0x7b2   : > { %v8823_v54 = vmax.f32 %v10148_v32, 0.0  ;;  %v8825_v49 = vmax.f32 %v10212_v53, 0.0  ;;  %v10150_v37 = vadd.f32 %v7882_v41, %v14900_v3  ;;  %v10214_v22 = vadd.f32 %v8268_v39, %v14903_v62  ;;  %v7884_v10 = vpop.f32.mrb[223].mxu0  ;;  %v8270_v45 = vpop.f32.mrb[95].mxu1 }
 0x7b3   : > { %v8824_v35 = vmax.f32 %v10149_v14, 0.0  ;;  %v8826_v30 = vmax.f32 %v10213_v60, 0.0  ;;  %v10151_v56 = vadd.f32 %v7884_v10, %v14908_v36  ;;  %v10215_v19 = vadd.f32 %v8270_v45, %v14911_v13 }
 0x7b4   : > { %9015 = vst [vmem:[%s14918_s27 + $0x2a0] sm:$0xff] %v8823_v54  ;;  %9017 = vst [vmem:[%s14918_s27 + $0x2b0] sm:$0xff] %v8825_v49  ;;  %v8829_v40 = vmax.f32 %v10150_v37, 0.0  ;;  %v8831_v11 = vmax.f32 %v10214_v22, 0.0  ;;  %8599 = vmatmul.mubr.bf16.gmra.mrb[8].mxu0 %v14210_v42 }
 0x7b5   : > { %9016 = vst [vmem:[%s14918_s27 + $0x2a8] sm:$0xff] %v8824_v35  ;;  %9018 = vst [vmem:[%s14918_s27 + $0x2b8] sm:$0xff] %v8826_v30  ;;  %v8830_v0 = vmax.f32 %v10151_v56, 0.0  ;;  %v8832_v20 = vmax.f32 %v10215_v19, 0.0  ;;  %8608 = vmatprep.mubr.bf16.mxu0 %v14258_v33 }
 0x7b6   : > { %9021 = vst [vmem:[%s14918_s27 + $0x2d0] sm:$0xff] %v8829_v40  ;;  %9023 = vst [vmem:[%s14918_s27 + $0x2e0] sm:$0xff] %v8831_v11 }
 0x7b7   : > { %9022 = vst [vmem:[%s14918_s27 + $0x2d8] sm:$0xff] %v8830_v0  ;;  %9024 = vst [vmem:[%s14918_s27 + $0x2e8] sm:$0xff] %v8832_v20  ;;  %v7888_v6 = vpop.f32.mrb[224].mxu0  ;;  %v8274_v27 = vpop.f32.mrb[96].mxu1 }
 0x7b8   : > { %v10152_v4 = vadd.f32 %v7888_v6, %v14900_v3  ;;  %v10216_v46 = vadd.f32 %v8274_v27, %v14903_v62  ;;  %v7890_v28 = vpop.f32.mrb[225].mxu0  ;;  %v8276_v8 = vpop.f32.mrb[97].mxu1 }
 0x7b9   : > { %v10153_v42 = vadd.f32 %v7890_v28, %v14908_v36  ;;  %v10217_v58 = vadd.f32 %v8276_v8, %v14911_v13  ;;  %v7892_v23 = vpop.f32.mrb[226].mxu0  ;;  %v8278_v33 = vpop.f32.mrb[98].mxu1 }
 0x7ba   : > { %v8835_v17 = vmax.f32 %v10152_v4, 0.0  ;;  %v8837_v29 = vmax.f32 %v10216_v46, 0.0  ;;  %v10154_v63 = vadd.f32 %v7892_v23, %v14900_v3  ;;  %v10218_v32 = vadd.f32 %v8278_v33, %v14903_v62  ;;  %v7894_v53 = vpop.f32.mrb[227].mxu0  ;;  %v8280_v34 = vpop.f32.mrb[99].mxu1 }
 0x7bb   : > { %v8836_v25 = vmax.f32 %v10153_v42, 0.0  ;;  %v8838_v14 = vmax.f32 %v10217_v58, 0.0  ;;  %v10155_v60 = vadd.f32 %v7894_v53, %v14908_v36  ;;  %v10219_v41 = vadd.f32 %v8280_v34, %v14911_v13 }
 0x7bc   : > { %9027 = vst [vmem:[%s14918_s27 + $0x300] sm:$0xff] %v8835_v17  ;;  %9029 = vst [vmem:[%s14918_s27 + $0x310] sm:$0xff] %v8837_v29  ;;  %v8841_v39 = vmax.f32 %v10154_v63, 0.0  ;;  %v8843_v54 = vmax.f32 %v10218_v32, 0.0  ;;  %8609 = vmatmul.mubr.bf16.gmra.mrb[12].mxu0 %v14254_v12 }
 0x7bd   : > { %9028 = vst [vmem:[%s14918_s27 + $0x308] sm:$0xff] %v8836_v25  ;;  %9030 = vst [vmem:[%s14918_s27 + $0x318] sm:$0xff] %v8838_v14  ;;  %v8842_v49 = vmax.f32 %v10155_v60, 0.0  ;;  %v8844_v37 = vmax.f32 %v10219_v41, 0.0  ;;  %8618 = vmatprep.mubr.bf16.mxu0 %v14302_v9 }
 0x7be   : > { %9033 = vst [vmem:[%s14918_s27 + $0x330] sm:$0xff] %v8841_v39  ;;  %9035 = vst [vmem:[%s14918_s27 + $0x340] sm:$0xff] %v8843_v54 }
 0x7bf   : > { %9034 = vst [vmem:[%s14918_s27 + $0x338] sm:$0xff] %v8842_v49  ;;  %9036 = vst [vmem:[%s14918_s27 + $0x348] sm:$0xff] %v8844_v37  ;;  %v7898_v22 = vpop.f32.mrb[228].mxu0  ;;  %v8284_v10 = vpop.f32.mrb[100].mxu1 }
 0x7c0   : > { %v10156_v45 = vadd.f32 %v7898_v22, %v14900_v3  ;;  %v10220_v35 = vadd.f32 %v8284_v10, %v14903_v62  ;;  %v7900_v30 = vpop.f32.mrb[229].mxu0  ;;  %v8286_v56 = vpop.f32.mrb[101].mxu1 }
 0x7c1   : > { %v10157_v12 = vadd.f32 %v7900_v30, %v14908_v36  ;;  %v10221_v19 = vadd.f32 %v8286_v56, %v14911_v13  ;;  %v7902_v40 = vpop.f32.mrb[230].mxu0  ;;  %v8288_v9 = vpop.f32.mrb[102].mxu1 }
 0x7c2   : > { %v8847_v11 = vmax.f32 %v10156_v45, 0.0  ;;  %v8849_v0 = vmax.f32 %v10220_v35, 0.0  ;;  %v10158_v20 = vadd.f32 %v7902_v40, %v14900_v3  ;;  %v10222_v6 = vadd.f32 %v8288_v9, %v14903_v62  ;;  %v7904_v27 = vpop.f32.mrb[231].mxu0  ;;  %v8290_v4 = vpop.f32.mrb[103].mxu1 }
 0x7c3   : > { %v8848_v46 = vmax.f32 %v10157_v12, 0.0  ;;  %v8850_v28 = vmax.f32 %v10221_v19, 0.0  ;;  %v10159_v8 = vadd.f32 %v7904_v27, %v14908_v36  ;;  %v10223_v42 = vadd.f32 %v8290_v4, %v14911_v13 }
 0x7c4   : > { %9039 = vst [vmem:[%s14918_s27 + $0x360] sm:$0xff] %v8847_v11  ;;  %9041 = vst [vmem:[%s14918_s27 + $0x370] sm:$0xff] %v8849_v0  ;;  %v8853_v58 = vmax.f32 %v10158_v20, 0.0  ;;  %v8855_v23 = vmax.f32 %v10222_v6, 0.0  ;;  %8619 = vmatmul.mubr.bf16.gmra.mrb[16].mxu0 %v14298_v5 }
 0x7c5   : > { %9040 = vst [vmem:[%s14918_s27 + $0x368] sm:$0xff] %v8848_v46  ;;  %9042 = vst [vmem:[%s14918_s27 + $0x378] sm:$0xff] %v8850_v28  ;;  %v8854_v33 = vmax.f32 %v10159_v8, 0.0  ;;  %v8856_v17 = vmax.f32 %v10223_v42, 0.0  ;;  %8628 = vmatprep.mubr.bf16.mxu0 %v14346_v51 }
 0x7c6   : > { %9045 = vst [vmem:[%s14918_s27 + $0x390] sm:$0xff] %v8853_v58  ;;  %9047 = vst [vmem:[%s14918_s27 + $0x3a0] sm:$0xff] %v8855_v23 }
 0x7c7   : > { %9046 = vst [vmem:[%s14918_s27 + $0x398] sm:$0xff] %v8854_v33  ;;  %9048 = vst [vmem:[%s14918_s27 + $0x3a8] sm:$0xff] %v8856_v17  ;;  %v7908_v29 = vpop.f32.mrb[232].mxu0  ;;  %v8294_v63 = vpop.f32.mrb[104].mxu1 }
 0x7c8   : > { %v10160_v32 = vadd.f32 %v7908_v29, %v14900_v3  ;;  %v10224_v53 = vadd.f32 %v8294_v63, %v14903_v62  ;;  %v7910_v34 = vpop.f32.mrb[233].mxu0  ;;  %v8296_v25 = vpop.f32.mrb[105].mxu1 }
 0x7c9   : > { %v10161_v5 = vadd.f32 %v7910_v34, %v14908_v36  ;;  %v10225_v14 = vadd.f32 %v8296_v25, %v14911_v13  ;;  %v7912_v60 = vpop.f32.mrb[234].mxu0  ;;  %v8298_v51 = vpop.f32.mrb[106].mxu1 }
 0x7ca   : > { %v8859_v41 = vmax.f32 %v10160_v32, 0.0  ;;  %v8861_v39 = vmax.f32 %v10224_v53, 0.0  ;;  %v10162_v54 = vadd.f32 %v7912_v60, %v14900_v3  ;;  %v10226_v49 = vadd.f32 %v8298_v51, %v14903_v62  ;;  %v7914_v37 = vpop.f32.mrb[235].mxu0  ;;  %v8300_v22 = vpop.f32.mrb[107].mxu1 }
 0x7cb   : > { %v8860_v10 = vmax.f32 %v10161_v5, 0.0  ;;  %v8862_v45 = vmax.f32 %v10225_v14, 0.0  ;;  %v10163_v35 = vadd.f32 %v7914_v37, %v14908_v36  ;;  %v10227_v30 = vadd.f32 %v8300_v22, %v14911_v13 }
 0x7cc   : > { %9051 = vst [vmem:[%s14918_s27 + $0x3c0] sm:$0xff] %v8859_v41  ;;  %9053 = vst [vmem:[%s14918_s27 + $0x3d0] sm:$0xff] %v8861_v39  ;;  %v8865_v56 = vmax.f32 %v10162_v54, 0.0  ;;  %v8867_v12 = vmax.f32 %v10226_v49, 0.0  ;;  %8629 = vmatmul.mubr.bf16.gmra.mrb[20].mxu0 %v14342_v26 }
 0x7cd   : > { %9052 = vst [vmem:[%s14918_s27 + $0x3c8] sm:$0xff] %v8860_v10  ;;  %9054 = vst [vmem:[%s14918_s27 + $0x3d8] sm:$0xff] %v8862_v45  ;;  %v8866_v19 = vmax.f32 %v10163_v35, 0.0  ;;  %v8868_v40 = vmax.f32 %v10227_v30, 0.0  ;;  %8638 = vmatprep.mubr.bf16.mxu0 %v14390_v48 }
 0x7ce   : > { %9057 = vst [vmem:[%s14918_s27 + $0x3f0] sm:$0xff] %v8865_v56  ;;  %9059 = vst [vmem:[%s14918_s27 + $0x400] sm:$0xff] %v8867_v12 }
 0x7cf   : > { %9058 = vst [vmem:[%s14918_s27 + $0x3f8] sm:$0xff] %v8866_v19  ;;  %9060 = vst [vmem:[%s14918_s27 + $0x408] sm:$0xff] %v8868_v40  ;;  %v7918_v9 = vpop.f32.mrb[236].mxu0  ;;  %v8304_v11 = vpop.f32.mrb[108].mxu1 }
 0x7d0   : > { %v10164_v0 = vadd.f32 %v7918_v9, %v14900_v3  ;;  %v10228_v20 = vadd.f32 %v8304_v11, %v14903_v62  ;;  %v7920_v6 = vpop.f32.mrb[237].mxu0  ;;  %v8306_v27 = vpop.f32.mrb[109].mxu1 }
 0x7d1   : > { %v10165_v26 = vadd.f32 %v7920_v6, %v14908_v36  ;;  %v10229_v4 = vadd.f32 %v8306_v27, %v14911_v13  ;;  %v7922_v46 = vpop.f32.mrb[238].mxu0  ;;  %v8308_v48 = vpop.f32.mrb[110].mxu1 }
 0x7d2   : > { %v8871_v28 = vmax.f32 %v10164_v0, 0.0  ;;  %v8873_v8 = vmax.f32 %v10228_v20, 0.0  ;;  %v10166_v42 = vadd.f32 %v7922_v46, %v14900_v3  ;;  %v10230_v58 = vadd.f32 %v8308_v48, %v14903_v62  ;;  %v7924_v23 = vpop.f32.mrb[239].mxu0  ;;  %v8310_v33 = vpop.f32.mrb[111].mxu1 }
 0x7d3   : > { %v8872_v17 = vmax.f32 %v10165_v26, 0.0  ;;  %v8874_v29 = vmax.f32 %v10229_v4, 0.0  ;;  %v10167_v63 = vadd.f32 %v7924_v23, %v14908_v36  ;;  %v10231_v32 = vadd.f32 %v8310_v33, %v14911_v13 }
 0x7d4   : > { %9063 = vst [vmem:[%s14918_s27 + $0x420] sm:$0xff] %v8871_v28  ;;  %9065 = vst [vmem:[%s14918_s27 + $0x430] sm:$0xff] %v8873_v8  ;;  %v8877_v53 = vmax.f32 %v10166_v42, 0.0  ;;  %v8879_v34 = vmax.f32 %v10230_v58, 0.0  ;;  %8639 = vmatmul.mubr.bf16.gmra.mrb[24].mxu0 %v14386_v31 }
 0x7d5   : > { %9064 = vst [vmem:[%s14918_s27 + $0x428] sm:$0xff] %v8872_v17  ;;  %9066 = vst [vmem:[%s14918_s27 + $0x438] sm:$0xff] %v8874_v29  ;;  %v8878_v25 = vmax.f32 %v10167_v63, 0.0  ;;  %v8880_v5 = vmax.f32 %v10231_v32, 0.0  ;;  %8648 = vmatprep.mubr.bf16.mxu0 %v14434_v61 }
 0x7d6   : > { %9069 = vst [vmem:[%s14918_s27 + $0x450] sm:$0xff] %v8877_v53  ;;  %9071 = vst [vmem:[%s14918_s27 + $0x460] sm:$0xff] %v8879_v34 }
 0x7d7   : > { %9070 = vst [vmem:[%s14918_s27 + $0x458] sm:$0xff] %v8878_v25  ;;  %9072 = vst [vmem:[%s14918_s27 + $0x468] sm:$0xff] %v8880_v5  ;;  %v7928_v14 = vpop.f32.mrb[240].mxu0  ;;  %v8314_v60 = vpop.f32.mrb[112].mxu1 }
 0x7d8   : > { %v10168_v51 = vadd.f32 %v7928_v14, %v14900_v3  ;;  %v10232_v41 = vadd.f32 %v8314_v60, %v14903_v62  ;;  %v7930_v39 = vpop.f32.mrb[241].mxu0  ;;  %v8316_v54 = vpop.f32.mrb[113].mxu1 }
 0x7d9   : > { %v10169_v31 = vadd.f32 %v7930_v39, %v14908_v36  ;;  %v10233_v49 = vadd.f32 %v8316_v54, %v14911_v13  ;;  %v7932_v37 = vpop.f32.mrb[242].mxu0  ;;  %v8318_v61 = vpop.f32.mrb[114].mxu1 }
 0x7da   : > { %v8883_v22 = vmax.f32 %v10168_v51, 0.0  ;;  %v8885_v10 = vmax.f32 %v10232_v41, 0.0  ;;  %v10170_v45 = vadd.f32 %v7932_v37, %v14900_v3  ;;  %v10234_v35 = vadd.f32 %v8318_v61, %v14903_v62  ;;  %v7934_v30 = vpop.f32.mrb[243].mxu0  ;;  %v8320_v56 = vpop.f32.mrb[115].mxu1 }
 0x7db   : > { %v8884_v12 = vmax.f32 %v10169_v31, 0.0  ;;  %v8886_v19 = vmax.f32 %v10233_v49, 0.0  ;;  %v10171_v40 = vadd.f32 %v7934_v30, %v14908_v36  ;;  %v10235_v9 = vadd.f32 %v8320_v56, %v14911_v13 }
 0x7dc   : > { %9075 = vst [vmem:[%s14918_s27 + $0x480] sm:$0xff] %v8883_v22  ;;  %9077 = vst [vmem:[%s14918_s27 + $0x490] sm:$0xff] %v8885_v10  ;;  %v8889_v11 = vmax.f32 %v10170_v45, 0.0  ;;  %v8891_v0 = vmax.f32 %v10234_v35, 0.0  ;;  %8649 = vmatmul.mubr.bf16.gmra.mrb[28].mxu0 %v14430_v50 }
 0x7dd   : > { %9076 = vst [vmem:[%s14918_s27 + $0x488] sm:$0xff] %v8884_v12  ;;  %9078 = vst [vmem:[%s14918_s27 + $0x498] sm:$0xff] %v8886_v19  ;;  %v8890_v20 = vmax.f32 %v10171_v40, 0.0  ;;  %v8892_v6 = vmax.f32 %v10235_v9, 0.0  ;;  %8658 = vmatprep.mubr.bf16.mxu0 %v14475_v1 }
 0x7de   : > { %9081 = vst [vmem:[%s14918_s27 + $0x4b0] sm:$0xff] %v8889_v11  ;;  %9083 = vst [vmem:[%s14918_s27 + $0x4c0] sm:$0xff] %v8891_v0 }
 0x7df   : > { %9082 = vst [vmem:[%s14918_s27 + $0x4b8] sm:$0xff] %v8890_v20  ;;  %9084 = vst [vmem:[%s14918_s27 + $0x4c8] sm:$0xff] %v8892_v6  ;;  %v7938_v27 = vpop.f32.mrb[244].mxu0  ;;  %v8324_v26 = vpop.f32.mrb[116].mxu1 }
 0x7e0   : > { %v10172_v4 = vadd.f32 %v7938_v27, %v14900_v3  ;;  %v10236_v46 = vadd.f32 %v8324_v26, %v14903_v62  ;;  %v7940_v48 = vpop.f32.mrb[245].mxu0  ;;  %v8326_v28 = vpop.f32.mrb[117].mxu1 }
 0x7e1   : > { %v10173_v50 = vadd.f32 %v7940_v48, %v14908_v36  ;;  %v10237_v8 = vadd.f32 %v8326_v28, %v14911_v13  ;;  %v7942_v42 = vpop.f32.mrb[246].mxu0  ;;  %v8328_v1 = vpop.f32.mrb[118].mxu1 }
 0x7e2   : > { %v8895_v58 = vmax.f32 %v10172_v4, 0.0  ;;  %v8897_v23 = vmax.f32 %v10236_v46, 0.0  ;;  %v10174_v33 = vadd.f32 %v7942_v42, %v14900_v3  ;;  %v10238_v17 = vadd.f32 %v8328_v1, %v14903_v62  ;;  %v7944_v29 = vpop.f32.mrb[247].mxu0  ;;  %v8330_v63 = vpop.f32.mrb[119].mxu1 }
 0x7e3   : > { %v8896_v32 = vmax.f32 %v10173_v50, 0.0  ;;  %v8898_v53 = vmax.f32 %v10237_v8, 0.0  ;;  %v10175_v34 = vadd.f32 %v7944_v29, %v14908_v36  ;;  %v10239_v25 = vadd.f32 %v8330_v63, %v14911_v13 }
 0x7e4   : > { %9087 = vst [vmem:[%s14918_s27 + $0x4e0] sm:$0xff] %v8895_v58  ;;  %9089 = vst [vmem:[%s14918_s27 + $0x4f0] sm:$0xff] %v8897_v23  ;;  %v8901_v5 = vmax.f32 %v10174_v33, 0.0  ;;  %v8903_v14 = vmax.f32 %v10238_v17, 0.0  ;;  %8659 = vmatmul.mubr.bf16.gmra.mrb[32].mxu0 %v14471_v57 }
 0x7e5   : > { %9088 = vst [vmem:[%s14918_s27 + $0x4e8] sm:$0xff] %v8896_v32  ;;  %9090 = vst [vmem:[%s14918_s27 + $0x4f8] sm:$0xff] %v8898_v53  ;;  %v8902_v60 = vmax.f32 %v10175_v34, 0.0  ;;  %v8904_v51 = vmax.f32 %v10239_v25, 0.0  ;;  %8668 = vmatprep.mubr.bf16.mxu0 %v14495_v38 }
 0x7e6   : > { %9093 = vst [vmem:[%s14918_s27 + $0x510] sm:$0xff] %v8901_v5  ;;  %9095 = vst [vmem:[%s14918_s27 + $0x520] sm:$0xff] %v8903_v14 }
 0x7e7   : > { %9094 = vst [vmem:[%s14918_s27 + $0x518] sm:$0xff] %v8902_v60  ;;  %9096 = vst [vmem:[%s14918_s27 + $0x528] sm:$0xff] %v8904_v51  ;;  %v7948_v41 = vpop.f32.mrb[248].mxu0  ;;  %v8334_v39 = vpop.f32.mrb[120].mxu1 }
 0x7e8   : > { %v10176_v54 = vadd.f32 %v7948_v41, %v14900_v3  ;;  %v10240_v31 = vadd.f32 %v8334_v39, %v14903_v62  ;;  %v7950_v49 = vpop.f32.mrb[249].mxu0  ;;  %v8336_v37 = vpop.f32.mrb[121].mxu1 }
 0x7e9   : > { %v10177_v57 = vadd.f32 %v7950_v49, %v14908_v36  ;;  %v10241_v61 = vadd.f32 %v8336_v37, %v14911_v13  ;;  %v7952_v22 = vpop.f32.mrb[250].mxu0  ;;  %v8338_v38 = vpop.f32.mrb[122].mxu1 }
 0x7ea   : > { %v8907_v10 = vmax.f32 %v10176_v54, 0.0  ;;  %v8909_v45 = vmax.f32 %v10240_v31, 0.0  ;;  %v10178_v35 = vadd.f32 %v7952_v22, %v14900_v3  ;;  %v10242_v30 = vadd.f32 %v8338_v38, %v14903_v62  ;;  %v7954_v56 = vpop.f32.mrb[251].mxu0  ;;  %v8340_v12 = vpop.f32.mrb[123].mxu1 }
 0x7eb   : > { %v8908_v19 = vmax.f32 %v10177_v57, 0.0  ;;  %v8910_v40 = vmax.f32 %v10241_v61, 0.0  ;;  %v10179_v9 = vadd.f32 %v7954_v56, %v14908_v36  ;;  %v10243_v11 = vadd.f32 %v8340_v12, %v14911_v13 }
 0x7ec   : > { %9099 = vst [vmem:[%s14918_s27 + $0x540] sm:$0xff] %v8907_v10  ;;  %9101 = vst [vmem:[%s14918_s27 + $0x550] sm:$0xff] %v8909_v45  ;;  %v8913_v0 = vmax.f32 %v10178_v35, 0.0  ;;  %v8915_v20 = vmax.f32 %v10242_v30, 0.0  ;;  %8669 = vmatmul.mubr.bf16.gmra.mrb[36].mxu0 %v14491_v21 }
 0x7ed   : > { %9100 = vst [vmem:[%s14918_s27 + $0x548] sm:$0xff] %v8908_v19  ;;  %9102 = vst [vmem:[%s14918_s27 + $0x558] sm:$0xff] %v8910_v40  ;;  %v8914_v6 = vmax.f32 %v10179_v9, 0.0  ;;  %v8916_v27 = vmax.f32 %v10243_v11, 0.0  ;;  %8678 = vmatprep.mubr.bf16.mxu0 %v14515_v44 }
 0x7ee   : > { %9105 = vst [vmem:[%s14918_s27 + $0x570] sm:$0xff] %v8913_v0  ;;  %9107 = vst [vmem:[%s14918_s27 + $0x580] sm:$0xff] %v8915_v20 }
 0x7ef   : > { %9106 = vst [vmem:[%s14918_s27 + $0x578] sm:$0xff] %v8914_v6  ;;  %9108 = vst [vmem:[%s14918_s27 + $0x588] sm:$0xff] %v8916_v27  ;;  %v7958_v26 = vpop.f32.mrb[252].mxu0  ;;  %v8344_v4 = vpop.f32.mrb[124].mxu1 }
 0x7f0   : > { %v10180_v46 = vadd.f32 %v7958_v26, %v14900_v3  ;;  %v10244_v48 = vadd.f32 %v8344_v4, %v14903_v62  ;;  %v7960_v28 = vpop.f32.mrb[253].mxu0  ;;  %v8346_v50 = vpop.f32.mrb[125].mxu1 }
 0x7f1   : > { %v10181_v21 = vadd.f32 %v7960_v28, %v14908_v36  ;;  %v10245_v8 = vadd.f32 %v8346_v50, %v14911_v13  ;;  %v7962_v42 = vpop.f32.mrb[254].mxu0  ;;  %v8348_v44 = vpop.f32.mrb[126].mxu1 }
 0x7f2   : > { %v8919_v1 = vmax.f32 %v10180_v46, 0.0  ;;  %v8921_v58 = vmax.f32 %v10244_v48, 0.0  ;;  %v10182_v23 = vadd.f32 %v7962_v42, %v14900_v3  ;;  %v10246_v33 = vadd.f32 %v8348_v44, %v14903_v62  ;;  %v7964_v17 = vpop.f32.mrb[255].mxu0  ;;  %v8350_v29 = vpop.f32.mrb[127].mxu1 }
 0x7f3   : > { %v8920_v63 = vmax.f32 %v10181_v21, 0.0  ;;  %v8922_v32 = vmax.f32 %v10245_v8, 0.0  ;;  %v10183_v53 = vadd.f32 %v7964_v17, %v14908_v36  ;;  %v10247_v34 = vadd.f32 %v8350_v29, %v14911_v13 }
 0x7f4   : > { %9111 = vst [vmem:[%s14918_s27 + $0x5a0] sm:$0xff] %v8919_v1  ;;  %9113 = vst [vmem:[%s14918_s27 + $0x5b0] sm:$0xff] %v8921_v58  ;;  %v8925_v25 = vmax.f32 %v10182_v23, 0.0  ;;  %v8927_v5 = vmax.f32 %v10246_v33, 0.0  ;;  %8679 = vmatmul.mubr.bf16.gmra.mrb[40].mxu0 %v14511_v15 }
 0x7f5   : > { %9112 = vst [vmem:[%s14918_s27 + $0x5a8] sm:$0xff] %v8920_v63  ;;  %9114 = vst [vmem:[%s14918_s27 + $0x5b8] sm:$0xff] %v8922_v32  ;;  %v8926_v3 = vmax.f32 %v10183_v53, 0.0  ;;  %v8928_v62 = vmax.f32 %v10247_v34, 0.0  ;;  %8688 = vmatprep.mubr.bf16.mxu0 %v14535_v55  ;;  %v15490_v55 = vld [vmem:[#allocation14_spill] sm:$0xff] }
 0x7f6   : > { %9117 = vst [vmem:[%s14918_s27 + $0x5d0] sm:$0xff] %v8925_v25  ;;  %9119 = vst [vmem:[%s14918_s27 + $0x5e0] sm:$0xff] %v8927_v5  ;;  %v6609_v15 = vsub.s32 4, %v15490_v55 }
 0x7f7   : > { %9118 = vst [vmem:[%s14918_s27 + $0x5d8] sm:$0xff] %v8926_v3  ;;  %9120 = vst [vmem:[%s14918_s27 + $0x5e8] sm:$0xff] %v8928_v62 }
 0x7fc   : > { %8689 = vmatmul.mubr.bf16.gmra.mrb[44].mxu0 %v14531_v43  ;;  %v6613_v43 = vsub.s32 5, %v15490_v55 }
 0x7fd   : > { %8698 = vmatprep.mubr.bf16.mxu0 %v14555_v59 }
 0x804   : > { %8699 = vmatmul.mubr.bf16.gmra.mrb[48].mxu0 %v14551_v18 }
 0x805   : > { %8708 = vmatprep.mubr.bf16.mxu0 %v14575_v2  ;;  %v11869_v2 = vld [vmem:[%s15367_s12] sm:$0x3f] }
 0x806   : > { %v15220_v59 = vrot.slane %v11869_v2, %v6609_v15 }
 0x80c   : > { %8709 = vmatmul.mubr.bf16.gmra.mrb[52].mxu0 %v14571_v47 }
 0x80d   : > { %8718 = vmatprep.mubr.bf16.mxu0 %v14595_v24  ;;  %v15222_v24 = vrot.slane %v11869_v2, %v6613_v43 }
 0x814   : > { %8719 = vmatmul.mubr.bf16.gmra.mrb[56].mxu0 %v14591_v16 }
 0x815   : > { %8728 = vmatprep.mubr.bf16.mxu0 %v14615_v52 }
 0x81c   : > { %8729 = vmatmul.mubr.bf16.gmra.mrb[60].mxu0 %v14611_v7 }
 0x877   : > { %v8580_v18 = vpop.f32.mrb[0].mxu0 }
 0x878   : > { %v10248_v52 = vadd.f32 %v8580_v18, %v15220_v59  ;;  %v8582_v47 = vpop.f32.mrb[1].mxu0 }
 0x879   : > { %v10249_v16 = vadd.f32 %v8582_v47, %v15222_v24  ;;  %v8584_v7 = vpop.f32.mrb[2].mxu0 }
 0x87a   : > { %v8743_v36 = vmax.f32 %v10248_v52, 0.0  ;;  %v10250_v13 = vadd.f32 %v8584_v7, %v15220_v59  ;;  %v8586_v14 = vpop.f32.mrb[3].mxu0 }
 0x87b   : > { %v8744_v60 = vmax.f32 %v10249_v16, 0.0  ;;  %v10251_v51 = vadd.f32 %v8586_v14, %v15222_v24 }
 0x87c   : > { %8935 = vst [vmem:[%s14918_s27 + $0x20] sm:$0xff] %v8743_v36  ;;  %v8749_v41 = vmax.f32 %v10250_v13, 0.0 }
 0x87d   : > { %8936 = vst [vmem:[%s14918_s27 + $0x28] sm:$0xff] %v8744_v60  ;;  %v8750_v39 = vmax.f32 %v10251_v51, 0.0 }
 0x87e   : > { %8941 = vst [vmem:[%s14918_s27 + $0x50] sm:$0xff] %v8749_v41 }
 0x87f   : > { %8942 = vst [vmem:[%s14918_s27 + $0x58] sm:$0xff] %v8750_v39  ;;  %v8590_v54 = vpop.f32.mrb[4].mxu0 }
 0x880   : > { %v10252_v31 = vadd.f32 %v8590_v54, %v15220_v59  ;;  %v8592_v49 = vpop.f32.mrb[5].mxu0 }
 0x881   : > { %v10253_v37 = vadd.f32 %v8592_v49, %v15222_v24  ;;  %v8594_v57 = vpop.f32.mrb[6].mxu0 }
 0x882   : > { %v8755_v61 = vmax.f32 %v10252_v31, 0.0  ;;  %v10254_v22 = vadd.f32 %v8594_v57, %v15220_v59  ;;  %v8596_v38 = vpop.f32.mrb[7].mxu0 }
 0x883   : > { %v8756_v10 = vmax.f32 %v10253_v37, 0.0  ;;  %v10255_v45 = vadd.f32 %v8596_v38, %v15222_v24 }
 0x884   : > { %8947 = vst [vmem:[%s14918_s27 + $0x80] sm:$0xff] %v8755_v61  ;;  %v8761_v35 = vmax.f32 %v10254_v22, 0.0 }
 0x885   : > { %8948 = vst [vmem:[%s14918_s27 + $0x88] sm:$0xff] %v8756_v10  ;;  %v8762_v30 = vmax.f32 %v10255_v45, 0.0 }
 0x886   : > { %8953 = vst [vmem:[%s14918_s27 + $0xb0] sm:$0xff] %v8761_v35 }
 0x887   : > { %8954 = vst [vmem:[%s14918_s27 + $0xb8] sm:$0xff] %v8762_v30  ;;  %v8600_v56 = vpop.f32.mrb[8].mxu0 }
 0x888   : > { %v10256_v12 = vadd.f32 %v8600_v56, %v15220_v59  ;;  %v8602_v19 = vpop.f32.mrb[9].mxu0 }
 0x889   : > { %v10257_v40 = vadd.f32 %v8602_v19, %v15222_v24  ;;  %v8604_v9 = vpop.f32.mrb[10].mxu0 }
 0x88a   : > { %v8767_v11 = vmax.f32 %v10256_v12, 0.0  ;;  %v10258_v0 = vadd.f32 %v8604_v9, %v15220_v59  ;;  %v8606_v20 = vpop.f32.mrb[11].mxu0 }
 0x88b   : > { %v8768_v6 = vmax.f32 %v10257_v40, 0.0  ;;  %v10259_v27 = vadd.f32 %v8606_v20, %v15222_v24 }
 0x88c   : > { %8959 = vst [vmem:[%s14918_s27 + $0xe0] sm:$0xff] %v8767_v11  ;;  %v8773_v26 = vmax.f32 %v10258_v0, 0.0 }
 0x88d   : > { %8960 = vst [vmem:[%s14918_s27 + $0xe8] sm:$0xff] %v8768_v6  ;;  %v8774_v4 = vmax.f32 %v10259_v27, 0.0 }
 0x88e   : > { %8965 = vst [vmem:[%s14918_s27 + $0x110] sm:$0xff] %v8773_v26 }
 0x88f   : > { %8966 = vst [vmem:[%s14918_s27 + $0x118] sm:$0xff] %v8774_v4  ;;  %v8610_v46 = vpop.f32.mrb[12].mxu0 }
 0x890   : > { %v10260_v48 = vadd.f32 %v8610_v46, %v15220_v59  ;;  %v8612_v28 = vpop.f32.mrb[13].mxu0 }
 0x891   : > { %v10261_v50 = vadd.f32 %v8612_v28, %v15222_v24  ;;  %v8614_v21 = vpop.f32.mrb[14].mxu0 }
 0x892   : > { %v8779_v8 = vmax.f32 %v10260_v48, 0.0  ;;  %v10262_v42 = vadd.f32 %v8614_v21, %v15220_v59  ;;  %v8616_v44 = vpop.f32.mrb[15].mxu0 }
 0x893   : > { %v8780_v1 = vmax.f32 %v10261_v50, 0.0  ;;  %v10263_v58 = vadd.f32 %v8616_v44, %v15222_v24 }
 0x894   : > { %8971 = vst [vmem:[%s14918_s27 + $0x140] sm:$0xff] %v8779_v8  ;;  %v8785_v23 = vmax.f32 %v10262_v42, 0.0 }
 0x895   : > { %8972 = vst [vmem:[%s14918_s27 + $0x148] sm:$0xff] %v8780_v1  ;;  %v8786_v33 = vmax.f32 %v10263_v58, 0.0 }
 0x896   : > { %8977 = vst [vmem:[%s14918_s27 + $0x170] sm:$0xff] %v8785_v23 }
 0x897   : > { %8978 = vst [vmem:[%s14918_s27 + $0x178] sm:$0xff] %v8786_v33  ;;  %v8620_v17 = vpop.f32.mrb[16].mxu0 }
 0x898   : > { %v10264_v29 = vadd.f32 %v8620_v17, %v15220_v59  ;;  %v8622_v63 = vpop.f32.mrb[17].mxu0 }
 0x899   : > { %v10265_v32 = vadd.f32 %v8622_v63, %v15222_v24  ;;  %v8624_v53 = vpop.f32.mrb[18].mxu0 }
 0x89a   : > { %v8791_v34 = vmax.f32 %v10264_v29, 0.0  ;;  %v10266_v25 = vadd.f32 %v8624_v53, %v15220_v59  ;;  %v8626_v5 = vpop.f32.mrb[19].mxu0 }
 0x89b   : > { %v8792_v3 = vmax.f32 %v10265_v32, 0.0  ;;  %v10267_v62 = vadd.f32 %v8626_v5, %v15222_v24 }
 0x89c   : > { %8983 = vst [vmem:[%s14918_s27 + $0x1a0] sm:$0xff] %v8791_v34  ;;  %v8797_v55 = vmax.f32 %v10266_v25, 0.0 }
 0x89d   : > { %8984 = vst [vmem:[%s14918_s27 + $0x1a8] sm:$0xff] %v8792_v3  ;;  %v8798_v15 = vmax.f32 %v10267_v62, 0.0 }
 0x89e   : > { %8989 = vst [vmem:[%s14918_s27 + $0x1d0] sm:$0xff] %v8797_v55 }
 0x89f   : > { %8990 = vst [vmem:[%s14918_s27 + $0x1d8] sm:$0xff] %v8798_v15  ;;  %v8630_v43 = vpop.f32.mrb[20].mxu0 }
 0x8a0   : > { %v10268_v2 = vadd.f32 %v8630_v43, %v15220_v59  ;;  %v8632_v18 = vpop.f32.mrb[21].mxu0 }
 0x8a1   : > { %v10269_v52 = vadd.f32 %v8632_v18, %v15222_v24  ;;  %v8634_v47 = vpop.f32.mrb[22].mxu0 }
 0x8a2   : > { %v8803_v16 = vmax.f32 %v10268_v2, 0.0  ;;  %v10270_v7 = vadd.f32 %v8634_v47, %v15220_v59  ;;  %v8636_v36 = vpop.f32.mrb[23].mxu0 }
 0x8a3   : > { %v8804_v13 = vmax.f32 %v10269_v52, 0.0  ;;  %v10271_v14 = vadd.f32 %v8636_v36, %v15222_v24 }
 0x8a4   : > { %8995 = vst [vmem:[%s14918_s27 + $0x200] sm:$0xff] %v8803_v16  ;;  %v8809_v60 = vmax.f32 %v10270_v7, 0.0 }
 0x8a5   : > { %8996 = vst [vmem:[%s14918_s27 + $0x208] sm:$0xff] %v8804_v13  ;;  %v8810_v51 = vmax.f32 %v10271_v14, 0.0 }
 0x8a6   : > { %9001 = vst [vmem:[%s14918_s27 + $0x230] sm:$0xff] %v8809_v60 }
 0x8a7   : > { %9002 = vst [vmem:[%s14918_s27 + $0x238] sm:$0xff] %v8810_v51  ;;  %v8640_v41 = vpop.f32.mrb[24].mxu0 }
 0x8a8   : > { %v10272_v39 = vadd.f32 %v8640_v41, %v15220_v59  ;;  %v8642_v54 = vpop.f32.mrb[25].mxu0 }
 0x8a9   : > { %v10273_v31 = vadd.f32 %v8642_v54, %v15222_v24  ;;  %v8644_v49 = vpop.f32.mrb[26].mxu0 }
 0x8aa   : > { %v8815_v37 = vmax.f32 %v10272_v39, 0.0  ;;  %v10274_v57 = vadd.f32 %v8644_v49, %v15220_v59  ;;  %v8646_v61 = vpop.f32.mrb[27].mxu0 }
 0x8ab   : > { %v8816_v22 = vmax.f32 %v10273_v31, 0.0  ;;  %v10275_v38 = vadd.f32 %v8646_v61, %v15222_v24 }
 0x8ac   : > { %9007 = vst [vmem:[%s14918_s27 + $0x260] sm:$0xff] %v8815_v37  ;;  %v8821_v10 = vmax.f32 %v10274_v57, 0.0 }
 0x8ad   : > { %9008 = vst [vmem:[%s14918_s27 + $0x268] sm:$0xff] %v8816_v22  ;;  %v8822_v45 = vmax.f32 %v10275_v38, 0.0 }
 0x8ae   : > { %9013 = vst [vmem:[%s14918_s27 + $0x290] sm:$0xff] %v8821_v10 }
 0x8af   : > { %9014 = vst [vmem:[%s14918_s27 + $0x298] sm:$0xff] %v8822_v45  ;;  %v8650_v35 = vpop.f32.mrb[28].mxu0 }
 0x8b0   : > { %v10276_v30 = vadd.f32 %v8650_v35, %v15220_v59  ;;  %v8652_v56 = vpop.f32.mrb[29].mxu0 }
 0x8b1   : > { %v10277_v12 = vadd.f32 %v8652_v56, %v15222_v24  ;;  %v8654_v19 = vpop.f32.mrb[30].mxu0 }
 0x8b2   : > { %v8827_v40 = vmax.f32 %v10276_v30, 0.0  ;;  %v10278_v9 = vadd.f32 %v8654_v19, %v15220_v59  ;;  %v8656_v11 = vpop.f32.mrb[31].mxu0 }
 0x8b3   : > { %v8828_v0 = vmax.f32 %v10277_v12, 0.0  ;;  %v10279_v20 = vadd.f32 %v8656_v11, %v15222_v24 }
 0x8b4   : > { %9019 = vst [vmem:[%s14918_s27 + $0x2c0] sm:$0xff] %v8827_v40  ;;  %v8833_v6 = vmax.f32 %v10278_v9, 0.0 }
 0x8b5   : > { %9020 = vst [vmem:[%s14918_s27 + $0x2c8] sm:$0xff] %v8828_v0  ;;  %v8834_v27 = vmax.f32 %v10279_v20, 0.0 }
 0x8b6   : > { %9025 = vst [vmem:[%s14918_s27 + $0x2f0] sm:$0xff] %v8833_v6 }
 0x8b7   : > { %9026 = vst [vmem:[%s14918_s27 + $0x2f8] sm:$0xff] %v8834_v27  ;;  %v8660_v26 = vpop.f32.mrb[32].mxu0 }
 0x8b8   : > { %v10280_v4 = vadd.f32 %v8660_v26, %v15220_v59  ;;  %v8662_v46 = vpop.f32.mrb[33].mxu0 }
 0x8b9   : > { %v10281_v48 = vadd.f32 %v8662_v46, %v15222_v24  ;;  %v8664_v28 = vpop.f32.mrb[34].mxu0 }
 0x8ba   : > { %v8839_v50 = vmax.f32 %v10280_v4, 0.0  ;;  %v10282_v21 = vadd.f32 %v8664_v28, %v15220_v59  ;;  %v8666_v8 = vpop.f32.mrb[35].mxu0 }
 0x8bb   : > { %v8840_v42 = vmax.f32 %v10281_v48, 0.0  ;;  %v10283_v44 = vadd.f32 %v8666_v8, %v15222_v24 }
 0x8bc   : > { %9031 = vst [vmem:[%s14918_s27 + $0x320] sm:$0xff] %v8839_v50  ;;  %v8845_v1 = vmax.f32 %v10282_v21, 0.0 }
 0x8bd   : > { %9032 = vst [vmem:[%s14918_s27 + $0x328] sm:$0xff] %v8840_v42  ;;  %v8846_v58 = vmax.f32 %v10283_v44, 0.0 }
 0x8be   : > { %9037 = vst [vmem:[%s14918_s27 + $0x350] sm:$0xff] %v8845_v1 }
 0x8bf   : > { %9038 = vst [vmem:[%s14918_s27 + $0x358] sm:$0xff] %v8846_v58  ;;  %v8670_v23 = vpop.f32.mrb[36].mxu0 }
 0x8c0   : > { %v10284_v33 = vadd.f32 %v8670_v23, %v15220_v59  ;;  %v8672_v17 = vpop.f32.mrb[37].mxu0 }
 0x8c1   : > { %v10285_v29 = vadd.f32 %v8672_v17, %v15222_v24  ;;  %v8674_v63 = vpop.f32.mrb[38].mxu0 }
 0x8c2   : > { %v8851_v32 = vmax.f32 %v10284_v33, 0.0  ;;  %v10286_v53 = vadd.f32 %v8674_v63, %v15220_v59  ;;  %v8676_v34 = vpop.f32.mrb[39].mxu0 }
 0x8c3   : > { %v8852_v25 = vmax.f32 %v10285_v29, 0.0  ;;  %v10287_v5 = vadd.f32 %v8676_v34, %v15222_v24 }
 0x8c4   : > { %9043 = vst [vmem:[%s14918_s27 + $0x380] sm:$0xff] %v8851_v32  ;;  %v8857_v3 = vmax.f32 %v10286_v53, 0.0 }
 0x8c5   : > { %9044 = vst [vmem:[%s14918_s27 + $0x388] sm:$0xff] %v8852_v25  ;;  %v8858_v62 = vmax.f32 %v10287_v5, 0.0 }
 0x8c6   : > { %9049 = vst [vmem:[%s14918_s27 + $0x3b0] sm:$0xff] %v8857_v3 }
 0x8c7   : > { %9050 = vst [vmem:[%s14918_s27 + $0x3b8] sm:$0xff] %v8858_v62  ;;  %v8680_v55 = vpop.f32.mrb[40].mxu0 }
 0x8c8   : > { %v10288_v15 = vadd.f32 %v8680_v55, %v15220_v59  ;;  %v8682_v43 = vpop.f32.mrb[41].mxu0 }
 0x8c9   : > { %v10289_v2 = vadd.f32 %v8682_v43, %v15222_v24  ;;  %v8684_v18 = vpop.f32.mrb[42].mxu0 }
 0x8ca   : > { %v8863_v52 = vmax.f32 %v10288_v15, 0.0  ;;  %v10290_v47 = vadd.f32 %v8684_v18, %v15220_v59  ;;  %v8686_v16 = vpop.f32.mrb[43].mxu0 }
 0x8cb   : > { %v8864_v7 = vmax.f32 %v10289_v2, 0.0  ;;  %v10291_v36 = vadd.f32 %v8686_v16, %v15222_v24 }
 0x8cc   : > { %9055 = vst [vmem:[%s14918_s27 + $0x3e0] sm:$0xff] %v8863_v52  ;;  %v8869_v13 = vmax.f32 %v10290_v47, 0.0 }
 0x8cd   : > { %9056 = vst [vmem:[%s14918_s27 + $0x3e8] sm:$0xff] %v8864_v7  ;;  %v8870_v14 = vmax.f32 %v10291_v36, 0.0 }
 0x8ce   : > { %9061 = vst [vmem:[%s14918_s27 + $0x410] sm:$0xff] %v8869_v13 }
 0x8cf   : > { %9062 = vst [vmem:[%s14918_s27 + $0x418] sm:$0xff] %v8870_v14  ;;  %v8690_v60 = vpop.f32.mrb[44].mxu0 }
 0x8d0   : > { %v10292_v51 = vadd.f32 %v8690_v60, %v15220_v59  ;;  %v8692_v41 = vpop.f32.mrb[45].mxu0 }
 0x8d1   : > { %v10293_v39 = vadd.f32 %v8692_v41, %v15222_v24  ;;  %v8694_v54 = vpop.f32.mrb[46].mxu0 }
 0x8d2   : > { %v8875_v31 = vmax.f32 %v10292_v51, 0.0  ;;  %v10294_v49 = vadd.f32 %v8694_v54, %v15220_v59  ;;  %v8696_v37 = vpop.f32.mrb[47].mxu0 }
 0x8d3   : > { %v8876_v57 = vmax.f32 %v10293_v39, 0.0  ;;  %v10295_v61 = vadd.f32 %v8696_v37, %v15222_v24 }
 0x8d4   : > { %9067 = vst [vmem:[%s14918_s27 + $0x440] sm:$0xff] %v8875_v31  ;;  %v8881_v22 = vmax.f32 %v10294_v49, 0.0 }
 0x8d5   : > { %9068 = vst [vmem:[%s14918_s27 + $0x448] sm:$0xff] %v8876_v57  ;;  %v8882_v38 = vmax.f32 %v10295_v61, 0.0 }
 0x8d6   : > { %9073 = vst [vmem:[%s14918_s27 + $0x470] sm:$0xff] %v8881_v22 }
 0x8d7   : > { %9074 = vst [vmem:[%s14918_s27 + $0x478] sm:$0xff] %v8882_v38  ;;  %v8700_v10 = vpop.f32.mrb[48].mxu0 }
 0x8d8   : > { %v10296_v45 = vadd.f32 %v8700_v10, %v15220_v59  ;;  %v8702_v35 = vpop.f32.mrb[49].mxu0 }
 0x8d9   : > { %v10297_v30 = vadd.f32 %v8702_v35, %v15222_v24  ;;  %v8704_v56 = vpop.f32.mrb[50].mxu0 }
 0x8da   : > { %v8887_v12 = vmax.f32 %v10296_v45, 0.0  ;;  %v10298_v19 = vadd.f32 %v8704_v56, %v15220_v59  ;;  %v8706_v40 = vpop.f32.mrb[51].mxu0 }
 0x8db   : > { %v8888_v9 = vmax.f32 %v10297_v30, 0.0  ;;  %v10299_v11 = vadd.f32 %v8706_v40, %v15222_v24 }
 0x8dc   : > { %9079 = vst [vmem:[%s14918_s27 + $0x4a0] sm:$0xff] %v8887_v12  ;;  %v8893_v0 = vmax.f32 %v10298_v19, 0.0 }
 0x8dd   : > { %9080 = vst [vmem:[%s14918_s27 + $0x4a8] sm:$0xff] %v8888_v9  ;;  %v8894_v20 = vmax.f32 %v10299_v11, 0.0 }
 0x8de   : > { %9085 = vst [vmem:[%s14918_s27 + $0x4d0] sm:$0xff] %v8893_v0 }
 0x8df   : > { %9086 = vst [vmem:[%s14918_s27 + $0x4d8] sm:$0xff] %v8894_v20  ;;  %v8710_v6 = vpop.f32.mrb[52].mxu0 }
 0x8e0   : > { %v10300_v27 = vadd.f32 %v8710_v6, %v15220_v59  ;;  %v8712_v26 = vpop.f32.mrb[53].mxu0 }
 0x8e1   : > { %v10301_v4 = vadd.f32 %v8712_v26, %v15222_v24  ;;  %v8714_v46 = vpop.f32.mrb[54].mxu0 }
 0x8e2   : > { %v8899_v48 = vmax.f32 %v10300_v27, 0.0  ;;  %v10302_v28 = vadd.f32 %v8714_v46, %v15220_v59  ;;  %v8716_v50 = vpop.f32.mrb[55].mxu0 }
 0x8e3   : > { %v8900_v21 = vmax.f32 %v10301_v4, 0.0  ;;  %v10303_v8 = vadd.f32 %v8716_v50, %v15222_v24 }
 0x8e4   : > { %9091 = vst [vmem:[%s14918_s27 + $0x500] sm:$0xff] %v8899_v48  ;;  %v8905_v42 = vmax.f32 %v10302_v28, 0.0 }
 0x8e5   : > { %9092 = vst [vmem:[%s14918_s27 + $0x508] sm:$0xff] %v8900_v21  ;;  %v8906_v44 = vmax.f32 %v10303_v8, 0.0 }
 0x8e6   : > { %9097 = vst [vmem:[%s14918_s27 + $0x530] sm:$0xff] %v8905_v42 }
 0x8e7   : > { %9098 = vst [vmem:[%s14918_s27 + $0x538] sm:$0xff] %v8906_v44  ;;  %v8720_v1 = vpop.f32.mrb[56].mxu0 }
 0x8e8   : > { %v10304_v58 = vadd.f32 %v8720_v1, %v15220_v59  ;;  %v8722_v23 = vpop.f32.mrb[57].mxu0 }
 0x8e9   : > { %v10305_v33 = vadd.f32 %v8722_v23, %v15222_v24  ;;  %v8724_v17 = vpop.f32.mrb[58].mxu0 }
 0x8ea   : > { %v8911_v29 = vmax.f32 %v10304_v58, 0.0  ;;  %v10306_v63 = vadd.f32 %v8724_v17, %v15220_v59  ;;  %v8726_v32 = vpop.f32.mrb[59].mxu0 }
 0x8eb   : > { %v8912_v53 = vmax.f32 %v10305_v33, 0.0  ;;  %v10307_v34 = vadd.f32 %v8726_v32, %v15222_v24 }
 0x8ec   : > { %9103 = vst [vmem:[%s14918_s27 + $0x560] sm:$0xff] %v8911_v29  ;;  %v8917_v25 = vmax.f32 %v10306_v63, 0.0 }
 0x8ed   : > { %9104 = vst [vmem:[%s14918_s27 + $0x568] sm:$0xff] %v8912_v53  ;;  %v8918_v5 = vmax.f32 %v10307_v34, 0.0 }
 0x8ee   : > { %9109 = vst [vmem:[%s14918_s27 + $0x590] sm:$0xff] %v8917_v25 }
 0x8ef   : > { %9110 = vst [vmem:[%s14918_s27 + $0x598] sm:$0xff] %v8918_v5  ;;  %v8730_v3 = vpop.f32.mrb[60].mxu0 }
 0x8f0   : > { %v10308_v62 = vadd.f32 %v8730_v3, %v15220_v59  ;;  %v8732_v55 = vpop.f32.mrb[61].mxu0 }
 0x8f1   : > { %v10309_v15 = vadd.f32 %v8732_v55, %v15222_v24  ;;  %v8734_v43 = vpop.f32.mrb[62].mxu0 }
 0x8f2   : > { %v8923_v2 = vmax.f32 %v10308_v62, 0.0  ;;  %v10310_v18 = vadd.f32 %v8734_v43, %v15220_v59  ;;  %v8736_v52 = vpop.f32.mrb[63].mxu0 }
 0x8f3   : > { %v8924_v47 = vmax.f32 %v10309_v15, 0.0  ;;  %v10311_v16 = vadd.f32 %v8736_v52, %v15222_v24 }
 0x8f4   : > { %9115 = vst [vmem:[%s14918_s27 + $0x5c0] sm:$0xff] %v8923_v2  ;;  %v8929_v7 = vmax.f32 %v10310_v18, 0.0 }
 0x8f5   : > { %9116 = vst [vmem:[%s14918_s27 + $0x5c8] sm:$0xff] %v8924_v47  ;;  %v8930_v36 = vmax.f32 %v10311_v16, 0.0 }
 0x8f6   : > { %9121 = vst [vmem:[%s14918_s27 + $0x5f0] sm:$0xff] %v8929_v7 }
 0x8f7   : > { %9122 = vst [vmem:[%s14918_s27 + $0x5f8] sm:$0xff] %v8930_v36 }
 0x8f8 PF: > { %s23_s25 = sadd.s32 1, %s11876_s25  }
 0x8f9   : > { %p20_p4 = scmp.ge.s32.totalorder %s23_s25, 4  }
 0x8fb   :  { %22 = sbr.rel (!%p20_p4) target bundleno = 1 (0x1), region = 102 }

</bundles_post_ra>
